<compile_context>
chip_gen: v6e
topology: v6e:2x2x1
jax: 0.10.0
libtpu: 0.0.40
codegen_flags: <defaults>
</compile_context>

<pallas_src>
import jax
import jax.numpy as jnp
from jax.experimental import pallas as pl
from jax.experimental.pallas import tpu as pltpu

INPUT_SIZE = 100
PADDED_INPUT = 128          # lane-aligned K for layer 1
NUM_CLASSES = 3072
HIDDEN = (128, 256, 512, 1024)
BN_EPS = 1e-5
LRELU_SLOPE = 0.2
TN = 1536                   # output tile width for the final (1024 x 3072) layer


def _leaky_relu(h):
    return jnp.where(h > 0, h, LRELU_SLOPE * h)


def _bn_leaky(h, gamma, beta):
    """Training-mode BatchNorm1d (biased batch stats) folded to scale/shift,
    followed by LeakyReLU(0.2). Variance via E[h^2] - mean^2 (single sweep)."""
    inv_b = 1.0 / h.shape[0]
    mean = jnp.sum(h, axis=0, keepdims=True) * inv_b
    mean_sq = jnp.sum(h * h, axis=0, keepdims=True) * inv_b
    var = jnp.maximum(mean_sq - mean * mean, 0.0)
    scale = gamma * jax.lax.rsqrt(var + BN_EPS)
    shift = beta - mean * scale
    return _leaky_relu(h * scale + shift)


def generator_kernel(
    x_ref,
    w1_ref, b1_ref,
    w2_ref, b2_ref, g2_ref, be2_ref,
    w3_ref, b3_ref, g3_ref, be3_ref,
    w4_ref, b4_ref, g4_ref, be4_ref,
    w5_ref, b5_ref,
    out_ref,
    h4_ref,                 # persistent VMEM scratch (B, 1024) f32
):
    """Fused forward. Grid is over the N=3072 output dim of the final layer.

    Step 0 runs layers 1-4 once and stashes h4 in VMEM scratch; every step
    computes one (B, TN) tile of the final Linear + Tanh from that scratch.
    """
    bf16 = jnp.bfloat16

    @pl.when(pl.program_id(0) == 0)
    def _trunk():
        # Layer 1: Linear + LeakyReLU  (x zero-padded to K=128, w1 pre-padded)
        h = jnp.dot(x_ref[...].astype(bf16), w1_ref[...],
                    preferred_element_type=jnp.float32) + b1_ref[...]
        h = _leaky_relu(h)
        # Layer 2: Linear + BN + LeakyReLU
        h = jnp.dot(h.astype(bf16), w2_ref[...],
                    preferred_element_type=jnp.float32) + b2_ref[...]
        h = _bn_leaky(h, g2_ref[...], be2_ref[...])
        # Layer 3: Linear + BN + LeakyReLU
        h = jnp.dot(h.astype(bf16), w3_ref[...],
                    preferred_element_type=jnp.float32) + b3_ref[...]
        h = _bn_leaky(h, g3_ref[...], be3_ref[...])
        # Layer 4: Linear + BN + LeakyReLU
        h = jnp.dot(h.astype(bf16), w4_ref[...],
                    preferred_element_type=jnp.float32) + b4_ref[...]
        h = _bn_leaky(h, g4_ref[...], be4_ref[...])
        h4_ref[...] = h

    # Layer 5 tile: Linear(1024 -> TN) + Tanh
    z = jnp.dot(h4_ref[...].astype(bf16), w5_ref[...],
                preferred_element_type=jnp.float32) + b5_ref[...]
    out_ref[...] = jnp.tanh(z)


def prepare_params(params):
    """One-time parameter prep, OUTSIDE the jitted forward:
    pad w1 (100->128 input dim) and store bf16 master copies of all matmul
    weights. Biases and BN affine params stay float32 (tiny)."""
    bf16 = jnp.bfloat16
    prep = dict(params)
    prep["w1"] = jnp.pad(
        params["w1"], ((0, PADDED_INPUT - INPUT_SIZE), (0, 0))).astype(bf16)
    for k in ("w2", "w3", "w4", "w5"):
        prep[k] = params[k].astype(bf16)
    return prep


@jax.jit
def cifar_generator_forward(x, prep):
    """x: (B, 100) float32, prep: output of prepare_params -> (B, 3, 32, 32) f32."""
    B = x.shape[0]

    # Lane-align K: zero-pad the latent 100 -> 128 (cheap; done per call).
    x_pad = jnp.pad(x, ((0, 0), (0, PADDED_INPUT - INPUT_SIZE)))

    resident = lambda j: (0, 0)   # same block every step -> DMA'd once, stays in VMEM
    tiled = lambda j: (0, j)      # w5 / b5 / output tiles over the N axis

    args = (
        x_pad,
        prep["w1"], prep["b1"],
        prep["w2"], prep["b2"], prep["g2"], prep["be2"],
        prep["w3"], prep["b3"], prep["g3"], prep["be3"],
        prep["w4"], prep["b4"], prep["g4"], prep["be4"],
        prep["w5"], prep["b5"],
    )
    in_specs = (
        [pl.BlockSpec(a.shape, resident) for a in args[:-2]]
        + [pl.BlockSpec((HIDDEN[-1], TN), tiled),   # w5 tile (1024, TN)
           pl.BlockSpec((1, TN), tiled)]            # b5 tile
    )

    y_flat = pl.pallas_call(
        generator_kernel,
        out_shape=jax.ShapeDtypeStruct((B, NUM_CLASSES), jnp.float32),
        grid=(NUM_CLASSES // TN,),
        in_specs=in_specs,
        out_specs=pl.BlockSpec((B, TN), tiled),
        scratch_shapes=[pltpu.VMEM((B, HIDDEN[-1]), jnp.float32)],
        # "arbitrary": later steps consume the step-0 scratch write, so the
        # axis must not be sharded across v7x's two TensorCores.
        compiler_params=pltpu.CompilerParams(
            dimension_semantics=("arbitrary",)),
    )(*args)

    # Row-major reshape matches PyTorch's .view(B, 3, 32, 32) (NCHW).
    return y_flat.reshape(B, 3, 32, 32)


def init_params(key):
    """Deterministic synthetic parameters with the module's shapes.

    Linear weights stored as (in_features, out_features), float32 master copy."""
    dims = (INPUT_SIZE,) + HIDDEN + (NUM_CLASSES,)
    keys = jax.random.split(key, 2 * (len(dims) - 1))
    params = {}
    for i in range(len(dims) - 1):
        fan_in, fan_out = dims[i], dims[i + 1]
        bound = 1.0 / jnp.sqrt(jnp.float32(fan_in))
        params[f"w{i+1}"] = jax.random.uniform(
            keys[2 * i], (fan_in, fan_out), jnp.float32, -bound, bound)
        params[f"b{i+1}"] = jax.random.uniform(
            keys[2 * i + 1], (1, fan_out), jnp.float32, -bound, bound)
    # BatchNorm1d affine params (PyTorch default init: gamma=1, beta=0)
    for idx, dim in zip((2, 3, 4), HIDDEN[1:]):
        params[f"g{idx}"] = jnp.ones((1, dim), jnp.float32)
        params[f"be{idx}"] = jnp.zeros((1, dim), jnp.float32)
    return params


if __name__ == "__main__":
    key = jax.random.PRNGKey(0)
    pkey, xkey = jax.random.split(key)
    params = init_params(pkey)
    prep = prepare_params(params)   # one-time bf16 cast + w1 pad (outside jit)

    B = 8  # small batch; training-mode BatchNorm batch statistics need B > 1
    x = jax.random.normal(xkey, (B, INPUT_SIZE), jnp.float32)

    y = cifar_generator_forward(x, prep)
    y = jax.block_until_ready(y)
    assert y.shape == (B, 3, 32, 32), y.shape
    assert bool(jnp.all(jnp.isfinite(y)))
    assert bool(jnp.all(jnp.abs(y) <= 1.0 + 1e-6))  # tanh output range
    print("KERNEL_OK")
</pallas_src>

<mosaic_0001>
module attributes {stable_mosaic.version = 11 : i64} {
  func.func @generator_kernel(%arg0: i32, %arg1: memref<8x128xf32, #tpu.memory_space<vmem>>, %arg2: memref<128x128xbf16, #tpu.memory_space<vmem>>, %arg3: memref<1x128xf32, #tpu.memory_space<vmem>>, %arg4: memref<128x256xbf16, #tpu.memory_space<vmem>>, %arg5: memref<1x256xf32, #tpu.memory_space<vmem>>, %arg6: memref<1x256xf32, #tpu.memory_space<vmem>>, %arg7: memref<1x256xf32, #tpu.memory_space<vmem>>, %arg8: memref<256x512xbf16, #tpu.memory_space<vmem>>, %arg9: memref<1x512xf32, #tpu.memory_space<vmem>>, %arg10: memref<1x512xf32, #tpu.memory_space<vmem>>, %arg11: memref<1x512xf32, #tpu.memory_space<vmem>>, %arg12: memref<512x1024xbf16, #tpu.memory_space<vmem>>, %arg13: memref<1x1024xf32, #tpu.memory_space<vmem>>, %arg14: memref<1x1024xf32, #tpu.memory_space<vmem>>, %arg15: memref<1x1024xf32, #tpu.memory_space<vmem>>, %arg16: memref<1024x1536xbf16, #tpu.memory_space<vmem>>, %arg17: memref<1x1536xf32, #tpu.memory_space<vmem>>, %arg18: memref<8x1536xf32, #tpu.memory_space<vmem>>, %arg19: memref<8x1024xf32, #tpu.memory_space<vmem>>) attributes {dimension_semantics = [#tpu.dimension_semantics<arbitrary>], iteration_bounds = array<i64: 2>, scalar_prefetch = 0 : i64, scratch_operands = 1 : i64, tpu.core_type = #tpu.core_type<tc>, window_params = [{pipeline_mode = #tpu.pipeline_mode<synchronous>, transform_indices = @transform_0, window_bounds = array<i64: 8, 128>}, {pipeline_mode = #tpu.pipeline_mode<synchronous>, transform_indices = @transform_1, window_bounds = array<i64: 128, 128>}, {pipeline_mode = #tpu.pipeline_mode<synchronous>, transform_indices = @transform_2, window_bounds = array<i64: 1, 128>}, {pipeline_mode = #tpu.pipeline_mode<synchronous>, transform_indices = @transform_3, window_bounds = array<i64: 128, 256>}, {pipeline_mode = #tpu.pipeline_mode<synchronous>, transform_indices = @transform_4, window_bounds = array<i64: 1, 256>}, {pipeline_mode = #tpu.pipeline_mode<synchronous>, transform_indices = @transform_5, window_bounds = array<i64: 1, 256>}, {pipeline_mode = #tpu.pipeline_mode<synchronous>, transform_indices = @transform_6, window_bounds = array<i64: 1, 256>}, {pipeline_mode = #tpu.pipeline_mode<synchronous>, transform_indices = @transform_7, window_bounds = array<i64: 256, 512>}, {pipeline_mode = #tpu.pipeline_mode<synchronous>, transform_indices = @transform_8, window_bounds = array<i64: 1, 512>}, {pipeline_mode = #tpu.pipeline_mode<synchronous>, transform_indices = @transform_9, window_bounds = array<i64: 1, 512>}, {pipeline_mode = #tpu.pipeline_mode<synchronous>, transform_indices = @transform_10, window_bounds = array<i64: 1, 512>}, {pipeline_mode = #tpu.pipeline_mode<synchronous>, transform_indices = @transform_11, window_bounds = array<i64: 512, 1024>}, {pipeline_mode = #tpu.pipeline_mode<synchronous>, transform_indices = @transform_12, window_bounds = array<i64: 1, 1024>}, {pipeline_mode = #tpu.pipeline_mode<synchronous>, transform_indices = @transform_13, window_bounds = array<i64: 1, 1024>}, {pipeline_mode = #tpu.pipeline_mode<synchronous>, transform_indices = @transform_14, window_bounds = array<i64: 1, 1024>}, {transform_indices = @transform_15, window_bounds = array<i64: 1024, 1536>}, {transform_indices = @transform_16, window_bounds = array<i64: 1, 1536>}, {transform_indices = @transform_17, window_bounds = array<i64: 8, 1536>}]} {
    %c0_i32 = arith.constant 0 : i32
    %0 = arith.cmpi eq, %arg0, %c0_i32 : i32
    %1 = arith.extui %0 : i1 to i32
    %c0_i32_0 = arith.constant 0 : i32
    %2 = arith.cmpi ne, %1, %c0_i32_0 : i32
    scf.if %2 {
      %c0_8 = arith.constant 0 : index
      %c0_9 = arith.constant 0 : index
      %12 = vector.load %arg1[%c0_8, %c0_9] : memref<8x128xf32, #tpu.memory_space<vmem>>, vector<8x128xf32>
      %13 = arith.truncf %12 : vector<8x128xf32> to vector<8x128xbf16>
      %c0_10 = arith.constant 0 : index
      %c0_11 = arith.constant 0 : index
      %14 = vector.load %arg2[%c0_10, %c0_11] : memref<128x128xbf16, #tpu.memory_space<vmem>>, vector<128x128xbf16>
      %cst_12 = arith.constant dense<0.000000e+00> : vector<8x128xf32>
      %15 = tpu.matmul %13, %14, %cst_12 {dimension_numbers = #tpu.dot_dimension_numbers<[1], [0], [0], [1], [0, 0, 1, 1], [], []>} : vector<8x128xbf16>, vector<128x128xbf16>, vector<8x128xf32> -> vector<8x128xf32>
      %c0_13 = arith.constant 0 : index
      %c0_14 = arith.constant 0 : index
      %16 = vector.load %arg3[%c0_13, %c0_14] : memref<1x128xf32, #tpu.memory_space<vmem>>, vector<1x128xf32>
      %17 = vector.broadcast %16 : vector<1x128xf32> to vector<8x128xf32>
      %18 = arith.addf %15, %17 : vector<8x128xf32>
      %cst_15 = arith.constant 0.000000e+00 : f32
      %19 = vector.broadcast %cst_15 : f32 to vector<8x128xf32>
      %20 = arith.cmpf ogt, %18, %19 : vector<8x128xf32>
      %cst_16 = arith.constant 2.000000e-01 : f32
      %21 = vector.broadcast %cst_16 : f32 to vector<8x128xf32>
      %22 = arith.mulf %21, %18 : vector<8x128xf32>
      %23 = arith.select %20, %18, %22 : vector<8x128xi1>, vector<8x128xf32>
      %24 = arith.truncf %23 : vector<8x128xf32> to vector<8x128xbf16>
      %c0_17 = arith.constant 0 : index
      %c0_18 = arith.constant 0 : index
      %25 = vector.load %arg4[%c0_17, %c0_18] : memref<128x256xbf16, #tpu.memory_space<vmem>>, vector<128x256xbf16>
      %cst_19 = arith.constant dense<0.000000e+00> : vector<8x256xf32>
      %26 = tpu.matmul %24, %25, %cst_19 {dimension_numbers = #tpu.dot_dimension_numbers<[1], [0], [0], [1], [0, 0, 1, 1], [], []>} : vector<8x128xbf16>, vector<128x256xbf16>, vector<8x256xf32> -> vector<8x256xf32>
      %c0_20 = arith.constant 0 : index
      %c0_21 = arith.constant 0 : index
      %27 = vector.load %arg5[%c0_20, %c0_21] : memref<1x256xf32, #tpu.memory_space<vmem>>, vector<1x256xf32>
      %28 = vector.broadcast %27 : vector<1x256xf32> to vector<8x256xf32>
      %29 = arith.addf %26, %28 : vector<8x256xf32>
      %c0_22 = arith.constant 0 : index
      %c0_23 = arith.constant 0 : index
      %30 = vector.load %arg6[%c0_22, %c0_23] : memref<1x256xf32, #tpu.memory_space<vmem>>, vector<1x256xf32>
      %c0_24 = arith.constant 0 : index
      %c0_25 = arith.constant 0 : index
      %31 = vector.load %arg7[%c0_24, %c0_25] : memref<1x256xf32, #tpu.memory_space<vmem>>, vector<1x256xf32>
      %cst_26 = arith.constant dense<0.000000e+00> : vector<256xf32>
      %32 = vector.multi_reduction <add>, %29, %cst_26 [0] : vector<8x256xf32> to vector<256xf32>
      %33 = vector.shape_cast %32 : vector<256xf32> to vector<1x256xf32>
      %cst_27 = arith.constant 1.250000e-01 : f32
      %34 = vector.broadcast %cst_27 : f32 to vector<1x256xf32>
      %35 = arith.mulf %33, %34 : vector<1x256xf32>
      %36 = arith.mulf %29, %29 : vector<8x256xf32>
      %cst_28 = arith.constant dense<0.000000e+00> : vector<256xf32>
      %37 = vector.multi_reduction <add>, %36, %cst_28 [0] : vector<8x256xf32> to vector<256xf32>
      %38 = vector.shape_cast %37 : vector<256xf32> to vector<1x256xf32>
      %cst_29 = arith.constant 1.250000e-01 : f32
      %39 = vector.broadcast %cst_29 : f32 to vector<1x256xf32>
      %40 = arith.mulf %38, %39 : vector<1x256xf32>
      %41 = arith.mulf %35, %35 : vector<1x256xf32>
      %42 = arith.subf %40, %41 : vector<1x256xf32>
      %cst_30 = arith.constant 0.000000e+00 : f32
      %43 = vector.broadcast %cst_30 : f32 to vector<1x256xf32>
      %44 = arith.maximumf %42, %43 : vector<1x256xf32>
      %cst_31 = arith.constant 9.99999974E-6 : f32
      %45 = vector.broadcast %cst_31 : f32 to vector<1x256xf32>
      %46 = arith.addf %44, %45 : vector<1x256xf32>
      %47 = math.rsqrt %46 : vector<1x256xf32>
      %48 = arith.mulf %30, %47 : vector<1x256xf32>
      %49 = arith.mulf %35, %48 : vector<1x256xf32>
      %50 = arith.subf %31, %49 : vector<1x256xf32>
      %51 = vector.broadcast %48 : vector<1x256xf32> to vector<8x256xf32>
      %52 = arith.mulf %29, %51 : vector<8x256xf32>
      %53 = vector.broadcast %50 : vector<1x256xf32> to vector<8x256xf32>
      %54 = arith.addf %52, %53 : vector<8x256xf32>
      %cst_32 = arith.constant 0.000000e+00 : f32
      %55 = vector.broadcast %cst_32 : f32 to vector<8x256xf32>
      %56 = arith.cmpf ogt, %54, %55 : vector<8x256xf32>
      %cst_33 = arith.constant 2.000000e-01 : f32
      %57 = vector.broadcast %cst_33 : f32 to vector<8x256xf32>
      %58 = arith.mulf %57, %54 : vector<8x256xf32>
      %59 = arith.select %56, %54, %58 : vector<8x256xi1>, vector<8x256xf32>
      %60 = arith.truncf %59 : vector<8x256xf32> to vector<8x256xbf16>
      %c0_34 = arith.constant 0 : index
      %c0_35 = arith.constant 0 : index
      %61 = vector.load %arg8[%c0_34, %c0_35] : memref<256x512xbf16, #tpu.memory_space<vmem>>, vector<256x512xbf16>
      %cst_36 = arith.constant dense<0.000000e+00> : vector<8x512xf32>
      %62 = tpu.matmul %60, %61, %cst_36 {dimension_numbers = #tpu.dot_dimension_numbers<[1], [0], [0], [1], [0, 0, 1, 1], [], []>} : vector<8x256xbf16>, vector<256x512xbf16>, vector<8x512xf32> -> vector<8x512xf32>
      %c0_37 = arith.constant 0 : index
      %c0_38 = arith.constant 0 : index
      %63 = vector.load %arg9[%c0_37, %c0_38] : memref<1x512xf32, #tpu.memory_space<vmem>>, vector<1x512xf32>
      %64 = vector.broadcast %63 : vector<1x512xf32> to vector<8x512xf32>
      %65 = arith.addf %62, %64 : vector<8x512xf32>
      %c0_39 = arith.constant 0 : index
      %c0_40 = arith.constant 0 : index
      %66 = vector.load %arg10[%c0_39, %c0_40] : memref<1x512xf32, #tpu.memory_space<vmem>>, vector<1x512xf32>
      %c0_41 = arith.constant 0 : index
      %c0_42 = arith.constant 0 : index
      %67 = vector.load %arg11[%c0_41, %c0_42] : memref<1x512xf32, #tpu.memory_space<vmem>>, vector<1x512xf32>
      %cst_43 = arith.constant dense<0.000000e+00> : vector<512xf32>
      %68 = vector.multi_reduction <add>, %65, %cst_43 [0] : vector<8x512xf32> to vector<512xf32>
      %69 = vector.shape_cast %68 : vector<512xf32> to vector<1x512xf32>
      %cst_44 = arith.constant 1.250000e-01 : f32
      %70 = vector.broadcast %cst_44 : f32 to vector<1x512xf32>
      %71 = arith.mulf %69, %70 : vector<1x512xf32>
      %72 = arith.mulf %65, %65 : vector<8x512xf32>
      %cst_45 = arith.constant dense<0.000000e+00> : vector<512xf32>
      %73 = vector.multi_reduction <add>, %72, %cst_45 [0] : vector<8x512xf32> to vector<512xf32>
      %74 = vector.shape_cast %73 : vector<512xf32> to vector<1x512xf32>
      %cst_46 = arith.constant 1.250000e-01 : f32
      %75 = vector.broadcast %cst_46 : f32 to vector<1x512xf32>
      %76 = arith.mulf %74, %75 : vector<1x512xf32>
      %77 = arith.mulf %71, %71 : vector<1x512xf32>
      %78 = arith.subf %76, %77 : vector<1x512xf32>
      %cst_47 = arith.constant 0.000000e+00 : f32
      %79 = vector.broadcast %cst_47 : f32 to vector<1x512xf32>
      %80 = arith.maximumf %78, %79 : vector<1x512xf32>
      %cst_48 = arith.constant 9.99999974E-6 : f32
      %81 = vector.broadcast %cst_48 : f32 to vector<1x512xf32>
      %82 = arith.addf %80, %81 : vector<1x512xf32>
      %83 = math.rsqrt %82 : vector<1x512xf32>
      %84 = arith.mulf %66, %83 : vector<1x512xf32>
      %85 = arith.mulf %71, %84 : vector<1x512xf32>
      %86 = arith.subf %67, %85 : vector<1x512xf32>
      %87 = vector.broadcast %84 : vector<1x512xf32> to vector<8x512xf32>
      %88 = arith.mulf %65, %87 : vector<8x512xf32>
      %89 = vector.broadcast %86 : vector<1x512xf32> to vector<8x512xf32>
      %90 = arith.addf %88, %89 : vector<8x512xf32>
      %cst_49 = arith.constant 0.000000e+00 : f32
      %91 = vector.broadcast %cst_49 : f32 to vector<8x512xf32>
      %92 = arith.cmpf ogt, %90, %91 : vector<8x512xf32>
      %cst_50 = arith.constant 2.000000e-01 : f32
      %93 = vector.broadcast %cst_50 : f32 to vector<8x512xf32>
      %94 = arith.mulf %93, %90 : vector<8x512xf32>
      %95 = arith.select %92, %90, %94 : vector<8x512xi1>, vector<8x512xf32>
      %96 = arith.truncf %95 : vector<8x512xf32> to vector<8x512xbf16>
      %c0_51 = arith.constant 0 : index
      %c0_52 = arith.constant 0 : index
      %97 = vector.load %arg12[%c0_51, %c0_52] : memref<512x1024xbf16, #tpu.memory_space<vmem>>, vector<512x1024xbf16>
      %cst_53 = arith.constant dense<0.000000e+00> : vector<8x1024xf32>
      %98 = tpu.matmul %96, %97, %cst_53 {dimension_numbers = #tpu.dot_dimension_numbers<[1], [0], [0], [1], [0, 0, 1, 1], [], []>} : vector<8x512xbf16>, vector<512x1024xbf16>, vector<8x1024xf32> -> vector<8x1024xf32>
      %c0_54 = arith.constant 0 : index
      %c0_55 = arith.constant 0 : index
      %99 = vector.load %arg13[%c0_54, %c0_55] : memref<1x1024xf32, #tpu.memory_space<vmem>>, vector<1x1024xf32>
      %100 = vector.broadcast %99 : vector<1x1024xf32> to vector<8x1024xf32>
      %101 = arith.addf %98, %100 : vector<8x1024xf32>
      %c0_56 = arith.constant 0 : index
      %c0_57 = arith.constant 0 : index
      %102 = vector.load %arg14[%c0_56, %c0_57] : memref<1x1024xf32, #tpu.memory_space<vmem>>, vector<1x1024xf32>
      %c0_58 = arith.constant 0 : index
      %c0_59 = arith.constant 0 : index
      %103 = vector.load %arg15[%c0_58, %c0_59] : memref<1x1024xf32, #tpu.memory_space<vmem>>, vector<1x1024xf32>
      %cst_60 = arith.constant dense<0.000000e+00> : vector<1024xf32>
      %104 = vector.multi_reduction <add>, %101, %cst_60 [0] : vector<8x1024xf32> to vector<1024xf32>
      %105 = vector.shape_cast %104 : vector<1024xf32> to vector<1x1024xf32>
      %cst_61 = arith.constant 1.250000e-01 : f32
      %106 = vector.broadcast %cst_61 : f32 to vector<1x1024xf32>
      %107 = arith.mulf %105, %106 : vector<1x1024xf32>
      %108 = arith.mulf %101, %101 : vector<8x1024xf32>
      %cst_62 = arith.constant dense<0.000000e+00> : vector<1024xf32>
      %109 = vector.multi_reduction <add>, %108, %cst_62 [0] : vector<8x1024xf32> to vector<1024xf32>
      %110 = vector.shape_cast %109 : vector<1024xf32> to vector<1x1024xf32>
      %cst_63 = arith.constant 1.250000e-01 : f32
      %111 = vector.broadcast %cst_63 : f32 to vector<1x1024xf32>
      %112 = arith.mulf %110, %111 : vector<1x1024xf32>
      %113 = arith.mulf %107, %107 : vector<1x1024xf32>
      %114 = arith.subf %112, %113 : vector<1x1024xf32>
      %cst_64 = arith.constant 0.000000e+00 : f32
      %115 = vector.broadcast %cst_64 : f32 to vector<1x1024xf32>
      %116 = arith.maximumf %114, %115 : vector<1x1024xf32>
      %cst_65 = arith.constant 9.99999974E-6 : f32
      %117 = vector.broadcast %cst_65 : f32 to vector<1x1024xf32>
      %118 = arith.addf %116, %117 : vector<1x1024xf32>
      %119 = math.rsqrt %118 : vector<1x1024xf32>
      %120 = arith.mulf %102, %119 : vector<1x1024xf32>
      %121 = arith.mulf %107, %120 : vector<1x1024xf32>
      %122 = arith.subf %103, %121 : vector<1x1024xf32>
      %123 = vector.broadcast %120 : vector<1x1024xf32> to vector<8x1024xf32>
      %124 = arith.mulf %101, %123 : vector<8x1024xf32>
      %125 = vector.broadcast %122 : vector<1x1024xf32> to vector<8x1024xf32>
      %126 = arith.addf %124, %125 : vector<8x1024xf32>
      %cst_66 = arith.constant 0.000000e+00 : f32
      %127 = vector.broadcast %cst_66 : f32 to vector<8x1024xf32>
      %128 = arith.cmpf ogt, %126, %127 : vector<8x1024xf32>
      %cst_67 = arith.constant 2.000000e-01 : f32
      %129 = vector.broadcast %cst_67 : f32 to vector<8x1024xf32>
      %130 = arith.mulf %129, %126 : vector<8x1024xf32>
      %131 = arith.select %128, %126, %130 : vector<8x1024xi1>, vector<8x1024xf32>
      %c0_68 = arith.constant 0 : index
      %c0_69 = arith.constant 0 : index
      %132 = vector.load %arg19[%c0_68, %c0_69] : memref<8x1024xf32, #tpu.memory_space<vmem>>, vector<8x1024xf32>
      tpu.vector_store %arg19[%c0_68, %c0_69], %131 {strides = array<i32>} : memref<8x1024xf32, #tpu.memory_space<vmem>>, vector<8x1024xf32>,
    } else {
    }
    %c0 = arith.constant 0 : index
    %c0_1 = arith.constant 0 : index
    %3 = vector.load %arg19[%c0, %c0_1] : memref<8x1024xf32, #tpu.memory_space<vmem>>, vector<8x1024xf32>
    %4 = arith.truncf %3 : vector<8x1024xf32> to vector<8x1024xbf16>
    %c0_2 = arith.constant 0 : index
    %c0_3 = arith.constant 0 : index
    %5 = vector.load %arg16[%c0_2, %c0_3] : memref<1024x1536xbf16, #tpu.memory_space<vmem>>, vector<1024x1536xbf16>
    %cst = arith.constant dense<0.000000e+00> : vector<8x1536xf32>
    %6 = tpu.matmul %4, %5, %cst {dimension_numbers = #tpu.dot_dimension_numbers<[1], [0], [0], [1], [0, 0, 1, 1], [], []>} : vector<8x1024xbf16>, vector<1024x1536xbf16>, vector<8x1536xf32> -> vector<8x1536xf32>
    %c0_4 = arith.constant 0 : index
    %c0_5 = arith.constant 0 : index
    %7 = vector.load %arg17[%c0_4, %c0_5] : memref<1x1536xf32, #tpu.memory_space<vmem>>, vector<1x1536xf32>
    %8 = vector.broadcast %7 : vector<1x1536xf32> to vector<8x1536xf32>
    %9 = arith.addf %6, %8 : vector<8x1536xf32>
    %10 = math.tanh %9 : vector<8x1536xf32>
    %c0_6 = arith.constant 0 : index
    %c0_7 = arith.constant 0 : index
    %11 = vector.load %arg18[%c0_6, %c0_7] : memref<8x1536xf32, #tpu.memory_space<vmem>>, vector<8x1536xf32>
    tpu.vector_store %arg18[%c0_6, %c0_7], %10 {strides = array<i32>} : memref<8x1536xf32, #tpu.memory_space<vmem>>, vector<8x1536xf32>,
    return
  }
  func.func @transform_0(%arg0: i32) -> (i32, i32) {
    %c0_i32 = arith.constant 0 : i32
    %c0_i32_0 = arith.constant 0 : i32
    %c0_i32_1 = arith.constant 0 : i32
    return %c0_i32, %c0_i32_0 : i32, i32
  }
  func.func @transform_1(%arg0: i32) -> (i32, i32) {
    %c0_i32 = arith.constant 0 : i32
    %c0_i32_0 = arith.constant 0 : i32
    %c0_i32_1 = arith.constant 0 : i32
    return %c0_i32, %c0_i32_0 : i32, i32
  }
  func.func @transform_2(%arg0: i32) -> (i32, i32) {
    %c0_i32 = arith.constant 0 : i32
    %c0_i32_0 = arith.constant 0 : i32
    %c0_i32_1 = arith.constant 0 : i32
    return %c0_i32, %c0_i32_0 : i32, i32
  }
  func.func @transform_3(%arg0: i32) -> (i32, i32) {
    %c0_i32 = arith.constant 0 : i32
    %c0_i32_0 = arith.constant 0 : i32
    %c0_i32_1 = arith.constant 0 : i32
    return %c0_i32, %c0_i32_0 : i32, i32
  }
  func.func @transform_4(%arg0: i32) -> (i32, i32) {
    %c0_i32 = arith.constant 0 : i32
    %c0_i32_0 = arith.constant 0 : i32
    %c0_i32_1 = arith.constant 0 : i32
    return %c0_i32, %c0_i32_0 : i32, i32
  }
  func.func @transform_5(%arg0: i32) -> (i32, i32) {
    %c0_i32 = arith.constant 0 : i32
    %c0_i32_0 = arith.constant 0 : i32
    %c0_i32_1 = arith.constant 0 : i32
    return %c0_i32, %c0_i32_0 : i32, i32
  }
  func.func @transform_6(%arg0: i32) -> (i32, i32) {
    %c0_i32 = arith.constant 0 : i32
    %c0_i32_0 = arith.constant 0 : i32
    %c0_i32_1 = arith.constant 0 : i32
    return %c0_i32, %c0_i32_0 : i32, i32
  }
  func.func @transform_7(%arg0: i32) -> (i32, i32) {
    %c0_i32 = arith.constant 0 : i32
    %c0_i32_0 = arith.constant 0 : i32
    %c0_i32_1 = arith.constant 0 : i32
    return %c0_i32, %c0_i32_0 : i32, i32
  }
  func.func @transform_8(%arg0: i32) -> (i32, i32) {
    %c0_i32 = arith.constant 0 : i32
    %c0_i32_0 = arith.constant 0 : i32
    %c0_i32_1 = arith.constant 0 : i32
    return %c0_i32, %c0_i32_0 : i32, i32
  }
  func.func @transform_9(%arg0: i32) -> (i32, i32) {
    %c0_i32 = arith.constant 0 : i32
    %c0_i32_0 = arith.constant 0 : i32
    %c0_i32_1 = arith.constant 0 : i32
    return %c0_i32, %c0_i32_0 : i32, i32
  }
  func.func @transform_10(%arg0: i32) -> (i32, i32) {
    %c0_i32 = arith.constant 0 : i32
    %c0_i32_0 = arith.constant 0 : i32
    %c0_i32_1 = arith.constant 0 : i32
    return %c0_i32, %c0_i32_0 : i32, i32
  }
  func.func @transform_11(%arg0: i32) -> (i32, i32) {
    %c0_i32 = arith.constant 0 : i32
    %c0_i32_0 = arith.constant 0 : i32
    %c0_i32_1 = arith.constant 0 : i32
    return %c0_i32, %c0_i32_0 : i32, i32
  }
  func.func @transform_12(%arg0: i32) -> (i32, i32) {
    %c0_i32 = arith.constant 0 : i32
    %c0_i32_0 = arith.constant 0 : i32
    %c0_i32_1 = arith.constant 0 : i32
    return %c0_i32, %c0_i32_0 : i32, i32
  }
  func.func @transform_13(%arg0: i32) -> (i32, i32) {
    %c0_i32 = arith.constant 0 : i32
    %c0_i32_0 = arith.constant 0 : i32
    %c0_i32_1 = arith.constant 0 : i32
    return %c0_i32, %c0_i32_0 : i32, i32
  }
  func.func @transform_14(%arg0: i32) -> (i32, i32) {
    %c0_i32 = arith.constant 0 : i32
    %c0_i32_0 = arith.constant 0 : i32
    %c0_i32_1 = arith.constant 0 : i32
    return %c0_i32, %c0_i32_0 : i32, i32
  }
  func.func @transform_15(%arg0: i32) -> (i32, i32) {
    %c0_i32 = arith.constant 0 : i32
    %c0_i32_0 = arith.constant 0 : i32
    return %c0_i32, %arg0 : i32, i32
  }
  func.func @transform_16(%arg0: i32) -> (i32, i32) {
    %c0_i32 = arith.constant 0 : i32
    %c0_i32_0 = arith.constant 0 : i32
    return %c0_i32, %arg0 : i32, i32
  }
  func.func @transform_17(%arg0: i32) -> (i32, i32) {
    %c0_i32 = arith.constant 0 : i32
    %c0_i32_0 = arith.constant 0 : i32
    return %c0_i32, %arg0 : i32, i32
  }
}

</mosaic_0001>

<bundles_post_ra>
// kernel: cifar_generator_forward.1
= control target key start
LH: loop header
LB: loop body
LE: loop exit
PB: predicated region body
PF: predicated region fallthrough
CT: control target
= control target key end

     0   :  { %s14963_s0 = inlined_call_operand.vmem [shape: f32[8,128], index: 0, kind: input, shape index: {}]   ;;  %s14964_s1 = inlined_call_operand.hbm [shape: bf16[128,128], index: 1, kind: input, shape index: {}]   ;;  %s14965_s2 = inlined_call_operand.hbm [shape: f32[1,128], index: 2, kind: input, shape index: {}]   ;;  %s14966_s3 = inlined_call_operand.hbm [shape: bf16[128,256], index: 3, kind: input, shape index: {}]   ;;  %s14967_s4 = inlined_call_operand.hbm [shape: f32[1,256], index: 4, kind: input, shape index: {}]   ;;  %s14968_s5 = inlined_call_operand.hbm [shape: f32[1,256], index: 5, kind: input, shape index: {}]   ;;  %s14969_s6 = inlined_call_operand.hbm [shape: f32[1,256], index: 6, kind: input, shape index: {}]   ;;  %s14970_s7 = inlined_call_operand.hbm [shape: bf16[256,512], index: 7, kind: input, shape index: {}]   ;;  %s14971_s8 = inlined_call_operand.hbm [shape: f32[1,512], index: 8, kind: input, shape index: {}]   ;;  %s14972_s9 = inlined_call_operand.hbm [shape: f32[1,512], index: 9, kind: input, shape index: {}]   ;;  %s14973_s10 = inlined_call_operand.hbm [shape: f32[1,512], index: 10, kind: input, shape index: {}]   ;;  %s14974_s11 = inlined_call_operand.hbm [shape: bf16[512,1024], index: 11, kind: input, shape index: {}]   ;;  %s14975_s12 = inlined_call_operand.hbm [shape: f32[1,1024], index: 12, kind: input, shape index: {}]   ;;  %s14976_s13 = inlined_call_operand.hbm [shape: f32[1,1024], index: 13, kind: input, shape index: {}]   ;;  %s14977_s14 = inlined_call_operand.hbm [shape: f32[1,1024], index: 14, kind: input, shape index: {}]   ;;  %s14978_s15 = inlined_call_operand.hbm [shape: bf16[1024,3072], index: 15, kind: input, shape index: {}]   ;;  %s14979_s16 = inlined_call_operand.hbm [shape: f32[1,3072], index: 16, kind: input, shape index: {}]   ;;  %s14980_s17 = inlined_call_operand.vmem [shape: f32[8,3072], index: 17, kind: output, shape index: {}]  }
   0x1   :  { %14992 = sst [smem:[#allocation37_spill]] %s14963_s0 }
   0x2   :  { %14993 = sst [smem:[#allocation38_spill]] %s14964_s1 }
   0x3   :  { %14994 = sst [smem:[#allocation39_spill]] %s14965_s2 }
   0x4   :  { %14995 = sst [smem:[#allocation40_spill]] %s14966_s3 }
   0x5   :  { %14996 = sst [smem:[#allocation41_spill]] %s14967_s4 }
   0x6   :  { %14997 = sst [smem:[#allocation42_spill]] %s14968_s5 }
   0x7   :  { %14998 = sst [smem:[#allocation43_spill]] %s14969_s6 }
   0x8   :  { %14999 = sst [smem:[#allocation44_spill]] %s14976_s13 }
   0x9   :  { %15000 = sst [smem:[#allocation45_spill]] %s14977_s14 }
   0xa   :  { %15001 = sst [smem:[#allocation46_spill]] %s14979_s16 }
   0xb   :  { %15002 = sst [smem:[#allocation47_spill]] %s14980_s17 }
   0xc   :  { %22 = vsyncpa [#allocation4], 0 }
   0xd   :  { %23 = vsyncpa [#allocation6], 0 }
   0xe   :  { %24 = vsyncpa [#allocation9], 0 }
   0xf   :  { %25 = vsyncpa [#allocation12], 0 }
  0x10   :  { %26 = vsyncpa [#allocation15], 0 }
  0x11   :  { %27 = vsyncpa [#allocation18], 0 }
  0x12   :  { %28 = vsyncpa [#allocation21], 0 }
  0x13   :  { %29 = vsyncpa [#allocation24], 0  ;;  %s13445_s24 = smov 0   ;;  %s13447_s25 = smov 0  }
  0x14   :  { %s13449_s26 = smov 0   ;;  %s13451_s27 = smov 0  }
  0x15 LB: > { %s13324_s28 = smov [#allocation3]   ;;  %s13466_s0 = sadd.s32 4294967295, %s13322_s27   ;;  %s13322_s27 = sphi %s13451_s27, %s15049_s27   ;;  %s13318_s26 = sphi %s13449_s26, %s15048_s26   ;;  %s13314_s25 = sphi %s13447_s25, %s15047_s25   ;;  %s13310_s24 = sphi %s13445_s24, %s15046_s24  }
  0x16   : > { %s448_s29 = sshll.u32 %s13324_s28, 4  ;;  %p10117_p0 = scmp.ge.s32.totalorder %s13322_s27, 1  ;;  %s449_s29 = int_to_ptr.vmem [resolvable:$true] %s448_s29 }
  0x17   : > { %p14983_p1 = scmp.eq.s32.totalorder %s13466_s0, 0  ;;  %p433_p2 = scmp.lt.s32.totalorder %s13322_s27, 3 }
  0x18   : > { %s13325_s18 = smov [#allocation5]   ;;  %s13326_s20 = smov [#allocation8]  }
  0x19   : > { %p13472_p4 = pnand %p10117_p0, %p433_p2  ;;  %s462_s19 = sshll.u32 %s13325_s18, 4  ;;  %s463_s19 = int_to_ptr.vmem [resolvable:$true] %s462_s19 }
  0x1a   : > { %s486_s21 = sshll.u32 %s13326_s20, 4  ;;  %s12847_s23 = scalar_lea.vmem %s449_s29, 1024  ;;  %s13484_s21 = int_to_ptr.vmem [resolvable:$true] %s486_s21 }
  0x1b   : > { %s15003_s30 = scalar_select %p13472_p4, 1, 0 }
  0x1c   : > { %p11362_p5 = pneg %p13472_p4  ;;  %p12848_p8 = scmp.ne.s32.totalorder %s449_s29, %s12847_s23 }
  0x1d   : > { %15004 = sst [smem:[#allocation36_spill]] %s15003_s30  ;;  %p12855_p11 = scmp.lt.s32.totalorder %s449_s29, %s449_s29 }
  0x1e   : > { %p13480_p6 = pnand %p11362_p5, %p14983_p1  ;;  %p12856_p12 = scmp.lt.s32.totalorder %s12847_s23, %s12847_s23 }
  0x20   : > { %s15005_s1 = scalar_select %p13480_p6, 1, 0 }
  0x21   : > { %p13488_p7 = pneg %p13480_p6  ;;  %p12857_p13 = por %p12856_p12, %p12855_p11 }
  0x23   : > { %p12850_p9 = pnand %p12848_p8, %p13488_p7 }
  0x25   : > { %p12851_p10 = pneg %p12850_p9 }
  0x27   : > { %p12858_p0 = pnand %p12857_p13, %p12851_p10 }
  0x29   : > { %12861 = shalt.err (!%p12858_p0)
}
  0x2a   : > { %s13327_s28 = smov 64   ;;  %s13328_s18 = smov 4  }
  0x2b   : > { %s15007_s30 = sld [smem:[#allocation38_spill]]  ;;  %s12873_s16 = scalar_lea.vmem %s463_s19, 16 }
  0x2c   : > { %p12874_p2 = scmp.ne.s32.totalorder %s463_s19, %s12873_s16  ;;  %s12880_s14 = scalar_lea.vmem %s463_s19, 32 }
  0x2d   : > { %p12881_p9 = scmp.lt.s32.totalorder %s463_s19, %s463_s19  ;;  %p12882_p3 = scmp.lt.s32.totalorder %s12880_s14, %s12873_s16 }
  0x2e   : > { %p12876_p5 = pnand %p12874_p2, %p13488_p7 }
  0x2f   : > { %p12883_p11 = por %p12882_p3, %p12881_p9 }
  0x30   : > { %p12877_p8 = pneg %p12876_p5 }
  0x31   : > { %11365 = dma.hbm_to_vmem [thread:$0]  (!%p13480_p6), %s15007_s30, 1024, %s449_s29, [#allocation4], %s13327_s28, %s13327_s28, %s13328_s18  }
  0x32   : > { %p12884_p10 = pnand %p12883_p11, %p12877_p8 }
  0x34   : > { %12887 = shalt.err (!%p12884_p10)
}
  0x35   : > { %s15008_s2 = sld [smem:[#allocation39_spill]]  ;;  %s12899_s17 = scalar_lea.vmem %s13484_s21, 32 }
  0x36   : > { %p12900_p12 = scmp.ne.s32.totalorder %s13484_s21, %s12899_s17  ;;  %p12907_p2 = scmp.lt.s32.totalorder %s13484_s21, %s13484_s21 }
  0x37   : > { %p12908_p3 = scmp.lt.s32.totalorder %s12899_s17, %s12899_s17 }
  0x38   : > { %p12902_p13 = pnand %p12900_p12, %p13488_p7 }
  0x39   : > { %p12909_p5 = por %p12908_p3, %p12907_p2 }
  0x3a   : > { %p12903_p0 = pneg %p12902_p13 }
  0x3b   : > { %11368 = dma.hbm_to_vmem [thread:$0]  (!%p13480_p6), %s15008_s2, 16, %s463_s19, [#allocation6]  }
  0x3c   : > { %p12910_p8 = pnand %p12909_p5, %p12903_p0 }
  0x3e   : > { %12913 = shalt.err (!%p12910_p8)
}
  0x3f   : > { %s15009_s4 = sld [smem:[#allocation41_spill]]  ;;  %s13329_s16 = smov [#allocation11]  }
  0x40   : > { %s508_s29 = sshll.u32 %s13329_s16, 4  ;;  %s13330_s30 = smov [#allocation14]   ;;  %s509_s29 = int_to_ptr.vmem [resolvable:$true] %s508_s29 }
  0x41   : > { %s532_s19 = sshll.u32 %s13330_s30, 4  ;;  %s12925_s28 = scalar_lea.vmem %s509_s29, 32  ;;  %s533_s19 = int_to_ptr.vmem [resolvable:$true] %s532_s19 }
  0x42   : > { %p12926_p9 = scmp.ne.s32.totalorder %s509_s29, %s12925_s28  ;;  %p12933_p12 = scmp.lt.s32.totalorder %s509_s29, %s509_s29 }
  0x43   : > { %p12934_p13 = scmp.lt.s32.totalorder %s12925_s28, %s12925_s28 }
  0x44   : > { %p12928_p11 = pnand %p12926_p9, %p13488_p7 }
  0x45   : > { %11374 = dma.hbm_to_vmem [thread:$0]  (!%p13480_p6), %s15009_s4, 32, %s13484_s21, [#allocation9]  }
  0x46   : > { %p12929_p10 = pneg %p12928_p11  ;;  %p12935_p0 = por %p12934_p13, %p12933_p12 }
  0x48   : > { %p12936_p2 = pnand %p12935_p0, %p12929_p10 }
  0x4a   : > { %12939 = shalt.err (!%p12936_p2)
}
  0x4b   : > { %s15010_s6 = sld [smem:[#allocation43_spill]]  ;;  %s12951_s21 = scalar_lea.vmem %s533_s19, 64 }
  0x4c   : > { %p12952_p3 = scmp.ne.s32.totalorder %s533_s19, %s12951_s21  ;;  %p12959_p9 = scmp.lt.s32.totalorder %s533_s19, %s533_s19 }
  0x4d   : > { %p12960_p11 = scmp.lt.s32.totalorder %s12951_s21, %s12951_s21 }
  0x4e   : > { %p12954_p5 = pnand %p12952_p3, %p13488_p7 }
  0x4f   : > { %p12961_p1 = por %p12960_p11, %p12959_p9 }
  0x50   : > { %p12955_p8 = pneg %p12954_p5 }
  0x51   : > { %11380 = dma.hbm_to_vmem [thread:$0]  (!%p13480_p6), %s15010_s6, 32, %s509_s29, [#allocation12]  }
  0x52   : > { %p12962_p4 = pnand %p12961_p1, %p12955_p8 }
  0x54   : > { %12965 = shalt.err (!%p12962_p4)
}
  0x55   : > { %11386 = dma.hbm_to_vmem [thread:$0]  (!%p13480_p6), %s14971_s8, 64, %s533_s19, [#allocation15]  }
  0x56   : > { %s13331_s13 = smov [#allocation17]   ;;  %s13332_s16 = smov [#allocation20]  }
  0x57   : > { %s554_s14 = sshll.u32 %s13331_s13, 4  ;;  %s578_s29 = sshll.u32 %s13332_s16, 4  ;;  %s555_s14 = int_to_ptr.vmem [resolvable:$true] %s554_s14  ;;  %s579_s29 = int_to_ptr.vmem [resolvable:$true] %s578_s29 }
  0x58   : > { %s12977_s30 = scalar_lea.vmem %s555_s14, 64  ;;  %p12985_p0 = scmp.lt.s32.totalorder %s555_s14, %s555_s14 }
  0x59   : > { %p12978_p10 = scmp.ne.s32.totalorder %s555_s14, %s12977_s30  ;;  %p12986_p1 = scmp.lt.s32.totalorder %s12977_s30, %s12977_s30 }
  0x5b   : > { %p12980_p12 = pnand %p12978_p10, %p13488_p7  ;;  %p12987_p4 = por %p12986_p1, %p12985_p0 }
  0x5d   : > { %p12981_p13 = pneg %p12980_p12 }
  0x5f   : > { %p12988_p2 = pnand %p12987_p4, %p12981_p13 }
  0x61   : > { %12991 = shalt.err (!%p12988_p2)
}
  0x62   : > { %11392 = dma.hbm_to_vmem [thread:$0]  (!%p13480_p6), %s14973_s10, 64, %s555_s14, [#allocation18]  }
  0x63   : > { %s13003_s19 = scalar_lea.vmem %s579_s29, 128  ;;  %p13011_p9 = scmp.lt.s32.totalorder %s579_s29, %s579_s29 }
  0x64   : > { %p13004_p3 = scmp.ne.s32.totalorder %s579_s29, %s13003_s19  ;;  %p13012_p11 = scmp.lt.s32.totalorder %s13003_s19, %s13003_s19 }
  0x66   : > { %p13006_p5 = pnand %p13004_p3, %p13488_p7  ;;  %p13013_p10 = por %p13012_p11, %p13011_p9 }
  0x68   : > { %p13007_p8 = pneg %p13006_p5 }
  0x6a   : > { %p13014_p12 = pnand %p13013_p10, %p13007_p8 }
  0x6c   : > { %13017 = shalt.err (!%p13014_p12)
}
  0x6d   : > { %11398 = dma.hbm_to_vmem [thread:$0]  (!%p13480_p6), %s14975_s12, 128, %s579_s29, [#allocation21]  }
  0x6e   : > { %s13547_s23 = sadd.s32 1, %s13322_s27   ;;  %s357_s13 = sadd.s32 1, %s13318_s26 }
  0x6f   : > { %s354_s17 = ssub.s32 %s13322_s27, %s13547_s23  ;;  %p364_p0 = scmp.ne.s32.totalorder %s13318_s26, %s13314_s25 }
  0x70   : > { %p355_p13 = scmp.eq.s32.totalorder %s354_s17, 0  ;;  %p365_p1 = scmp.eq.s32.totalorder %s13322_s27, 0 }
  0x71   : > { %p370_p4 = scmp.ne.s32.totalorder %s13314_s25, %s13310_s24  ;;  %p15011_p3 = scmp.eq.s32.totalorder %s13466_s0, 0 }
  0x72   : > { %s13558_s14 = scalar_select %p355_p13, %s13318_s26, %s357_s13  }
  0x73   : > { %p366_p2 = por %p365_p1, %p364_p0  ;;  %p13562_p5 = por %p15011_p3, %p370_p4 }
  0x74   : > { %p11426_p8 = scmp.lt.s32.totalorder %s13322_s27, 2  ;;  %s611_s29 = sand.u32 1, %s13322_s27  }
  0x75   : > { %s15012_s16 = scalar_select %p13562_p5, 1, 0 }
  0x76   : > { %s14985_s30 = sand.u32 1, %s13318_s26   ;;  %p13571_p9 = pnand %p11426_p8, %p366_p2 }
  0x77   : > { %s11298_s28 = smul.u32 6144, %s14985_s30  ;;  %s13583_s30 = scalar_lea.sflag [#allocation4], %s611_s29 }
  0x78   : > { %s15013_s18 = scalar_select %p13571_p9, 1, 0 }
  0x79   : > { %s11267_s24 = smul.u32 768, %s13322_s27  ;;  %s615_s17 = scalar_lea.vmem [#allocation25], %s11298_s28 }
  0x7a   : > { %s622_s13 = sshll.u32 %s615_s17, 4  ;;  %p14989_p10 = pneg %p13571_p9  ;;  %s13581_s13 = int_to_ptr.vmem [resolvable:$true] %s622_s13 }
  0x7b   : > { %s13579_s21 = scalar_lea.hbm %s14978_s15, %s11267_s24  ;;  %s13023_s20 = scalar_lea.hbm %s14978_s15, 196608 }
  0x7c   : > { %s13018_s2 = scalar_lea.hbm %s13579_s21, 98304  ;;  %p13024_p0 = scmp.lt.s32.totalorder %s13579_s21, %s14978_s15 }
  0x7d   : > { %p13019_p11 = scmp.ne.s32.totalorder %s13579_s21, %s13018_s2  ;;  %p13025_p1 = scmp.lt.s32.totalorder %s13023_s20, %s13018_s2 }
  0x7f   : > { %p13021_p12 = pnand %p14989_p10, %p13019_p11  ;;  %p13026_p4 = por %p13025_p1, %p13024_p0 }
  0x81   : > { %p13022_p13 = pneg %p13021_p12 }
  0x83   : > { %p13027_p2 = pnand %p13026_p4, %p13022_p13 }
  0x85   : > { %13030 = shalt.err (!%p13027_p2)
}
  0x86   : > { %s13031_s29 = scalar_lea.vmem %s13581_s13, 98304  ;;  %s13333_s28 = smov [#allocation25]  }
  0x87   : > { %p13032_p3 = scmp.ne.s32.totalorder %s13581_s13, %s13031_s29  ;;  %s13036_s17 = sshll.u32 %s13333_s28, 4  ;;  %s13037_s17 = int_to_ptr.vmem [resolvable:$false] %s13036_s17 }
  0x88   : > { %s13038_s19 = scalar_lea.vmem %s13037_s17, 196608  ;;  %p13039_p12 = scmp.lt.s32.totalorder %s13581_s13, %s13037_s17 }
  0x89   : > { %p13034_p8 = pnand %p13032_p3, %p14989_p10  ;;  %p13040_p5 = scmp.lt.s32.totalorder %s13038_s19, %s13031_s29 }
  0x8b   : > { %p13035_p11 = pneg %p13034_p8  ;;  %p13041_p6 = por %p13040_p5, %p13039_p12 }
  0x8d   : > { %p13042_p0 = pnand %p13041_p6, %p13035_p11 }
  0x8f   : > { %13045 = shalt.err (!%p13042_p0)
}
  0x90   : > { %s13334_s2 = smov 1536   ;;  %s13335_s4 = smov 768  }
  0x91   : > { %s13336_s6 = smov 48   ;;  %s13337_s24 = smov [#allocation7]  }
  0x92   : > { %11408 = dma.hbm_to_vmem [thread:$0]  (!%p13571_p9), %s13579_s21, 98304, %s13581_s13, %s13583_s30, %s13334_s2, %s13335_s4, %s13336_s6  }
  0x93   : > { %s472_s20 = sshll.u32 %s13337_s24, 4  ;;  %s473_s20 = int_to_ptr.vmem [resolvable:$true] %s472_s20 }
  0x94   : > { %s13057_s28 = scalar_lea.vmem %s473_s20, 2048  ;;  %p13065_p6 = scmp.lt.s32.totalorder %s473_s20, %s473_s20 }
  0x95   : > { %p13058_p13 = scmp.ne.s32.totalorder %s473_s20, %s13057_s28  ;;  %p13066_p4 = scmp.lt.s32.totalorder %s13057_s28, %s13057_s28 }
  0x97   : > { %p13060_p1 = pnand %p13058_p13, %p13488_p7  ;;  %p13067_p2 = por %p13066_p4, %p13065_p6 }
  0x99   : > { %p13061_p5 = pneg %p13060_p1 }
  0x9b   : > { %p13068_p3 = pnand %p13067_p2, %p13061_p5 }
  0x9d   : > { %13071 = shalt.err (!%p13068_p3)
}
  0x9e   : > { %s13338_s29 = smov 128   ;;  %s13339_s17 = smov 8  }
  0x9f   : > { %p15014_p8 = scmp.ne.s32.totalorder %s15005_s1, 0  ;;  %s15015_s3 = sld [smem:[#allocation40_spill]] }
  0xa0   : > { %s13340_s13 = smov [#allocation10]   ;;  %s13341_s4 = smov [#allocation13]  }
  0xa1   : > { %s497_s2 = sshll.u32 %s13340_s13, 4  ;;  %s518_s6 = sshll.u32 %s13341_s4, 4  ;;  %s498_s2 = int_to_ptr.vmem [resolvable:$true] %s497_s2  ;;  %s519_s6 = int_to_ptr.vmem [resolvable:$true] %s518_s6 }
  0xa2   : > { %s13083_s24 = scalar_lea.vmem %s498_s2, 32  ;;  %p13091_p13 = scmp.lt.s32.totalorder %s498_s2, %s498_s2 }
  0xa3   : > { %p13084_p11 = scmp.ne.s32.totalorder %s498_s2, %s13083_s24  ;;  %p13092_p1 = scmp.lt.s32.totalorder %s13083_s24, %s13083_s24 }
  0xa5   : > { %11371 = dma.hbm_to_vmem [thread:$0]  (!%p15014_p8), %s15015_s3, 2048, %s473_s20, [#allocation6], %s13338_s29, %s13338_s29, %s13339_s17  }
  0xa6   : > { %p13086_p12 = pnand %p13084_p11, %p13488_p7  ;;  %p13093_p5 = por %p13092_p1, %p13091_p13 }
  0xa8   : > { %p13087_p0 = pneg %p13086_p12 }
  0xaa   : > { %p13094_p6 = pnand %p13093_p5, %p13087_p0 }
  0xac   : > { %13097 = shalt.err (!%p13094_p6)
}
  0xad   : > { %s15016_s5 = sld [smem:[#allocation42_spill]]  ;;  %s13109_s29 = scalar_lea.vmem %s519_s6, 8192 }
  0xae   : > { %p13110_p4 = scmp.ne.s32.totalorder %s519_s6, %s13109_s29  ;;  %p13117_p10 = scmp.lt.s32.totalorder %s519_s6, %s519_s6 }
  0xaf   : > { %p13118_p11 = scmp.lt.s32.totalorder %s13109_s29, %s13109_s29 }
  0xb0   : > { %p13112_p2 = pnand %p13110_p4, %p13488_p7 }
  0xb1   : > { %p13119_p12 = por %p13118_p11, %p13117_p10 }
  0xb2   : > { %p13113_p3 = pneg %p13112_p2 }
  0xb3   : > { %11377 = dma.hbm_to_vmem [thread:$0]  (!%p15014_p8), %s15016_s5, 32, %s498_s2, [#allocation9]  }
  0xb4   : > { %p13120_p9 = pnand %p13119_p12, %p13113_p3 }
  0xb6   : > { %13123 = shalt.err (!%p13120_p9)
}
  0xb7   : > { %s13342_s17 = smov 256   ;;  %s13343_s19 = smov 16  }
  0xb8   : > { %11383 = dma.hbm_to_vmem [thread:$0]  (!%p15014_p8), %s14970_s7, 8192, %s519_s6, [#allocation12], %s13342_s17, %s13342_s17, %s13343_s19  }
  0xb9   : > { %s13344_s2 = smov [#allocation16]   ;;  %s13345_s24 = smov [#allocation19]  }
  0xba   : > { %s543_s4 = sshll.u32 %s13344_s2, 4  ;;  %s564_s28 = sshll.u32 %s13345_s24, 4  ;;  %s544_s4 = int_to_ptr.vmem [resolvable:$true] %s543_s4  ;;  %s565_s28 = int_to_ptr.vmem [resolvable:$true] %s564_s28 }
  0xbb   : > { %s13135_s20 = scalar_lea.vmem %s544_s4, 64  ;;  %p13143_p13 = scmp.lt.s32.totalorder %s544_s4, %s544_s4 }
  0xbc   : > { %p13136_p0 = scmp.ne.s32.totalorder %s544_s4, %s13135_s20  ;;  %p13144_p1 = scmp.lt.s32.totalorder %s13135_s20, %s13135_s20 }
  0xbe   : > { %p13138_p10 = pnand %p13136_p0, %p13488_p7  ;;  %p13145_p5 = por %p13144_p1, %p13143_p13 }
  0xc0   : > { %p13139_p9 = pneg %p13138_p10 }
  0xc2   : > { %p13146_p6 = pnand %p13145_p5, %p13139_p9 }
  0xc4   : > { %13149 = shalt.err (!%p13146_p6)
}
  0xc5   : > { %11389 = dma.hbm_to_vmem [thread:$0]  (!%p15014_p8), %s14972_s9, 64, %s544_s4, [#allocation15]  }
  0xc6   : > { %s13161_s17 = scalar_lea.vmem %s565_s28, 32768  ;;  %p13169_p11 = scmp.lt.s32.totalorder %s565_s28, %s565_s28 }
  0xc7   : > { %p13162_p4 = scmp.ne.s32.totalorder %s565_s28, %s13161_s17  ;;  %p13170_p12 = scmp.lt.s32.totalorder %s13161_s17, %s13161_s17 }
  0xc9   : > { %p13164_p2 = pnand %p13162_p4, %p13488_p7  ;;  %p13171_p0 = por %p13170_p12, %p13169_p11 }
  0xcb   : > { %p13165_p3 = pneg %p13164_p2 }
  0xcd   : > { %p13172_p10 = pnand %p13171_p0, %p13165_p3 }
  0xcf   : > { %13175 = shalt.err (!%p13172_p10)
}
  0xd0   : > { %s13346_s19 = smov 512   ;;  %s13347_s21 = smov 32  }
  0xd1   : > { %11395 = dma.hbm_to_vmem [thread:$0]  (!%p15014_p8), %s14974_s11, 32768, %s565_s28, [#allocation18], %s13346_s19, %s13346_s19, %s13347_s21  }
  0xd2   : > { %s13348_s4 = smov [#allocation22]   ;;  %s13349_s20 = smov [#allocation23]  }
  0xd3   : > { %s589_s24 = sshll.u32 %s13348_s4, 4  ;;  %s600_s29 = sshll.u32 %s13349_s20, 4  ;;  %s590_s24 = int_to_ptr.vmem [resolvable:$true] %s589_s24  ;;  %s601_s29 = int_to_ptr.vmem [resolvable:$true] %s600_s29 }
  0xd4   : > { %s13187_s6 = scalar_lea.vmem %s590_s24, 128  ;;  %p13195_p5 = scmp.lt.s32.totalorder %s590_s24, %s590_s24 }
  0xd5   : > { %p13188_p9 = scmp.ne.s32.totalorder %s590_s24, %s13187_s6  ;;  %p13196_p6 = scmp.lt.s32.totalorder %s13187_s6, %s13187_s6 }
  0xd7   : > { %p13190_p13 = pnand %p13188_p9, %p13488_p7  ;;  %p13197_p4 = por %p13196_p6, %p13195_p5 }
  0xd9   : > { %p13191_p1 = pneg %p13190_p13 }
  0xdb   : > { %p13198_p2 = pnand %p13197_p4, %p13191_p1 }
  0xdd   : > { %13201 = shalt.err (!%p13198_p2)
}
  0xde   : > { %s15017_s19 = sld [smem:[#allocation44_spill]]  ;;  %s13213_s21 = scalar_lea.vmem %s601_s29, 128 }
  0xdf   : > { %p13214_p3 = scmp.ne.s32.totalorder %s601_s29, %s13213_s21  ;;  %p13221_p0 = scmp.lt.s32.totalorder %s601_s29, %s601_s29 }
  0xe0   : > { %p13222_p10 = scmp.lt.s32.totalorder %s13213_s21, %s13213_s21 }
  0xe1   : > { %p13216_p11 = pnand %p13214_p3, %p13488_p7 }
  0xe2   : > { %p13223_p9 = por %p13222_p10, %p13221_p0 }
  0xe3   : > { %p13217_p12 = pneg %p13216_p11 }
  0xe4   : > { %11401 = dma.hbm_to_vmem [thread:$0]  (!%p15014_p8), %s15017_s19, 128, %s590_s24, [#allocation21]  }
  0xe5   : > { %p13224_p13 = pnand %p13223_p9, %p13217_p12 }
  0xe7   : > { %13227 = shalt.err (!%p13224_p13)
}
  0xe8   : > { %s15018_s4 = sld [smem:[#allocation45_spill]]  ;;  %s15019_s24 = sand.u32 1, %s13318_s26  }
  0xe9   : > { %s11299_s20 = smul.u32 12, %s15019_s24  ;;  %s15020_s28 = sld [smem:[#allocation46_spill]] }
  0xea   : > { %s11268_s6 = smul.u32 192, %s13322_s27  ;;  %p15021_p1 = scmp.ne.s32.totalorder %s15013_s18, 0 }
  0xeb   : > { %s636_s21 = scalar_lea.vmem [#allocation26], %s11299_s20 }
  0xec   : > { %s644_s3 = sshll.u32 %s636_s21, 4  ;;  %p15022_p5 = pneg %p15021_p1  ;;  %s645_s3 = int_to_ptr.vmem [resolvable:$true] %s644_s3 }
  0xee   : > { %11404 = dma.hbm_to_vmem [thread:$0]  (!%p15014_p8), %s15018_s4, 128, %s601_s29, [#allocation24]  }
  0xef   : > { %s642_s19 = scalar_lea.hbm %s15020_s28, %s11268_s6  ;;  %s13233_s29 = scalar_lea.hbm %s15020_s28, 384 }
  0xf0   : > { %s13228_s5 = scalar_lea.hbm %s642_s19, 192  ;;  %p13234_p8 = scmp.lt.s32.totalorder %s642_s19, %s15020_s28 }
  0xf1   : > { %p13229_p7 = scmp.ne.s32.totalorder %s642_s19, %s13228_s5  ;;  %p13235_p2 = scmp.lt.s32.totalorder %s13233_s29, %s13228_s5 }
  0xf3   : > { %p13231_p6 = pnand %p13229_p7, %p15022_p5  ;;  %p13236_p3 = por %p13235_p2, %p13234_p8 }
  0xf5   : > { %p13232_p4 = pneg %p13231_p6 }
  0xf7   : > { %p13237_p11 = pnand %p13236_p3, %p13232_p4 }
  0xf9   : > { %13240 = shalt.err (!%p13237_p11)
}
  0xfa   : > { %s13241_s27 = scalar_lea.vmem %s645_s3, 192  ;;  %p15023_p0 = pmov %p15022_p5 }
  0xfb   : > { %p13242_p12 = scmp.ne.s32.totalorder %s645_s3, %s13241_s27  ;;  %s13350_s24 = smov [#allocation26]  }
  0xfc   : > { %s13246_s20 = sshll.u32 %s13350_s24, 4  ;;  %s13247_s20 = int_to_ptr.vmem [resolvable:$false] %s13246_s20 }
  0xfd   : > { %p13244_p10 = pnand %p13242_p12, %p15023_p0  ;;  %s13248_s6 = scalar_lea.vmem %s13247_s20, 384 }
  0xfe   : > { %p13249_p13 = scmp.lt.s32.totalorder %s645_s3, %s13247_s20  ;;  %p13250_p7 = scmp.lt.s32.totalorder %s13248_s6, %s13241_s27 }
  0xff   : > { %p13245_p9 = pneg %p13244_p10 }
 0x100   : > { %p13251_p5 = por %p13250_p7, %p13249_p13 }
 0x102   : > { %p13252_p6 = pnand %p13251_p5, %p13245_p9 }
 0x104   : > { %13255 = shalt.err (!%p13252_p6)
}
 0x105   : > { %11411 = dma.hbm_to_vmem [thread:$0]  (!%p15021_p1), %s642_s19, 192, %s645_s3, %s13583_s30  }
 0x106   : > { %s15024_s5 = sld [smem:[#allocation36_spill]] }
 0x10c   : > { %p15025_p4 = scmp.ne.s32.totalorder %s15024_s5, 0 }
 0x10d   : > { %p15026_p8 = scmp.eq.s32.totalorder (!%p15025_p4), %s13466_s0, 0 }
 0x10e   : > { %653 = sbr.rel (%p15025_p4) target bundleno = 2529 (0x9e1), region = 88 }
 0x113   : > { %13273 = dma.done.wait (%p15026_p8), [#allocation4], 1024   ;;  %p15027_p2 = pmov %p15026_p8 }
 0x115   : > { %13275 = vsyncadd (%p15027_p2), [#allocation4], 4294966272  ;;  %p15028_p3 = pmov %p15027_p2 }
 0x116   : > { %p15029_p11 = pmov %p15027_p2 }
 0x117   : > { %13277 = dma.done.wait (%p15028_p3), [#allocation6], 2064  }
 0x118   : > { %13279 = vsyncadd (%p15029_p11), [#allocation6], 4294965232  ;;  %p15030_p12 = pmov %p15027_p2 }
 0x119   : > { %p15031_p1 = pmov %p15027_p2 }
 0x11a   : > { %13281 = dma.done.wait (%p15030_p12), [#allocation9], 64  }
 0x11b   : > { %13283 = vsyncadd (%p15031_p1), [#allocation9], 4294967232  ;;  %p15032_p0 = pmov %p15031_p1 }
 0x11d   : > { %13285 = dma.done.wait (%p15032_p0), [#allocation12], 8224   ;;  %p15033_p10 = pmov %p15032_p0 }
 0x11e   : > { %p15034_p9 = pmov %p15032_p0 }
 0x11f   : > { %13287 = vsyncadd (%p15033_p10), [#allocation12], 4294959072 }
 0x120   : > { %13289 = dma.done.wait (%p15034_p9), [#allocation15], 128   ;;  %p15035_p13 = pmov %p15032_p0 }
 0x121   : > { %p15036_p7 = pmov %p15032_p0 }
 0x122   : > { %13291 = vsyncadd (%p15035_p13), [#allocation15], 4294967168 }
 0x123   : > { %13293 = dma.done.wait (%p15036_p7), [#allocation18], 32832   ;;  %p15037_p5 = pmov %p15032_p0 }
 0x124   : > { %p15038_p6 = pmov %p15032_p0 }
 0x125   : > { %13295 = vsyncadd (%p15037_p5), [#allocation18], 4294934464 }
 0x126   : > { %13297 = dma.done.wait (%p15038_p6), [#allocation21], 256   ;;  %p15039_p4 = pmov %p15032_p0 }
 0x127   : > { %p15040_p8 = pmov %p15032_p0 }
 0x128   : > { %13299 = vsyncadd (%p15039_p4), [#allocation21], 4294967040 }
 0x129   : > { %13301 = dma.done.wait (%p15040_p8), [#allocation24], 128   ;;  %p15041_p2 = pmov %p15032_p0 }
 0x12a   : > { %s711_s3 = sand.u32 1, %s13466_s0   ;;  %s713_s30 = sand.u32 1, %s13314_s25  }
 0x12b   : > { %13303 = vsyncadd (%p15041_p2), [#allocation24], 4294967168  ;;  %s11300_s18 = smul.u32 6144, %s713_s30  ;;  %s712_s22 = scalar_lea.sflag [#allocation4], %s711_s3 }
 0x12c   : > { %p15042_p3 = scmp.ne.s32.totalorder %s15012_s16, 0 }
 0x12d   : > { %s13716_s17 = scalar_lea.vmem [#allocation25], %s11300_s18 }
 0x12e   : > { %13305 = dma.done.wait (%p15042_p3), %s712_s22, 98496  }
 0x12f   : > { %13307 = vsyncadd (%p15042_p3), %s712_s22, 4294868800  ;;  %s11301_s19 = smul.u32 12, %s713_s30  ;;  %s15043_s2 = sld [smem:[#allocation47_spill]] }
 0x130   : > { %s782_s21 = smul.u32 12, %s13466_s0  ;;  %p15044_p12 = scmp.ne.s32.totalorder %s13466_s0, 0 }
 0x131   : > { %s13728_s27 = scalar_lea.vmem [#allocation26], %s11301_s19  ;;  %s15045_s24 = sld [smem:[#allocation37_spill]] (!%p15044_p12) }
 0x132   : > { %p783_p11 = scmp.lt.s32.totalorder %s782_s21, 23  ;;  %792 = sbr.rel (%p15044_p12) target bundleno = 1546 (0x60a), region = 156 }
 0x134   : > { %s15051_s21 = smov (!%p783_p11, %s782_s21), 23 }
 0x135   : > { %s10150_s1 = sshll.u32 %s15051_s21, 3 }
 0x136   : > { %s13726_s4 = scalar_lea.vmem %s15043_s2, %s10150_s1 }
 0x137   : > { %v11502_v0 = vld [vmem:[#allocation3 + $0x38] sm:$0xff]   ;;  %v13351_v1 = vmov 0.0   ;;  %v11503_v2 = vld [vmem:[#allocation3 + $0x30] sm:$0xff]   ;;  %vm13352_vm0 = vmmov 0   ;;  %v11504_v3 = vld [vmem:[#allocation3 + $0x28] sm:$0xff]   ;;  %v13353_v27 = vmov 0  }
 0x138   : > { %11278 = vmatprep.subr.bf16.mxu0 %v13351_v1  ;;  %11294 = vmatprep.mubr.msk.bf16.mxu0 %vm13352_vm0, %v13351_v1  ;;  %v11510_v4 = vld [vmem:[#allocation7 + $0x74] ss:$8 sps:$4 sm:$0xff]   ;;  %v11512_v5 = vld [vmem:[#allocation7 + $0x70] ss:$8 sps:$4 sm:$0xff]   ;;  %v11513_v7 = vld [vmem:[#allocation7 + $0x64] ss:$8 sps:$4 sm:$0xff]  }
 0x139   : > { %11279 = vmatpush3.bf16.msra.mxu0 %v11502_v0  ;;  %v11505_v6 = vld [vmem:[#allocation3 + $0x20] sm:$0xff]   ;;  %1018 = vmatprep.subr.bf16.mxu1 %v11510_v4  ;;  %v11506_v10 = vld [vmem:[#allocation3 + $0x18] sm:$0xff]   ;;  %v11507_v11 = vld [vmem:[#allocation3 + $0x10] sm:$0xff]  }
 0x13a   : > { %11280 = vmatprep.subr.bf16.mxu0 %v13351_v1  ;;  %1019 = vmatpush1.bf16.msra.mxu1 %v11512_v5  ;;  %v11515_v8 = vld [vmem:[#allocation7 + $0x60] ss:$8 sps:$4 sm:$0xff]   ;;  %v11516_v9 = vld [vmem:[#allocation7 + $0x54] ss:$8 sps:$4 sm:$0xff]   ;;  %v11518_v12 = vld [vmem:[#allocation7 + $0x50] ss:$8 sps:$4 sm:$0xff]  }
 0x13b   : > { %1020 = vmatprep.subr.bf16.mxu1 %v11513_v7  ;;  %v11519_v13 = vld [vmem:[#allocation7 + $0x44] ss:$8 sps:$4 sm:$0xff]   ;;  %v11521_v14 = vld [vmem:[#allocation7 + $0x40] ss:$8 sps:$4 sm:$0xff]   ;;  %v11522_v15 = vld [vmem:[#allocation7 + $0x34] ss:$8 sps:$4 sm:$0xff]   ;;  %1050 = vmatprep.mubr.bf16.mxu1 %v13353_v27 }
 0x13c   : > { %v11508_v16 = vld [vmem:[#allocation3 + $0x8] sm:$0xff]   ;;  %v11524_v17 = vld [vmem:[#allocation7 + $0x30] ss:$8 sps:$4 sm:$0xff]   ;;  %v11509_v19 = vld [vmem:[#allocation3] sm:$0xff]  }
 0x13d   : > { %11281 = vmatpush3.bf16.msra.mxu0 %v11503_v2  ;;  %v11525_v18 = vld [vmem:[#allocation7 + $0x24] ss:$8 sps:$4 sm:$0xff]   ;;  %v11527_v21 = vld [vmem:[#allocation7 + $0x20] ss:$8 sps:$4 sm:$0xff]   ;;  %v11528_v23 = vld [vmem:[#allocation7 + $0x14] ss:$8 sps:$4 sm:$0xff]  }
 0x13e   : > { %11282 = vmatprep.subr.bf16.mxu0 %v13351_v1  ;;  %1021 = vmatpush1.bf16.msra.mxu1 %v11515_v8  ;;  %v793_v20 = vld [vmem:[%s15045_s24] sm:$0xff]  ;;  %v11530_v24 = vld [vmem:[#allocation7 + $0x10] ss:$8 sps:$4 sm:$0xff]  }
 0x13f   : > { %1022 = vmatprep.subr.bf16.mxu1 %v11516_v9  ;;  %v794_v22 = vpack.c.bf16 %v793_v20, %v793_v20  ;;  %v11531_v25 = vld [vmem:[#allocation7 + $0x4] ss:$8 sps:$4 sm:$0xff]   ;;  %v11533_v26 = vld [vmem:[#allocation7] ss:$8 sps:$4 sm:$0xff]   ;;  %v10152_v28 = vld [vmem:[#allocation5] ss:$0 sm:$0xff] }
 0x140   : > { %v11536_v37 = vld [vmem:[#allocation13 + $0xe4] ss:$16 sps:$4 sm:$0xff]   ;;  %v11539_v38 = vld [vmem:[#allocation13 + $0xec] ss:$16 sps:$4 sm:$0xff]   ;;  %v11534_v39 = vld [vmem:[#allocation13 + $0xe0] ss:$16 sps:$4 sm:$0xff]  }
 0x141   : > { %11283 = vmatpush3.bf16.msra.mxu0 %v11504_v3  ;;  %v11537_v40 = vld [vmem:[#allocation13 + $0xe8] ss:$16 sps:$4 sm:$0xff]   ;;  %v11542_v41 = vld [vmem:[#allocation13 + $0xc4] ss:$16 sps:$4 sm:$0xff]   ;;  %v11545_v42 = vld [vmem:[#allocation13 + $0xcc] ss:$16 sps:$4 sm:$0xff]  }
 0x142   : > { %11284 = vmatprep.subr.bf16.mxu0 %v13351_v1  ;;  %1023 = vmatpush1.bf16.msra.mxu1 %v11518_v12  ;;  %v11540_v43 = vld [vmem:[#allocation13 + $0xc0] ss:$16 sps:$4 sm:$0xff]   ;;  %v11543_v44 = vld [vmem:[#allocation13 + $0xc8] ss:$16 sps:$4 sm:$0xff]   ;;  %v11548_v45 = vld [vmem:[#allocation13 + $0xa4] ss:$16 sps:$4 sm:$0xff]  }
 0x143   : > { %1024 = vmatprep.subr.bf16.mxu1 %v11519_v13  ;;  %v11551_v46 = vld [vmem:[#allocation13 + $0xac] ss:$16 sps:$4 sm:$0xff]   ;;  %v11546_v47 = vld [vmem:[#allocation13 + $0xa0] ss:$16 sps:$4 sm:$0xff]   ;;  %v11549_v48 = vld [vmem:[#allocation13 + $0xa8] ss:$16 sps:$4 sm:$0xff]  }
 0x144   : > { %v11554_v49 = vld [vmem:[#allocation13 + $0x84] ss:$16 sps:$4 sm:$0xff]   ;;  %v11557_v50 = vld [vmem:[#allocation13 + $0x8c] ss:$16 sps:$4 sm:$0xff]   ;;  %v11552_v51 = vld [vmem:[#allocation13 + $0x80] ss:$16 sps:$4 sm:$0xff]  }
 0x145   : > { %11285 = vmatpush3.bf16.msra.mxu0 %v11505_v6  ;;  %v11555_v52 = vld [vmem:[#allocation13 + $0x88] ss:$16 sps:$4 sm:$0xff]   ;;  %v11560_v53 = vld [vmem:[#allocation13 + $0x64] ss:$16 sps:$4 sm:$0xff]   ;;  %v11563_v54 = vld [vmem:[#allocation13 + $0x6c] ss:$16 sps:$4 sm:$0xff]  }
 0x146   : > { %11286 = vmatprep.subr.bf16.mxu0 %v13351_v1  ;;  %1025 = vmatpush1.bf16.msra.mxu1 %v11521_v14  ;;  %v11558_v55 = vld [vmem:[#allocation13 + $0x60] ss:$16 sps:$4 sm:$0xff]   ;;  %v11561_v56 = vld [vmem:[#allocation13 + $0x68] ss:$16 sps:$4 sm:$0xff]   ;;  %v11566_v57 = vld [vmem:[#allocation13 + $0x44] ss:$16 sps:$4 sm:$0xff]  }
 0x147   : > { %1026 = vmatprep.subr.bf16.mxu1 %v11522_v15  ;;  %v11564_v58 = vld [vmem:[#allocation13 + $0x40] ss:$16 sps:$4 sm:$0xff]   ;;  %v11567_v59 = vld [vmem:[#allocation13 + $0x48] ss:$16 sps:$4 sm:$0xff]   ;;  %v11569_v60 = vld [vmem:[#allocation13 + $0x4c] ss:$16 sps:$4 sm:$0xff]  }
 0x148   : > { %v11572_v61 = vld [vmem:[#allocation13 + $0x24] ss:$16 sps:$4 sm:$0xff]   ;;  %v11575_v62 = vld [vmem:[#allocation13 + $0x2c] ss:$16 sps:$4 sm:$0xff]   ;;  %v11570_v63 = vld [vmem:[#allocation13 + $0x20] ss:$16 sps:$4 sm:$0xff]  }
 0x149   : > { %11287 = vmatpush3.bf16.msra.mxu0 %v11506_v10  ;;  %v11573_v0 = vld [vmem:[#allocation13 + $0x28] ss:$16 sps:$4 sm:$0xff]   ;;  %v11581_v2 = vld [vmem:[#allocation13 + $0xc] ss:$16 sps:$4 sm:$0xff]   ;;  %v11576_v3 = vld [vmem:[#allocation13] ss:$16 sps:$4 sm:$0xff]  }
 0x14a   : > { %11288 = vmatprep.subr.bf16.mxu0 %v13351_v1  ;;  %1027 = vmatpush1.bf16.msra.mxu1 %v11524_v17  ;;  %v11579_v4 = vld [vmem:[#allocation13 + $0x8] ss:$16 sps:$4 sm:$0xff]   ;;  %v11584_v5 = vld [vmem:[#allocation13 + $0x1e4] ss:$16 sps:$4 sm:$0xff]   ;;  %v11587_v6 = vld [vmem:[#allocation13 + $0x1ec] ss:$16 sps:$4 sm:$0xff]  }
 0x14b   : > { %1028 = vmatprep.subr.bf16.mxu1 %v11525_v18  ;;  %v11582_v7 = vld [vmem:[#allocation13 + $0x1e0] ss:$16 sps:$4 sm:$0xff]   ;;  %v11585_v8 = vld [vmem:[#allocation13 + $0x1e8] ss:$16 sps:$4 sm:$0xff]   ;;  %v11590_v9 = vld [vmem:[#allocation13 + $0x1c4] ss:$16 sps:$4 sm:$0xff]  }
 0x14c   : > { %v11593_v10 = vld [vmem:[#allocation13 + $0x1cc] ss:$16 sps:$4 sm:$0xff]   ;;  %v11591_v12 = vld [vmem:[#allocation13 + $0x1c8] ss:$16 sps:$4 sm:$0xff]   ;;  %v11596_v13 = vld [vmem:[#allocation13 + $0x1a4] ss:$16 sps:$4 sm:$0xff]  }
 0x14d   : > { %11289 = vmatpush3.bf16.msra.mxu0 %v11507_v11  ;;  %v11588_v11 = vld [vmem:[#allocation13 + $0x1c0] ss:$16 sps:$4 sm:$0xff]   ;;  %v11599_v14 = vld [vmem:[#allocation13 + $0x1ac] ss:$16 sps:$4 sm:$0xff]   ;;  %v11602_v17 = vld [vmem:[#allocation13 + $0x184] ss:$16 sps:$4 sm:$0xff]  }
 0x14e   : > { %11290 = vmatprep.subr.bf16.mxu0 %v13351_v1  ;;  %1029 = vmatpush1.bf16.msra.mxu1 %v11527_v21  ;;  %v11594_v15 = vld [vmem:[#allocation13 + $0x1a0] ss:$16 sps:$4 sm:$0xff]   ;;  %v11605_v18 = vld [vmem:[#allocation13 + $0x18c] ss:$16 sps:$4 sm:$0xff]   ;;  %v11603_v20 = vld [vmem:[#allocation13 + $0x188] ss:$16 sps:$4 sm:$0xff]  }
 0x14f   : > { %1030 = vmatprep.subr.bf16.mxu1 %v11528_v23  ;;  %v11608_v21 = vld [vmem:[#allocation13 + $0x164] ss:$16 sps:$4 sm:$0xff]   ;;  %v11606_v23 = vld [vmem:[#allocation13 + $0x160] ss:$16 sps:$4 sm:$0xff]   ;;  %v11617_v27 = vld [vmem:[#allocation13 + $0x14c] ss:$16 sps:$4 sm:$0xff]  }
 0x151   : > { %11291 = vmatpush3.bf16.msra.mxu0 %v11508_v16  ;;  %v11597_v16 = vld [vmem:[#allocation13 + $0x1a8] ss:$16 sps:$4 sm:$0xff]  }
 0x152   : > { %11292 = vmatprep.subr.bf16.mxu0 %v13351_v1  ;;  %1031 = vmatpush1.bf16.msra.mxu1 %v11530_v24  ;;  %v11578_v1 = vld [vmem:[#allocation13 + $0x4] ss:$16 sps:$4 sm:$0xff]   ;;  %v11609_v24 = vld [vmem:[#allocation13 + $0x168] ss:$16 sps:$4 sm:$0xff]  }
 0x153   : > { %1032 = vmatprep.subr.bf16.mxu1 %v11531_v25  ;;  %v11614_v25 = vld [vmem:[#allocation13 + $0x144] ss:$16 sps:$4 sm:$0xff]  }
 0x155   : > { %11293 = vmatpush3.bf16.msra.mxu0 %v11509_v19  ;;  %v11600_v19 = vld [vmem:[#allocation13 + $0x180] ss:$16 sps:$4 sm:$0xff]  }
 0x156   : > { %1033 = vmatpush1.bf16.msra.mxu1 %v11533_v26  ;;  %1581 = vmatprep.subr.bf16.mxu0 %v11536_v37  ;;  %v11612_v26 = vld [vmem:[#allocation13 + $0x140] ss:$16 sps:$4 sm:$0xff]   ;;  %v928_v37 = vlaneseq }
 0x157   : > { %1622 = vmatprep.subr.bf16.mxu1 %v11539_v38 }
 0x158   : > { %11295 = vmatmul.mubr.bf16.vlgmr.msra.gmra.mxu0 %v794_v22  ;;  %v11611_v22 = vld [vmem:[#allocation13 + $0x16c] ss:$16 sps:$4 sm:$0xff]   ;;  %v13735_v38 = vshrl.u32 %v928_v37, 7 }
 0x159   : > { %1582 = vmatpush1.bf16.msra.mxu0 %v11534_v39 }
 0x15a   : > { %1583 = vmatprep.subr.bf16.mxu0 %v11542_v41  ;;  %v13738_v39 = vsub.s32 0, %v13735_v38  ;;  %v13741_v41 = vsub.s32 1, %v13735_v38 }
 0x15d   : > { %1584 = vmatpush1.bf16.msra.mxu0 %v11540_v43 }
 0x15e   : > { %1585 = vmatprep.subr.bf16.mxu0 %v11548_v45 }
 0x161   : > { %1586 = vmatpush1.bf16.msra.mxu0 %v11546_v47 }
 0x162   : > { %1587 = vmatprep.subr.bf16.mxu0 %v11554_v49 }
 0x165   : > { %1588 = vmatpush1.bf16.msra.mxu0 %v11552_v51 }
 0x166   : > { %1589 = vmatprep.subr.bf16.mxu0 %v11560_v53 }
 0x169   : > { %1590 = vmatpush1.bf16.msra.mxu0 %v11558_v55 }
 0x16a   : > { %1591 = vmatprep.subr.bf16.mxu0 %v11566_v57 }
 0x16d   : > { %1592 = vmatpush1.bf16.msra.mxu0 %v11564_v58 }
 0x16e   : > { %1593 = vmatprep.subr.bf16.mxu0 %v11572_v61 }
 0x171   : > { %1594 = vmatpush1.bf16.msra.mxu0 %v11570_v63 }
 0x172   : > { %1595 = vmatprep.subr.bf16.mxu0 %v11578_v1 }
 0x175   : > { %1596 = vmatpush1.bf16.msra.mxu0 %v11576_v3 }
 0x176   : > { %1597 = vmatprep.subr.bf16.mxu0 %v11584_v5 }
 0x179   : > { %1598 = vmatpush2.bf16.msra.mxu0 %v11582_v7 }
 0x17a   : > { %1599 = vmatprep.subr.bf16.mxu0 %v11590_v9 }
 0x17d   : > { %1600 = vmatpush2.bf16.msra.mxu0 %v11588_v11 }
 0x17e   : > { %1601 = vmatprep.subr.bf16.mxu0 %v11596_v13 }
 0x181   : > { %1602 = vmatpush2.bf16.msra.mxu0 %v11594_v15 }
 0x182   : > { %1603 = vmatprep.subr.bf16.mxu0 %v11602_v17 }
 0x185   : > { %1604 = vmatpush2.bf16.msra.mxu0 %v11600_v19 }
 0x186   : > { %1605 = vmatprep.subr.bf16.mxu0 %v11608_v21 }
 0x189   : > { %1606 = vmatpush2.bf16.msra.mxu0 %v11606_v23 }
 0x18a   : > { %1607 = vmatprep.subr.bf16.mxu0 %v11614_v25 }
 0x18d   : > { %1608 = vmatpush2.bf16.msra.mxu0 %v11612_v26 }
 0x218   : > { %v900_v29 = vpop.f32.mrf.mxu0 }
 0x219   : > { %v901_v30 = vadd.f32 %v10152_v28, %v900_v29  ;;  %v11615_v28 = vld [vmem:[#allocation13 + $0x148] ss:$16 sps:$4 sm:$0xff]   ;;  %v11620_v29 = vld [vmem:[#allocation13 + $0x124] ss:$16 sps:$4 sm:$0xff]  }
 0x21a   : > { %v11296_v31 = vpop.f32.mrf.mxu0  ;;  %1609 = vmatprep.subr.bf16.mxu0 %v11620_v29 }
 0x21b   : > { %vm906_vm1 = vcmp.gt.f32.partialorder %v901_v30, 0.0  ;;  %v907_v32 = vmul.f32 0.2, %v901_v30  ;;  %v11618_v31 = vld [vmem:[#allocation13 + $0x120] ss:$16 sps:$4 sm:$0xff]  }
 0x21c   : > { %v903_v33 = vpop.f32.mrf.mxu0  ;;  %1610 = vmatpush2.bf16.msra.mxu0 %v11618_v31 }
 0x21d   : > { %v908_v34 = vsel %vm906_vm1, %v901_v30, %v907_v32  ;;  %v11623_v30 = vld [vmem:[#allocation13 + $0x12c] ss:$16 sps:$4 sm:$0xff]   ;;  %v11621_v32 = vld [vmem:[#allocation13 + $0x128] ss:$16 sps:$4 sm:$0xff]   ;;  %v11626_v33 = vld [vmem:[#allocation13 + $0x104] ss:$16 sps:$4 sm:$0xff]  }
 0x21e   : > { %v11297_v35 = vpop.f32.mrf.mxu0  ;;  %v909_v36 = vpack.c.bf16 %v908_v34, %v908_v34  ;;  %v11629_v34 = vld [vmem:[#allocation13 + $0x10c] ss:$16 sps:$4 sm:$0xff]   ;;  %1611 = vmatprep.subr.bf16.mxu0 %v11626_v33 }
 0x21f   : > { %v11624_v35 = vld [vmem:[#allocation13 + $0x100] ss:$16 sps:$4 sm:$0xff]  }
 0x220   : > { %1051 = vmatmul.mubr.bf16.vlgmr.msra.gmra.mxu1 %v909_v36  ;;  %v11627_v36 = vld [vmem:[#allocation13 + $0x108] ss:$16 sps:$4 sm:$0xff]   ;;  %1612 = vmatpush2.bf16.msra.mxu0 %v11624_v35 }
 0x221   : > { %1623 = vmatpush1.bf16.msra.mxu1 %v11537_v40  ;;  %v926_v40 = vld [vmem:[#allocation8] sm:$0x3] }
 0x222   : > { %1624 = vmatprep.subr.bf16.mxu1 %v11545_v42  ;;  %v931_v42 = vrot.slane %v926_v40, %v13738_v39  ;;  %v935_v43 = vrot.slane %v926_v40, %v13741_v41 }
 0x225   : > { %1625 = vmatpush1.bf16.msra.mxu1 %v11543_v44 }
 0x226   : > { %1626 = vmatprep.subr.bf16.mxu1 %v11551_v46 }
 0x229   : > { %1627 = vmatpush1.bf16.msra.mxu1 %v11549_v48 }
 0x22a   : > { %1628 = vmatprep.subr.bf16.mxu1 %v11557_v50 }
 0x22d   : > { %1629 = vmatpush1.bf16.msra.mxu1 %v11555_v52 }
 0x22e   : > { %1630 = vmatprep.subr.bf16.mxu1 %v11563_v54 }
 0x231   : > { %1631 = vmatpush1.bf16.msra.mxu1 %v11561_v56 }
 0x232   : > { %1632 = vmatprep.subr.bf16.mxu1 %v11569_v60 }
 0x235   : > { %1633 = vmatpush1.bf16.msra.mxu1 %v11567_v59 }
 0x236   : > { %1634 = vmatprep.subr.bf16.mxu1 %v11575_v62 }
 0x239   : > { %1635 = vmatpush1.bf16.msra.mxu1 %v11573_v0 }
 0x23a   : > { %1636 = vmatprep.subr.bf16.mxu1 %v11581_v2 }
 0x23d   : > { %1637 = vmatpush1.bf16.msra.mxu1 %v11579_v4 }
 0x23e   : > { %1638 = vmatprep.subr.bf16.mxu1 %v11587_v6 }
 0x241   : > { %1639 = vmatpush2.bf16.msra.mxu1 %v11585_v8 }
 0x242   : > { %1640 = vmatprep.subr.bf16.mxu1 %v11593_v10 }
 0x245   : > { %1641 = vmatpush2.bf16.msra.mxu1 %v11591_v12 }
 0x246   : > { %1642 = vmatprep.subr.bf16.mxu1 %v11599_v14 }
 0x249   : > { %1643 = vmatpush2.bf16.msra.mxu1 %v11597_v16 }
 0x24a   : > { %1644 = vmatprep.subr.bf16.mxu1 %v11605_v18 }
 0x24d   : > { %1645 = vmatpush2.bf16.msra.mxu1 %v11603_v20 }
 0x24e   : > { %1646 = vmatprep.subr.bf16.mxu1 %v11611_v22 }
 0x251   : > { %1647 = vmatpush2.bf16.msra.mxu1 %v11609_v24  ;;  %v13354_v24 = vmov 1966171168  }
 0x252   : > { %1648 = vmatprep.subr.bf16.mxu1 %v11617_v27  ;;  %v1105_v25 = vunpack.c.l.s4 %v13354_v24 }
 0x254   : > { %v1106_v26 = vunpack.c.0.s8 %v1105_v25 }
 0x255   : > { %1649 = vmatpush2.bf16.msra.mxu1 %v11615_v28 }
 0x256   : > { %1650 = vmatprep.subr.bf16.mxu1 %v11623_v30  ;;  %v13752_v28 = vsub.s32 %v1106_v26, %v13735_v38 }
 0x259   : > { %1651 = vmatpush2.bf16.msra.mxu1 %v11621_v32  ;;  %v1059_v32 = vld [vmem:[#allocation10] sm:$0x3] }
 0x25a   : > { %1652 = vmatprep.subr.bf16.mxu1 %v11629_v34 }
 0x25d   : > { %1653 = vmatpush2.bf16.msra.mxu1 %v11627_v36 }
 0x2e0   : > { %v1052_v44 = vpop.f32.mrf.mxu1 }
 0x2e1   : > { %v13745_v45 = vadd.f32 %v1052_v44, %v931_v42  ;;  %v1060_v44 = vld [vmem:[#allocation11] sm:$0x3] }
 0x2e2   : > { %v1054_v46 = vpop.f32.mrf.mxu1 }
 0x2e3   : > { %v1061_v47 = vrot.slane %v13745_v45, 4  ;;  %v1075_v48 = vmul.f32 %v13745_v45, %v13745_v45  ;;  %v1055_v49 = vadd.f32 %v1054_v46, %v935_v43 }
 0x2e4   : > { %v1056_v50 = vpop.f32.mrf.mxu1 }
 0x2e5   : > { %v1062_v51 = vadd.f32 %v1061_v47, %v13745_v45  ;;  %v1077_v52 = vrot.slane %v1075_v48, 4  ;;  %v1067_v53 = vrot.slane %v1055_v49, 4  ;;  %v1076_v54 = vmul.f32 %v1055_v49, %v1055_v49 }
 0x2e6   : > { %v1057_v55 = vpop.f32.mrf.mxu1 }
 0x2e7   : > { %v1063_v56 = vrot.slane %v1062_v51, 2  ;;  %v1078_v57 = vadd.f32 %v1077_v52, %v1075_v48  ;;  %v1068_v58 = vadd.f32 %v1067_v53, %v1055_v49  ;;  %v1083_v59 = vrot.slane %v1076_v54, 4 }
 0x2e9   : > { %v1064_v60 = vadd.f32 %v1063_v56, %v1062_v51  ;;  %v1079_v61 = vrot.slane %v1078_v57, 2  ;;  %v1069_v62 = vrot.slane %v1068_v58, 2  ;;  %v1084_v63 = vadd.f32 %v1083_v59, %v1076_v54 }
 0x2eb   : > { %v1065_v0 = vrot.slane %v1064_v60, 1  ;;  %v1080_v1 = vadd.f32 %v1079_v61, %v1078_v57  ;;  %v1070_v2 = vadd.f32 %v1069_v62, %v1068_v58  ;;  %v1085_v3 = vrot.slane %v1084_v63, 2  ;;  %v1935_v61 = vld [vmem:[#allocation19 + $0x1e0] sm:$0xff] }
 0x2ec   : > { %v2059_v62 = vld [vmem:[#allocation19 + $0x5c0] sm:$0xff] }
 0x2ed   : > { %v1066_v4 = vadd.f32 %v1065_v0, %v1064_v60  ;;  %v1081_v5 = vrot.slane %v1080_v1, 1  ;;  %v1071_v6 = vrot.slane %v1070_v2, 1  ;;  %v1086_v7 = vadd.f32 %v1085_v3, %v1084_v63  ;;  %v2063_v63 = vld [vmem:[#allocation19 + $0x5e0] sm:$0xff] }
 0x2ee   : > { %v1923_v3 = vld [vmem:[#allocation19 + $0x180] sm:$0xff] }
 0x2ef   : > { %v1073_v8 = vmul.f32 0.125, %v1066_v4  ;;  %v1082_v9 = vadd.f32 %v1081_v5, %v1080_v1  ;;  %v1072_v10 = vadd.f32 %v1071_v6, %v1070_v2  ;;  %v1087_v11 = vrot.slane %v1086_v7, 1  ;;  %v1927_v4 = vld [vmem:[#allocation19 + $0x1a0] sm:$0xff] }
 0x2f0   : > { %v10425_v1 = vcombine.low %v2059_v62, %v2063_v63  ;;  %v10426_v2 = vcombine.high %v2059_v62, %v2063_v63  ;;  %v2051_v5 = vld [vmem:[#allocation19 + $0x580] sm:$0xff]  ;;  %v10290_v6 = vcombine.high %v1923_v3, %v1927_v4 }
 0x2f1   : > { %v1089_v12 = vmul.f32 0.125, %v1082_v9  ;;  %v1091_v13 = vmul.f32 %v1073_v8, %v1073_v8  ;;  %v1074_v14 = vmul.f32 0.125, %v1072_v10  ;;  %v1088_v15 = vadd.f32 %v1087_v11, %v1086_v7  ;;  %v2055_v7 = vld [vmem:[#allocation19 + $0x5a0] sm:$0xff] }
 0x2f2   : > { %3494 = vmatprep.subr.bf16.mxu1 %v10426_v2  ;;  %v10417_v9 = vcombine.low %v2051_v5, %v2055_v7  ;;  %v10418_v10 = vcombine.high %v2051_v5, %v2055_v7  ;;  %v1915_v11 = vld [vmem:[#allocation19 + $0x140] sm:$0xff] }
 0x2f3   : > { %v1093_v16 = vsub.f32 %v1089_v12, %v1091_v13  ;;  %v1090_v17 = vmul.f32 0.125, %v1088_v15  ;;  %v1092_v18 = vmul.f32 %v1074_v14, %v1074_v14  ;;  %v1919_v12 = vld [vmem:[#allocation19 + $0x160] sm:$0xff] }
 0x2f4   : > { %v2043_v13 = vld [vmem:[#allocation19 + $0x540] sm:$0xff] }
 0x2f5   : > { %v1095_v19 = vmax.f32 %v1093_v16, 0.0  ;;  %v1094_v20 = vsub.f32 %v1090_v17, %v1092_v18  ;;  %v2047_v15 = vld [vmem:[#allocation19 + $0x560] sm:$0xff]  ;;  %v10281_v16 = vcombine.low %v1915_v11, %v1919_v12 }
 0x2f6   : > { %v10409_v17 = vcombine.low %v2043_v13, %v2047_v15  ;;  %v10410_v18 = vcombine.high %v2043_v13, %v2047_v15  ;;  %v1995_v63 = vld [vmem:[#allocation19 + $0x3c0] sm:$0xff] }
 0x2f7   : > { %v1097_v21 = vadd.f32 1e-05, %v1095_v19  ;;  %v1096_v22 = vmax.f32 %v1094_v20, 0.0  ;;  %v1907_v19 = vld [vmem:[#allocation19 + $0x100] sm:$0xff] }
 0x2f8   : > { %v1911_v20 = vld [vmem:[#allocation19 + $0x120] sm:$0xff] }
 0x2f9   : > { %v1098_v23 = vadd.f32 1e-05, %v1096_v22  ;;  %11630 = vrsqrt.f32 %v1097_v21  ;;  %v2035_v21 = vld [vmem:[#allocation19 + $0x500] sm:$0xff]  ;;  %v10274_v22 = vcombine.high %v1907_v19, %v1911_v20  ;;  %v10273_v24 = vcombine.low %v1907_v19, %v1911_v20 }
 0x2fa   : > { %v1987_v7 = vld [vmem:[#allocation19 + $0x380] sm:$0xff] }
 0x2fb   : > { %11632 = vrsqrt.f32 %v1098_v23  ;;  %v2039_v23 = vld [vmem:[#allocation19 + $0x520] sm:$0xff] }
 0x2fc   : > { %v10401_v25 = vcombine.low %v2035_v21, %v2039_v23  ;;  %v10402_v26 = vcombine.high %v2035_v21, %v2039_v23  ;;  %v1979_v15 = vld [vmem:[#allocation19 + $0x340] sm:$0xff] }
 0x2fd   : > { %v2111_v19 = vld [vmem:[#allocation19 + $0x760] sm:$0xff] }
 0x2fe   : > { %v1971_v23 = vld [vmem:[#allocation19 + $0x300] sm:$0xff] }
 0x306   : > { %v11631_v27 = vpop.eup %11630 }
 0x308   : > { %v11633_v29 = vpop.eup %11632 }
 0x309   : > { %v1103_v30 = vcombine.low %v11631_v27, %v11633_v29  ;;  %v1899_v27 = vld [vmem:[#allocation19 + $0xc0] sm:$0xff] }
 0x30a   : > { %v1903_v29 = vld [vmem:[#allocation19 + $0xe0] sm:$0xff] }
 0x30b   : > { %v1110_v31 = vrot.slane %v1103_v30, %v13752_v28  ;;  %v2027_v30 = vld [vmem:[#allocation19 + $0x4c0] sm:$0xff] }
 0x30d   : > { %v1117_v33 = vrot.slane %v1110_v31, %v13752_v28  ;;  %v10266_v31 = vcombine.high %v1899_v27, %v1903_v29 }
 0x30f   : > { %v1119_v34 = vmul.f32 %v1117_v33, %v1059_v32  ;;  %v2031_v32 = vld [vmem:[#allocation19 + $0x4e0] sm:$0xff]  ;;  %v10265_v33 = vcombine.low %v1899_v27, %v1903_v29 }
 0x310   : > { %v2103_v27 = vld [vmem:[#allocation19 + $0x720] sm:$0xff] }
 0x311   : > { %v1124_v35 = vrot.slane %v1119_v34, %v13738_v39  ;;  %v1128_v36 = vrot.slane %v1119_v34, %v13741_v41  ;;  %v10393_v34 = vcombine.low %v2027_v30, %v2031_v32 }
 0x313   : > { %v1131_v37 = vmul.f32 %v1124_v35, %v1073_v8  ;;  %v1132_v40 = vmul.f32 %v1128_v36, %v1074_v14  ;;  %v1153_v48 = vmul.f32 %v1128_v36, %v1055_v49  ;;  %v1152_v51 = vmul.f32 %v1124_v35, %v13745_v45  ;;  %v1931_v49 = vld [vmem:[#allocation19 + $0x1c0] sm:$0xff] }
 0x314   : > { %v10298_v45 = vcombine.high %v1931_v49, %v1935_v61  ;;  %v10297_v0 = vcombine.low %v1931_v49, %v1935_v61  ;;  %v10289_v8 = vcombine.low %v1923_v3, %v1927_v4  ;;  %v10282_v14 = vcombine.high %v1915_v11, %v1919_v12  ;;  %v1891_v36 = vld [vmem:[#allocation19 + $0x80] sm:$0xff] }
 0x315   : > { %v1135_v42 = vcombine.low %v1131_v37, %v1132_v40  ;;  %v10394_v35 = vcombine.high %v2027_v30, %v2031_v32  ;;  %v1895_v37 = vld [vmem:[#allocation19 + $0xa0] sm:$0xff] }
 0x316   : > { %3453 = vmatprep.subr.bf16.mxu0 %v10298_v45  ;;  %v2019_v40 = vld [vmem:[#allocation19 + $0x480] sm:$0xff] }
 0x317   : > { %v1142_v43 = vrot.slane %v1135_v42, %v13752_v28  ;;  %v10258_v42 = vcombine.high %v1891_v36, %v1895_v37  ;;  %v2007_v49 = vld [vmem:[#allocation19 + $0x420] sm:$0xff] }
 0x318   : > { %v2127_v3 = vld [vmem:[#allocation19 + $0x7e0] sm:$0xff] }
 0x319   : > { %v1149_v46 = vrot.slane %v1142_v43, %v13752_v28  ;;  %v2023_v43 = vld [vmem:[#allocation19 + $0x4a0] sm:$0xff] }
 0x31a   : > { %v2119_v11 = vld [vmem:[#allocation19 + $0x7a0] sm:$0xff] }
 0x31b   : > { %v1151_v47 = vsub.f32 %v1060_v44, %v1149_v46  ;;  %v10257_v44 = vcombine.low %v1891_v36, %v1895_v37  ;;  %v10385_v46 = vcombine.low %v2019_v40, %v2023_v43  ;;  %v1963_v32 = vld [vmem:[#allocation19 + $0x2c0] sm:$0xff] }
 0x31c   : > { %v2095_v36 = vld [vmem:[#allocation19 + $0x6e0] sm:$0xff] }
 0x31d   : > { %v1162_v50 = vrot.slane %v1151_v47, %v13741_v41  ;;  %v1158_v52 = vrot.slane %v1151_v47, %v13738_v39  ;;  %v10386_v47 = vcombine.high %v2019_v40, %v2023_v43  ;;  %v1955_v43 = vld [vmem:[#allocation19 + $0x280] sm:$0xff] }
 0x31f   : > { %v1166_v53 = vadd.f32 %v1162_v50, %v1153_v48  ;;  %v1165_v54 = vadd.f32 %v1158_v52, %v1152_v51  ;;  %v1883_v48 = vld [vmem:[#allocation19 + $0x40] sm:$0xff] }
 0x320   : > { %v1887_v50 = vld [vmem:[#allocation19 + $0x60] sm:$0xff] }
 0x321   : > { %vm1168_vm2 = vcmp.gt.f32.partialorder %v1166_v53, 0.0  ;;  %v1170_v55 = vmul.f32 0.2, %v1166_v53  ;;  %vm1167_vm3 = vcmp.gt.f32.partialorder %v1165_v54, 0.0  ;;  %v1169_v56 = vmul.f32 0.2, %v1165_v54 }
 0x322   : > { %v2011_v51 = vld [vmem:[#allocation19 + $0x440] sm:$0xff]  ;;  %v10250_v52 = vcombine.high %v1883_v48, %v1887_v50 }
 0x323   : > { %v1172_v57 = vsel %vm1168_vm2, %v1166_v53, %v1170_v55  ;;  %v1171_v58 = vsel %vm1167_vm3, %v1165_v54, %v1169_v56  ;;  %v2015_v53 = vld [vmem:[#allocation19 + $0x460] sm:$0xff]  ;;  %v10249_v54 = vcombine.low %v1883_v48, %v1887_v50 }
 0x324   : > { %v1174_v59 = vpack.c.bf16 %v1172_v57, %v1172_v57  ;;  %v1173_v60 = vpack.c.bf16 %v1171_v58, %v1171_v58  ;;  %v10377_v55 = vcombine.low %v2011_v51, %v2015_v53  ;;  %v10378_v56 = vcombine.high %v2011_v51, %v2015_v53  ;;  %v1875_v57 = vld [vmem:[#allocation19] sm:$0xff] }
 0x325   : > { %v1879_v58 = vld [vmem:[#allocation19 + $0x20] sm:$0xff] }
 0x326   : > { %1613 = vmatprep.mubr.bf16.mxu0 %v1174_v59  ;;  %1654 = vmatprep.mubr.bf16.mxu1 %v1174_v59  ;;  %v2003_v59 = vld [vmem:[#allocation19 + $0x400] sm:$0xff]  ;;  %v10241_v61 = vcombine.low %v1875_v57, %v1879_v58 }
 0x327   : > { %1614 = vmatmul.mubr.bf16.vlgmr.msra.gmra.mxu0 %v1173_v60  ;;  %1655 = vmatmul.mubr.bf16.vlgmr.msra.gmra.mxu1 %v1173_v60  ;;  %v10242_v60 = vcombine.high %v1875_v57, %v1879_v58  ;;  %v10369_v62 = vcombine.low %v2003_v59, %v2007_v49  ;;  %v10370_v45 = vcombine.high %v2003_v59, %v2007_v49  ;;  %v2087_v48 = vld [vmem:[#allocation19 + $0x6a0] sm:$0xff] }
 0x328   : > { %3454 = vmatpush1.bf16.msra.mxu0 %v10297_v0  ;;  %3495 = vmatpush1.bf16.msra.mxu1 %v10425_v1  ;;  %v1999_v0 = vld [vmem:[#allocation19 + $0x3e0] sm:$0xff] }
 0x329   : > { %3455 = vmatprep.subr.bf16.mxu0 %v10290_v6  ;;  %3496 = vmatprep.subr.bf16.mxu1 %v10418_v10  ;;  %v2123_v1 = vld [vmem:[#allocation19 + $0x7c0] sm:$0xff]  ;;  %v10362_v2 = vcombine.high %v1995_v63, %v1999_v0  ;;  %v10361_v4 = vcombine.low %v1995_v63, %v1999_v0 }
 0x32a   : > { %v10489_v5 = vcombine.low %v2123_v1, %v2127_v3  ;;  %v10490_v6 = vcombine.high %v2123_v1, %v2127_v3  ;;  %v1947_v53 = vld [vmem:[#allocation19 + $0x240] sm:$0xff]  ;;  %v13763_v3 = vld [vmem:[#allocation19 + $0x1c8] sm:$0xff] }
 0x32b   : > { %v2079_v57 = vld [vmem:[#allocation19 + $0x660] sm:$0xff] }
 0x32c   : > { %3456 = vmatpush1.bf16.msra.mxu0 %v10289_v8  ;;  %3497 = vmatpush1.bf16.msra.mxu1 %v10417_v9  ;;  %v1991_v8 = vld [vmem:[#allocation19 + $0x3a0] sm:$0xff] }
 0x32d   : > { %3457 = vmatprep.subr.bf16.mxu0 %v10282_v14  ;;  %3498 = vmatprep.subr.bf16.mxu1 %v10410_v18  ;;  %v2115_v9 = vld [vmem:[#allocation19 + $0x780] sm:$0xff]  ;;  %v10354_v10 = vcombine.high %v1987_v7, %v1991_v8  ;;  %v10353_v12 = vcombine.low %v1987_v7, %v1991_v8  ;;  %v13771_v7 = vld [vmem:[#allocation19 + $0x5e8] sm:$0xff] }
 0x32e   : > { %v10481_v13 = vcombine.low %v2115_v9, %v2119_v11  ;;  %v10482_v14 = vcombine.high %v2115_v9, %v2119_v11  ;;  %v1939_v49 = vld [vmem:[#allocation19 + $0x200] sm:$0xff]  ;;  %v13780_v11 = vsub.s32 2, %v13735_v38 }
 0x32f   : > { %v2071_v0 = vld [vmem:[#allocation19 + $0x620] sm:$0xff] }
 0x330   : > { %3458 = vmatpush1.bf16.msra.mxu0 %v10281_v16  ;;  %3499 = vmatpush1.bf16.msra.mxu1 %v10409_v17  ;;  %v1983_v16 = vld [vmem:[#allocation19 + $0x360] sm:$0xff] }
 0x331   : > { %3459 = vmatprep.subr.bf16.mxu0 %v10274_v22  ;;  %3500 = vmatprep.subr.bf16.mxu1 %v10402_v26  ;;  %v2107_v17 = vld [vmem:[#allocation19 + $0x740] sm:$0xff]  ;;  %v10346_v18 = vcombine.high %v1979_v15, %v1983_v16  ;;  %v10345_v20 = vcombine.low %v1979_v15, %v1983_v16 }
 0x332   : > { %v10473_v21 = vcombine.low %v2107_v17, %v2111_v19  ;;  %v10474_v22 = vcombine.high %v2107_v17, %v2111_v19 }
 0x334   : > { %3460 = vmatpush1.bf16.msra.mxu0 %v10273_v24  ;;  %3501 = vmatpush1.bf16.msra.mxu1 %v10401_v25  ;;  %v1975_v24 = vld [vmem:[#allocation19 + $0x320] sm:$0xff] }
 0x335   : > { %3461 = vmatprep.subr.bf16.mxu0 %v10266_v31  ;;  %3502 = vmatprep.subr.bf16.mxu1 %v10394_v35  ;;  %v2099_v25 = vld [vmem:[#allocation19 + $0x700] sm:$0xff]  ;;  %v10338_v26 = vcombine.high %v1971_v23, %v1975_v24  ;;  %v10337_v29 = vcombine.low %v1971_v23, %v1975_v24 }
 0x336   : > { %v10465_v30 = vcombine.low %v2099_v25, %v2103_v27  ;;  %v10466_v31 = vcombine.high %v2099_v25, %v2103_v27 }
 0x338   : > { %3462 = vmatpush1.bf16.msra.mxu0 %v10265_v33  ;;  %3503 = vmatpush1.bf16.msra.mxu1 %v10393_v34  ;;  %v1967_v33 = vld [vmem:[#allocation19 + $0x2e0] sm:$0xff] }
 0x339   : > { %3463 = vmatprep.subr.bf16.mxu0 %v10258_v42  ;;  %3504 = vmatprep.subr.bf16.mxu1 %v10386_v47  ;;  %v2091_v34 = vld [vmem:[#allocation19 + $0x6c0] sm:$0xff]  ;;  %v10330_v35 = vcombine.high %v1963_v32, %v1967_v33  ;;  %v10329_v37 = vcombine.low %v1963_v32, %v1967_v33 }
 0x33a   : > { %v10457_v40 = vcombine.low %v2091_v34, %v2095_v36  ;;  %v10458_v42 = vcombine.high %v2091_v34, %v2095_v36 }
 0x33c   : > { %3464 = vmatpush1.bf16.msra.mxu0 %v10257_v44  ;;  %3505 = vmatpush1.bf16.msra.mxu1 %v10385_v46  ;;  %v1959_v44 = vld [vmem:[#allocation19 + $0x2a0] sm:$0xff] }
 0x33d   : > { %3465 = vmatprep.subr.bf16.mxu0 %v10250_v52  ;;  %3506 = vmatprep.subr.bf16.mxu1 %v10378_v56  ;;  %v2083_v46 = vld [vmem:[#allocation19 + $0x680] sm:$0xff]  ;;  %v10322_v47 = vcombine.high %v1955_v43, %v1959_v44  ;;  %v10321_v50 = vcombine.low %v1955_v43, %v1959_v44 }
 0x33e   : > { %v10449_v51 = vcombine.low %v2083_v46, %v2087_v48  ;;  %v10450_v52 = vcombine.high %v2083_v46, %v2087_v48 }
 0x340   : > { %3466 = vmatpush1.bf16.msra.mxu0 %v10249_v54  ;;  %3507 = vmatpush1.bf16.msra.mxu1 %v10377_v55  ;;  %v1951_v54 = vld [vmem:[#allocation19 + $0x260] sm:$0xff] }
 0x341   : > { %3467 = vmatprep.subr.bf16.mxu0 %v10242_v60  ;;  %3508 = vmatprep.subr.bf16.mxu1 %v10370_v45  ;;  %v2075_v55 = vld [vmem:[#allocation19 + $0x640] sm:$0xff]  ;;  %v10314_v56 = vcombine.high %v1947_v53, %v1951_v54  ;;  %v10313_v58 = vcombine.low %v1947_v53, %v1951_v54 }
 0x342   : > { %v10441_v59 = vcombine.low %v2075_v55, %v2079_v57  ;;  %v10442_v60 = vcombine.high %v2075_v55, %v2079_v57 }
 0x344   : > { %3468 = vmatpush1.bf16.msra.mxu0 %v10241_v61  ;;  %3509 = vmatpush1.bf16.msra.mxu1 %v10369_v62  ;;  %v1943_v61 = vld [vmem:[#allocation19 + $0x220] sm:$0xff] }
 0x345   : > { %3469 = vmatprep.subr.bf16.mxu0 %v10362_v2  ;;  %3510 = vmatprep.subr.bf16.mxu1 %v10490_v6  ;;  %v2067_v62 = vld [vmem:[#allocation19 + $0x600] sm:$0xff]  ;;  %v10305_v45 = vcombine.low %v1939_v49, %v1943_v61  ;;  %v10306_v63 = vcombine.high %v1939_v49, %v1943_v61 }
 0x346   : > { %v10433_v1 = vcombine.low %v2067_v62, %v2071_v0  ;;  %v10434_v2 = vcombine.high %v2067_v62, %v2071_v0 }
 0x348   : > { %3470 = vmatpush2.bf16.msra.mxu0 %v10361_v4  ;;  %3511 = vmatpush2.bf16.msra.mxu1 %v10489_v5  ;;  %v13765_v4 = vld [vmem:[#allocation19 + $0x1e8] sm:$0xff] }
 0x349   : > { %3471 = vmatprep.subr.bf16.mxu0 %v10354_v10  ;;  %3512 = vmatprep.subr.bf16.mxu1 %v10482_v14  ;;  %v13767_v5 = vld [vmem:[#allocation19 + $0x5c8] sm:$0xff]  ;;  %v10300_v6 = vcombine.high %v13763_v3, %v13765_v4  ;;  %v10299_v8 = vcombine.low %v13763_v3, %v13765_v4 }
 0x34a   : > { %v10427_v9 = vcombine.low %v13767_v5, %v13771_v7  ;;  %v10428_v10 = vcombine.high %v13767_v5, %v13771_v7 }
 0x34c   : > { %3472 = vmatpush2.bf16.msra.mxu0 %v10353_v12  ;;  %3513 = vmatpush2.bf16.msra.mxu1 %v10481_v13  ;;  %v1239_v12 = vld [vmem:[#allocation14] sm:$0xf]  ;;  %v13783_v13 = vsub.s32 3, %v13735_v38 }
 0x34d   : > { %3473 = vmatprep.subr.bf16.mxu0 %v10346_v18  ;;  %3514 = vmatprep.subr.bf16.mxu1 %v10474_v22  ;;  %v1244_v14 = vrot.slane %v1239_v12, %v13738_v39  ;;  %v1252_v15 = vrot.slane %v1239_v12, %v13780_v11  ;;  %v1248_v18 = vrot.slane %v1239_v12, %v13741_v41 }
 0x34e   : > { %v1256_v19 = vrot.slane %v1239_v12, %v13783_v13 }
 0x350   : > { %3474 = vmatpush2.bf16.msra.mxu0 %v10345_v20  ;;  %3515 = vmatpush2.bf16.msra.mxu1 %v10473_v21 }
 0x351   : > { %3475 = vmatprep.subr.bf16.mxu0 %v10338_v26  ;;  %3516 = vmatprep.subr.bf16.mxu1 %v10466_v31 }
 0x354   : > { %3476 = vmatpush2.bf16.msra.mxu0 %v10337_v29  ;;  %3517 = vmatpush2.bf16.msra.mxu1 %v10465_v30 }
 0x355   : > { %3477 = vmatprep.subr.bf16.mxu0 %v10330_v35  ;;  %3518 = vmatprep.subr.bf16.mxu1 %v10458_v42 }
 0x358   : > { %3478 = vmatpush2.bf16.msra.mxu0 %v10329_v37  ;;  %3519 = vmatpush2.bf16.msra.mxu1 %v10457_v40 }
 0x359   : > { %3479 = vmatprep.subr.bf16.mxu0 %v10322_v47  ;;  %3520 = vmatprep.subr.bf16.mxu1 %v10450_v52 }
 0x35c   : > { %3480 = vmatpush2.bf16.msra.mxu0 %v10321_v50  ;;  %3521 = vmatpush2.bf16.msra.mxu1 %v10449_v51 }
 0x35d   : > { %3481 = vmatprep.subr.bf16.mxu0 %v10314_v56  ;;  %3522 = vmatprep.subr.bf16.mxu1 %v10442_v60 }
 0x360   : > { %3482 = vmatpush2.bf16.msra.mxu0 %v10313_v58  ;;  %3523 = vmatpush2.bf16.msra.mxu1 %v10441_v59 }
 0x361   : > { %3483 = vmatprep.subr.bf16.mxu0 %v10306_v63  ;;  %3524 = vmatprep.subr.bf16.mxu1 %v10434_v2 }
 0x364   : > { %3484 = vmatpush2.bf16.msra.mxu0 %v10305_v45  ;;  %3525 = vmatpush2.bf16.msra.mxu1 %v10433_v1 }
 0x365   : > { %3535 = vmatprep.subr.bf16.mxu0 %v10300_v6  ;;  %3576 = vmatprep.subr.bf16.mxu1 %v10428_v10 }
 0x3e7   : > { %v1615_v16 = vpop.f32.mrf.mxu0  ;;  %v1656_v17 = vpop.f32.mrf.mxu1 }
 0x3e8   : > { %v13789_v20 = vadd.f32 %v1615_v16, %v1244_v14  ;;  %v13791_v21 = vadd.f32 %v1656_v17, %v1252_v15 }
 0x3e9   : > { %v1617_v22 = vpop.f32.mrf.mxu0  ;;  %v1658_v23 = vpop.f32.mrf.mxu1 }
 0x3ea   : > { %v1665_v24 = vrot.slane %v13789_v20, 4  ;;  %v1693_v25 = vmul.f32 %v13789_v20, %v13789_v20  ;;  %v1677_v26 = vrot.slane %v13791_v21, 4  ;;  %v1695_v27 = vmul.f32 %v13791_v21, %v13791_v21 }
 0x3eb   : > { %v13799_v29 = vadd.f32 %v1617_v22, %v1248_v18  ;;  %v13801_v30 = vadd.f32 %v1658_v23, %v1256_v19  ;;  %v1619_v31 = vpop.f32.mrf.mxu0  ;;  %v1660_v32 = vpop.f32.mrf.mxu1 }
 0x3ec   : > { %v1666_v33 = vadd.f32 %v1665_v24, %v13789_v20  ;;  %v1697_v34 = vrot.slane %v1693_v25, 4  ;;  %v1678_v35 = vadd.f32 %v1677_v26, %v13791_v21  ;;  %v1709_v36 = vrot.slane %v1695_v27, 4 }
 0x3ed   : > { %v1671_v37 = vrot.slane %v13799_v29, 4  ;;  %v1694_v40 = vmul.f32 %v13799_v29, %v13799_v29  ;;  %v1683_v42 = vrot.slane %v13801_v30, 4  ;;  %v1696_v43 = vmul.f32 %v13801_v30, %v13801_v30  ;;  %v1620_v44 = vpop.f32.mrf.mxu0  ;;  %v1661_v46 = vpop.f32.mrf.mxu1 }
 0x3ee   : > { %v1667_v47 = vrot.slane %v1666_v33, 2  ;;  %v1698_v48 = vadd.f32 %v1697_v34, %v1693_v25  ;;  %v1679_v50 = vrot.slane %v1678_v35, 2  ;;  %v1710_v51 = vadd.f32 %v1709_v36, %v1695_v27 }
 0x3ef   : > { %v1672_v52 = vadd.f32 %v1671_v37, %v13799_v29  ;;  %v1703_v53 = vrot.slane %v1694_v40, 4  ;;  %v1684_v54 = vadd.f32 %v1683_v42, %v13801_v30  ;;  %v1715_v55 = vrot.slane %v1696_v43, 4 }
 0x3f0   : > { %v1668_v56 = vadd.f32 %v1667_v47, %v1666_v33  ;;  %v1699_v57 = vrot.slane %v1698_v48, 2  ;;  %v1680_v58 = vadd.f32 %v1679_v50, %v1678_v35  ;;  %v1711_v59 = vrot.slane %v1710_v51, 2 }
 0x3f1   : > { %v1673_v60 = vrot.slane %v1672_v52, 2  ;;  %v1704_v49 = vadd.f32 %v1703_v53, %v1694_v40  ;;  %v1685_v61 = vrot.slane %v1684_v54, 2  ;;  %v1716_v62 = vadd.f32 %v1715_v55, %v1696_v43 }
 0x3f2   : > { %v1669_v45 = vrot.slane %v1668_v56, 1  ;;  %v1700_v63 = vadd.f32 %v1699_v57, %v1698_v48  ;;  %v1681_v0 = vrot.slane %v1680_v58, 1  ;;  %v1712_v1 = vadd.f32 %v1711_v59, %v1710_v51 }
 0x3f3   : > { %v1674_v2 = vadd.f32 %v1673_v60, %v1672_v52  ;;  %v1705_v6 = vrot.slane %v1704_v49, 2  ;;  %v1686_v10 = vadd.f32 %v1685_v61, %v1684_v54  ;;  %v1717_v12 = vrot.slane %v1716_v62, 2 }
 0x3f4   : > { %v1670_v14 = vadd.f32 %v1669_v45, %v1668_v56  ;;  %v1701_v15 = vrot.slane %v1700_v63, 1  ;;  %v1682_v16 = vadd.f32 %v1681_v0, %v1680_v58  ;;  %v1713_v17 = vrot.slane %v1712_v1, 1 }
 0x3f5   : > { %v1675_v18 = vrot.slane %v1674_v2, 1  ;;  %v1706_v19 = vadd.f32 %v1705_v6, %v1704_v49  ;;  %v1687_v22 = vrot.slane %v1686_v10, 1  ;;  %v1718_v23 = vadd.f32 %v1717_v12, %v1716_v62 }
 0x3f6   : > { %v1689_v24 = vmul.f32 0.125, %v1670_v14  ;;  %v1702_v25 = vadd.f32 %v1701_v15, %v1700_v63  ;;  %v1691_v26 = vmul.f32 0.125, %v1682_v16  ;;  %v1714_v27 = vadd.f32 %v1713_v17, %v1712_v1  ;;  %v1663_v15 = vld [vmem:[#allocation16] sm:$0xf] }
 0x3f7   : > { %v1676_v31 = vadd.f32 %v1675_v18, %v1674_v2  ;;  %v1707_v32 = vrot.slane %v1706_v19, 1  ;;  %v1688_v33 = vadd.f32 %v1687_v22, %v1686_v10  ;;  %v1719_v34 = vrot.slane %v1718_v23, 1 }
 0x3f8   : > { %v1721_v35 = vmul.f32 0.125, %v1702_v25  ;;  %v1725_v36 = vmul.f32 %v1689_v24, %v1689_v24  ;;  %v1723_v37 = vmul.f32 0.125, %v1714_v27  ;;  %v1727_v40 = vmul.f32 %v1691_v26, %v1691_v26 }
 0x3f9   : > { %v1690_v42 = vmul.f32 0.125, %v1676_v31  ;;  %v1708_v43 = vadd.f32 %v1707_v32, %v1706_v19  ;;  %v1692_v44 = vmul.f32 0.125, %v1688_v33  ;;  %v1720_v46 = vadd.f32 %v1719_v34, %v1718_v23 }
 0x3fa   : > { %v1729_v47 = vsub.f32 %v1721_v35, %v1725_v36  ;;  %v1731_v48 = vsub.f32 %v1723_v37, %v1727_v40  ;;  %v1664_v40 = vld [vmem:[#allocation17] sm:$0xf] }
 0x3fb   : > { %v1722_v50 = vmul.f32 0.125, %v1708_v43  ;;  %v1726_v51 = vmul.f32 %v1690_v42, %v1690_v42  ;;  %v1724_v52 = vmul.f32 0.125, %v1720_v46  ;;  %v1728_v53 = vmul.f32 %v1692_v44, %v1692_v44 }
 0x3fc   : > { %v1733_v54 = vmax.f32 %v1729_v47, 0.0  ;;  %v1735_v55 = vmax.f32 %v1731_v48, 0.0 }
 0x3fd   : > { %v1730_v56 = vsub.f32 %v1722_v50, %v1726_v51  ;;  %v1732_v57 = vsub.f32 %v1724_v52, %v1728_v53 }
 0x3fe   : > { %v1737_v58 = vadd.f32 1e-05, %v1733_v54  ;;  %v1739_v59 = vadd.f32 1e-05, %v1735_v55 }
 0x3ff   : > { %v1734_v60 = vmax.f32 %v1730_v56, 0.0  ;;  %v1736_v49 = vmax.f32 %v1732_v57, 0.0  ;;  %v1924_v56 = vld [vmem:[#allocation19 + $0x188] sm:$0xff] }
 0x400   : > { %11634 = vrsqrt.f32 %v1737_v58 }
 0x401   : > { %v1738_v61 = vadd.f32 1e-05, %v1734_v60  ;;  %v1740_v62 = vadd.f32 1e-05, %v1736_v49  ;;  %11636 = vrsqrt.f32 %v1739_v59  ;;  %v1928_v59 = vld [vmem:[#allocation19 + $0x1a8] sm:$0xff] }
 0x402   : > { %v2052_v60 = vld [vmem:[#allocation19 + $0x588] sm:$0xff] }
 0x403   : > { %11638 = vrsqrt.f32 %v1738_v61  ;;  %v2056_v49 = vld [vmem:[#allocation19 + $0x5a8] sm:$0xff] }
 0x404   : > { %11640 = vrsqrt.f32 %v1740_v62 }
 0x40d   : > { %v11635_v45 = vpop.eup %11634 }
 0x40e   : > { %v11637_v63 = vpop.eup %11636 }
 0x410   : > { %v11639_v0 = vpop.eup %11638 }
 0x411   : > { %v11641_v1 = vpop.eup %11640  ;;  %v1749_v2 = vcombine.low %v11635_v45, %v11639_v0 }
 0x412   : > { %v1750_v6 = vcombine.low %v11637_v63, %v11641_v1 }
 0x413   : > { %v1757_v10 = vrot.slane %v1749_v2, %v13752_v28  ;;  %v1916_v2 = vld [vmem:[#allocation19 + $0x148] sm:$0xff] }
 0x414   : > { %v1764_v12 = vrot.slane %v1750_v6, %v13752_v28  ;;  %v10292_v6 = vcombine.high %v1924_v56, %v1928_v59 }
 0x416   : > { %v1765_v14 = vcombine.low %v1757_v10, %v1764_v12  ;;  %v10420_v10 = vcombine.high %v2052_v60, %v2056_v49  ;;  %v1920_v12 = vld [vmem:[#allocation19 + $0x168] sm:$0xff] }
 0x417   : > { %v10283_v3 = vcombine.low %v1916_v2, %v1920_v12 }
 0x418   : > { %v1772_v16 = vrot.slane %v1765_v14, %v13752_v28  ;;  %v2044_v14 = vld [vmem:[#allocation19 + $0x548] sm:$0xff] }
 0x41a   : > { %v1774_v17 = vmul.f32 %v1772_v16, %v1663_v15  ;;  %v2048_v15 = vld [vmem:[#allocation19 + $0x568] sm:$0xff]  ;;  %v10291_v16 = vcombine.low %v1924_v56, %v1928_v59 }
 0x41b   : > { %v10411_v4 = vcombine.low %v2044_v14, %v2048_v15  ;;  %v2004_v56 = vld [vmem:[#allocation19 + $0x408] sm:$0xff] }
 0x41c   : > { %v1779_v18 = vrot.slane %v1774_v17, %v13738_v39  ;;  %v1783_v19 = vrot.slane %v1774_v17, %v13741_v41  ;;  %v1787_v22 = vrot.slane %v1774_v17, %v13780_v11  ;;  %v1791_v23 = vrot.slane %v1774_v17, %v13783_v13 }
 0x41d   : > { %v10419_v17 = vcombine.low %v2052_v60, %v2056_v49  ;;  %v1996_v60 = vld [vmem:[#allocation19 + $0x3c8] sm:$0xff] }
 0x41e   : > { %v1796_v25 = vmul.f32 %v1779_v18, %v1689_v24  ;;  %v1797_v27 = vmul.f32 %v1783_v19, %v1690_v42  ;;  %v1798_v31 = vmul.f32 %v1787_v22, %v1691_v26  ;;  %v1799_v32 = vmul.f32 %v1791_v23, %v1692_v44  ;;  %v2000_v49 = vld [vmem:[#allocation19 + $0x3e8] sm:$0xff] }
 0x41f   : > { %v1833_v47 = vmul.f32 %v1791_v23, %v13801_v30  ;;  %v1831_v48 = vmul.f32 %v1783_v19, %v13799_v29  ;;  %v1830_v24 = vmul.f32 %v1779_v18, %v13789_v20  ;;  %v1832_v26 = vmul.f32 %v1787_v22, %v13791_v21  ;;  %v1908_v22 = vld [vmem:[#allocation19 + $0x108] sm:$0xff] }
 0x420   : > { %v1804_v33 = vcombine.low %v1796_v25, %v1797_v27  ;;  %v1805_v34 = vcombine.low %v1798_v31, %v1799_v32  ;;  %v10284_v18 = vcombine.high %v1916_v2, %v1920_v12  ;;  %v10412_v19 = vcombine.high %v2044_v14, %v2048_v15  ;;  %v1912_v23 = vld [vmem:[#allocation19 + $0x128] sm:$0xff] }
 0x421   : > { %v2036_v25 = vld [vmem:[#allocation19 + $0x508] sm:$0xff]  ;;  %v10276_v5 = vcombine.high %v1908_v22, %v1912_v23 }
 0x422   : > { %v1812_v35 = vrot.slane %v1804_v33, %v13752_v28  ;;  %v1819_v36 = vrot.slane %v1805_v34, %v13752_v28  ;;  %v2040_v27 = vld [vmem:[#allocation19 + $0x528] sm:$0xff]  ;;  %v10275_v33 = vcombine.low %v1908_v22, %v1912_v23 }
 0x423   : > { %v10404_v7 = vcombine.high %v2036_v25, %v2040_v27  ;;  %v2028_v31 = vld [vmem:[#allocation19 + $0x4c8] sm:$0xff]  ;;  %v10403_v34 = vcombine.low %v2036_v25, %v2040_v27 }
 0x424   : > { %v1820_v37 = vcombine.low %v1812_v35, %v1819_v36  ;;  %v2032_v32 = vld [vmem:[#allocation19 + $0x4e8] sm:$0xff] }
 0x425   : > { %v10396_v36 = vcombine.high %v2028_v31, %v2032_v32  ;;  %v1988_v14 = vld [vmem:[#allocation19 + $0x388] sm:$0xff] }
 0x426   : > { %v1827_v43 = vrot.slane %v1820_v37, %v13752_v28  ;;  %v1892_v37 = vld [vmem:[#allocation19 + $0x88] sm:$0xff] }
 0x427   : > { %v1992_v15 = vld [vmem:[#allocation19 + $0x3a8] sm:$0xff] }
 0x428   : > { %v1829_v46 = vsub.f32 %v1664_v40, %v1827_v43  ;;  %v1896_v40 = vld [vmem:[#allocation19 + $0xa8] sm:$0xff]  ;;  %v10356_v22 = vcombine.high %v1988_v14, %v1992_v15 }
 0x429   : > { %v2020_v43 = vld [vmem:[#allocation19 + $0x488] sm:$0xff] }
 0x42a   : > { %v1850_v42 = vrot.slane %v1829_v46, %v13783_v13  ;;  %v1842_v44 = vrot.slane %v1829_v46, %v13741_v41  ;;  %v1838_v50 = vrot.slane %v1829_v46, %v13738_v39  ;;  %v1846_v51 = vrot.slane %v1829_v46, %v13780_v11  ;;  %v2024_v46 = vld [vmem:[#allocation19 + $0x4a8] sm:$0xff] }
 0x42b   : > { %v1980_v25 = vld [vmem:[#allocation19 + $0x348] sm:$0xff] }
 0x42c   : > { %v1858_v52 = vadd.f32 %v1850_v42, %v1833_v47  ;;  %v1856_v53 = vadd.f32 %v1842_v44, %v1831_v48  ;;  %v1855_v54 = vadd.f32 %v1838_v50, %v1830_v24  ;;  %v1857_v55 = vadd.f32 %v1846_v51, %v1832_v26  ;;  %v1884_v42 = vld [vmem:[#allocation19 + $0x48] sm:$0xff] }
 0x42d   : > { %v10395_v48 = vcombine.low %v2028_v31, %v2032_v32  ;;  %v10260_v24 = vcombine.high %v1892_v37, %v1896_v40  ;;  %v10388_v26 = vcombine.high %v2020_v43, %v2024_v46  ;;  %v1888_v44 = vld [vmem:[#allocation19 + $0x68] sm:$0xff] }
 0x42e   : > { %vm1860_vm4 = vcmp.gt.f32.partialorder %v1856_v53, 0.0  ;;  %v1864_v30 = vmul.f32 0.2, %v1856_v53  ;;  %vm1862_vm5 = vcmp.gt.f32.partialorder %v1858_v52, 0.0  ;;  %v1866_v29 = vmul.f32 0.2, %v1858_v52 }
 0x42f   : > { %vm1859_vm6 = vcmp.gt.f32.partialorder %v1855_v54, 0.0  ;;  %v1863_v20 = vmul.f32 0.2, %v1855_v54  ;;  %vm1861_vm7 = vcmp.gt.f32.partialorder %v1857_v55, 0.0  ;;  %v1865_v21 = vmul.f32 0.2, %v1857_v55 }
 0x430   : > { %v1868_v57 = vsel %vm1860_vm4, %v1856_v53, %v1864_v30  ;;  %v1870_v58 = vsel %vm1862_vm5, %v1858_v52, %v1866_v29  ;;  %v2012_v50 = vld [vmem:[#allocation19 + $0x448] sm:$0xff]  ;;  %v10259_v52 = vcombine.low %v1892_v37, %v1896_v40  ;;  %v10387_v53 = vcombine.low %v2020_v43, %v2024_v46 }
 0x431   : > { %v13831_v61 = vpack.c.bf16 %v1868_v57, %v1868_v57  ;;  %v13833_v62 = vpack.c.bf16 %v1870_v58, %v1870_v58  ;;  %v1867_v45 = vsel %vm1859_vm6, %v1855_v54, %v1863_v20  ;;  %v1869_v63 = vsel %vm1861_vm7, %v1857_v55, %v1865_v21  ;;  %v2016_v51 = vld [vmem:[#allocation19 + $0x468] sm:$0xff] }
 0x432   : > { %v13835_v0 = vpack.c.bf16 %v1867_v45, %v1867_v45  ;;  %v13837_v1 = vpack.c.bf16 %v1869_v63, %v1869_v63  ;;  %v10252_v54 = vcombine.high %v1884_v42, %v1888_v44  ;;  %v10380_v55 = vcombine.high %v2012_v50, %v2016_v51  ;;  %v1876_v30 = vld [vmem:[#allocation19 + $0x8] sm:$0xff] }
 0x433   : > { %3485 = vmatprep.mubr.bf16.mxu0 %v13831_v61  ;;  %3526 = vmatprep.mubr.bf16.mxu1 %v13833_v62  ;;  %v1880_v29 = vld [vmem:[#allocation19 + $0x28] sm:$0xff]  ;;  %v10251_v21 = vcombine.low %v1884_v42, %v1888_v44  ;;  %v10379_v57 = vcombine.low %v2012_v50, %v2016_v51 }
 0x434   : > { %3486 = vmatmul.mubr.bf16.vlgmr.msra.gmra.mxu0 %v13835_v0  ;;  %3527 = vmatmul.mubr.bf16.vlgmr.msra.gmra.mxu1 %v13837_v1  ;;  %v2008_v20 = vld [vmem:[#allocation19 + $0x428] sm:$0xff]  ;;  %v10244_v58 = vcombine.high %v1876_v30, %v1880_v29  ;;  %v10243_v2 = vcombine.low %v1876_v30, %v1880_v29 }
 0x435   : > { %3536 = vmatpush1.bf16.msra.mxu0 %v10299_v8  ;;  %3577 = vmatpush1.bf16.msra.mxu1 %v10427_v9  ;;  %v1900_v8 = vld [vmem:[#allocation19 + $0xc8] sm:$0xff]  ;;  %v10372_v59 = vcombine.high %v2004_v56, %v2008_v20 }
 0x436   : > { %3567 = vmatprep.mubr.bf16.mxu0 %v13831_v61  ;;  %3608 = vmatprep.mubr.bf16.mxu1 %v13833_v62  ;;  %v1904_v9 = vld [vmem:[#allocation19 + $0xe8] sm:$0xff] }
 0x437   : > { %3537 = vmatprep.subr.bf16.mxu0 %v10292_v6  ;;  %3578 = vmatprep.subr.bf16.mxu1 %v10420_v10  ;;  %v10268_v35 = vcombine.high %v1900_v8, %v1904_v9  ;;  %v10267_v47 = vcombine.low %v1900_v8, %v1904_v9  ;;  %v2124_v45 = vld [vmem:[#allocation19 + $0x7c8] sm:$0xff]  ;;  %v10371_v6 = vcombine.low %v2004_v56, %v2008_v20 }
 0x438   : > { %v2128_v63 = vld [vmem:[#allocation19 + $0x7e8] sm:$0xff]  ;;  %v10364_v10 = vcombine.high %v1996_v60, %v2000_v49 }
 0x439   : > { %3538 = vmatpush1.bf16.msra.mxu0 %v10291_v16  ;;  %3579 = vmatpush1.bf16.msra.mxu1 %v10419_v17  ;;  %v10492_v12 = vcombine.high %v2124_v45, %v2128_v63  ;;  %v2116_v16 = vld [vmem:[#allocation19 + $0x788] sm:$0xff] }
 0x43a   : > { %3539 = vmatprep.subr.bf16.mxu0 %v10284_v18  ;;  %3580 = vmatprep.subr.bf16.mxu1 %v10412_v19  ;;  %v2120_v17 = vld [vmem:[#allocation19 + $0x7a8] sm:$0xff]  ;;  %v10363_v18 = vcombine.low %v1996_v60, %v2000_v49  ;;  %v10491_v19 = vcombine.low %v2124_v45, %v2128_v63 }
 0x43b   : > { %v10484_v23 = vcombine.high %v2116_v16, %v2120_v17  ;;  %v1984_v27 = vld [vmem:[#allocation19 + $0x368] sm:$0xff] }
 0x43c   : > { %v10348_v8 = vcombine.high %v1980_v25, %v1984_v27  ;;  %v1972_v31 = vld [vmem:[#allocation19 + $0x308] sm:$0xff] }
 0x43d   : > { %3540 = vmatpush1.bf16.msra.mxu0 %v10283_v3  ;;  %3581 = vmatpush1.bf16.msra.mxu1 %v10411_v4  ;;  %v2108_v3 = vld [vmem:[#allocation19 + $0x748] sm:$0xff] }
 0x43e   : > { %3541 = vmatprep.subr.bf16.mxu0 %v10276_v5  ;;  %3582 = vmatprep.subr.bf16.mxu1 %v10404_v7  ;;  %v2112_v4 = vld [vmem:[#allocation19 + $0x768] sm:$0xff]  ;;  %v10355_v5 = vcombine.low %v1988_v14, %v1992_v15  ;;  %v10483_v7 = vcombine.low %v2116_v16, %v2120_v17  ;;  %v1933_v16 = vld [vmem:[#allocation19 + $0x1d0] sm:$0xff] }
 0x43f   : > { %v10476_v9 = vcombine.high %v2108_v3, %v2112_v4  ;;  %v1976_v32 = vld [vmem:[#allocation19 + $0x328] sm:$0xff]  ;;  %v1937_v17 = vld [vmem:[#allocation19 + $0x1f0] sm:$0xff] }
 0x440   : > { %v10340_v37 = vcombine.high %v1972_v31, %v1976_v32  ;;  %v1964_v43 = vld [vmem:[#allocation19 + $0x2c8] sm:$0xff] }
 0x441   : > { %3542 = vmatpush1.bf16.msra.mxu0 %v10275_v33  ;;  %3583 = vmatpush1.bf16.msra.mxu1 %v10403_v34  ;;  %v2100_v33 = vld [vmem:[#allocation19 + $0x708] sm:$0xff] }
 0x442   : > { %3543 = vmatprep.subr.bf16.mxu0 %v10268_v35  ;;  %3584 = vmatprep.subr.bf16.mxu1 %v10396_v36  ;;  %v2104_v34 = vld [vmem:[#allocation19 + $0x728] sm:$0xff]  ;;  %v10347_v35 = vcombine.low %v1980_v25, %v1984_v27  ;;  %v10475_v36 = vcombine.low %v2108_v3, %v2112_v4  ;;  %v10302_v25 = vcombine.high %v1933_v16, %v1937_v17  ;;  %v1925_v3 = vld [vmem:[#allocation19 + $0x190] sm:$0xff] }
 0x443   : > { %v10468_v40 = vcombine.high %v2100_v33, %v2104_v34  ;;  %v1968_v46 = vld [vmem:[#allocation19 + $0x2e8] sm:$0xff]  ;;  %v1929_v4 = vld [vmem:[#allocation19 + $0x1b0] sm:$0xff] }
 0x444   : > { %v10332_v42 = vcombine.high %v1964_v43, %v1968_v46  ;;  %v1956_v50 = vld [vmem:[#allocation19 + $0x288] sm:$0xff] }
 0x445   : > { %3544 = vmatpush1.bf16.msra.mxu0 %v10267_v47  ;;  %3585 = vmatpush1.bf16.msra.mxu1 %v10395_v48  ;;  %v2092_v47 = vld [vmem:[#allocation19 + $0x6c8] sm:$0xff] }
 0x446   : > { %3545 = vmatprep.subr.bf16.mxu0 %v10260_v24  ;;  %3586 = vmatprep.subr.bf16.mxu1 %v10388_v26  ;;  %v2096_v48 = vld [vmem:[#allocation19 + $0x6e8] sm:$0xff]  ;;  %v10339_v24 = vcombine.low %v1972_v31, %v1976_v32  ;;  %v10467_v26 = vcombine.low %v2100_v33, %v2104_v34  ;;  %v10294_v31 = vcombine.high %v1925_v3, %v1929_v4  ;;  %v1917_v33 = vld [vmem:[#allocation19 + $0x150] sm:$0xff] }
 0x447   : > { %v10460_v44 = vcombine.high %v2092_v47, %v2096_v48  ;;  %v1960_v51 = vld [vmem:[#allocation19 + $0x2a8] sm:$0xff]  ;;  %v1921_v34 = vld [vmem:[#allocation19 + $0x170] sm:$0xff] }
 0x448   : > { %v10324_v30 = vcombine.high %v1956_v50, %v1960_v51  ;;  %v1948_v56 = vld [vmem:[#allocation19 + $0x248] sm:$0xff] }
 0x449   : > { %3546 = vmatpush1.bf16.msra.mxu0 %v10259_v52  ;;  %3587 = vmatpush1.bf16.msra.mxu1 %v10387_v53  ;;  %v2084_v52 = vld [vmem:[#allocation19 + $0x688] sm:$0xff] }
 0x44a   : > { %3547 = vmatprep.subr.bf16.mxu0 %v10252_v54  ;;  %3588 = vmatprep.subr.bf16.mxu1 %v10380_v55  ;;  %v2088_v53 = vld [vmem:[#allocation19 + $0x6a8] sm:$0xff]  ;;  %v10331_v54 = vcombine.low %v1964_v43, %v1968_v46  ;;  %v10459_v55 = vcombine.low %v2092_v47, %v2096_v48  ;;  %v10286_v43 = vcombine.high %v1917_v33, %v1921_v34  ;;  %v1909_v47 = vld [vmem:[#allocation19 + $0x110] sm:$0xff] }
 0x44b   : > { %v10452_v29 = vcombine.high %v2084_v52, %v2088_v53  ;;  %v1952_v20 = vld [vmem:[#allocation19 + $0x268] sm:$0xff]  ;;  %v1913_v48 = vld [vmem:[#allocation19 + $0x130] sm:$0xff] }
 0x44c   : > { %v10316_v60 = vcombine.high %v1948_v56, %v1952_v20  ;;  %v1940_v45 = vld [vmem:[#allocation19 + $0x208] sm:$0xff] }
 0x44d   : > { %3548 = vmatpush1.bf16.msra.mxu0 %v10251_v21  ;;  %3589 = vmatpush1.bf16.msra.mxu1 %v10379_v57  ;;  %v2076_v21 = vld [vmem:[#allocation19 + $0x648] sm:$0xff] }
 0x44e   : > { %3549 = vmatprep.subr.bf16.mxu0 %v10244_v58  ;;  %3590 = vmatprep.subr.bf16.mxu1 %v10372_v59  ;;  %v2080_v57 = vld [vmem:[#allocation19 + $0x668] sm:$0xff]  ;;  %v10323_v58 = vcombine.low %v1956_v50, %v1960_v51  ;;  %v10451_v59 = vcombine.low %v2084_v52, %v2088_v53  ;;  %v10278_v50 = vcombine.high %v1909_v47, %v1913_v48  ;;  %v1901_v52 = vld [vmem:[#allocation19 + $0xd0] sm:$0xff] }
 0x44f   : > { %v10444_v49 = vcombine.high %v2076_v21, %v2080_v57  ;;  %v1944_v63 = vld [vmem:[#allocation19 + $0x228] sm:$0xff]  ;;  %v1905_v53 = vld [vmem:[#allocation19 + $0xf0] sm:$0xff] }
 0x450   : > { %v10308_v14 = vcombine.high %v1940_v45, %v1944_v63 }
 0x451   : > { %3550 = vmatpush1.bf16.msra.mxu0 %v10243_v2  ;;  %3591 = vmatpush1.bf16.msra.mxu1 %v10371_v6  ;;  %v2068_v2 = vld [vmem:[#allocation19 + $0x608] sm:$0xff] }
 0x452   : > { %3551 = vmatprep.subr.bf16.mxu0 %v10364_v10  ;;  %3592 = vmatprep.subr.bf16.mxu1 %v10492_v12  ;;  %v2072_v6 = vld [vmem:[#allocation19 + $0x628] sm:$0xff]  ;;  %v10315_v10 = vcombine.low %v1948_v56, %v1952_v20  ;;  %v10443_v12 = vcombine.low %v2076_v21, %v2080_v57  ;;  %v10270_v56 = vcombine.high %v1901_v52, %v1905_v53  ;;  %v1893_v21 = vld [vmem:[#allocation19 + $0x90] sm:$0xff] }
 0x453   : > { %v10436_v15 = vcombine.high %v2068_v2, %v2072_v6  ;;  %v1897_v57 = vld [vmem:[#allocation19 + $0xb0] sm:$0xff] }
 0x455   : > { %3552 = vmatpush2.bf16.msra.mxu0 %v10363_v18  ;;  %3593 = vmatpush2.bf16.msra.mxu1 %v10491_v19  ;;  %v2061_v18 = vld [vmem:[#allocation19 + $0x5d0] sm:$0xff] }
 0x456   : > { %3553 = vmatprep.subr.bf16.mxu0 %v10356_v22  ;;  %3594 = vmatprep.subr.bf16.mxu1 %v10484_v23  ;;  %v2065_v19 = vld [vmem:[#allocation19 + $0x5f0] sm:$0xff]  ;;  %v10307_v22 = vcombine.low %v1940_v45, %v1944_v63  ;;  %v10435_v23 = vcombine.low %v2068_v2, %v2072_v6  ;;  %v10262_v45 = vcombine.high %v1893_v21, %v1897_v57 }
 0x457   : > { %v10430_v27 = vcombine.high %v2061_v18, %v2065_v19  ;;  %v1885_v2 = vld [vmem:[#allocation19 + $0x50] sm:$0xff] }
 0x458   : > { %v1889_v6 = vld [vmem:[#allocation19 + $0x70] sm:$0xff] }
 0x459   : > { %3554 = vmatpush2.bf16.msra.mxu0 %v10355_v5  ;;  %3595 = vmatpush2.bf16.msra.mxu1 %v10483_v7  ;;  %v2053_v5 = vld [vmem:[#allocation19 + $0x590] sm:$0xff] }
 0x45a   : > { %3555 = vmatprep.subr.bf16.mxu0 %v10348_v8  ;;  %3596 = vmatprep.subr.bf16.mxu1 %v10476_v9  ;;  %v2057_v7 = vld [vmem:[#allocation19 + $0x5b0] sm:$0xff]  ;;  %v10301_v8 = vcombine.low %v1933_v16, %v1937_v17  ;;  %v10429_v9 = vcombine.low %v2061_v18, %v2065_v19  ;;  %v10254_v16 = vcombine.high %v1885_v2, %v1889_v6 }
 0x45b   : > { %v10422_v32 = vcombine.high %v2053_v5, %v2057_v7  ;;  %v1877_v18 = vld [vmem:[#allocation19 + $0x10] sm:$0xff] }
 0x45c   : > { %v1881_v19 = vld [vmem:[#allocation19 + $0x30] sm:$0xff] }
 0x45d   : > { %3556 = vmatpush2.bf16.msra.mxu0 %v10347_v35  ;;  %3597 = vmatpush2.bf16.msra.mxu1 %v10475_v36  ;;  %v2045_v35 = vld [vmem:[#allocation19 + $0x550] sm:$0xff] }
 0x45e   : > { %3557 = vmatprep.subr.bf16.mxu0 %v10340_v37  ;;  %3598 = vmatprep.subr.bf16.mxu1 %v10468_v40  ;;  %v2049_v36 = vld [vmem:[#allocation19 + $0x570] sm:$0xff]  ;;  %v10293_v37 = vcombine.low %v1925_v3, %v1929_v4  ;;  %v10421_v40 = vcombine.low %v2053_v5, %v2057_v7  ;;  %v10246_v3 = vcombine.high %v1877_v18, %v1881_v19 }
 0x45f   : > { %v10414_v46 = vcombine.high %v2045_v35, %v2049_v36  ;;  %v1997_v5 = vld [vmem:[#allocation19 + $0x3d0] sm:$0xff] }
 0x460   : > { %v2001_v7 = vld [vmem:[#allocation19 + $0x3f0] sm:$0xff] }
 0x461   : > { %3558 = vmatpush2.bf16.msra.mxu0 %v10339_v24  ;;  %3599 = vmatpush2.bf16.msra.mxu1 %v10467_v26  ;;  %v2037_v24 = vld [vmem:[#allocation19 + $0x510] sm:$0xff] }
 0x462   : > { %3559 = vmatprep.subr.bf16.mxu0 %v10332_v42  ;;  %3600 = vmatprep.subr.bf16.mxu1 %v10460_v44  ;;  %v2041_v26 = vld [vmem:[#allocation19 + $0x530] sm:$0xff]  ;;  %v10285_v42 = vcombine.low %v1917_v33, %v1921_v34  ;;  %v10413_v44 = vcombine.low %v2045_v35, %v2049_v36  ;;  %v10366_v33 = vcombine.high %v1997_v5, %v2001_v7 }
 0x463   : > { %v10406_v51 = vcombine.high %v2037_v24, %v2041_v26  ;;  %v1989_v35 = vld [vmem:[#allocation19 + $0x390] sm:$0xff] }
 0x464   : > { %v1993_v36 = vld [vmem:[#allocation19 + $0x3b0] sm:$0xff] }
 0x465   : > { %3560 = vmatpush2.bf16.msra.mxu0 %v10331_v54  ;;  %3601 = vmatpush2.bf16.msra.mxu1 %v10459_v55  ;;  %v2029_v54 = vld [vmem:[#allocation19 + $0x4d0] sm:$0xff] }
 0x466   : > { %3561 = vmatprep.subr.bf16.mxu0 %v10324_v30  ;;  %3602 = vmatprep.subr.bf16.mxu1 %v10452_v29  ;;  %v2033_v55 = vld [vmem:[#allocation19 + $0x4f0] sm:$0xff]  ;;  %v10277_v30 = vcombine.low %v1909_v47, %v1913_v48  ;;  %v10405_v29 = vcombine.low %v2037_v24, %v2041_v26  ;;  %v10358_v47 = vcombine.high %v1989_v35, %v1993_v36 }
 0x467   : > { %v10398_v20 = vcombine.high %v2029_v54, %v2033_v55  ;;  %v1981_v24 = vld [vmem:[#allocation19 + $0x350] sm:$0xff] }
 0x468   : > { %v1985_v26 = vld [vmem:[#allocation19 + $0x370] sm:$0xff] }
 0x469   : > { %3562 = vmatpush2.bf16.msra.mxu0 %v10323_v58  ;;  %3603 = vmatpush2.bf16.msra.mxu1 %v10451_v59  ;;  %v2021_v58 = vld [vmem:[#allocation19 + $0x490] sm:$0xff] }
 0x46a   : > { %3563 = vmatprep.subr.bf16.mxu0 %v10316_v60  ;;  %3604 = vmatprep.subr.bf16.mxu1 %v10444_v49  ;;  %v2025_v59 = vld [vmem:[#allocation19 + $0x4b0] sm:$0xff]  ;;  %v10269_v60 = vcombine.low %v1901_v52, %v1905_v53  ;;  %v10397_v49 = vcombine.low %v2029_v54, %v2033_v55  ;;  %v10350_v52 = vcombine.high %v1981_v24, %v1985_v26 }
 0x46b   : > { %v10390_v63 = vcombine.high %v2021_v58, %v2025_v59  ;;  %v1973_v54 = vld [vmem:[#allocation19 + $0x310] sm:$0xff] }
 0x46c   : > { %v1977_v55 = vld [vmem:[#allocation19 + $0x330] sm:$0xff] }
 0x46d   : > { %3564 = vmatpush2.bf16.msra.mxu0 %v10315_v10  ;;  %3605 = vmatpush2.bf16.msra.mxu1 %v10443_v12  ;;  %v2013_v10 = vld [vmem:[#allocation19 + $0x450] sm:$0xff] }
 0x46e   : > { %3565 = vmatprep.subr.bf16.mxu0 %v10308_v14  ;;  %3606 = vmatprep.subr.bf16.mxu1 %v10436_v15  ;;  %v2017_v12 = vld [vmem:[#allocation19 + $0x470] sm:$0xff]  ;;  %v10261_v14 = vcombine.low %v1893_v21, %v1897_v57  ;;  %v10389_v15 = vcombine.low %v2021_v58, %v2025_v59  ;;  %v10342_v21 = vcombine.high %v1973_v54, %v1977_v55 }
 0x46f   : > { %v10382_v17 = vcombine.high %v2013_v10, %v2017_v12  ;;  %v1965_v58 = vld [vmem:[#allocation19 + $0x2d0] sm:$0xff] }
 0x470   : > { %v1969_v59 = vld [vmem:[#allocation19 + $0x2f0] sm:$0xff] }
 0x471   : > { %3566 = vmatpush2.bf16.msra.mxu0 %v10307_v22  ;;  %3607 = vmatpush2.bf16.msra.mxu1 %v10435_v23  ;;  %v2005_v22 = vld [vmem:[#allocation19 + $0x410] sm:$0xff] }
 0x472   : > { %3617 = vmatprep.subr.bf16.mxu0 %v10302_v25  ;;  %3658 = vmatprep.subr.bf16.mxu1 %v10430_v27  ;;  %v2009_v23 = vld [vmem:[#allocation19 + $0x430] sm:$0xff]  ;;  %v10253_v25 = vcombine.low %v1885_v2, %v1889_v6  ;;  %v10381_v27 = vcombine.low %v2013_v10, %v2017_v12  ;;  %v10334_v2 = vcombine.high %v1965_v58, %v1969_v59 }
 0x473   : > { %v10374_v4 = vcombine.high %v2005_v22, %v2009_v23  ;;  %v1957_v10 = vld [vmem:[#allocation19 + $0x290] sm:$0xff] }
 0x474   : > { %3568 = vmatmul.mubr.bf16.vlgmr.msra.gmra.mxu0 %v13835_v0  ;;  %3609 = vmatmul.mubr.bf16.vlgmr.msra.gmra.mxu1 %v13837_v1  ;;  %v1961_v12 = vld [vmem:[#allocation19 + $0x2b0] sm:$0xff] }
 0x475   : > { %3618 = vmatpush1.bf16.msra.mxu0 %v10301_v8  ;;  %3649 = vmatprep.mubr.bf16.mxu0 %v13831_v61  ;;  %v2125_v8 = vld [vmem:[#allocation19 + $0x7d0] sm:$0xff] }
 0x476   : > { %3659 = vmatpush1.bf16.msra.mxu1 %v10429_v9  ;;  %3690 = vmatprep.mubr.bf16.mxu1 %v13833_v62  ;;  %v2129_v9 = vld [vmem:[#allocation19 + $0x7f0] sm:$0xff] }
 0x477   : > { %3619 = vmatprep.subr.bf16.mxu0 %v10294_v31  ;;  %3660 = vmatprep.subr.bf16.mxu1 %v10422_v32  ;;  %v10245_v31 = vcombine.low %v1877_v18, %v1881_v19  ;;  %v10373_v32 = vcombine.low %v2005_v22, %v2009_v23  ;;  %v10494_v34 = vcombine.high %v2125_v8, %v2129_v9  ;;  %v1949_v22 = vld [vmem:[#allocation19 + $0x250] sm:$0xff] }
 0x478   : > { %v10326_v18 = vcombine.high %v1957_v10, %v1961_v12  ;;  %v1953_v23 = vld [vmem:[#allocation19 + $0x270] sm:$0xff] }
 0x479   : > { %3620 = vmatpush1.bf16.msra.mxu0 %v10293_v37  ;;  %v2117_v37 = vld [vmem:[#allocation19 + $0x790] sm:$0xff] }
 0x47a   : > { %3661 = vmatpush1.bf16.msra.mxu1 %v10421_v40  ;;  %3621 = vmatprep.subr.bf16.mxu0 %v10286_v43  ;;  %v2121_v40 = vld [vmem:[#allocation19 + $0x7b0] sm:$0xff]  ;;  %v10365_v43 = vcombine.low %v1997_v5, %v2001_v7  ;;  %v10318_v5 = vcombine.high %v1949_v22, %v1953_v23 }
 0x47b   : > { %3662 = vmatprep.subr.bf16.mxu1 %v10414_v46  ;;  %v10493_v46 = vcombine.low %v2125_v8, %v2129_v9  ;;  %v10486_v48 = vcombine.high %v2117_v37, %v2121_v40  ;;  %v1941_v8 = vld [vmem:[#allocation19 + $0x210] sm:$0xff] }
 0x47c   : > { %v1945_v9 = vld [vmem:[#allocation19 + $0x230] sm:$0xff] }
 0x47d   : > { %3622 = vmatpush1.bf16.msra.mxu0 %v10285_v42  ;;  %v2109_v42 = vld [vmem:[#allocation19 + $0x750] sm:$0xff] }
 0x47e   : > { %3663 = vmatpush1.bf16.msra.mxu1 %v10413_v44  ;;  %3623 = vmatprep.subr.bf16.mxu0 %v10278_v50  ;;  %v2113_v44 = vld [vmem:[#allocation19 + $0x770] sm:$0xff]  ;;  %v10357_v50 = vcombine.low %v1989_v35, %v1993_v36  ;;  %v10310_v35 = vcombine.high %v1941_v8, %v1945_v9 }
 0x47f   : > { %3664 = vmatprep.subr.bf16.mxu1 %v10406_v51  ;;  %v10485_v51 = vcombine.low %v2117_v37, %v2121_v40  ;;  %v10478_v53 = vcombine.high %v2109_v42, %v2113_v44  ;;  %v1934_v37 = vld [vmem:[#allocation19 + $0x1d8] sm:$0xff] }
 0x480   : > { %v1938_v40 = vld [vmem:[#allocation19 + $0x1f8] sm:$0xff] }
 0x481   : > { %3624 = vmatpush1.bf16.msra.mxu0 %v10277_v30  ;;  %v2101_v30 = vld [vmem:[#allocation19 + $0x710] sm:$0xff] }
 0x482   : > { %3665 = vmatpush1.bf16.msra.mxu1 %v10405_v29  ;;  %3625 = vmatprep.subr.bf16.mxu0 %v10270_v56  ;;  %v2105_v29 = vld [vmem:[#allocation19 + $0x730] sm:$0xff]  ;;  %v10349_v56 = vcombine.low %v1981_v24, %v1985_v26  ;;  %v10304_v24 = vcombine.high %v1934_v37, %v1938_v40 }
 0x483   : > { %3666 = vmatprep.subr.bf16.mxu1 %v10398_v20  ;;  %v10477_v20 = vcombine.low %v2109_v42, %v2113_v44  ;;  %v10470_v57 = vcombine.high %v2101_v30, %v2105_v29  ;;  %v1926_v42 = vld [vmem:[#allocation19 + $0x198] sm:$0xff] }
 0x484   : > { %v1930_v44 = vld [vmem:[#allocation19 + $0x1b8] sm:$0xff] }
 0x485   : > { %3626 = vmatpush1.bf16.msra.mxu0 %v10269_v60  ;;  %v2093_v60 = vld [vmem:[#allocation19 + $0x6d0] sm:$0xff] }
 0x486   : > { %3667 = vmatpush1.bf16.msra.mxu1 %v10397_v49  ;;  %3627 = vmatprep.subr.bf16.mxu0 %v10262_v45  ;;  %v2097_v49 = vld [vmem:[#allocation19 + $0x6f0] sm:$0xff]  ;;  %v10341_v45 = vcombine.low %v1973_v54, %v1977_v55  ;;  %v10296_v54 = vcombine.high %v1926_v42, %v1930_v44  ;;  %v1918_v55 = vld [vmem:[#allocation19 + $0x158] sm:$0xff] }
 0x487   : > { %3668 = vmatprep.subr.bf16.mxu1 %v10390_v63  ;;  %v10469_v63 = vcombine.low %v2101_v30, %v2105_v29  ;;  %v10462_v6 = vcombine.high %v2093_v60, %v2097_v49  ;;  %v1922_v30 = vld [vmem:[#allocation19 + $0x178] sm:$0xff] }
 0x489   : > { %3628 = vmatpush1.bf16.msra.mxu0 %v10261_v14  ;;  %v2085_v14 = vld [vmem:[#allocation19 + $0x690] sm:$0xff] }
 0x48a   : > { %3669 = vmatpush1.bf16.msra.mxu1 %v10389_v15  ;;  %3629 = vmatprep.subr.bf16.mxu0 %v10254_v16  ;;  %v2089_v15 = vld [vmem:[#allocation19 + $0x6b0] sm:$0xff]  ;;  %v10333_v16 = vcombine.low %v1965_v58, %v1969_v59  ;;  %v10288_v58 = vcombine.high %v1918_v55, %v1922_v30 }
 0x48b   : > { %3670 = vmatprep.subr.bf16.mxu1 %v10382_v17  ;;  %v10461_v17 = vcombine.low %v2093_v60, %v2097_v49  ;;  %v10454_v19 = vcombine.high %v2085_v14, %v2089_v15  ;;  %v1910_v60 = vld [vmem:[#allocation19 + $0x118] sm:$0xff] }
 0x48c   : > { %v1914_v49 = vld [vmem:[#allocation19 + $0x138] sm:$0xff] }
 0x48d   : > { %3630 = vmatpush1.bf16.msra.mxu0 %v10253_v25  ;;  %v2077_v25 = vld [vmem:[#allocation19 + $0x650] sm:$0xff] }
 0x48e   : > { %3671 = vmatpush1.bf16.msra.mxu1 %v10381_v27  ;;  %3631 = vmatprep.subr.bf16.mxu0 %v10246_v3  ;;  %v2081_v27 = vld [vmem:[#allocation19 + $0x670] sm:$0xff]  ;;  %v10325_v3 = vcombine.low %v1957_v10, %v1961_v12  ;;  %v10280_v10 = vcombine.high %v1910_v60, %v1914_v49  ;;  %v1902_v12 = vld [vmem:[#allocation19 + $0xd8] sm:$0xff] }
 0x48f   : > { %3672 = vmatprep.subr.bf16.mxu1 %v10374_v4  ;;  %v10453_v4 = vcombine.low %v2085_v14, %v2089_v15  ;;  %v10446_v7 = vcombine.high %v2077_v25, %v2081_v27  ;;  %v1906_v14 = vld [vmem:[#allocation19 + $0xf8] sm:$0xff] }
 0x490   : > { %v2030_v15 = vld [vmem:[#allocation19 + $0x4d8] sm:$0xff] }
 0x491   : > { %3632 = vmatpush1.bf16.msra.mxu0 %v10245_v31  ;;  %v2069_v31 = vld [vmem:[#allocation19 + $0x610] sm:$0xff] }
 0x492   : > { %3673 = vmatpush1.bf16.msra.mxu1 %v10373_v32  ;;  %3633 = vmatprep.subr.bf16.mxu0 %v10366_v33  ;;  %v2073_v32 = vld [vmem:[#allocation19 + $0x630] sm:$0xff]  ;;  %v10317_v33 = vcombine.low %v1949_v22, %v1953_v23  ;;  %v1894_v22 = vld [vmem:[#allocation19 + $0x98] sm:$0xff] }
 0x493   : > { %3674 = vmatprep.subr.bf16.mxu1 %v10494_v34  ;;  %v10445_v34 = vcombine.low %v2077_v25, %v2081_v27  ;;  %v10438_v36 = vcombine.high %v2069_v31, %v2073_v32  ;;  %v1898_v23 = vld [vmem:[#allocation19 + $0xb8] sm:$0xff] }
 0x494   : > { %v2022_v25 = vld [vmem:[#allocation19 + $0x498] sm:$0xff] }
 0x495   : > { %3634 = vmatpush2.bf16.msra.mxu0 %v10365_v43  ;;  %v2062_v43 = vld [vmem:[#allocation19 + $0x5d8] sm:$0xff] }
 0x496   : > { %3675 = vmatpush2.bf16.msra.mxu1 %v10493_v46  ;;  %3635 = vmatprep.subr.bf16.mxu0 %v10358_v47  ;;  %v2066_v46 = vld [vmem:[#allocation19 + $0x5f8] sm:$0xff]  ;;  %v10309_v47 = vcombine.low %v1941_v8, %v1945_v9 }
 0x497   : > { %3676 = vmatprep.subr.bf16.mxu1 %v10486_v48  ;;  %v10437_v48 = vcombine.low %v2069_v31, %v2073_v32  ;;  %v10432_v26 = vcombine.high %v2062_v43, %v2066_v46  ;;  %v2026_v27 = vld [vmem:[#allocation19 + $0x4b8] sm:$0xff] }
 0x498   : > { %v1886_v8 = vld [vmem:[#allocation19 + $0x58] sm:$0xff] }
 0x499   : > { %3636 = vmatpush2.bf16.msra.mxu0 %v10357_v50  ;;  %v10303_v50 = vcombine.low %v1934_v37, %v1938_v40  ;;  %v1890_v9 = vld [vmem:[#allocation19 + $0x78] sm:$0xff] }
 0x49a   : > { %3677 = vmatpush2.bf16.msra.mxu1 %v10485_v51  ;;  %3637 = vmatprep.subr.bf16.mxu0 %v10350_v52  ;;  %v2054_v51 = vld [vmem:[#allocation19 + $0x598] sm:$0xff] }
 0x49b   : > { %3678 = vmatprep.subr.bf16.mxu1 %v10478_v53  ;;  %v2058_v52 = vld [vmem:[#allocation19 + $0x5b8] sm:$0xff]  ;;  %v10431_v53 = vcombine.low %v2062_v43, %v2066_v46 }
 0x49c   : > { %v10424_v29 = vcombine.high %v2054_v51, %v2058_v52  ;;  %v2014_v31 = vld [vmem:[#allocation19 + $0x458] sm:$0xff] }
 0x49d   : > { %3638 = vmatpush2.bf16.msra.mxu0 %v10349_v56  ;;  %v2046_v56 = vld [vmem:[#allocation19 + $0x558] sm:$0xff] }
 0x49e   : > { %3679 = vmatpush2.bf16.msra.mxu1 %v10477_v20  ;;  %3639 = vmatprep.subr.bf16.mxu0 %v10342_v21  ;;  %v2050_v20 = vld [vmem:[#allocation19 + $0x578] sm:$0xff]  ;;  %v10295_v21 = vcombine.low %v1926_v42, %v1930_v44 }
 0x49f   : > { %3680 = vmatprep.subr.bf16.mxu1 %v10470_v57  ;;  %v10423_v57 = vcombine.low %v2054_v51, %v2058_v52  ;;  %v10416_v59 = vcombine.high %v2046_v56, %v2050_v20  ;;  %v2018_v32 = vld [vmem:[#allocation19 + $0x478] sm:$0xff] }
 0x4a0   : > { %v1878_v37 = vld [vmem:[#allocation19 + $0x18] sm:$0xff] }
 0x4a1   : > { %3640 = vmatpush2.bf16.msra.mxu0 %v10341_v45  ;;  %v2038_v45 = vld [vmem:[#allocation19 + $0x518] sm:$0xff] }
 0x4a2   : > { %3681 = vmatpush2.bf16.msra.mxu1 %v10469_v63  ;;  %3641 = vmatprep.subr.bf16.mxu0 %v10334_v2  ;;  %v2042_v63 = vld [vmem:[#allocation19 + $0x538] sm:$0xff]  ;;  %v10287_v2 = vcombine.low %v1918_v55, %v1922_v30 }
 0x4a3   : > { %3682 = vmatprep.subr.bf16.mxu1 %v10462_v6  ;;  %v10415_v6 = vcombine.low %v2046_v56, %v2050_v20  ;;  %v1882_v40 = vld [vmem:[#allocation19 + $0x38] sm:$0xff] }
 0x4a4   : > { %v2006_v43 = vld [vmem:[#allocation19 + $0x418] sm:$0xff]  ;;  %v10247_v52 = vcombine.low %v1878_v37, %v1882_v40 }
 0x4a5   : > { %3642 = vmatpush2.bf16.msra.mxu0 %v10333_v16  ;;  %v2034_v16 = vld [vmem:[#allocation19 + $0x4f8] sm:$0xff] }
 0x4a6   : > { %3683 = vmatpush2.bf16.msra.mxu1 %v10461_v17  ;;  %3643 = vmatprep.subr.bf16.mxu0 %v10326_v18  ;;  %v10407_v17 = vcombine.low %v2038_v45, %v2042_v63  ;;  %v10272_v18 = vcombine.high %v1902_v12, %v1906_v14  ;;  %v2010_v46 = vld [vmem:[#allocation19 + $0x438] sm:$0xff] }
 0x4a7   : > { %3684 = vmatprep.subr.bf16.mxu1 %v10454_v19  ;;  %v10400_v19 = vcombine.high %v2030_v15, %v2034_v16  ;;  %v1998_v42 = vld [vmem:[#allocation19 + $0x3d8] sm:$0xff] }
 0x4a8   : > { %v2002_v44 = vld [vmem:[#allocation19 + $0x3f8] sm:$0xff] }
 0x4a9   : > { %3644 = vmatpush2.bf16.msra.mxu0 %v10325_v3  ;;  %v10271_v3 = vcombine.low %v1902_v12, %v1906_v14  ;;  %v2130_v51 = vld [vmem:[#allocation19 + $0x7f8] sm:$0xff] }
 0x4aa   : > { %3685 = vmatpush2.bf16.msra.mxu1 %v10453_v4  ;;  %3645 = vmatprep.subr.bf16.mxu0 %v10318_v5  ;;  %v10399_v4 = vcombine.low %v2030_v15, %v2034_v16  ;;  %v10264_v5 = vcombine.high %v1894_v22, %v1898_v23  ;;  %v1990_v30 = vld [vmem:[#allocation19 + $0x398] sm:$0xff] }
 0x4ab   : > { %3686 = vmatprep.subr.bf16.mxu1 %v10446_v7  ;;  %v10392_v7 = vcombine.high %v2022_v25, %v2026_v27  ;;  %v2118_v56 = vld [vmem:[#allocation19 + $0x798] sm:$0xff] }
 0x4ac   : > { %v2122_v20 = vld [vmem:[#allocation19 + $0x7b8] sm:$0xff] }
 0x4ad   : > { %3646 = vmatpush2.bf16.msra.mxu0 %v10317_v33  ;;  %v10263_v33 = vcombine.low %v1894_v22, %v1898_v23  ;;  %v1974_v12 = vld [vmem:[#allocation19 + $0x318] sm:$0xff] }
 0x4ae   : > { %3687 = vmatpush2.bf16.msra.mxu1 %v10445_v34  ;;  %3647 = vmatprep.subr.bf16.mxu0 %v10310_v35  ;;  %v10391_v34 = vcombine.low %v2022_v25, %v2026_v27  ;;  %v10256_v35 = vcombine.high %v1886_v8, %v1890_v9  ;;  %v1978_v14 = vld [vmem:[#allocation19 + $0x338] sm:$0xff] }
 0x4af   : > { %3688 = vmatprep.subr.bf16.mxu1 %v10438_v36  ;;  %v10384_v36 = vcombine.high %v2014_v31, %v2018_v32  ;;  %v2102_v15 = vld [vmem:[#allocation19 + $0x718] sm:$0xff] }
 0x4b0   : > { %v2106_v16 = vld [vmem:[#allocation19 + $0x738] sm:$0xff] }
 0x4b1   : > { %3648 = vmatpush2.bf16.msra.mxu0 %v10309_v47  ;;  %v10255_v47 = vcombine.low %v1886_v8, %v1890_v9  ;;  %v1966_v22 = vld [vmem:[#allocation19 + $0x2d8] sm:$0xff] }
 0x4b2   : > { %3689 = vmatpush2.bf16.msra.mxu1 %v10437_v48  ;;  %3699 = vmatprep.subr.bf16.mxu0 %v10304_v24  ;;  %v10383_v48 = vcombine.low %v2014_v31, %v2018_v32  ;;  %v10248_v24 = vcombine.high %v1878_v37, %v1882_v40  ;;  %v1970_v23 = vld [vmem:[#allocation19 + $0x2f8] sm:$0xff] }
 0x4b3   : > { %3740 = vmatprep.subr.bf16.mxu1 %v10432_v26  ;;  %v10376_v26 = vcombine.high %v2006_v43, %v2010_v46  ;;  %v2094_v25 = vld [vmem:[#allocation19 + $0x6d8] sm:$0xff] }
 0x4b4   : > { %3650 = vmatmul.mubr.bf16.vlgmr.msra.gmra.mxu0 %v13835_v0  ;;  %v2098_v27 = vld [vmem:[#allocation19 + $0x6f8] sm:$0xff] }
 0x4b5   : > { %3691 = vmatmul.mubr.bf16.vlgmr.msra.gmra.mxu1 %v13837_v1  ;;  %3700 = vmatpush1.bf16.msra.mxu0 %v10303_v50  ;;  %v2126_v50 = vld [vmem:[#allocation19 + $0x7d8] sm:$0xff] }
 0x4b6   : > { %3731 = vmatprep.mubr.bf16.mxu0 %v13831_v61  ;;  %3741 = vmatpush1.bf16.msra.mxu1 %v10431_v53  ;;  %v10408_v61 = vcombine.high %v2038_v45, %v2042_v63  ;;  %v10375_v53 = vcombine.low %v2006_v43, %v2010_v46  ;;  %v10496_v55 = vcombine.high %v2126_v50, %v2130_v51  ;;  %v2110_v45 = vld [vmem:[#allocation19 + $0x758] sm:$0xff] }
 0x4b7   : > { %3772 = vmatprep.mubr.bf16.mxu1 %v13833_v62  ;;  %3701 = vmatprep.subr.bf16.mxu0 %v10296_v54  ;;  %v10279_v62 = vcombine.low %v1910_v60, %v1914_v49  ;;  %v10368_v54 = vcombine.high %v1998_v42, %v2002_v44  ;;  %v1982_v60 = vld [vmem:[#allocation19 + $0x358] sm:$0xff] }
 0x4b8   : > { %3742 = vmatprep.subr.bf16.mxu1 %v10424_v29  ;;  %v1994_v29 = vld [vmem:[#allocation19 + $0x3b8] sm:$0xff] }
 0x4b9   : > { %3702 = vmatpush1.bf16.msra.mxu0 %v10295_v21  ;;  %v10367_v21 = vcombine.low %v1998_v42, %v2002_v44  ;;  %v1986_v49 = vld [vmem:[#allocation19 + $0x378] sm:$0xff] }
 0x4ba   : > { %3743 = vmatpush1.bf16.msra.mxu1 %v10423_v57  ;;  %3703 = vmatprep.subr.bf16.mxu0 %v10288_v58  ;;  %v10495_v57 = vcombine.low %v2126_v50, %v2130_v51  ;;  %v10360_v58 = vcombine.high %v1990_v30, %v1994_v29  ;;  %v2114_v63 = vld [vmem:[#allocation19 + $0x778] sm:$0xff] }
 0x4bb   : > { %3744 = vmatprep.subr.bf16.mxu1 %v10416_v59  ;;  %v10488_v59 = vcombine.high %v2118_v56, %v2122_v20  ;;  %v1958_v8 = vld [vmem:[#allocation19 + $0x298] sm:$0xff] }
 0x4bc   : > { %v1962_v9 = vld [vmem:[#allocation19 + $0x2b8] sm:$0xff] }
 0x4bd   : > { %3704 = vmatpush1.bf16.msra.mxu0 %v10287_v2  ;;  %v10359_v2 = vcombine.low %v1990_v30, %v1994_v29  ;;  %v2086_v31 = vld [vmem:[#allocation19 + $0x698] sm:$0xff] }
 0x4be   : > { %3745 = vmatpush1.bf16.msra.mxu1 %v10415_v6  ;;  %3705 = vmatprep.subr.bf16.mxu0 %v10280_v10  ;;  %v10487_v6 = vcombine.low %v2118_v56, %v2122_v20  ;;  %v10352_v10 = vcombine.high %v1982_v60, %v1986_v49  ;;  %v2090_v32 = vld [vmem:[#allocation19 + $0x6b8] sm:$0xff]  ;;  %v13859_v56 = vld [vmem:[#allocation20] sm:$0xff] }
 0x4bf   : > { %3746 = vmatprep.subr.bf16.mxu1 %v10408_v61  ;;  %v10480_v61 = vcombine.high %v2110_v45, %v2114_v63  ;;  %v1950_v37 = vld [vmem:[#allocation19 + $0x258] sm:$0xff]  ;;  %v2136_v20 = vrot.slane %v13859_v56, %v13738_v39 }
 0x4c0   : > { %v1954_v40 = vld [vmem:[#allocation19 + $0x278] sm:$0xff] }
 0x4c1   : > { %3706 = vmatpush1.bf16.msra.mxu0 %v10279_v62  ;;  %v10351_v62 = vcombine.low %v1982_v60, %v1986_v49  ;;  %v2078_v43 = vld [vmem:[#allocation19 + $0x658] sm:$0xff] }
 0x4c2   : > { %3747 = vmatpush1.bf16.msra.mxu1 %v10407_v17  ;;  %3707 = vmatprep.subr.bf16.mxu0 %v10272_v18  ;;  %v10479_v17 = vcombine.low %v2110_v45, %v2114_v63  ;;  %v10344_v18 = vcombine.high %v1974_v12, %v1978_v14  ;;  %v2082_v46 = vld [vmem:[#allocation19 + $0x678] sm:$0xff] }
 0x4c3   : > { %3748 = vmatprep.subr.bf16.mxu1 %v10400_v19  ;;  %v10472_v19 = vcombine.high %v2102_v15, %v2106_v16  ;;  %v1942_v42 = vld [vmem:[#allocation19 + $0x218] sm:$0xff] }
 0x4c4   : > { %v1946_v44 = vld [vmem:[#allocation19 + $0x238] sm:$0xff] }
 0x4c5   : > { %3708 = vmatpush1.bf16.msra.mxu0 %v10271_v3  ;;  %v10343_v3 = vcombine.low %v1974_v12, %v1978_v14  ;;  %v2070_v50 = vld [vmem:[#allocation19 + $0x618] sm:$0xff]  ;;  %v10311_v30 = vcombine.low %v1942_v42, %v1946_v44 }
 0x4c6   : > { %3749 = vmatpush1.bf16.msra.mxu1 %v10399_v4  ;;  %3709 = vmatprep.subr.bf16.mxu0 %v10264_v5  ;;  %v10471_v4 = vcombine.low %v2102_v15, %v2106_v16  ;;  %v10336_v5 = vcombine.high %v1966_v22, %v1970_v23  ;;  %v2074_v51 = vld [vmem:[#allocation19 + $0x638] sm:$0xff] }
 0x4c7   : > { %3750 = vmatprep.subr.bf16.mxu1 %v10392_v7  ;;  %v10464_v7 = vcombine.high %v2094_v25, %v2098_v27  ;;  %v10439_v29 = vcombine.low %v2070_v50, %v2074_v51 }
 0x4c9   : > { %3710 = vmatpush1.bf16.msra.mxu0 %v10263_v33  ;;  %v10335_v33 = vcombine.low %v1966_v22, %v1970_v23 }
 0x4ca   : > { %3751 = vmatpush1.bf16.msra.mxu1 %v10391_v34  ;;  %3711 = vmatprep.subr.bf16.mxu0 %v10256_v35  ;;  %v10463_v34 = vcombine.low %v2094_v25, %v2098_v27  ;;  %v10328_v35 = vcombine.high %v1958_v8, %v1962_v9 }
 0x4cb   : > { %3752 = vmatprep.subr.bf16.mxu1 %v10384_v36  ;;  %v10456_v36 = vcombine.high %v2086_v31, %v2090_v32 }
 0x4cd   : > { %3712 = vmatpush1.bf16.msra.mxu0 %v10255_v47  ;;  %v10327_v47 = vcombine.low %v1958_v8, %v1962_v9 }
 0x4ce   : > { %3753 = vmatpush1.bf16.msra.mxu1 %v10383_v48  ;;  %3713 = vmatprep.subr.bf16.mxu0 %v10248_v24  ;;  %v10455_v48 = vcombine.low %v2086_v31, %v2090_v32  ;;  %v10320_v24 = vcombine.high %v1950_v37, %v1954_v40 }
 0x4cf   : > { %3754 = vmatprep.subr.bf16.mxu1 %v10376_v26  ;;  %v10448_v26 = vcombine.high %v2078_v43, %v2082_v46 }
 0x4d1   : > { %3714 = vmatpush1.bf16.msra.mxu0 %v10247_v52  ;;  %v10319_v52 = vcombine.low %v1950_v37, %v1954_v40 }
 0x4d2   : > { %3755 = vmatpush1.bf16.msra.mxu1 %v10375_v53  ;;  %3715 = vmatprep.subr.bf16.mxu0 %v10368_v54  ;;  %v10447_v53 = vcombine.low %v2078_v43, %v2082_v46  ;;  %v10312_v54 = vcombine.high %v1942_v42, %v1946_v44 }
 0x4d3   : > { %3756 = vmatprep.subr.bf16.mxu1 %v10496_v55  ;;  %v10440_v55 = vcombine.high %v2070_v50, %v2074_v51 }
 0x4d5   : > { %3716 = vmatpush2.bf16.msra.mxu0 %v10367_v21  ;;  %v2140_v21 = vrot.slane %v13859_v56, %v13741_v41 }
 0x4d6   : > { %3757 = vmatpush2.bf16.msra.mxu1 %v10495_v57  ;;  %3717 = vmatprep.subr.bf16.mxu0 %v10360_v58 }
 0x4d7   : > { %3758 = vmatprep.subr.bf16.mxu1 %v10488_v59 }
 0x4d9   : > { %3718 = vmatpush2.bf16.msra.mxu0 %v10359_v2 }
 0x4da   : > { %3759 = vmatpush2.bf16.msra.mxu1 %v10487_v6  ;;  %3719 = vmatprep.subr.bf16.mxu0 %v10352_v10 }
 0x4db   : > { %3760 = vmatprep.subr.bf16.mxu1 %v10480_v61 }
 0x4dd   : > { %3720 = vmatpush2.bf16.msra.mxu0 %v10351_v62 }
 0x4de   : > { %3761 = vmatpush2.bf16.msra.mxu1 %v10479_v17  ;;  %3721 = vmatprep.subr.bf16.mxu0 %v10344_v18 }
 0x4df   : > { %3762 = vmatprep.subr.bf16.mxu1 %v10472_v19 }
 0x4e1   : > { %3722 = vmatpush2.bf16.msra.mxu0 %v10343_v3 }
 0x4e2   : > { %3763 = vmatpush2.bf16.msra.mxu1 %v10471_v4  ;;  %3723 = vmatprep.subr.bf16.mxu0 %v10336_v5 }
 0x4e3   : > { %3764 = vmatprep.subr.bf16.mxu1 %v10464_v7 }
 0x4e5   : > { %3724 = vmatpush2.bf16.msra.mxu0 %v10335_v33 }
 0x4e6   : > { %3765 = vmatpush2.bf16.msra.mxu1 %v10463_v34  ;;  %3725 = vmatprep.subr.bf16.mxu0 %v10328_v35 }
 0x4e7   : > { %3766 = vmatprep.subr.bf16.mxu1 %v10456_v36 }
 0x4e9   : > { %3726 = vmatpush2.bf16.msra.mxu0 %v10327_v47 }
 0x4ea   : > { %3767 = vmatpush2.bf16.msra.mxu1 %v10455_v48  ;;  %3727 = vmatprep.subr.bf16.mxu0 %v10320_v24 }
 0x4eb   : > { %3768 = vmatprep.subr.bf16.mxu1 %v10448_v26 }
 0x4ed   : > { %3728 = vmatpush2.bf16.msra.mxu0 %v10319_v52 }
 0x4ee   : > { %3769 = vmatpush2.bf16.msra.mxu1 %v10447_v53  ;;  %3729 = vmatprep.subr.bf16.mxu0 %v10312_v54 }
 0x4ef   : > { %3770 = vmatprep.subr.bf16.mxu1 %v10440_v55 }
 0x4f1   : > { %3730 = vmatpush2.bf16.msra.mxu0 %v10311_v30  ;;  %v2144_v30 = vrot.slane %v13859_v56, %v13780_v11 }
 0x4f2   : > { %3771 = vmatpush2.bf16.msra.mxu1 %v10439_v29  ;;  %v2148_v29 = vrot.slane %v13859_v56, %v13783_v13 }
 0x4f4   : > { %3732 = vmatmul.mubr.bf16.vlgmr.msra.gmra.mxu0 %v13835_v0  ;;  %v3487_v57 = vpop.f32.mrf.mxu0  ;;  %v3528_v58 = vpop.f32.mrf.mxu1 }
 0x4f5   : > { %3773 = vmatmul.mubr.bf16.vlgmr.msra.gmra.mxu1 %v13837_v1  ;;  %v3488_v59 = vadd.f32 %v3487_v57, %v2136_v20 }
 0x4f6   : > { %v3489_v60 = vpop.f32.mrf.mxu0  ;;  %v3530_v49 = vpop.f32.mrf.mxu1 }
 0x4f7   : > { %v13867_v45 = vadd.f32 %v3528_v58, %v3488_v59  ;;  %v3490_v63 = vadd.f32 %v3489_v60, %v2140_v21 }
 0x4f8   : > { %v3491_v2 = vpop.f32.mrf.mxu0  ;;  %v3532_v6 = vpop.f32.mrf.mxu1 }
 0x4f9   : > { %v3783_v10 = vrot.slane %v13867_v45, 4  ;;  %v3839_v61 = vmul.f32 %v13867_v45, %v13867_v45  ;;  %v13872_v12 = vadd.f32 %v3530_v49, %v3490_v63 }
 0x4fa   : > { %v3492_v0 = vpop.f32.mrf.mxu0  ;;  %v3533_v14 = vpop.f32.mrf.mxu1 }
 0x4fb   : > { %v3784_v15 = vadd.f32 %v3783_v10, %v13867_v45  ;;  %v3847_v1 = vrot.slane %v3839_v61, 4  ;;  %v3789_v16 = vrot.slane %v13872_v12, 4  ;;  %v3840_v62 = vmul.f32 %v13872_v12, %v13872_v12 }
 0x4fc   : > { %v13902_v0 = vsub.s32 4, %v13735_v38  ;;  %v13905_v14 = vsub.s32 5, %v13735_v38 }
 0x4fd   : > { %v3785_v17 = vrot.slane %v3784_v15, 2  ;;  %v3848_v18 = vadd.f32 %v3847_v1, %v3839_v61  ;;  %v3790_v19 = vadd.f32 %v3789_v16, %v13872_v12  ;;  %v3853_v22 = vrot.slane %v3840_v62, 4 }
 0x4fe   : > { %v2156_v1 = vrot.slane %v13859_v56, %v13905_v14 }
 0x4ff   : > { %v3786_v23 = vadd.f32 %v3785_v17, %v3784_v15  ;;  %v3849_v25 = vrot.slane %v3848_v18, 2  ;;  %v3791_v27 = vrot.slane %v3790_v19, 2  ;;  %v3854_v3 = vadd.f32 %v3853_v22, %v3840_v62 }
 0x500   : > { %v2152_v15 = vrot.slane %v13859_v56, %v13902_v0 }
 0x501   : > { %v3787_v4 = vrot.slane %v3786_v23, 1  ;;  %v3850_v5 = vadd.f32 %v3849_v25, %v3848_v18  ;;  %v3792_v7 = vadd.f32 %v3791_v27, %v3790_v19  ;;  %v3855_v8 = vrot.slane %v3854_v3, 2 }
 0x503   : > { %v3788_v9 = vadd.f32 %v3787_v4, %v3786_v23  ;;  %v3851_v31 = vrot.slane %v3850_v5, 1  ;;  %v3793_v32 = vrot.slane %v3792_v7, 1  ;;  %v3856_v33 = vadd.f32 %v3855_v8, %v3854_v3 }
 0x505   : > { %v13879_v34 = vmul.f32 0.125, %v3788_v9  ;;  %v3852_v35 = vadd.f32 %v3851_v31, %v3850_v5  ;;  %v3794_v36 = vadd.f32 %v3793_v32, %v3792_v7  ;;  %v3857_v37 = vrot.slane %v3856_v33, 1 }
 0x507   : > { %v3895_v40 = vmul.f32 0.125, %v3852_v35  ;;  %v3903_v43 = vmul.f32 %v13879_v34, %v13879_v34  ;;  %v13883_v46 = vmul.f32 0.125, %v3794_v36  ;;  %v3858_v47 = vadd.f32 %v3857_v37, %v3856_v33 }
 0x509   : > { %v3911_v48 = vsub.f32 %v3895_v40, %v3903_v43  ;;  %v3896_v24 = vmul.f32 0.125, %v3858_v47  ;;  %v3904_v26 = vmul.f32 %v13883_v46, %v13883_v46 }
 0x50b   : > { %v3919_v42 = vmax.f32 %v3911_v48, 0.0  ;;  %v3912_v44 = vsub.f32 %v3896_v24, %v3904_v26 }
 0x50d   : > { %v3927_v50 = vadd.f32 1e-05, %v3919_v42  ;;  %v3920_v51 = vmax.f32 %v3912_v44, 0.0 }
 0x50f   : > { %v3928_v52 = vadd.f32 1e-05, %v3920_v51  ;;  %11642 = vrsqrt.f32 %v3927_v50 }
 0x511   : > { %11644 = vrsqrt.f32 %v3928_v52 }
 0x51c   : > { %v13887_v53 = vpop.eup %11642 }
 0x51e   : > { %v13889_v54 = vpop.eup %11644 }
 0x51f   : > { %v3951_v55 = vcombine.low %v13887_v53, %v13889_v54 }
 0x534   : > { %v3569_v20 = vpop.f32.mrf.mxu0  ;;  %v3610_v21 = vpop.f32.mrf.mxu1 }
 0x535   : > { %v3570_v57 = vadd.f32 %v3569_v20, %v2144_v30 }
 0x536   : > { %v3571_v58 = vpop.f32.mrf.mxu0  ;;  %v3612_v59 = vpop.f32.mrf.mxu1 }
 0x537   : > { %v13897_v60 = vadd.f32 %v3610_v21, %v3570_v57  ;;  %v3572_v49 = vadd.f32 %v3571_v58, %v2148_v29 }
 0x538   : > { %v3573_v63 = vpop.f32.mrf.mxu0  ;;  %v3614_v2 = vpop.f32.mrf.mxu1 }
 0x539   : > { %v13899_v6 = vadd.f32 %v3612_v59, %v3572_v49  ;;  %v3795_v9 = vrot.slane %v13897_v60, 4  ;;  %v3841_v31 = vmul.f32 %v13897_v60, %v13897_v60 }
 0x53a   : > { %v3574_v10 = vpop.f32.mrf.mxu0  ;;  %v3615_v61 = vpop.f32.mrf.mxu1 }
 0x53b   : > { %v3801_v7 = vrot.slane %v13899_v6, 4  ;;  %v3842_v8 = vmul.f32 %v13899_v6, %v13899_v6  ;;  %v3796_v37 = vadd.f32 %v3795_v9, %v13897_v60  ;;  %v3859_v40 = vrot.slane %v3841_v31, 4 }
 0x53d   : > { %v3802_v32 = vadd.f32 %v3801_v7, %v13899_v6  ;;  %v3865_v33 = vrot.slane %v3842_v8, 4  ;;  %v3797_v44 = vrot.slane %v3796_v37, 2  ;;  %v3860_v50 = vadd.f32 %v3859_v40, %v3841_v31 }
 0x53f   : > { %v3803_v48 = vrot.slane %v3802_v32, 2  ;;  %v3866_v24 = vadd.f32 %v3865_v33, %v3842_v8  ;;  %v3798_v57 = vadd.f32 %v3797_v44, %v3796_v37  ;;  %v3861_v58 = vrot.slane %v3860_v50, 2 }
 0x541   : > { %v3804_v30 = vadd.f32 %v3803_v48, %v3802_v32  ;;  %v3867_v29 = vrot.slane %v3866_v24, 2 }
 0x543   : > { %v3805_v63 = vrot.slane %v3804_v30, 1  ;;  %v3868_v2 = vadd.f32 %v3867_v29, %v3866_v24 }
 0x574   : > { %v3651_v16 = vpop.f32.mrf.mxu0 }
 0x575   : > { %v3652_v62 = vadd.f32 %v3651_v16, %v2152_v15  ;;  %v3692_v17 = vpop.f32.mrf.mxu1  ;;  %v13932_v15 = vsub.s32 6, %v13735_v38  ;;  %v3862_v16 = vadd.f32 %v3861_v58, %v3860_v50 }
 0x576   : > { %v3653_v18 = vpop.f32.mrf.mxu0 }
 0x577   : > { %v13911_v19 = vadd.f32 %v3692_v17, %v3652_v62  ;;  %v3654_v22 = vadd.f32 %v3653_v18, %v2156_v1  ;;  %v3694_v23 = vpop.f32.mrf.mxu1  ;;  %v3799_v1 = vrot.slane %v3798_v57, 1  ;;  %v13935_v18 = vsub.s32 7, %v13735_v38 }
 0x578   : > { %v3655_v25 = vpop.f32.mrf.mxu0  ;;  %v3863_v7 = vrot.slane %v3862_v16, 1 }
 0x579   : > { %v13913_v27 = vadd.f32 %v3694_v23, %v3654_v22  ;;  %v3696_v3 = vpop.f32.mrf.mxu1  ;;  %v3807_v43 = vrot.slane %v13911_v19, 4  ;;  %v3843_v47 = vmul.f32 %v13911_v19, %v13911_v19  ;;  %v3806_v22 = vadd.f32 %v3805_v63, %v3804_v30 }
 0x57a   : > { %v3656_v4 = vpop.f32.mrf.mxu0  ;;  %v3869_v23 = vrot.slane %v3868_v2, 1  ;;  %v2164_v31 = vrot.slane %v13859_v56, %v13935_v18 }
 0x57b   : > { %v3697_v5 = vpop.f32.mrf.mxu1  ;;  %v3813_v35 = vrot.slane %v13913_v27, 4  ;;  %v3844_v36 = vmul.f32 %v13913_v27, %v13913_v27  ;;  %v3808_v51 = vadd.f32 %v3807_v43, %v13911_v19  ;;  %v3871_v52 = vrot.slane %v3843_v47, 4 }
 0x57c   : > { %v2160_v4 = vrot.slane %v13859_v56, %v13932_v15  ;;  %v3800_v5 = vadd.f32 %v3799_v1, %v3798_v57  ;;  %v13941_v32 = vmul.f32 0.125, %v3806_v22  ;;  %v3870_v33 = vadd.f32 %v3869_v23, %v3868_v2 }
 0x57d   : > { %v3814_v26 = vadd.f32 %v3813_v35, %v13913_v27  ;;  %v3877_v42 = vrot.slane %v3844_v36, 4  ;;  %v3809_v59 = vrot.slane %v3808_v51, 2  ;;  %v3872_v49 = vadd.f32 %v3871_v52, %v3843_v47 }
 0x57e   : > { %v13943_v43 = vmul.f32 0.125, %v3800_v5  ;;  %v3864_v47 = vadd.f32 %v3863_v7, %v3862_v16  ;;  %v3906_v56 = vmul.f32 %v13941_v32, %v13941_v32 }
 0x57f   : > { %v3815_v20 = vrot.slane %v3814_v26, 2  ;;  %v3878_v21 = vadd.f32 %v3877_v42, %v3844_v36  ;;  %v3810_v62 = vadd.f32 %v3809_v59, %v3808_v51  ;;  %v3873_v17 = vrot.slane %v3872_v49, 2 }
 0x580   : > { %v3898_v51 = vmul.f32 0.125, %v3870_v33  ;;  %v3897_v59 = vmul.f32 0.125, %v3864_v47 }
 0x581   : > { %v3816_v10 = vadd.f32 %v3815_v20, %v3814_v26  ;;  %v3879_v61 = vrot.slane %v3878_v21, 2  ;;  %v3811_v8 = vrot.slane %v3810_v62, 1  ;;  %v3874_v9 = vadd.f32 %v3873_v17, %v3872_v49 }
 0x582   : > { %v3905_v49 = vmul.f32 %v13943_v43, %v13943_v43  ;;  %v3914_v22 = vsub.f32 %v3898_v51, %v3906_v56 }
 0x583   : > { %v3817_v25 = vrot.slane %v3816_v10, 1  ;;  %v3880_v3 = vadd.f32 %v3879_v61, %v3878_v21  ;;  %v3812_v48 = vadd.f32 %v3811_v8, %v3810_v62  ;;  %v3875_v24 = vrot.slane %v3874_v9, 1 }
 0x584   : > { %v3913_v8 = vsub.f32 %v3897_v59, %v3905_v49 }
 0x585   : > { %v3818_v35 = vadd.f32 %v3817_v25, %v3816_v10  ;;  %v3881_v38 = vrot.slane %v3880_v3, 1  ;;  %v13958_v63 = vmul.f32 0.125, %v3812_v48  ;;  %v3876_v2 = vadd.f32 %v3875_v24, %v3874_v9 }
 0x587   : > { %v13949_v52 = vmul.f32 0.125, %v3818_v35  ;;  %v3882_v30 = vadd.f32 %v3881_v38, %v3880_v3  ;;  %v3899_v9 = vmul.f32 0.125, %v3876_v2 }
 0x589   : > { %v3900_v23 = vmul.f32 0.125, %v3882_v30  ;;  %v3908_v25 = vmul.f32 %v13949_v52, %v13949_v52 }
 0x5b4   : > { %v3733_v36 = vpop.f32.mrf.mxu0 }
 0x5b5   : > { %v3734_v37 = vadd.f32 %v3733_v36, %v2160_v4  ;;  %v3774_v40 = vpop.f32.mrf.mxu1 }
 0x5b6   : > { %v3735_v26 = vpop.f32.mrf.mxu0 }
 0x5b7   : > { %v13945_v42 = vadd.f32 %v3774_v40, %v3734_v37  ;;  %v3736_v44 = vadd.f32 %v3735_v26, %v2164_v31  ;;  %v3776_v50 = vpop.f32.mrf.mxu1  ;;  %v3907_v31 = vmul.f32 %v13958_v63, %v13958_v63  ;;  %v3922_v37 = vmax.f32 %v3914_v22, 0.0 }
 0x5b8   : > { %v3737_v29 = vpop.f32.mrf.mxu0  ;;  %v3916_v40 = vsub.f32 %v3900_v23, %v3908_v25 }
 0x5b9   : > { %v3819_v20 = vrot.slane %v13945_v42, 4  ;;  %v3845_v21 = vmul.f32 %v13945_v42, %v13945_v42  ;;  %v13954_v57 = vadd.f32 %v3776_v50, %v3736_v44  ;;  %v3778_v58 = vpop.f32.mrf.mxu1  ;;  %v3921_v44 = vmax.f32 %v3913_v8, 0.0 }
 0x5ba   : > { %v3738_v10 = vpop.f32.mrf.mxu0  ;;  %v3915_v50 = vsub.f32 %v3899_v9, %v3907_v31 }
 0x5bb   : > { %v3820_v61 = vadd.f32 %v3819_v20, %v13945_v42  ;;  %v3883_v1 = vrot.slane %v3845_v21, 4  ;;  %v3825_v16 = vrot.slane %v13954_v57, 4  ;;  %v3846_v62 = vmul.f32 %v13954_v57, %v13954_v57  ;;  %v3779_v17 = vpop.f32.mrf.mxu1 }
 0x5bc   : > { %v3930_v20 = vadd.f32 1e-05, %v3922_v37  ;;  %v3929_v10 = vadd.f32 1e-05, %v3921_v44 }
 0x5bd   : > { %v3821_v3 = vrot.slane %v3820_v61, 2  ;;  %v3884_v4 = vadd.f32 %v3883_v1, %v3845_v21  ;;  %v3826_v5 = vadd.f32 %v3825_v16, %v13954_v57  ;;  %v3889_v7 = vrot.slane %v3846_v62, 4 }
 0x5be   : > { %v3924_v21 = vmax.f32 %v3916_v40, 0.0  ;;  %11646 = vrsqrt.f32 %v3930_v20 }
 0x5bf   : > { %v3822_v33 = vadd.f32 %v3821_v3, %v3820_v61  ;;  %v3885_v35 = vrot.slane %v3884_v4, 2  ;;  %v3827_v38 = vrot.slane %v3826_v5, 2  ;;  %v3890_v36 = vadd.f32 %v3889_v7, %v3846_v62 }
 0x5c0   : > { %v3923_v61 = vmax.f32 %v3915_v50, 0.0  ;;  %v3932_v22 = vadd.f32 1e-05, %v3924_v21  ;;  %11648 = vrsqrt.f32 %v3929_v10  ;;  %v3781_v21 = vld [vmem:[#allocation22] sm:$0xff] }
 0x5c1   : > { %v3823_v47 = vrot.slane %v3822_v33, 1  ;;  %v3886_v48 = vadd.f32 %v3885_v35, %v3884_v4  ;;  %v3828_v24 = vadd.f32 %v3827_v38, %v3826_v5  ;;  %v3891_v26 = vrot.slane %v3890_v36, 2 }
 0x5c2   : > { %v3931_v4 = vadd.f32 1e-05, %v3923_v61  ;;  %11650 = vrsqrt.f32 %v3932_v22 }
 0x5c3   : > { %v3824_v51 = vadd.f32 %v3823_v47, %v3822_v33  ;;  %v3887_v56 = vrot.slane %v3886_v48, 1  ;;  %v3829_v30 = vrot.slane %v3828_v24, 1  ;;  %v3892_v29 = vadd.f32 %v3891_v26, %v3890_v36 }
 0x5c4   : > { %11652 = vrsqrt.f32 %v3931_v4  ;;  %v3961_v26 = vrot.slane %v3951_v55, %v13752_v28 }
 0x5c5   : > { %v3837_v58 = vmul.f32 0.125, %v3824_v51  ;;  %v3888_v59 = vadd.f32 %v3887_v56, %v3886_v48  ;;  %v3830_v49 = vadd.f32 %v3829_v30, %v3828_v24  ;;  %v3893_v2 = vrot.slane %v3892_v29, 1 }
 0x5c7   : > { %v3901_v1 = vmul.f32 0.125, %v3888_v59  ;;  %v3909_v16 = vmul.f32 %v3837_v58, %v3837_v58  ;;  %v3838_v62 = vmul.f32 0.125, %v3830_v49  ;;  %v3894_v17 = vadd.f32 %v3893_v2, %v3892_v29 }
 0x5c9   : > { %v3917_v23 = vsub.f32 %v3901_v1, %v3909_v16  ;;  %v3902_v25 = vmul.f32 0.125, %v3894_v17  ;;  %v3910_v3 = vmul.f32 %v3838_v62, %v3838_v62 }
 0x5cb   : > { %v3925_v5 = vmax.f32 %v3917_v23, 0.0  ;;  %v3918_v7 = vsub.f32 %v3902_v25, %v3910_v3  ;;  %v11647_v33 = vpop.eup %11646 }
 0x5cd   : > { %v3933_v8 = vadd.f32 1e-05, %v3925_v5  ;;  %v3926_v9 = vmax.f32 %v3918_v7, 0.0  ;;  %v11649_v35 = vpop.eup %11648 }
 0x5ce   : > { %v3952_v38 = vcombine.low %v11649_v35, %v11647_v33 }
 0x5cf   : > { %v3934_v31 = vadd.f32 1e-05, %v3926_v9  ;;  %11654 = vrsqrt.f32 %v3933_v8  ;;  %v11651_v36 = vpop.eup %11650 }
 0x5d0   : > { %v3968_v47 = vrot.slane %v3952_v38, %v13752_v28 }
 0x5d1   : > { %11656 = vrsqrt.f32 %v3934_v31  ;;  %v11653_v37 = vpop.eup %11652 }
 0x5d2   : > { %v3953_v48 = vcombine.low %v11653_v37, %v11651_v36  ;;  %v3983_v50 = vcombine.low %v3961_v26, %v3968_v47  ;;  %v3782_v36 = vld [vmem:[#allocation23] sm:$0xff] }
 0x5d4   : > { %v3975_v51 = vrot.slane %v3953_v48, %v13752_v28  ;;  %v3991_v29 = vrot.slane %v3983_v50, %v13752_v28 }
 0x5dc   : > { %v11655_v40 = vpop.eup %11654 }
 0x5de   : > { %v11657_v24 = vpop.eup %11656 }
 0x5df   : > { %v3954_v44 = vcombine.low %v11655_v40, %v11657_v24 }
 0x5e1   : > { %v3982_v56 = vrot.slane %v3954_v44, %v13752_v28 }
 0x5e3   : > { %v3984_v30 = vcombine.low %v3975_v51, %v3982_v56 }
 0x5e5   : > { %v3998_v20 = vrot.slane %v3984_v30, %v13752_v28 }
 0x5e7   : > { %v3999_v59 = vcombine.low %v3991_v29, %v3998_v20 }
 0x5e9   : > { %v4001_v49 = vmul.f32 %v3999_v59, %v3781_v21 }
 0x5eb   : > { %v4006_v2 = vrot.slane %v4001_v49, %v13738_v39  ;;  %v4010_v10 = vrot.slane %v4001_v49, %v13741_v41  ;;  %v4014_v53 = vrot.slane %v4001_v49, %v13780_v11  ;;  %v4018_v54 = vrot.slane %v4001_v49, %v13783_v13 }
 0x5ec   : > { %v4022_v55 = vrot.slane %v4001_v49, %v13902_v0  ;;  %v4026_v61 = vrot.slane %v4001_v49, %v13905_v14  ;;  %v4030_v1 = vrot.slane %v4001_v49, %v13932_v15  ;;  %v4034_v16 = vrot.slane %v4001_v49, %v13935_v18 }
 0x5ed   : > { %v4043_v17 = vmul.f32 %v4006_v2, %v13879_v34  ;;  %v4044_v22 = vmul.f32 %v4010_v10, %v13883_v46  ;;  %v4045_v23 = vmul.f32 %v4014_v53, %v13943_v43  ;;  %v4046_v25 = vmul.f32 %v4018_v54, %v13941_v32 }
 0x5ee   : > { %v4047_v3 = vmul.f32 %v4022_v55, %v13958_v63  ;;  %v4048_v4 = vmul.f32 %v4026_v61, %v13949_v52  ;;  %v4049_v5 = vmul.f32 %v4030_v1, %v3837_v58  ;;  %v4050_v7 = vmul.f32 %v4034_v16, %v3838_v62 }
 0x5ef   : > { %v4059_v8 = vcombine.low %v4043_v17, %v4044_v22  ;;  %v4060_v9 = vcombine.low %v4045_v23, %v4046_v25  ;;  %v4110_v31 = vmul.f32 %v4006_v2, %v13867_v45  ;;  %v4111_v33 = vmul.f32 %v4010_v10, %v13872_v12 }
 0x5f0   : > { %v4061_v35 = vcombine.low %v4047_v3, %v4048_v4  ;;  %v4062_v34 = vcombine.low %v4049_v5, %v4050_v7  ;;  %v4116_v52 = vmul.f32 %v4030_v1, %v13945_v42  ;;  %v4117_v58 = vmul.f32 %v4034_v16, %v13954_v57 }
 0x5f1   : > { %v4069_v46 = vrot.slane %v4059_v8, %v13752_v28  ;;  %v4076_v43 = vrot.slane %v4060_v9, %v13752_v28  ;;  %v4112_v47 = vmul.f32 %v4014_v53, %v13897_v60  ;;  %v4113_v48 = vmul.f32 %v4018_v54, %v13899_v6 }
 0x5f2   : > { %v4083_v32 = vrot.slane %v4061_v35, %v13752_v28  ;;  %v4090_v63 = vrot.slane %v4062_v34, %v13752_v28  ;;  %v4114_v24 = vmul.f32 %v4022_v55, %v13911_v19  ;;  %v4115_v26 = vmul.f32 %v4026_v61, %v13913_v27 }
 0x5f3   : > { %v4091_v62 = vcombine.low %v4069_v46, %v4076_v43 }
 0x5f4   : > { %v4092_v38 = vcombine.low %v4083_v32, %v4090_v63 }
 0x5f5   : > { %v4099_v45 = vrot.slane %v4091_v62, %v13752_v28 }
 0x5f6   : > { %v4106_v12 = vrot.slane %v4092_v38, %v13752_v28 }
 0x5f8   : > { %v4107_v37 = vcombine.low %v4099_v45, %v4106_v12 }
 0x5fa   : > { %v4109_v40 = vsub.f32 %v3782_v36, %v4107_v37 }
 0x5fc   : > { %v4122_v42 = vrot.slane %v4109_v40, %v13738_v39  ;;  %v4126_v57 = vrot.slane %v4109_v40, %v13741_v41  ;;  %v4130_v44 = vrot.slane %v4109_v40, %v13780_v11  ;;  %v4134_v50 = vrot.slane %v4109_v40, %v13783_v13 }
 0x5fd   : > { %v4138_v28 = vrot.slane %v4109_v40, %v13902_v0  ;;  %v4142_v51 = vrot.slane %v4109_v40, %v13905_v14  ;;  %v4146_v60 = vrot.slane %v4109_v40, %v13932_v15  ;;  %v4150_v6 = vrot.slane %v4109_v40, %v13935_v18 }
 0x5fe   : > { %v4159_v56 = vadd.f32 %v4122_v42, %v4110_v31  ;;  %v4160_v19 = vadd.f32 %v4126_v57, %v4111_v33  ;;  %v4161_v30 = vadd.f32 %v4130_v44, %v4112_v47  ;;  %v4162_v27 = vadd.f32 %v4134_v50, %v4113_v48 }
 0x5ff   : > { %v4163_v29 = vadd.f32 %v4138_v28, %v4114_v24  ;;  %v4164_v39 = vadd.f32 %v4142_v51, %v4115_v26  ;;  %v4165_v20 = vadd.f32 %v4146_v60, %v4116_v52  ;;  %v4166_v41 = vadd.f32 %v4150_v6, %v4117_v58 }
 0x600   : > { %vm4167_vm8 = vcmp.gt.f32.partialorder %v4159_v56, 0.0  ;;  %vm4168_vm9 = vcmp.gt.f32.partialorder %v4160_v19, 0.0  ;;  %vm4169_vm10 = vcmp.gt.f32.partialorder %v4161_v30, 0.0  ;;  %vm4170_vm11 = vcmp.gt.f32.partialorder %v4162_v27, 0.0 }
 0x601   : > { %vm4171_vm12 = vcmp.gt.f32.partialorder %v4163_v29, 0.0  ;;  %vm4172_vm13 = vcmp.gt.f32.partialorder %v4164_v39, 0.0  ;;  %vm4173_vm14 = vcmp.gt.f32.partialorder %v4165_v20, 0.0  ;;  %vm4174_vm15 = vcmp.gt.f32.partialorder %v4166_v41, 0.0 }
 0x602   : > { %v4175_v11 = vmul.f32 0.2, %v4159_v56  ;;  %v4176_v13 = vmul.f32 0.2, %v4160_v19  ;;  %v4177_v0 = vmul.f32 0.2, %v4161_v30 }
 0x603   : > { %v4178_v14 = vmul.f32 0.2, %v4162_v27  ;;  %v4179_v15 = vmul.f32 0.2, %v4163_v29  ;;  %v4180_v18 = vmul.f32 0.2, %v4164_v39 }
 0x604   : > { %v4181_v21 = vmul.f32 0.2, %v4165_v20  ;;  %v4182_v59 = vmul.f32 0.2, %v4166_v41  ;;  %v4183_v49 = vsel %vm4167_vm8, %v4159_v56, %v4175_v11  ;;  %v4184_v2 = vsel %vm4168_vm9, %v4160_v19, %v4176_v13 }
 0x605   : > { %v4185_v10 = vsel %vm4169_vm10, %v4161_v30, %v4177_v0  ;;  %v4186_v53 = vsel %vm4170_vm11, %v4162_v27, %v4178_v14  ;;  %v4187_v54 = vsel %vm4171_vm12, %v4163_v29, %v4179_v15  ;;  %v4188_v55 = vsel %vm4172_vm13, %v4164_v39, %v4180_v18  ;;  %4191 = vst [vmem:[#allocation2 + $0x30] sm:$0xff] %v4183_v49 }
 0x606   : > { %4192 = vst [vmem:[#allocation2] sm:$0xff] %v4184_v2  ;;  %v4189_v61 = vsel %vm4173_vm14, %v4165_v20, %v4181_v21  ;;  %v4190_v1 = vsel %vm4174_vm15, %v4166_v41, %v4182_v59  ;;  %4193 = vst [vmem:[#allocation2 + $0x18] sm:$0xff] %v4185_v10 }
 0x607   : > { %4194 = vst [vmem:[#allocation2 + $0x10] sm:$0xff] %v4186_v53  ;;  %4195 = vst [vmem:[#allocation2 + $0x8] sm:$0xff] %v4187_v54 }
 0x608   : > { %4196 = vst [vmem:[#allocation2 + $0x20] sm:$0xff] %v4188_v55  ;;  %4197 = vst [vmem:[#allocation2 + $0x28] sm:$0xff] %v4189_v61 }
 0x609   : > { %4198 = vst [vmem:[#allocation2 + $0x38] sm:$0xff] %v4190_v1 }
 0x60a PF: > { %v11658_v16 = vld [vmem:[%s13716_s17 + $0x2a4] ss:$48 sps:$4 sm:$0xff]   ;;  %v11662_v22 = vld [vmem:[%s13716_s17 + $0x2a0] ss:$48 sps:$4 sm:$0xff]  }
 0x60b   : > { %v11660_v17 = vld [vmem:[%s13716_s17 + $0x8a4] ss:$48 sps:$4 sm:$0xff]   ;;  %8887 = vmatprep.subr.bf16.mxu0 %v11658_v16  ;;  %v11663_v23 = vld [vmem:[%s13716_s17 + $0x8a0] ss:$48 sps:$4 sm:$0xff]  }
 0x60c   : > { %8928 = vmatprep.subr.bf16.mxu1 %v11660_v17  ;;  %v11664_v25 = vld [vmem:[%s13716_s17 + $0x244] ss:$48 sps:$4 sm:$0xff]   ;;  %8888 = vmatpush1.bf16.msra.mxu0 %v11662_v22  ;;  %v11668_v4 = vld [vmem:[%s13716_s17 + $0x240] ss:$48 sps:$4 sm:$0xff]  }
 0x60d   : > { %8929 = vmatpush1.bf16.msra.mxu1 %v11663_v23  ;;  %v11666_v3 = vld [vmem:[%s13716_s17 + $0x844] ss:$48 sps:$4 sm:$0xff]   ;;  %8889 = vmatprep.subr.bf16.mxu0 %v11664_v25  ;;  %v11669_v5 = vld [vmem:[%s13716_s17 + $0x840] ss:$48 sps:$4 sm:$0xff]  }
 0x60e   : > { %8930 = vmatprep.subr.bf16.mxu1 %v11666_v3  ;;  %v11670_v7 = vld [vmem:[%s13716_s17 + $0x1e4] ss:$48 sps:$4 sm:$0xff]   ;;  %v11674_v9 = vld [vmem:[%s13716_s17 + $0x1e0] ss:$48 sps:$4 sm:$0xff]  }
 0x60f   : > { %v11672_v8 = vld [vmem:[%s13716_s17 + $0x7e4] ss:$48 sps:$4 sm:$0xff]   ;;  %v11675_v31 = vld [vmem:[%s13716_s17 + $0x7e0] ss:$48 sps:$4 sm:$0xff]  }
 0x610   : > { %8890 = vmatpush1.bf16.msra.mxu0 %v11668_v4  ;;  %v11676_v33 = vld [vmem:[%s13716_s17 + $0x184] ss:$48 sps:$4 sm:$0xff]   ;;  %v11680_v34 = vld [vmem:[%s13716_s17 + $0x180] ss:$48 sps:$4 sm:$0xff]  }
 0x611   : > { %8931 = vmatpush1.bf16.msra.mxu1 %v11669_v5  ;;  %8891 = vmatprep.subr.bf16.mxu0 %v11670_v7  ;;  %v11678_v35 = vld [vmem:[%s13716_s17 + $0x784] ss:$48 sps:$4 sm:$0xff]   ;;  %v11681_v46 = vld [vmem:[%s13716_s17 + $0x780] ss:$48 sps:$4 sm:$0xff]  }
 0x612   : > { %8932 = vmatprep.subr.bf16.mxu1 %v11672_v8  ;;  %v11682_v43 = vld [vmem:[%s13716_s17 + $0x124] ss:$48 sps:$4 sm:$0xff]   ;;  %v11686_v63 = vld [vmem:[%s13716_s17 + $0x120] ss:$48 sps:$4 sm:$0xff]  }
 0x613   : > { %v11684_v32 = vld [vmem:[%s13716_s17 + $0x724] ss:$48 sps:$4 sm:$0xff]   ;;  %v11687_v52 = vld [vmem:[%s13716_s17 + $0x720] ss:$48 sps:$4 sm:$0xff]  }
 0x614   : > { %8892 = vmatpush1.bf16.msra.mxu0 %v11674_v9  ;;  %v11688_v58 = vld [vmem:[%s13716_s17 + $0xc4] ss:$48 sps:$4 sm:$0xff]   ;;  %v11692_v38 = vld [vmem:[%s13716_s17 + $0xc0] ss:$48 sps:$4 sm:$0xff]  }
 0x615   : > { %8933 = vmatpush1.bf16.msra.mxu1 %v11675_v31  ;;  %8893 = vmatprep.subr.bf16.mxu0 %v11676_v33  ;;  %v11690_v62 = vld [vmem:[%s13716_s17 + $0x6c4] ss:$48 sps:$4 sm:$0xff]   ;;  %v11693_v45 = vld [vmem:[%s13716_s17 + $0x6c0] ss:$48 sps:$4 sm:$0xff]  }
 0x616   : > { %8934 = vmatprep.subr.bf16.mxu1 %v11678_v35  ;;  %v11694_v12 = vld [vmem:[%s13716_s17 + $0x64] ss:$48 sps:$4 sm:$0xff]   ;;  %v11698_v37 = vld [vmem:[%s13716_s17 + $0x60] ss:$48 sps:$4 sm:$0xff]  }
 0x617   : > { %v11696_v36 = vld [vmem:[%s13716_s17 + $0x664] ss:$48 sps:$4 sm:$0xff]   ;;  %v11699_v40 = vld [vmem:[%s13716_s17 + $0x660] ss:$48 sps:$4 sm:$0xff]  }
 0x618   : > { %8894 = vmatpush1.bf16.msra.mxu0 %v11680_v34  ;;  %v11700_v47 = vld [vmem:[%s13716_s17 + $0x4] ss:$48 sps:$4 sm:$0xff]   ;;  %v11704_v24 = vld [vmem:[%s13716_s17] ss:$48 sps:$4 sm:$0xff]  }
 0x619   : > { %8935 = vmatpush1.bf16.msra.mxu1 %v11681_v46  ;;  %8895 = vmatprep.subr.bf16.mxu0 %v11682_v43  ;;  %v11702_v48 = vld [vmem:[%s13716_s17 + $0x604] ss:$48 sps:$4 sm:$0xff]   ;;  %v11705_v26 = vld [vmem:[%s13716_s17 + $0x600] ss:$48 sps:$4 sm:$0xff]  }
 0x61a   : > { %8936 = vmatprep.subr.bf16.mxu1 %v11684_v32  ;;  %v11706_v42 = vld [vmem:[%s13716_s17 + $0x5a4] ss:$48 sps:$4 sm:$0xff]   ;;  %v11710_v44 = vld [vmem:[%s13716_s17 + $0x5a0] ss:$48 sps:$4 sm:$0xff]  }
 0x61b   : > { %v11708_v57 = vld [vmem:[%s13716_s17 + $0xba4] ss:$48 sps:$4 sm:$0xff]   ;;  %v11711_v50 = vld [vmem:[%s13716_s17 + $0xba0] ss:$48 sps:$4 sm:$0xff]  }
 0x61c   : > { %8896 = vmatpush1.bf16.msra.mxu0 %v11686_v63  ;;  %v11712_v28 = vld [vmem:[%s13716_s17 + $0x544] ss:$48 sps:$4 sm:$0xff]   ;;  %v11716_v60 = vld [vmem:[%s13716_s17 + $0x540] ss:$48 sps:$4 sm:$0xff]  }
 0x61d   : > { %8937 = vmatpush1.bf16.msra.mxu1 %v11687_v52  ;;  %8897 = vmatprep.subr.bf16.mxu0 %v11688_v58  ;;  %v11714_v51 = vld [vmem:[%s13716_s17 + $0xb44] ss:$48 sps:$4 sm:$0xff]   ;;  %v11717_v6 = vld [vmem:[%s13716_s17 + $0xb40] ss:$48 sps:$4 sm:$0xff]  }
 0x61e   : > { %8938 = vmatprep.subr.bf16.mxu1 %v11690_v62  ;;  %v11718_v56 = vld [vmem:[%s13716_s17 + $0x4e4] ss:$48 sps:$4 sm:$0xff]   ;;  %v11722_v30 = vld [vmem:[%s13716_s17 + $0x4e0] ss:$48 sps:$4 sm:$0xff]  }
 0x61f   : > { %v11720_v19 = vld [vmem:[%s13716_s17 + $0xae4] ss:$48 sps:$4 sm:$0xff]   ;;  %v11723_v27 = vld [vmem:[%s13716_s17 + $0xae0] ss:$48 sps:$4 sm:$0xff]  }
 0x620   : > { %8898 = vmatpush1.bf16.msra.mxu0 %v11692_v38  ;;  %v11724_v29 = vld [vmem:[%s13716_s17 + $0x484] ss:$48 sps:$4 sm:$0xff]   ;;  %v11728_v41 = vld [vmem:[%s13716_s17 + $0x480] ss:$48 sps:$4 sm:$0xff]  }
 0x621   : > { %8939 = vmatpush1.bf16.msra.mxu1 %v11693_v45  ;;  %8899 = vmatprep.subr.bf16.mxu0 %v11694_v12  ;;  %v11726_v39 = vld [vmem:[%s13716_s17 + $0xa84] ss:$48 sps:$4 sm:$0xff]   ;;  %v11729_v11 = vld [vmem:[%s13716_s17 + $0xa80] ss:$48 sps:$4 sm:$0xff]  }
 0x622   : > { %8940 = vmatprep.subr.bf16.mxu1 %v11696_v36  ;;  %v4200_v20 = vld [vmem:[#allocation2] sm:$0xff]  ;;  %v4202_v0 = vld [vmem:[#allocation2 + $0x10] sm:$0xff]  ;;  %v11734_v21 = vld [vmem:[%s13716_s17 + $0x420] ss:$48 sps:$4 sm:$0xff]  }
 0x623   : > { %v14070_v13 = vpack.c.bf16 %v4200_v20, %v4200_v20  ;;  %v11730_v14 = vld [vmem:[%s13716_s17 + $0x424] ss:$48 sps:$4 sm:$0xff]   ;;  %v14073_v15 = vpack.c.bf16 %v4202_v0, %v4202_v0  ;;  %v11735_v59 = vld [vmem:[%s13716_s17 + $0xa20] ss:$48 sps:$4 sm:$0xff]  }
 0x624   : > { %8900 = vmatpush1.bf16.msra.mxu0 %v11698_v37  ;;  %v11732_v18 = vld [vmem:[%s13716_s17 + $0xa24] ss:$48 sps:$4 sm:$0xff]   ;;  %v11740_v10 = vld [vmem:[%s13716_s17 + $0x3c0] ss:$48 sps:$4 sm:$0xff]  }
 0x625   : > { %8941 = vmatpush1.bf16.msra.mxu1 %v11699_v40  ;;  %8901 = vmatprep.subr.bf16.mxu0 %v11700_v47  ;;  %v11736_v49 = vld [vmem:[%s13716_s17 + $0x3c4] ss:$48 sps:$4 sm:$0xff]   ;;  %v11741_v53 = vld [vmem:[%s13716_s17 + $0x9c0] ss:$48 sps:$4 sm:$0xff]  }
 0x626   : > { %8942 = vmatprep.subr.bf16.mxu1 %v11702_v48  ;;  %8919 = vmatprep.mubr.bf16.mxu0 %v14070_v13  ;;  %v11738_v2 = vld [vmem:[%s13716_s17 + $0x9c4] ss:$48 sps:$4 sm:$0xff]   ;;  %v11746_v61 = vld [vmem:[%s13716_s17 + $0x360] ss:$48 sps:$4 sm:$0xff]  }
 0x627   : > { %8960 = vmatprep.mubr.bf16.mxu1 %v14073_v15  ;;  %v11742_v54 = vld [vmem:[%s13716_s17 + $0x364] ss:$48 sps:$4 sm:$0xff]   ;;  %v11747_v1 = vld [vmem:[%s13716_s17 + $0x960] ss:$48 sps:$4 sm:$0xff]  }
 0x628   : > { %8902 = vmatpush1.bf16.msra.mxu0 %v11704_v24  ;;  %v11744_v55 = vld [vmem:[%s13716_s17 + $0x964] ss:$48 sps:$4 sm:$0xff]   ;;  %v11752_v22 = vld [vmem:[%s13716_s17 + $0x300] ss:$48 sps:$4 sm:$0xff]  }
 0x629   : > { %8943 = vmatpush1.bf16.msra.mxu1 %v11705_v26  ;;  %8903 = vmatprep.subr.bf16.mxu0 %v11706_v42  ;;  %v11748_v16 = vld [vmem:[%s13716_s17 + $0x304] ss:$48 sps:$4 sm:$0xff]   ;;  %v11753_v23 = vld [vmem:[%s13716_s17 + $0x900] ss:$48 sps:$4 sm:$0xff]  }
 0x62a   : > { %8944 = vmatprep.subr.bf16.mxu1 %v11708_v57  ;;  %v11750_v17 = vld [vmem:[%s13716_s17 + $0x904] ss:$48 sps:$4 sm:$0xff]   ;;  %v4201_v3 = vld [vmem:[#allocation2 + $0x18] sm:$0xff] }
 0x62b   : > { %v4199_v25 = vld [vmem:[#allocation2 + $0x30] sm:$0xff]  ;;  %v14096_v8 = vpack.c.bf16 %v4201_v3, %v4201_v3  ;;  %v11754_v9 = vld [vmem:[%s13716_s17 + $0xea0] ss:$48 sps:$4 sm:$0xff]  }
 0x62c   : > { %8904 = vmatpush2.bf16.msra.mxu0 %v11710_v44  ;;  %v11756_v4 = vld [vmem:[%s13716_s17 + $0xea4] ss:$48 sps:$4 sm:$0xff]   ;;  %v14094_v7 = vpack.c.bf16 %v4199_v25, %v4199_v25  ;;  %v11757_v31 = vld [vmem:[%s13716_s17 + $0x14a0] ss:$48 sps:$4 sm:$0xff]  }
 0x62d   : > { %8945 = vmatpush2.bf16.msra.mxu1 %v11711_v50  ;;  %8905 = vmatprep.subr.bf16.mxu0 %v11712_v28  ;;  %v11759_v5 = vld [vmem:[%s13716_s17 + $0x14a4] ss:$48 sps:$4 sm:$0xff]   ;;  %v11760_v34 = vld [vmem:[%s13716_s17 + $0xe40] ss:$48 sps:$4 sm:$0xff]  }
 0x62e   : > { %8946 = vmatprep.subr.bf16.mxu1 %v11714_v51  ;;  %v11762_v33 = vld [vmem:[%s13716_s17 + $0xe44] ss:$48 sps:$4 sm:$0xff]   ;;  %v11763_v46 = vld [vmem:[%s13716_s17 + $0x1440] ss:$48 sps:$4 sm:$0xff]  }
 0x62f   : > { %v11765_v35 = vld [vmem:[%s13716_s17 + $0x1444] ss:$48 sps:$4 sm:$0xff]   ;;  %v11766_v63 = vld [vmem:[%s13716_s17 + $0xde0] ss:$48 sps:$4 sm:$0xff]  }
 0x630   : > { %8906 = vmatpush2.bf16.msra.mxu0 %v11716_v60  ;;  %v11768_v43 = vld [vmem:[%s13716_s17 + $0xde4] ss:$48 sps:$4 sm:$0xff]   ;;  %v11769_v52 = vld [vmem:[%s13716_s17 + $0x13e0] ss:$48 sps:$4 sm:$0xff]  }
 0x631   : > { %8947 = vmatpush2.bf16.msra.mxu1 %v11717_v6  ;;  %8907 = vmatprep.subr.bf16.mxu0 %v11718_v56  ;;  %v11771_v32 = vld [vmem:[%s13716_s17 + $0x13e4] ss:$48 sps:$4 sm:$0xff]   ;;  %v11772_v38 = vld [vmem:[%s13716_s17 + $0xd80] ss:$48 sps:$4 sm:$0xff]  }
 0x632   : > { %8948 = vmatprep.subr.bf16.mxu1 %v11720_v19  ;;  %v11774_v58 = vld [vmem:[%s13716_s17 + $0xd84] ss:$48 sps:$4 sm:$0xff]   ;;  %v11775_v45 = vld [vmem:[%s13716_s17 + $0x1380] ss:$48 sps:$4 sm:$0xff]  }
 0x633   : > { %v11777_v62 = vld [vmem:[%s13716_s17 + $0x1384] ss:$48 sps:$4 sm:$0xff]   ;;  %v11778_v37 = vld [vmem:[%s13716_s17 + $0xd20] ss:$48 sps:$4 sm:$0xff]  }
 0x634   : > { %8908 = vmatpush2.bf16.msra.mxu0 %v11722_v30  ;;  %v11780_v12 = vld [vmem:[%s13716_s17 + $0xd24] ss:$48 sps:$4 sm:$0xff]   ;;  %v11781_v40 = vld [vmem:[%s13716_s17 + $0x1320] ss:$48 sps:$4 sm:$0xff]  }
 0x635   : > { %8949 = vmatpush2.bf16.msra.mxu1 %v11723_v27  ;;  %8909 = vmatprep.subr.bf16.mxu0 %v11724_v29  ;;  %v11783_v36 = vld [vmem:[%s13716_s17 + $0x1324] ss:$48 sps:$4 sm:$0xff]   ;;  %v11784_v24 = vld [vmem:[%s13716_s17 + $0xcc0] ss:$48 sps:$4 sm:$0xff]  }
 0x636   : > { %8950 = vmatprep.subr.bf16.mxu1 %v11726_v39  ;;  %v11786_v47 = vld [vmem:[%s13716_s17 + $0xcc4] ss:$48 sps:$4 sm:$0xff]   ;;  %v11787_v26 = vld [vmem:[%s13716_s17 + $0x12c0] ss:$48 sps:$4 sm:$0xff]  }
 0x637   : > { %v11789_v48 = vld [vmem:[%s13716_s17 + $0x12c4] ss:$48 sps:$4 sm:$0xff]   ;;  %v11790_v50 = vld [vmem:[%s13716_s17 + $0xc60] ss:$48 sps:$4 sm:$0xff]  }
 0x638   : > { %8910 = vmatpush2.bf16.msra.mxu0 %v11728_v41  ;;  %v11792_v42 = vld [vmem:[%s13716_s17 + $0xc64] ss:$48 sps:$4 sm:$0xff]   ;;  %v11793_v28 = vld [vmem:[%s13716_s17 + $0x1260] ss:$48 sps:$4 sm:$0xff]  }
 0x639   : > { %8951 = vmatpush2.bf16.msra.mxu1 %v11729_v11  ;;  %8911 = vmatprep.subr.bf16.mxu0 %v11730_v14  ;;  %v11795_v57 = vld [vmem:[%s13716_s17 + $0x1264] ss:$48 sps:$4 sm:$0xff]   ;;  %v4206_v60 = vld [vmem:[#allocation2 + $0x38] sm:$0xff] }
 0x63a   : > { %8952 = vmatprep.subr.bf16.mxu1 %v11732_v18  ;;  %v4204_v44 = vld [vmem:[#allocation2 + $0x20] sm:$0xff]  ;;  %v14129_v56 = vpack.c.bf16 %v4206_v60, %v4206_v60  ;;  %v11796_v30 = vld [vmem:[%s13716_s17 + $0xc00] ss:$48 sps:$4 sm:$0xff]   ;;  %v11879_v60 = vld [vmem:[%s13716_s17 + $0x72c] ss:$48 sps:$4 sm:$0xff]  }
 0x63b   : > { %v14126_v51 = vpack.c.bf16 %v4204_v44, %v4204_v44  ;;  %v11798_v6 = vld [vmem:[%s13716_s17 + $0xc04] ss:$48 sps:$4 sm:$0xff]   ;;  %v11799_v27 = vld [vmem:[%s13716_s17 + $0x1200] ss:$48 sps:$4 sm:$0xff]   ;;  %v11868_v44 = vld [vmem:[%s13716_s17 + $0x188] ss:$48 sps:$4 sm:$0xff]  }
 0x63c   : > { %8912 = vmatpush2.bf16.msra.mxu0 %v11734_v21  ;;  %v11801_v19 = vld [vmem:[%s13716_s17 + $0x1204] ss:$48 sps:$4 sm:$0xff]   ;;  %v11802_v20 = vld [vmem:[%s13716_s17 + $0x11a0] ss:$48 sps:$4 sm:$0xff]  }
 0x63d   : > { %8953 = vmatpush2.bf16.msra.mxu1 %v11735_v59  ;;  %8913 = vmatprep.subr.bf16.mxu0 %v11736_v49  ;;  %v11804_v29 = vld [vmem:[%s13716_s17 + $0x11a4] ss:$48 sps:$4 sm:$0xff]   ;;  %v11805_v41 = vld [vmem:[%s13716_s17 + $0x17a0] ss:$48 sps:$4 sm:$0xff]  }
 0x63e   : > { %8954 = vmatprep.subr.bf16.mxu1 %v11738_v2  ;;  %v11807_v39 = vld [vmem:[%s13716_s17 + $0x17a4] ss:$48 sps:$4 sm:$0xff]   ;;  %v11808_v14 = vld [vmem:[%s13716_s17 + $0x1140] ss:$48 sps:$4 sm:$0xff]  }
 0x63f   : > { %v11810_v11 = vld [vmem:[%s13716_s17 + $0x1144] ss:$48 sps:$4 sm:$0xff]   ;;  %v11811_v18 = vld [vmem:[%s13716_s17 + $0x1740] ss:$48 sps:$4 sm:$0xff]  }
 0x640   : > { %8914 = vmatpush2.bf16.msra.mxu0 %v11740_v10  ;;  %v11813_v0 = vld [vmem:[%s13716_s17 + $0x1744] ss:$48 sps:$4 sm:$0xff]   ;;  %v11814_v49 = vld [vmem:[%s13716_s17 + $0x10e0] ss:$48 sps:$4 sm:$0xff]  }
 0x641   : > { %8955 = vmatpush2.bf16.msra.mxu1 %v11741_v53  ;;  %8915 = vmatprep.subr.bf16.mxu0 %v11742_v54  ;;  %v11816_v21 = vld [vmem:[%s13716_s17 + $0x10e4] ss:$48 sps:$4 sm:$0xff]   ;;  %v11817_v2 = vld [vmem:[%s13716_s17 + $0x16e0] ss:$48 sps:$4 sm:$0xff]  }
 0x642   : > { %8956 = vmatprep.subr.bf16.mxu1 %v11744_v55  ;;  %v11819_v59 = vld [vmem:[%s13716_s17 + $0x16e4] ss:$48 sps:$4 sm:$0xff]   ;;  %v11820_v54 = vld [vmem:[%s13716_s17 + $0x1080] ss:$48 sps:$4 sm:$0xff]  }
 0x643   : > { %v11822_v10 = vld [vmem:[%s13716_s17 + $0x1084] ss:$48 sps:$4 sm:$0xff]   ;;  %v11823_v55 = vld [vmem:[%s13716_s17 + $0x1680] ss:$48 sps:$4 sm:$0xff]  }
 0x644   : > { %8916 = vmatpush2.bf16.msra.mxu0 %v11746_v61  ;;  %v11825_v53 = vld [vmem:[%s13716_s17 + $0x1684] ss:$48 sps:$4 sm:$0xff]   ;;  %v11832_v25 = vld [vmem:[%s13716_s17 + $0xfc0] ss:$48 sps:$4 sm:$0xff]  }
 0x645   : > { %8957 = vmatpush2.bf16.msra.mxu1 %v11747_v1  ;;  %8917 = vmatprep.subr.bf16.mxu0 %v11748_v16  ;;  %v11828_v61 = vld [vmem:[%s13716_s17 + $0x1024] ss:$48 sps:$4 sm:$0xff]   ;;  %v11826_v16 = vld [vmem:[%s13716_s17 + $0x1020] ss:$48 sps:$4 sm:$0xff]  }
 0x646   : > { %8958 = vmatprep.subr.bf16.mxu1 %v11750_v17  ;;  %v11831_v1 = vld [vmem:[%s13716_s17 + $0x1624] ss:$48 sps:$4 sm:$0xff]   ;;  %v11829_v17 = vld [vmem:[%s13716_s17 + $0x1620] ss:$48 sps:$4 sm:$0xff]  }
 0x647   : > { %v11835_v3 = vld [vmem:[%s13716_s17 + $0x15c0] ss:$48 sps:$4 sm:$0xff]  }
 0x648   : > { %8918 = vmatpush2.bf16.msra.mxu0 %v11752_v22  ;;  %v11834_v22 = vld [vmem:[%s13716_s17 + $0xfc4] ss:$48 sps:$4 sm:$0xff]  }
 0x649   : > { %8959 = vmatpush2.bf16.msra.mxu1 %v11753_v23  ;;  %8969 = vmatprep.subr.bf16.mxu0 %v11756_v4  ;;  %v11837_v23 = vld [vmem:[%s13716_s17 + $0x15c4] ss:$48 sps:$4 sm:$0xff]  }
 0x64a   : > { %9010 = vmatprep.subr.bf16.mxu1 %v11759_v5  ;;  %v11840_v4 = vld [vmem:[%s13716_s17 + $0xf64] ss:$48 sps:$4 sm:$0xff]  }
 0x64b   : > { %8920 = vmatmul.mubr.bf16.vlgmr.msra.gmra.mxu0 %v14094_v7  ;;  %v11843_v5 = vld [vmem:[%s13716_s17 + $0x1564] ss:$48 sps:$4 sm:$0xff]  }
 0x64c   : > { %8961 = vmatmul.mubr.bf16.vlgmr.msra.gmra.mxu1 %v14096_v8  ;;  %8970 = vmatpush1.bf16.msra.mxu0 %v11754_v9  ;;  %v11838_v9 = vld [vmem:[%s13716_s17 + $0xf60] ss:$48 sps:$4 sm:$0xff]  }
 0x64d   : > { %9011 = vmatpush1.bf16.msra.mxu1 %v11757_v31  ;;  %8971 = vmatprep.subr.bf16.mxu0 %v11762_v33  ;;  %v11841_v31 = vld [vmem:[%s13716_s17 + $0x1560] ss:$48 sps:$4 sm:$0xff]   ;;  %v11846_v33 = vld [vmem:[%s13716_s17 + $0xf04] ss:$48 sps:$4 sm:$0xff]  }
 0x64e   : > { %9012 = vmatprep.subr.bf16.mxu1 %v11765_v35  ;;  %9001 = vmatprep.mubr.bf16.mxu0 %v14126_v51  ;;  %v11849_v35 = vld [vmem:[%s13716_s17 + $0x1504] ss:$48 sps:$4 sm:$0xff]  }
 0x64f   : > { %9042 = vmatprep.mubr.bf16.mxu1 %v14129_v56 }
 0x650   : > { %8972 = vmatpush1.bf16.msra.mxu0 %v11760_v34  ;;  %v11844_v34 = vld [vmem:[%s13716_s17 + $0xf00] ss:$48 sps:$4 sm:$0xff]  }
 0x651   : > { %9013 = vmatpush1.bf16.msra.mxu1 %v11763_v46  ;;  %8973 = vmatprep.subr.bf16.mxu0 %v11768_v43  ;;  %v11847_v46 = vld [vmem:[%s13716_s17 + $0x1500] ss:$48 sps:$4 sm:$0xff]  }
 0x652   : > { %9014 = vmatprep.subr.bf16.mxu1 %v11771_v32  ;;  %v4203_v43 = vld [vmem:[#allocation2 + $0x8] sm:$0xff] }
 0x653   : > { %v4205_v32 = vld [vmem:[#allocation2 + $0x28] sm:$0xff] }
 0x654   : > { %8974 = vmatpush1.bf16.msra.mxu0 %v11766_v63  ;;  %v11852_v63 = vld [vmem:[%s13716_s17 + $0x2ac] ss:$48 sps:$4 sm:$0xff]  }
 0x655   : > { %9015 = vmatpush1.bf16.msra.mxu1 %v11769_v52  ;;  %8975 = vmatprep.subr.bf16.mxu0 %v11774_v58  ;;  %v11855_v52 = vld [vmem:[%s13716_s17 + $0x8ac] ss:$48 sps:$4 sm:$0xff]   ;;  %v14170_v58 = vpack.c.bf16 %v4203_v43, %v4203_v43  ;;  %v11928_v43 = vld [vmem:[%s13716_s17 + $0x3c8] ss:$48 sps:$4 sm:$0xff]  }
 0x656   : > { %9016 = vmatprep.subr.bf16.mxu1 %v11777_v62  ;;  %v14172_v62 = vpack.c.bf16 %v4205_v32, %v4205_v32  ;;  %v11931_v32 = vld [vmem:[%s13716_s17 + $0x9c8] ss:$48 sps:$4 sm:$0xff]  }
 0x658   : > { %8976 = vmatpush1.bf16.msra.mxu0 %v11772_v38  ;;  %v11850_v38 = vld [vmem:[%s13716_s17 + $0x2a8] ss:$48 sps:$4 sm:$0xff]  }
 0x659   : > { %9017 = vmatpush1.bf16.msra.mxu1 %v11775_v45  ;;  %8977 = vmatprep.subr.bf16.mxu0 %v11780_v12  ;;  %v11853_v45 = vld [vmem:[%s13716_s17 + $0x8a8] ss:$48 sps:$4 sm:$0xff]   ;;  %v11858_v12 = vld [vmem:[%s13716_s17 + $0x24c] ss:$48 sps:$4 sm:$0xff]  }
 0x65a   : > { %9018 = vmatprep.subr.bf16.mxu1 %v11783_v36  ;;  %v11861_v36 = vld [vmem:[%s13716_s17 + $0x84c] ss:$48 sps:$4 sm:$0xff]  }
 0x65c   : > { %8978 = vmatpush1.bf16.msra.mxu0 %v11778_v37  ;;  %v11856_v37 = vld [vmem:[%s13716_s17 + $0x248] ss:$48 sps:$4 sm:$0xff]  }
 0x65d   : > { %9019 = vmatpush1.bf16.msra.mxu1 %v11781_v40  ;;  %8979 = vmatprep.subr.bf16.mxu0 %v11786_v47  ;;  %v11859_v40 = vld [vmem:[%s13716_s17 + $0x848] ss:$48 sps:$4 sm:$0xff]   ;;  %v11864_v47 = vld [vmem:[%s13716_s17 + $0x1ec] ss:$48 sps:$4 sm:$0xff]  }
 0x65e   : > { %9020 = vmatprep.subr.bf16.mxu1 %v11789_v48  ;;  %v11867_v48 = vld [vmem:[%s13716_s17 + $0x7ec] ss:$48 sps:$4 sm:$0xff]  }
 0x660   : > { %8980 = vmatpush1.bf16.msra.mxu0 %v11784_v24  ;;  %v11862_v24 = vld [vmem:[%s13716_s17 + $0x1e8] ss:$48 sps:$4 sm:$0xff]  }
 0x661   : > { %9021 = vmatpush1.bf16.msra.mxu1 %v11787_v26  ;;  %8981 = vmatprep.subr.bf16.mxu0 %v11792_v42  ;;  %v11865_v26 = vld [vmem:[%s13716_s17 + $0x7e8] ss:$48 sps:$4 sm:$0xff]   ;;  %v11870_v42 = vld [vmem:[%s13716_s17 + $0x18c] ss:$48 sps:$4 sm:$0xff]  }
 0x662   : > { %9022 = vmatprep.subr.bf16.mxu1 %v11795_v57  ;;  %v11873_v57 = vld [vmem:[%s13716_s17 + $0x78c] ss:$48 sps:$4 sm:$0xff]  }
 0x664   : > { %8982 = vmatpush1.bf16.msra.mxu0 %v11790_v50  ;;  %v11871_v50 = vld [vmem:[%s13716_s17 + $0x788] ss:$48 sps:$4 sm:$0xff]  }
 0x665   : > { %9023 = vmatpush1.bf16.msra.mxu1 %v11793_v28  ;;  %8983 = vmatprep.subr.bf16.mxu0 %v11798_v6  ;;  %v11876_v28 = vld [vmem:[%s13716_s17 + $0x12c] ss:$48 sps:$4 sm:$0xff]   ;;  %v11874_v6 = vld [vmem:[%s13716_s17 + $0x128] ss:$48 sps:$4 sm:$0xff]  }
 0x666   : > { %9024 = vmatprep.subr.bf16.mxu1 %v11801_v19  ;;  %v11877_v19 = vld [vmem:[%s13716_s17 + $0x728] ss:$48 sps:$4 sm:$0xff]  }
 0x668   : > { %8984 = vmatpush1.bf16.msra.mxu0 %v11796_v30  ;;  %v11882_v30 = vld [vmem:[%s13716_s17 + $0xcc] ss:$48 sps:$4 sm:$0xff]  }
 0x669   : > { %9025 = vmatpush1.bf16.msra.mxu1 %v11799_v27  ;;  %8985 = vmatprep.subr.bf16.mxu0 %v11804_v29  ;;  %v11885_v27 = vld [vmem:[%s13716_s17 + $0x6cc] ss:$48 sps:$4 sm:$0xff]   ;;  %v11880_v29 = vld [vmem:[%s13716_s17 + $0xc8] ss:$48 sps:$4 sm:$0xff]  }
 0x66a   : > { %9026 = vmatprep.subr.bf16.mxu1 %v11807_v39  ;;  %v11883_v39 = vld [vmem:[%s13716_s17 + $0x6c8] ss:$48 sps:$4 sm:$0xff]  }
 0x66c   : > { %8986 = vmatpush2.bf16.msra.mxu0 %v11802_v20  ;;  %v11888_v20 = vld [vmem:[%s13716_s17 + $0x6c] ss:$48 sps:$4 sm:$0xff]  }
 0x66d   : > { %9027 = vmatpush2.bf16.msra.mxu1 %v11805_v41  ;;  %8987 = vmatprep.subr.bf16.mxu0 %v11810_v11  ;;  %v11891_v41 = vld [vmem:[%s13716_s17 + $0x66c] ss:$48 sps:$4 sm:$0xff]   ;;  %v11886_v11 = vld [vmem:[%s13716_s17 + $0x68] ss:$48 sps:$4 sm:$0xff]  }
 0x66e   : > { %9028 = vmatprep.subr.bf16.mxu1 %v11813_v0  ;;  %v11889_v0 = vld [vmem:[%s13716_s17 + $0x668] ss:$48 sps:$4 sm:$0xff]  }
 0x670   : > { %8988 = vmatpush2.bf16.msra.mxu0 %v11808_v14  ;;  %v11894_v14 = vld [vmem:[%s13716_s17 + $0xc] ss:$48 sps:$4 sm:$0xff]  }
 0x671   : > { %9029 = vmatpush2.bf16.msra.mxu1 %v11811_v18  ;;  %8989 = vmatprep.subr.bf16.mxu0 %v11816_v21  ;;  %v11897_v18 = vld [vmem:[%s13716_s17 + $0x60c] ss:$48 sps:$4 sm:$0xff]   ;;  %v11892_v21 = vld [vmem:[%s13716_s17 + $0x8] ss:$48 sps:$4 sm:$0xff]  }
 0x672   : > { %9030 = vmatprep.subr.bf16.mxu1 %v11819_v59  ;;  %v11895_v59 = vld [vmem:[%s13716_s17 + $0x608] ss:$48 sps:$4 sm:$0xff]  }
 0x674   : > { %8990 = vmatpush2.bf16.msra.mxu0 %v11814_v49  ;;  %v11900_v49 = vld [vmem:[%s13716_s17 + $0x5ac] ss:$48 sps:$4 sm:$0xff]  }
 0x675   : > { %9031 = vmatpush2.bf16.msra.mxu1 %v11817_v2  ;;  %8991 = vmatprep.subr.bf16.mxu0 %v11822_v10  ;;  %v11903_v2 = vld [vmem:[%s13716_s17 + $0xbac] ss:$48 sps:$4 sm:$0xff]   ;;  %v11898_v10 = vld [vmem:[%s13716_s17 + $0x5a8] ss:$48 sps:$4 sm:$0xff]  }
 0x676   : > { %9032 = vmatprep.subr.bf16.mxu1 %v11825_v53  ;;  %v11901_v53 = vld [vmem:[%s13716_s17 + $0xba8] ss:$48 sps:$4 sm:$0xff]  }
 0x678   : > { %8992 = vmatpush2.bf16.msra.mxu0 %v11820_v54  ;;  %v11906_v54 = vld [vmem:[%s13716_s17 + $0x54c] ss:$48 sps:$4 sm:$0xff]  }
 0x679   : > { %9033 = vmatpush2.bf16.msra.mxu1 %v11823_v55  ;;  %8993 = vmatprep.subr.bf16.mxu0 %v11828_v61  ;;  %v11909_v55 = vld [vmem:[%s13716_s17 + $0xb4c] ss:$48 sps:$4 sm:$0xff]   ;;  %v11904_v61 = vld [vmem:[%s13716_s17 + $0x548] ss:$48 sps:$4 sm:$0xff]  }
 0x67a   : > { %9034 = vmatprep.subr.bf16.mxu1 %v11831_v1  ;;  %v11907_v1 = vld [vmem:[%s13716_s17 + $0xb48] ss:$48 sps:$4 sm:$0xff]  }
 0x67c   : > { %8994 = vmatpush2.bf16.msra.mxu0 %v11826_v16  ;;  %v11912_v16 = vld [vmem:[%s13716_s17 + $0x4ec] ss:$48 sps:$4 sm:$0xff]  }
 0x67d   : > { %9035 = vmatpush2.bf16.msra.mxu1 %v11829_v17  ;;  %8995 = vmatprep.subr.bf16.mxu0 %v11834_v22  ;;  %v11915_v17 = vld [vmem:[%s13716_s17 + $0xaec] ss:$48 sps:$4 sm:$0xff]   ;;  %v11910_v22 = vld [vmem:[%s13716_s17 + $0x4e8] ss:$48 sps:$4 sm:$0xff]  }
 0x67e   : > { %9036 = vmatprep.subr.bf16.mxu1 %v11837_v23  ;;  %v11913_v23 = vld [vmem:[%s13716_s17 + $0xae8] ss:$48 sps:$4 sm:$0xff]  }
 0x680   : > { %8996 = vmatpush2.bf16.msra.mxu0 %v11832_v25  ;;  %v11918_v25 = vld [vmem:[%s13716_s17 + $0x48c] ss:$48 sps:$4 sm:$0xff]  }
 0x681   : > { %9037 = vmatpush2.bf16.msra.mxu1 %v11835_v3  ;;  %8997 = vmatprep.subr.bf16.mxu0 %v11840_v4  ;;  %v11921_v3 = vld [vmem:[%s13716_s17 + $0xa8c] ss:$48 sps:$4 sm:$0xff]   ;;  %v11916_v4 = vld [vmem:[%s13716_s17 + $0x488] ss:$48 sps:$4 sm:$0xff]  }
 0x682   : > { %9038 = vmatprep.subr.bf16.mxu1 %v11843_v5  ;;  %v11919_v5 = vld [vmem:[%s13716_s17 + $0xa88] ss:$48 sps:$4 sm:$0xff]  }
 0x684   : > { %8998 = vmatpush2.bf16.msra.mxu0 %v11838_v9  ;;  %v11924_v9 = vld [vmem:[%s13716_s17 + $0x42c] ss:$48 sps:$4 sm:$0xff]  }
 0x685   : > { %9039 = vmatpush2.bf16.msra.mxu1 %v11841_v31  ;;  %8999 = vmatprep.subr.bf16.mxu0 %v11846_v33  ;;  %v11927_v31 = vld [vmem:[%s13716_s17 + $0xa2c] ss:$48 sps:$4 sm:$0xff]   ;;  %v11922_v33 = vld [vmem:[%s13716_s17 + $0x428] ss:$48 sps:$4 sm:$0xff]  }
 0x686   : > { %9040 = vmatprep.subr.bf16.mxu1 %v11849_v35  ;;  %v11925_v35 = vld [vmem:[%s13716_s17 + $0xa28] ss:$48 sps:$4 sm:$0xff]  }
 0x688   : > { %9000 = vmatpush2.bf16.msra.mxu0 %v11844_v34  ;;  %v11930_v34 = vld [vmem:[%s13716_s17 + $0x3cc] ss:$48 sps:$4 sm:$0xff]  }
 0x689   : > { %9041 = vmatpush2.bf16.msra.mxu1 %v11847_v46  ;;  %9051 = vmatprep.subr.bf16.mxu0 %v11852_v63  ;;  %v11933_v46 = vld [vmem:[%s13716_s17 + $0x9cc] ss:$48 sps:$4 sm:$0xff]  }
 0x68a   : > { %9092 = vmatprep.subr.bf16.mxu1 %v11855_v52  ;;  %v11936_v63 = vld [vmem:[%s13716_s17 + $0x36c] ss:$48 sps:$4 sm:$0xff]  }
 0x68b   : > { %9002 = vmatmul.mubr.bf16.vlgmr.msra.gmra.mxu0 %v14170_v58  ;;  %v11939_v52 = vld [vmem:[%s13716_s17 + $0x96c] ss:$48 sps:$4 sm:$0xff]  }
 0x68c   : > { %9043 = vmatmul.mubr.bf16.vlgmr.msra.gmra.mxu1 %v14172_v62  ;;  %9052 = vmatpush1.bf16.msra.mxu0 %v11850_v38  ;;  %v11934_v38 = vld [vmem:[%s13716_s17 + $0x368] ss:$48 sps:$4 sm:$0xff]  }
 0x68d   : > { %9093 = vmatpush1.bf16.msra.mxu1 %v11853_v45  ;;  %9053 = vmatprep.subr.bf16.mxu0 %v11858_v12  ;;  %v11937_v45 = vld [vmem:[%s13716_s17 + $0x968] ss:$48 sps:$4 sm:$0xff]   ;;  %v11942_v12 = vld [vmem:[%s13716_s17 + $0x30c] ss:$48 sps:$4 sm:$0xff]  }
 0x68e   : > { %9094 = vmatprep.subr.bf16.mxu1 %v11861_v36  ;;  %9083 = vmatprep.mubr.bf16.mxu0 %v14070_v13  ;;  %v11945_v36 = vld [vmem:[%s13716_s17 + $0x90c] ss:$48 sps:$4 sm:$0xff]  }
 0x68f   : > { %9124 = vmatprep.mubr.bf16.mxu1 %v14073_v15 }
 0x690   : > { %9054 = vmatpush1.bf16.msra.mxu0 %v11856_v37  ;;  %v11940_v37 = vld [vmem:[%s13716_s17 + $0x308] ss:$48 sps:$4 sm:$0xff]  }
 0x691   : > { %9095 = vmatpush1.bf16.msra.mxu1 %v11859_v40  ;;  %9055 = vmatprep.subr.bf16.mxu0 %v11864_v47  ;;  %v11943_v40 = vld [vmem:[%s13716_s17 + $0x908] ss:$48 sps:$4 sm:$0xff]   ;;  %v11948_v47 = vld [vmem:[%s13716_s17 + $0xeac] ss:$48 sps:$4 sm:$0xff]  }
 0x692   : > { %9096 = vmatprep.subr.bf16.mxu1 %v11867_v48  ;;  %v11951_v48 = vld [vmem:[%s13716_s17 + $0x14ac] ss:$48 sps:$4 sm:$0xff]  }
 0x694   : > { %9056 = vmatpush1.bf16.msra.mxu0 %v11862_v24  ;;  %v11946_v24 = vld [vmem:[%s13716_s17 + $0xea8] ss:$48 sps:$4 sm:$0xff]  }
 0x695   : > { %9097 = vmatpush1.bf16.msra.mxu1 %v11865_v26  ;;  %9057 = vmatprep.subr.bf16.mxu0 %v11870_v42  ;;  %v11949_v26 = vld [vmem:[%s13716_s17 + $0x14a8] ss:$48 sps:$4 sm:$0xff]   ;;  %v11954_v42 = vld [vmem:[%s13716_s17 + $0xe4c] ss:$48 sps:$4 sm:$0xff]  }
 0x696   : > { %9098 = vmatprep.subr.bf16.mxu1 %v11873_v57  ;;  %v11957_v57 = vld [vmem:[%s13716_s17 + $0x144c] ss:$48 sps:$4 sm:$0xff]  }
 0x698   : > { %9058 = vmatpush1.bf16.msra.mxu0 %v11868_v44  ;;  %v11952_v44 = vld [vmem:[%s13716_s17 + $0xe48] ss:$48 sps:$4 sm:$0xff]  }
 0x699   : > { %9099 = vmatpush1.bf16.msra.mxu1 %v11871_v50  ;;  %9059 = vmatprep.subr.bf16.mxu0 %v11876_v28  ;;  %v11955_v50 = vld [vmem:[%s13716_s17 + $0x1448] ss:$48 sps:$4 sm:$0xff]   ;;  %v11960_v28 = vld [vmem:[%s13716_s17 + $0xdec] ss:$48 sps:$4 sm:$0xff]  }
 0x69a   : > { %9100 = vmatprep.subr.bf16.mxu1 %v11879_v60  ;;  %v11963_v60 = vld [vmem:[%s13716_s17 + $0x13ec] ss:$48 sps:$4 sm:$0xff]  }
 0x69c   : > { %9060 = vmatpush1.bf16.msra.mxu0 %v11874_v6  ;;  %v11958_v6 = vld [vmem:[%s13716_s17 + $0xde8] ss:$48 sps:$4 sm:$0xff]  }
 0x69d   : > { %9101 = vmatpush1.bf16.msra.mxu1 %v11877_v19  ;;  %9061 = vmatprep.subr.bf16.mxu0 %v11882_v30  ;;  %v11961_v19 = vld [vmem:[%s13716_s17 + $0x13e8] ss:$48 sps:$4 sm:$0xff]   ;;  %v11966_v30 = vld [vmem:[%s13716_s17 + $0xd8c] ss:$48 sps:$4 sm:$0xff]  }
 0x69e   : > { %9102 = vmatprep.subr.bf16.mxu1 %v11885_v27  ;;  %v11969_v27 = vld [vmem:[%s13716_s17 + $0x138c] ss:$48 sps:$4 sm:$0xff]  }
 0x6a0   : > { %9062 = vmatpush1.bf16.msra.mxu0 %v11880_v29  ;;  %v11964_v29 = vld [vmem:[%s13716_s17 + $0xd88] ss:$48 sps:$4 sm:$0xff]  }
 0x6a1   : > { %9103 = vmatpush1.bf16.msra.mxu1 %v11883_v39  ;;  %9063 = vmatprep.subr.bf16.mxu0 %v11888_v20  ;;  %v11967_v39 = vld [vmem:[%s13716_s17 + $0x1388] ss:$48 sps:$4 sm:$0xff]   ;;  %v11972_v20 = vld [vmem:[%s13716_s17 + $0xd2c] ss:$48 sps:$4 sm:$0xff]  }
 0x6a2   : > { %9104 = vmatprep.subr.bf16.mxu1 %v11891_v41  ;;  %v11975_v41 = vld [vmem:[%s13716_s17 + $0x132c] ss:$48 sps:$4 sm:$0xff]  }
 0x6a4   : > { %9064 = vmatpush1.bf16.msra.mxu0 %v11886_v11  ;;  %v11970_v11 = vld [vmem:[%s13716_s17 + $0xd28] ss:$48 sps:$4 sm:$0xff]  }
 0x6a5   : > { %9105 = vmatpush1.bf16.msra.mxu1 %v11889_v0  ;;  %9065 = vmatprep.subr.bf16.mxu0 %v11894_v14  ;;  %v11973_v0 = vld [vmem:[%s13716_s17 + $0x1328] ss:$48 sps:$4 sm:$0xff]   ;;  %v11978_v14 = vld [vmem:[%s13716_s17 + $0xccc] ss:$48 sps:$4 sm:$0xff]  }
 0x6a6   : > { %9106 = vmatprep.subr.bf16.mxu1 %v11897_v18  ;;  %v11981_v18 = vld [vmem:[%s13716_s17 + $0x12cc] ss:$48 sps:$4 sm:$0xff]  }
 0x6a8   : > { %9066 = vmatpush1.bf16.msra.mxu0 %v11892_v21  ;;  %v11976_v21 = vld [vmem:[%s13716_s17 + $0xcc8] ss:$48 sps:$4 sm:$0xff]  }
 0x6a9   : > { %9107 = vmatpush1.bf16.msra.mxu1 %v11895_v59  ;;  %9067 = vmatprep.subr.bf16.mxu0 %v11900_v49  ;;  %v11979_v59 = vld [vmem:[%s13716_s17 + $0x12c8] ss:$48 sps:$4 sm:$0xff]   ;;  %v11984_v49 = vld [vmem:[%s13716_s17 + $0xc6c] ss:$48 sps:$4 sm:$0xff]  }
 0x6aa   : > { %9108 = vmatprep.subr.bf16.mxu1 %v11903_v2  ;;  %v11987_v2 = vld [vmem:[%s13716_s17 + $0x126c] ss:$48 sps:$4 sm:$0xff]  }
 0x6ac   : > { %9068 = vmatpush2.bf16.msra.mxu0 %v11898_v10  ;;  %v11982_v10 = vld [vmem:[%s13716_s17 + $0xc68] ss:$48 sps:$4 sm:$0xff]  }
 0x6ad   : > { %9109 = vmatpush2.bf16.msra.mxu1 %v11901_v53  ;;  %9069 = vmatprep.subr.bf16.mxu0 %v11906_v54  ;;  %v11985_v53 = vld [vmem:[%s13716_s17 + $0x1268] ss:$48 sps:$4 sm:$0xff]   ;;  %v11990_v54 = vld [vmem:[%s13716_s17 + $0xc0c] ss:$48 sps:$4 sm:$0xff]  }
 0x6ae   : > { %9110 = vmatprep.subr.bf16.mxu1 %v11909_v55  ;;  %v11993_v55 = vld [vmem:[%s13716_s17 + $0x120c] ss:$48 sps:$4 sm:$0xff]  }
 0x6b0   : > { %9070 = vmatpush2.bf16.msra.mxu0 %v11904_v61  ;;  %v11988_v61 = vld [vmem:[%s13716_s17 + $0xc08] ss:$48 sps:$4 sm:$0xff]  }
 0x6b1   : > { %9111 = vmatpush2.bf16.msra.mxu1 %v11907_v1  ;;  %9071 = vmatprep.subr.bf16.mxu0 %v11912_v16  ;;  %v11991_v1 = vld [vmem:[%s13716_s17 + $0x1208] ss:$48 sps:$4 sm:$0xff]   ;;  %v11996_v16 = vld [vmem:[%s13716_s17 + $0x11ac] ss:$48 sps:$4 sm:$0xff]  }
 0x6b2   : > { %9112 = vmatprep.subr.bf16.mxu1 %v11915_v17  ;;  %v11999_v17 = vld [vmem:[%s13716_s17 + $0x17ac] ss:$48 sps:$4 sm:$0xff]  }
 0x6b4   : > { %9072 = vmatpush2.bf16.msra.mxu0 %v11910_v22  ;;  %v11994_v22 = vld [vmem:[%s13716_s17 + $0x11a8] ss:$48 sps:$4 sm:$0xff]  }
 0x6b5   : > { %9113 = vmatpush2.bf16.msra.mxu1 %v11913_v23  ;;  %9073 = vmatprep.subr.bf16.mxu0 %v11918_v25  ;;  %v11997_v23 = vld [vmem:[%s13716_s17 + $0x17a8] ss:$48 sps:$4 sm:$0xff]   ;;  %v12002_v25 = vld [vmem:[%s13716_s17 + $0x114c] ss:$48 sps:$4 sm:$0xff]  }
 0x6b6   : > { %9114 = vmatprep.subr.bf16.mxu1 %v11921_v3  ;;  %v12005_v3 = vld [vmem:[%s13716_s17 + $0x174c] ss:$48 sps:$4 sm:$0xff]  }
 0x6b8   : > { %9074 = vmatpush2.bf16.msra.mxu0 %v11916_v4  ;;  %v12000_v4 = vld [vmem:[%s13716_s17 + $0x1148] ss:$48 sps:$4 sm:$0xff]  }
 0x6b9   : > { %9115 = vmatpush2.bf16.msra.mxu1 %v11919_v5  ;;  %9075 = vmatprep.subr.bf16.mxu0 %v11924_v9  ;;  %v12003_v5 = vld [vmem:[%s13716_s17 + $0x1748] ss:$48 sps:$4 sm:$0xff]   ;;  %v12008_v9 = vld [vmem:[%s13716_s17 + $0x10ec] ss:$48 sps:$4 sm:$0xff]  }
 0x6ba   : > { %9116 = vmatprep.subr.bf16.mxu1 %v11927_v31  ;;  %v12011_v31 = vld [vmem:[%s13716_s17 + $0x16ec] ss:$48 sps:$4 sm:$0xff]  }
 0x6bc   : > { %9076 = vmatpush2.bf16.msra.mxu0 %v11922_v33  ;;  %v12006_v33 = vld [vmem:[%s13716_s17 + $0x10e8] ss:$48 sps:$4 sm:$0xff]  }
 0x6bd   : > { %9117 = vmatpush2.bf16.msra.mxu1 %v11925_v35  ;;  %9077 = vmatprep.subr.bf16.mxu0 %v11930_v34  ;;  %v12009_v35 = vld [vmem:[%s13716_s17 + $0x16e8] ss:$48 sps:$4 sm:$0xff]   ;;  %v12014_v34 = vld [vmem:[%s13716_s17 + $0x108c] ss:$48 sps:$4 sm:$0xff]  }
 0x6be   : > { %9118 = vmatprep.subr.bf16.mxu1 %v11933_v46  ;;  %v12017_v46 = vld [vmem:[%s13716_s17 + $0x168c] ss:$48 sps:$4 sm:$0xff]  }
 0x6c0   : > { %9078 = vmatpush2.bf16.msra.mxu0 %v11928_v43  ;;  %v12012_v43 = vld [vmem:[%s13716_s17 + $0x1088] ss:$48 sps:$4 sm:$0xff]  }
 0x6c1   : > { %9119 = vmatpush2.bf16.msra.mxu1 %v11931_v32  ;;  %9079 = vmatprep.subr.bf16.mxu0 %v11936_v63  ;;  %v12015_v32 = vld [vmem:[%s13716_s17 + $0x1688] ss:$48 sps:$4 sm:$0xff]   ;;  %v12020_v63 = vld [vmem:[%s13716_s17 + $0x102c] ss:$48 sps:$4 sm:$0xff]  }
 0x6c2   : > { %9120 = vmatprep.subr.bf16.mxu1 %v11939_v52  ;;  %v12023_v52 = vld [vmem:[%s13716_s17 + $0x162c] ss:$48 sps:$4 sm:$0xff]  }
 0x6c4   : > { %9080 = vmatpush2.bf16.msra.mxu0 %v11934_v38  ;;  %v12018_v38 = vld [vmem:[%s13716_s17 + $0x1028] ss:$48 sps:$4 sm:$0xff]  }
 0x6c5   : > { %9121 = vmatpush2.bf16.msra.mxu1 %v11937_v45  ;;  %9081 = vmatprep.subr.bf16.mxu0 %v11942_v12  ;;  %v12021_v45 = vld [vmem:[%s13716_s17 + $0x1628] ss:$48 sps:$4 sm:$0xff]   ;;  %v12026_v12 = vld [vmem:[%s13716_s17 + $0xfcc] ss:$48 sps:$4 sm:$0xff]  }
 0x6c6   : > { %9122 = vmatprep.subr.bf16.mxu1 %v11945_v36  ;;  %v12029_v36 = vld [vmem:[%s13716_s17 + $0x15cc] ss:$48 sps:$4 sm:$0xff]  }
 0x6c8   : > { %9082 = vmatpush2.bf16.msra.mxu0 %v11940_v37  ;;  %v12024_v37 = vld [vmem:[%s13716_s17 + $0xfc8] ss:$48 sps:$4 sm:$0xff]  }
 0x6c9   : > { %9123 = vmatpush2.bf16.msra.mxu1 %v11943_v40  ;;  %9133 = vmatprep.subr.bf16.mxu0 %v11948_v47  ;;  %v12027_v40 = vld [vmem:[%s13716_s17 + $0x15c8] ss:$48 sps:$4 sm:$0xff]   ;;  %v12032_v47 = vld [vmem:[%s13716_s17 + $0xf6c] ss:$48 sps:$4 sm:$0xff]  }
 0x6ca   : > { %9174 = vmatprep.subr.bf16.mxu1 %v11951_v48  ;;  %v12035_v48 = vld [vmem:[%s13716_s17 + $0x156c] ss:$48 sps:$4 sm:$0xff]  }
 0x6cb   : > { %9084 = vmatmul.mubr.bf16.vlgmr.msra.gmra.mxu0 %v14094_v7 }
 0x6cc   : > { %9125 = vmatmul.mubr.bf16.vlgmr.msra.gmra.mxu1 %v14096_v8  ;;  %9134 = vmatpush1.bf16.msra.mxu0 %v11946_v24  ;;  %v12030_v24 = vld [vmem:[%s13716_s17 + $0xf68] ss:$48 sps:$4 sm:$0xff]  }
 0x6cd   : > { %9175 = vmatpush1.bf16.msra.mxu1 %v11949_v26  ;;  %9135 = vmatprep.subr.bf16.mxu0 %v11954_v42  ;;  %v12033_v26 = vld [vmem:[%s13716_s17 + $0x1568] ss:$48 sps:$4 sm:$0xff]   ;;  %v12038_v42 = vld [vmem:[%s13716_s17 + $0xf0c] ss:$48 sps:$4 sm:$0xff]  }
 0x6ce   : > { %9176 = vmatprep.subr.bf16.mxu1 %v11957_v57  ;;  %9165 = vmatprep.mubr.bf16.mxu0 %v14126_v51  ;;  %v12041_v57 = vld [vmem:[%s13716_s17 + $0x150c] ss:$48 sps:$4 sm:$0xff]  }
 0x6cf   : > { %9206 = vmatprep.mubr.bf16.mxu1 %v14129_v56 }
 0x6d0   : > { %9136 = vmatpush1.bf16.msra.mxu0 %v11952_v44  ;;  %v12036_v44 = vld [vmem:[%s13716_s17 + $0xf08] ss:$48 sps:$4 sm:$0xff]  }
 0x6d1   : > { %9177 = vmatpush1.bf16.msra.mxu1 %v11955_v50  ;;  %9137 = vmatprep.subr.bf16.mxu0 %v11960_v28  ;;  %v12039_v50 = vld [vmem:[%s13716_s17 + $0x1508] ss:$48 sps:$4 sm:$0xff]   ;;  %v12044_v28 = vld [vmem:[%s13716_s17 + $0x2b4] ss:$48 sps:$4 sm:$0xff]  }
 0x6d2   : > { %9178 = vmatprep.subr.bf16.mxu1 %v11963_v60  ;;  %v12047_v60 = vld [vmem:[%s13716_s17 + $0x8b4] ss:$48 sps:$4 sm:$0xff]  }
 0x6d4   : > { %9138 = vmatpush1.bf16.msra.mxu0 %v11958_v6  ;;  %v12042_v6 = vld [vmem:[%s13716_s17 + $0x2b0] ss:$48 sps:$4 sm:$0xff]  }
 0x6d5   : > { %9179 = vmatpush1.bf16.msra.mxu1 %v11961_v19  ;;  %9139 = vmatprep.subr.bf16.mxu0 %v11966_v30  ;;  %v12045_v19 = vld [vmem:[%s13716_s17 + $0x8b0] ss:$48 sps:$4 sm:$0xff]   ;;  %v12050_v30 = vld [vmem:[%s13716_s17 + $0x254] ss:$48 sps:$4 sm:$0xff]  }
 0x6d6   : > { %9180 = vmatprep.subr.bf16.mxu1 %v11969_v27  ;;  %v12053_v27 = vld [vmem:[%s13716_s17 + $0x854] ss:$48 sps:$4 sm:$0xff]  }
 0x6d8   : > { %9140 = vmatpush1.bf16.msra.mxu0 %v11964_v29 }
 0x6d9   : > { %9181 = vmatpush1.bf16.msra.mxu1 %v11967_v39  ;;  %9141 = vmatprep.subr.bf16.mxu0 %v11972_v20  ;;  %v12048_v20 = vld [vmem:[%s13716_s17 + $0x250] ss:$48 sps:$4 sm:$0xff]  }
 0x6da   : > { %9182 = vmatprep.subr.bf16.mxu1 %v11975_v41  ;;  %v12051_v41 = vld [vmem:[%s13716_s17 + $0x850] ss:$48 sps:$4 sm:$0xff]  }
 0x6dc   : > { %9142 = vmatpush1.bf16.msra.mxu0 %v11970_v11 }
 0x6dd   : > { %9183 = vmatpush1.bf16.msra.mxu1 %v11973_v0  ;;  %9143 = vmatprep.subr.bf16.mxu0 %v11978_v14  ;;  %v12056_v14 = vld [vmem:[%s13716_s17 + $0x1f4] ss:$48 sps:$4 sm:$0xff]  }
 0x6de   : > { %9184 = vmatprep.subr.bf16.mxu1 %v11981_v18  ;;  %v12059_v18 = vld [vmem:[%s13716_s17 + $0x7f4] ss:$48 sps:$4 sm:$0xff]  }
 0x6e0   : > { %9144 = vmatpush1.bf16.msra.mxu0 %v11976_v21 }
 0x6e1   : > { %9185 = vmatpush1.bf16.msra.mxu1 %v11979_v59  ;;  %9145 = vmatprep.subr.bf16.mxu0 %v11984_v49  ;;  %v12054_v49 = vld [vmem:[%s13716_s17 + $0x1f0] ss:$48 sps:$4 sm:$0xff]  }
 0x6e2   : > { %9186 = vmatprep.subr.bf16.mxu1 %v11987_v2  ;;  %v12057_v2 = vld [vmem:[%s13716_s17 + $0x7f0] ss:$48 sps:$4 sm:$0xff]  }
 0x6e4   : > { %9146 = vmatpush1.bf16.msra.mxu0 %v11982_v10 }
 0x6e5   : > { %9187 = vmatpush1.bf16.msra.mxu1 %v11985_v53  ;;  %9147 = vmatprep.subr.bf16.mxu0 %v11990_v54  ;;  %v12062_v54 = vld [vmem:[%s13716_s17 + $0x194] ss:$48 sps:$4 sm:$0xff]  }
 0x6e6   : > { %9188 = vmatprep.subr.bf16.mxu1 %v11993_v55  ;;  %v12065_v55 = vld [vmem:[%s13716_s17 + $0x794] ss:$48 sps:$4 sm:$0xff]  }
 0x6e8   : > { %9148 = vmatpush1.bf16.msra.mxu0 %v11988_v61  ;;  %v12060_v61 = vld [vmem:[%s13716_s17 + $0x190] ss:$48 sps:$4 sm:$0xff]  }
 0x6e9   : > { %9189 = vmatpush1.bf16.msra.mxu1 %v11991_v1  ;;  %9149 = vmatprep.subr.bf16.mxu0 %v11996_v16  ;;  %v12063_v1 = vld [vmem:[%s13716_s17 + $0x790] ss:$48 sps:$4 sm:$0xff]   ;;  %v12068_v16 = vld [vmem:[%s13716_s17 + $0x134] ss:$48 sps:$4 sm:$0xff]  }
 0x6ea   : > { %9190 = vmatprep.subr.bf16.mxu1 %v11999_v17  ;;  %v12071_v17 = vld [vmem:[%s13716_s17 + $0x734] ss:$48 sps:$4 sm:$0xff]  }
 0x6ec   : > { %9150 = vmatpush2.bf16.msra.mxu0 %v11994_v22  ;;  %v12066_v22 = vld [vmem:[%s13716_s17 + $0x130] ss:$48 sps:$4 sm:$0xff]  }
 0x6ed   : > { %9191 = vmatpush2.bf16.msra.mxu1 %v11997_v23  ;;  %9151 = vmatprep.subr.bf16.mxu0 %v12002_v25  ;;  %v12069_v23 = vld [vmem:[%s13716_s17 + $0x730] ss:$48 sps:$4 sm:$0xff]   ;;  %v12074_v25 = vld [vmem:[%s13716_s17 + $0xd4] ss:$48 sps:$4 sm:$0xff]  }
 0x6ee   : > { %9192 = vmatprep.subr.bf16.mxu1 %v12005_v3  ;;  %v12077_v3 = vld [vmem:[%s13716_s17 + $0x6d4] ss:$48 sps:$4 sm:$0xff]  }
 0x6f0   : > { %9152 = vmatpush2.bf16.msra.mxu0 %v12000_v4  ;;  %v12072_v4 = vld [vmem:[%s13716_s17 + $0xd0] ss:$48 sps:$4 sm:$0xff]  }
 0x6f1   : > { %9193 = vmatpush2.bf16.msra.mxu1 %v12003_v5  ;;  %9153 = vmatprep.subr.bf16.mxu0 %v12008_v9  ;;  %v12075_v5 = vld [vmem:[%s13716_s17 + $0x6d0] ss:$48 sps:$4 sm:$0xff]   ;;  %v12080_v9 = vld [vmem:[%s13716_s17 + $0x74] ss:$48 sps:$4 sm:$0xff]  }
 0x6f2   : > { %9194 = vmatprep.subr.bf16.mxu1 %v12011_v31  ;;  %v12083_v31 = vld [vmem:[%s13716_s17 + $0x674] ss:$48 sps:$4 sm:$0xff]  }
 0x6f4   : > { %9154 = vmatpush2.bf16.msra.mxu0 %v12006_v33  ;;  %v12078_v33 = vld [vmem:[%s13716_s17 + $0x70] ss:$48 sps:$4 sm:$0xff]  }
 0x6f5   : > { %9195 = vmatpush2.bf16.msra.mxu1 %v12009_v35  ;;  %9155 = vmatprep.subr.bf16.mxu0 %v12014_v34  ;;  %v12081_v35 = vld [vmem:[%s13716_s17 + $0x670] ss:$48 sps:$4 sm:$0xff]   ;;  %v12086_v34 = vld [vmem:[%s13716_s17 + $0x14] ss:$48 sps:$4 sm:$0xff]  }
 0x6f6   : > { %9196 = vmatprep.subr.bf16.mxu1 %v12017_v46  ;;  %v12089_v46 = vld [vmem:[%s13716_s17 + $0x614] ss:$48 sps:$4 sm:$0xff]  }
 0x6f8   : > { %9156 = vmatpush2.bf16.msra.mxu0 %v12012_v43  ;;  %v12084_v43 = vld [vmem:[%s13716_s17 + $0x10] ss:$48 sps:$4 sm:$0xff]  }
 0x6f9   : > { %9197 = vmatpush2.bf16.msra.mxu1 %v12015_v32  ;;  %9157 = vmatprep.subr.bf16.mxu0 %v12020_v63  ;;  %v12087_v32 = vld [vmem:[%s13716_s17 + $0x610] ss:$48 sps:$4 sm:$0xff]   ;;  %v12092_v63 = vld [vmem:[%s13716_s17 + $0x5b4] ss:$48 sps:$4 sm:$0xff]  }
 0x6fa   : > { %9198 = vmatprep.subr.bf16.mxu1 %v12023_v52  ;;  %v12095_v52 = vld [vmem:[%s13716_s17 + $0xbb4] ss:$48 sps:$4 sm:$0xff]  }
 0x6fc   : > { %9158 = vmatpush2.bf16.msra.mxu0 %v12018_v38  ;;  %v12090_v38 = vld [vmem:[%s13716_s17 + $0x5b0] ss:$48 sps:$4 sm:$0xff]  }
 0x6fd   : > { %9199 = vmatpush2.bf16.msra.mxu1 %v12021_v45  ;;  %9159 = vmatprep.subr.bf16.mxu0 %v12026_v12  ;;  %v12093_v45 = vld [vmem:[%s13716_s17 + $0xbb0] ss:$48 sps:$4 sm:$0xff]   ;;  %v12098_v12 = vld [vmem:[%s13716_s17 + $0x554] ss:$48 sps:$4 sm:$0xff]  }
 0x6fe   : > { %9200 = vmatprep.subr.bf16.mxu1 %v12029_v36  ;;  %v12101_v36 = vld [vmem:[%s13716_s17 + $0xb54] ss:$48 sps:$4 sm:$0xff]  }
 0x700   : > { %9160 = vmatpush2.bf16.msra.mxu0 %v12024_v37  ;;  %v12096_v37 = vld [vmem:[%s13716_s17 + $0x550] ss:$48 sps:$4 sm:$0xff]  }
 0x701   : > { %9201 = vmatpush2.bf16.msra.mxu1 %v12027_v40  ;;  %9161 = vmatprep.subr.bf16.mxu0 %v12032_v47  ;;  %v12099_v40 = vld [vmem:[%s13716_s17 + $0xb50] ss:$48 sps:$4 sm:$0xff]   ;;  %v12104_v47 = vld [vmem:[%s13716_s17 + $0x4f4] ss:$48 sps:$4 sm:$0xff]  }
 0x702   : > { %9202 = vmatprep.subr.bf16.mxu1 %v12035_v48  ;;  %v12107_v48 = vld [vmem:[%s13716_s17 + $0xaf4] ss:$48 sps:$4 sm:$0xff]  }
 0x704   : > { %9162 = vmatpush2.bf16.msra.mxu0 %v12030_v24  ;;  %v12102_v24 = vld [vmem:[%s13716_s17 + $0x4f0] ss:$48 sps:$4 sm:$0xff]  }
 0x705   : > { %9203 = vmatpush2.bf16.msra.mxu1 %v12033_v26  ;;  %9163 = vmatprep.subr.bf16.mxu0 %v12038_v42  ;;  %v12105_v26 = vld [vmem:[%s13716_s17 + $0xaf0] ss:$48 sps:$4 sm:$0xff]   ;;  %v12110_v42 = vld [vmem:[%s13716_s17 + $0x494] ss:$48 sps:$4 sm:$0xff]  }
 0x706   : > { %9204 = vmatprep.subr.bf16.mxu1 %v12041_v57  ;;  %v12113_v57 = vld [vmem:[%s13716_s17 + $0xa94] ss:$48 sps:$4 sm:$0xff]  }
 0x708   : > { %9164 = vmatpush2.bf16.msra.mxu0 %v12036_v44  ;;  %v12108_v44 = vld [vmem:[%s13716_s17 + $0x490] ss:$48 sps:$4 sm:$0xff]  }
 0x709   : > { %9205 = vmatpush2.bf16.msra.mxu1 %v12039_v50  ;;  %9215 = vmatprep.subr.bf16.mxu0 %v12044_v28  ;;  %v12111_v50 = vld [vmem:[%s13716_s17 + $0xa90] ss:$48 sps:$4 sm:$0xff]   ;;  %v12116_v28 = vld [vmem:[%s13716_s17 + $0x434] ss:$48 sps:$4 sm:$0xff]  }
 0x70a   : > { %9256 = vmatprep.subr.bf16.mxu1 %v12047_v60  ;;  %v12119_v60 = vld [vmem:[%s13716_s17 + $0xa34] ss:$48 sps:$4 sm:$0xff]  }
 0x70b   : > { %v14314_v29 = vpop.f32.mrf.mxu0  ;;  %9166 = vmatmul.mubr.bf16.vlgmr.msra.gmra.mxu0 %v14170_v58 }
 0x70c   : > { %v14316_v39 = vpop.f32.mrf.mxu1  ;;  %9207 = vmatmul.mubr.bf16.vlgmr.msra.gmra.mxu1 %v14172_v62  ;;  %9216 = vmatpush1.bf16.msra.mxu0 %v12042_v6  ;;  %v4987_v6 = vlaneseq }
 0x70d   : > { %9257 = vmatpush1.bf16.msra.mxu1 %v12045_v19  ;;  %v14322_v11 = vpop.f32.mrf.mxu0  ;;  %9217 = vmatprep.subr.bf16.mxu0 %v12050_v30  ;;  %v12114_v19 = vld [vmem:[%s13716_s17 + $0x430] ss:$48 sps:$4 sm:$0xff]  }
 0x70e   : > { %v14324_v0 = vpop.f32.mrf.mxu1  ;;  %9258 = vmatprep.subr.bf16.mxu1 %v12053_v27  ;;  %9247 = vmatprep.mubr.bf16.mxu0 %v14070_v13  ;;  %v12117_v30 = vld [vmem:[%s13716_s17 + $0xa30] ss:$48 sps:$4 sm:$0xff]   ;;  %v12122_v27 = vld [vmem:[%s13716_s17 + $0x3d4] ss:$48 sps:$4 sm:$0xff]  }
 0x70f   : > { %9288 = vmatprep.mubr.bf16.mxu1 %v14073_v15  ;;  %v8925_v21 = vpop.f32.mrf.mxu0 }
 0x710   : > { %v8966_v59 = vpop.f32.mrf.mxu1  ;;  %9218 = vmatpush1.bf16.msra.mxu0 %v12048_v20  ;;  %v12125_v20 = vld [vmem:[%s13716_s17 + $0x9d4] ss:$48 sps:$4 sm:$0xff]  }
 0x711   : > { %9259 = vmatpush1.bf16.msra.mxu1 %v12051_v41  ;;  %v8926_v10 = vpop.f32.mrf.mxu0  ;;  %9219 = vmatprep.subr.bf16.mxu0 %v12056_v14  ;;  %v14374_v41 = vshrl.u32 %v4987_v6, 7  ;;  %v12120_v14 = vld [vmem:[%s13716_s17 + $0x3d0] ss:$48 sps:$4 sm:$0xff]   ;;  %v12128_v59 = vld [vmem:[%s13716_s17 + $0x374] ss:$48 sps:$4 sm:$0xff]  }
 0x712   : > { %v8967_v53 = vpop.f32.mrf.mxu1  ;;  %9260 = vmatprep.subr.bf16.mxu1 %v12059_v18  ;;  %v12123_v18 = vld [vmem:[%s13716_s17 + $0x9d0] ss:$48 sps:$4 sm:$0xff]  }
 0x713   : > { %v4983_v21 = vld [vmem:[%s13728_s27] sm:$0xff]  ;;  %v4993_v10 = vsub.s32 1, %v14374_v41 }
 0x714   : > { %9220 = vmatpush1.bf16.msra.mxu0 %v12054_v49  ;;  %v12131_v49 = vld [vmem:[%s13716_s17 + $0x974] ss:$48 sps:$4 sm:$0xff]   ;;  %v12126_v53 = vld [vmem:[%s13716_s17 + $0x370] ss:$48 sps:$4 sm:$0xff]  }
 0x715   : > { %9261 = vmatpush1.bf16.msra.mxu1 %v12057_v2  ;;  %9221 = vmatprep.subr.bf16.mxu0 %v12062_v54  ;;  %v4989_v2 = vsub.s32 0, %v14374_v41  ;;  %v12129_v54 = vld [vmem:[%s13716_s17 + $0x970] ss:$48 sps:$4 sm:$0xff]  }
 0x716   : > { %9262 = vmatprep.subr.bf16.mxu1 %v12065_v55  ;;  %v12134_v55 = vld [vmem:[%s13716_s17 + $0x314] ss:$48 sps:$4 sm:$0xff]   ;;  %v12165_v6 = vld [vmem:[%s13716_s17 + $0x1330] ss:$48 sps:$4 sm:$0xff]  }
 0x718   : > { %9222 = vmatpush1.bf16.msra.mxu0 %v12060_v61  ;;  %v12137_v61 = vld [vmem:[%s13716_s17 + $0x914] ss:$48 sps:$4 sm:$0xff]  }
 0x719   : > { %9263 = vmatpush1.bf16.msra.mxu1 %v12063_v1  ;;  %9223 = vmatprep.subr.bf16.mxu0 %v12068_v16  ;;  %v4990_v1 = vrot.slane %v4983_v21, %v4989_v2  ;;  %v4994_v16 = vrot.slane %v4983_v21, %v4993_v10  ;;  %v12179_v21 = vld [vmem:[%s13716_s17 + $0x1274] ss:$48 sps:$4 sm:$0xff]  }
 0x71a   : > { %9264 = vmatprep.subr.bf16.mxu1 %v12071_v17  ;;  %v12132_v17 = vld [vmem:[%s13716_s17 + $0x310] ss:$48 sps:$4 sm:$0xff]  }
 0x71c   : > { %9224 = vmatpush1.bf16.msra.mxu0 %v12066_v22  ;;  %v12135_v22 = vld [vmem:[%s13716_s17 + $0x910] ss:$48 sps:$4 sm:$0xff]  }
 0x71d   : > { %9265 = vmatpush1.bf16.msra.mxu1 %v12069_v23  ;;  %9225 = vmatprep.subr.bf16.mxu0 %v12074_v25  ;;  %v12140_v23 = vld [vmem:[%s13716_s17 + $0xeb4] ss:$48 sps:$4 sm:$0xff]  }
 0x71e   : > { %9266 = vmatprep.subr.bf16.mxu1 %v12077_v3  ;;  %v12143_v25 = vld [vmem:[%s13716_s17 + $0x14b4] ss:$48 sps:$4 sm:$0xff]   ;;  %v8922_v3 = vadd.f32 %v14314_v29, %v4990_v1  ;;  %v12183_v1 = vld [vmem:[%s13716_s17 + $0x1210] ss:$48 sps:$4 sm:$0xff]  }
 0x720   : > { %9226 = vmatpush1.bf16.msra.mxu0 %v12072_v4  ;;  %v12138_v4 = vld [vmem:[%s13716_s17 + $0xeb0] ss:$48 sps:$4 sm:$0xff]  }
 0x721   : > { %9267 = vmatpush1.bf16.msra.mxu1 %v12075_v5  ;;  %9227 = vmatprep.subr.bf16.mxu0 %v12080_v9  ;;  %v12141_v5 = vld [vmem:[%s13716_s17 + $0x14b0] ss:$48 sps:$4 sm:$0xff]   ;;  %v8924_v9 = vadd.f32 %v14322_v11, %v4994_v16  ;;  %v12188_v16 = vld [vmem:[%s13716_s17 + $0x11b4] ss:$48 sps:$4 sm:$0xff]  }
 0x722   : > { %9268 = vmatprep.subr.bf16.mxu1 %v12083_v31  ;;  %v12146_v31 = vld [vmem:[%s13716_s17 + $0xe54] ss:$48 sps:$4 sm:$0xff]  }
 0x723   : > { %v8965_v29 = vadd.f32 %v14324_v0, %v8924_v9  ;;  %v12200_v9 = vld [vmem:[%s13716_s17 + $0x10f4] ss:$48 sps:$4 sm:$0xff]  }
 0x724   : > { %9228 = vmatpush1.bf16.msra.mxu0 %v12078_v33  ;;  %v12149_v33 = vld [vmem:[%s13716_s17 + $0x1454] ss:$48 sps:$4 sm:$0xff]  }
 0x725   : > { %9269 = vmatpush1.bf16.msra.mxu1 %v12081_v35  ;;  %9229 = vmatprep.subr.bf16.mxu0 %v12086_v34  ;;  %v8963_v35 = vadd.f32 %v14316_v39, %v8922_v3  ;;  %v12144_v34 = vld [vmem:[%s13716_s17 + $0xe50] ss:$48 sps:$4 sm:$0xff]   ;;  %v12152_v39 = vld [vmem:[%s13716_s17 + $0xdf4] ss:$48 sps:$4 sm:$0xff]  }
 0x726   : > { %9270 = vmatprep.subr.bf16.mxu1 %v12089_v46  ;;  %v12147_v46 = vld [vmem:[%s13716_s17 + $0x1450] ss:$48 sps:$4 sm:$0xff]   ;;  %v12197_v3 = vld [vmem:[%s13716_s17 + $0x1754] ss:$48 sps:$4 sm:$0xff]  }
 0x728   : > { %9230 = vmatpush1.bf16.msra.mxu0 %v12084_v43 }
 0x729   : > { %9271 = vmatpush1.bf16.msra.mxu1 %v12087_v32  ;;  %9231 = vmatprep.subr.bf16.mxu0 %v12092_v63 }
 0x72a   : > { %9272 = vmatprep.subr.bf16.mxu1 %v12095_v52 }
 0x72c   : > { %9232 = vmatpush2.bf16.msra.mxu0 %v12090_v38  ;;  %v12155_v38 = vld [vmem:[%s13716_s17 + $0x13f4] ss:$48 sps:$4 sm:$0xff]  }
 0x72d   : > { %9273 = vmatpush2.bf16.msra.mxu1 %v12093_v45  ;;  %9233 = vmatprep.subr.bf16.mxu0 %v12098_v12 }
 0x72e   : > { %9274 = vmatprep.subr.bf16.mxu1 %v12101_v36  ;;  %v12150_v36 = vld [vmem:[%s13716_s17 + $0xdf0] ss:$48 sps:$4 sm:$0xff]  }
 0x730   : > { %9234 = vmatpush2.bf16.msra.mxu0 %v12096_v37  ;;  %v12153_v37 = vld [vmem:[%s13716_s17 + $0x13f0] ss:$48 sps:$4 sm:$0xff]  }
 0x731   : > { %9275 = vmatpush2.bf16.msra.mxu1 %v12099_v40  ;;  %9235 = vmatprep.subr.bf16.mxu0 %v12104_v47 }
 0x732   : > { %9276 = vmatprep.subr.bf16.mxu1 %v12107_v48 }
 0x734   : > { %9236 = vmatpush2.bf16.msra.mxu0 %v12102_v24 }
 0x735   : > { %9277 = vmatpush2.bf16.msra.mxu1 %v12105_v26  ;;  %9237 = vmatprep.subr.bf16.mxu0 %v12110_v42  ;;  %v12158_v26 = vld [vmem:[%s13716_s17 + $0xd94] ss:$48 sps:$4 sm:$0xff]  }
 0x736   : > { %9278 = vmatprep.subr.bf16.mxu1 %v12113_v57  ;;  %v12161_v42 = vld [vmem:[%s13716_s17 + $0x1394] ss:$48 sps:$4 sm:$0xff]   ;;  %v12156_v57 = vld [vmem:[%s13716_s17 + $0xd90] ss:$48 sps:$4 sm:$0xff]  }
 0x738   : > { %9238 = vmatpush2.bf16.msra.mxu0 %v12108_v44  ;;  %v12159_v44 = vld [vmem:[%s13716_s17 + $0x1390] ss:$48 sps:$4 sm:$0xff]  }
 0x739   : > { %9279 = vmatpush2.bf16.msra.mxu1 %v12111_v50  ;;  %9239 = vmatprep.subr.bf16.mxu0 %v12116_v28  ;;  %v12164_v50 = vld [vmem:[%s13716_s17 + $0xd34] ss:$48 sps:$4 sm:$0xff]  }
 0x73a   : > { %9280 = vmatprep.subr.bf16.mxu1 %v12119_v60  ;;  %v12167_v28 = vld [vmem:[%s13716_s17 + $0x1334] ss:$48 sps:$4 sm:$0xff]   ;;  %v12162_v60 = vld [vmem:[%s13716_s17 + $0xd30] ss:$48 sps:$4 sm:$0xff]  }
 0x73c   : > { %9240 = vmatpush2.bf16.msra.mxu0 %v12114_v19  ;;  %v12170_v19 = vld [vmem:[%s13716_s17 + $0xcd4] ss:$48 sps:$4 sm:$0xff]  }
 0x73d   : > { %9281 = vmatpush2.bf16.msra.mxu1 %v12117_v30  ;;  %9241 = vmatprep.subr.bf16.mxu0 %v12122_v27  ;;  %v12173_v30 = vld [vmem:[%s13716_s17 + $0x12d4] ss:$48 sps:$4 sm:$0xff]   ;;  %v12168_v27 = vld [vmem:[%s13716_s17 + $0xcd0] ss:$48 sps:$4 sm:$0xff]  }
 0x73e   : > { %9282 = vmatprep.subr.bf16.mxu1 %v12125_v20  ;;  %v12171_v20 = vld [vmem:[%s13716_s17 + $0x12d0] ss:$48 sps:$4 sm:$0xff]  }
 0x740   : > { %9242 = vmatpush2.bf16.msra.mxu0 %v12120_v14 }
 0x741   : > { %9283 = vmatpush2.bf16.msra.mxu1 %v12123_v18  ;;  %9243 = vmatprep.subr.bf16.mxu0 %v12128_v59  ;;  %v12176_v18 = vld [vmem:[%s13716_s17 + $0xc74] ss:$48 sps:$4 sm:$0xff]  }
 0x742   : > { %9284 = vmatprep.subr.bf16.mxu1 %v12131_v49  ;;  %v12174_v49 = vld [vmem:[%s13716_s17 + $0xc70] ss:$48 sps:$4 sm:$0xff]  }
 0x744   : > { %9244 = vmatpush2.bf16.msra.mxu0 %v12126_v53  ;;  %v12177_v53 = vld [vmem:[%s13716_s17 + $0x1270] ss:$48 sps:$4 sm:$0xff]  }
 0x745   : > { %9285 = vmatpush2.bf16.msra.mxu1 %v12129_v54  ;;  %9245 = vmatprep.subr.bf16.mxu0 %v12134_v55  ;;  %v12182_v54 = vld [vmem:[%s13716_s17 + $0xc14] ss:$48 sps:$4 sm:$0xff]  }
 0x746   : > { %9286 = vmatprep.subr.bf16.mxu1 %v12137_v61  ;;  %v12185_v55 = vld [vmem:[%s13716_s17 + $0x1214] ss:$48 sps:$4 sm:$0xff]   ;;  %v12180_v61 = vld [vmem:[%s13716_s17 + $0xc10] ss:$48 sps:$4 sm:$0xff]  }
 0x748   : > { %9246 = vmatpush2.bf16.msra.mxu0 %v12132_v17  ;;  %v12191_v17 = vld [vmem:[%s13716_s17 + $0x17b4] ss:$48 sps:$4 sm:$0xff]  }
 0x749   : > { %9287 = vmatpush2.bf16.msra.mxu1 %v12135_v22  ;;  %9297 = vmatprep.subr.bf16.mxu0 %v12140_v23  ;;  %v12186_v22 = vld [vmem:[%s13716_s17 + $0x11b0] ss:$48 sps:$4 sm:$0xff]  }
 0x74a   : > { %9338 = vmatprep.subr.bf16.mxu1 %v12143_v25  ;;  %v12189_v23 = vld [vmem:[%s13716_s17 + $0x17b0] ss:$48 sps:$4 sm:$0xff]   ;;  %v12194_v25 = vld [vmem:[%s13716_s17 + $0x1154] ss:$48 sps:$4 sm:$0xff]  }
 0x74b   : > { %v9003_v43 = vpop.f32.mrf.mxu0  ;;  %9248 = vmatmul.mubr.bf16.vlgmr.msra.gmra.mxu0 %v14094_v7 }
 0x74c   : > { %v9044_v32 = vpop.f32.mrf.mxu1  ;;  %9289 = vmatmul.mubr.bf16.vlgmr.msra.gmra.mxu1 %v14096_v8  ;;  %v9004_v11 = vadd.f32 %v9003_v43, %v8963_v35  ;;  %9298 = vmatpush1.bf16.msra.mxu0 %v12138_v4  ;;  %v12192_v4 = vld [vmem:[%s13716_s17 + $0x1150] ss:$48 sps:$4 sm:$0xff]  }
 0x74d   : > { %9339 = vmatpush1.bf16.msra.mxu1 %v12141_v5  ;;  %v9005_v63 = vpop.f32.mrf.mxu0  ;;  %9299 = vmatprep.subr.bf16.mxu0 %v12146_v31  ;;  %v12195_v5 = vld [vmem:[%s13716_s17 + $0x1750] ss:$48 sps:$4 sm:$0xff]   ;;  %v12203_v31 = vld [vmem:[%s13716_s17 + $0x16f4] ss:$48 sps:$4 sm:$0xff]  }
 0x74e   : > { %v9046_v52 = vpop.f32.mrf.mxu1  ;;  %9340 = vmatprep.subr.bf16.mxu1 %v12149_v33  ;;  %v9045_v45 = vadd.f32 %v9044_v32, %v9004_v11  ;;  %v9006_v12 = vadd.f32 %v9005_v63, %v8965_v29  ;;  %9329 = vmatprep.mubr.bf16.mxu0 %v14126_v51  ;;  %v12198_v33 = vld [vmem:[%s13716_s17 + $0x10f0] ss:$48 sps:$4 sm:$0xff]   ;;  %v12212_v29 = vld [vmem:[%s13716_s17 + $0x1034] ss:$48 sps:$4 sm:$0xff]  }
 0x74f   : > { %9370 = vmatprep.mubr.bf16.mxu1 %v14129_v56  ;;  %v9007_v0 = vpop.f32.mrf.mxu0  ;;  %v12201_v35 = vld [vmem:[%s13716_s17 + $0x16f0] ss:$48 sps:$4 sm:$0xff]   ;;  %v12215_v11 = vld [vmem:[%s13716_s17 + $0x1634] ss:$48 sps:$4 sm:$0xff]  }
 0x750   : > { %v9048_v40 = vpop.f32.mrf.mxu1  ;;  %12810 = vtanh.f32 %v9045_v45  ;;  %v9047_v47 = vadd.f32 %v9046_v52, %v9006_v12  ;;  %9300 = vmatpush1.bf16.msra.mxu0 %v12144_v34  ;;  %v12206_v34 = vld [vmem:[%s13716_s17 + $0x1094] ss:$48 sps:$4 sm:$0xff]   ;;  %v12204_v43 = vld [vmem:[%s13716_s17 + $0x1090] ss:$48 sps:$4 sm:$0xff]  }
 0x751   : > { %9341 = vmatpush1.bf16.msra.mxu1 %v12147_v46  ;;  %v9008_v48 = vpop.f32.mrf.mxu0  ;;  %9301 = vmatprep.subr.bf16.mxu0 %v12152_v39  ;;  %v12209_v46 = vld [vmem:[%s13716_s17 + $0x1694] ss:$48 sps:$4 sm:$0xff]   ;;  %v12207_v32 = vld [vmem:[%s13716_s17 + $0x1690] ss:$48 sps:$4 sm:$0xff]  }
 0x752   : > { %v9049_v24 = vpop.f32.mrf.mxu1  ;;  %9342 = vmatprep.subr.bf16.mxu1 %v12155_v38  ;;  %12812 = vtanh.f32 %v9047_v47  ;;  %v12210_v63 = vld [vmem:[%s13716_s17 + $0x1030] ss:$48 sps:$4 sm:$0xff]   ;;  %v12218_v39 = vld [vmem:[%s13716_s17 + $0xfd4] ss:$48 sps:$4 sm:$0xff]  }
 0x753   : > { %v12213_v52 = vld [vmem:[%s13716_s17 + $0x1630] ss:$48 sps:$4 sm:$0xff]   ;;  %v12221_v38 = vld [vmem:[%s13716_s17 + $0x15d4] ss:$48 sps:$4 sm:$0xff]  }
 0x754   : > { %9302 = vmatpush1.bf16.msra.mxu0 %v12150_v36  ;;  %v12216_v45 = vld [vmem:[%s13716_s17 + $0xfd0] ss:$48 sps:$4 sm:$0xff]   ;;  %v12224_v36 = vld [vmem:[%s13716_s17 + $0xf74] ss:$48 sps:$4 sm:$0xff]  }
 0x755   : > { %9343 = vmatpush1.bf16.msra.mxu1 %v12153_v37  ;;  %9303 = vmatprep.subr.bf16.mxu0 %v12158_v26  ;;  %v12219_v12 = vld [vmem:[%s13716_s17 + $0x15d0] ss:$48 sps:$4 sm:$0xff]   ;;  %v12227_v37 = vld [vmem:[%s13716_s17 + $0x1574] ss:$48 sps:$4 sm:$0xff]  }
 0x756   : > { %9344 = vmatprep.subr.bf16.mxu1 %v12161_v42  ;;  %v12222_v0 = vld [vmem:[%s13716_s17 + $0xf70] ss:$48 sps:$4 sm:$0xff]   ;;  %v12230_v47 = vld [vmem:[%s13716_s17 + $0xf14] ss:$48 sps:$4 sm:$0xff]   ;;  %v12236_v42 = vld [vmem:[%s13716_s17 + $0x2bc] ss:$48 sps:$4 sm:$0xff]  }
 0x757   : > { %v12225_v40 = vld [vmem:[%s13716_s17 + $0x1570] ss:$48 sps:$4 sm:$0xff]   ;;  %v12233_v48 = vld [vmem:[%s13716_s17 + $0x1514] ss:$48 sps:$4 sm:$0xff]  }
 0x758   : > { %9304 = vmatpush1.bf16.msra.mxu0 %v12156_v57  ;;  %v12228_v24 = vld [vmem:[%s13716_s17 + $0xf10] ss:$48 sps:$4 sm:$0xff]   ;;  %v12239_v57 = vld [vmem:[%s13716_s17 + $0x8bc] ss:$48 sps:$4 sm:$0xff]  }
 0x759   : > { %9345 = vmatpush1.bf16.msra.mxu1 %v12159_v44  ;;  %9305 = vmatprep.subr.bf16.mxu0 %v12164_v50  ;;  %v12231_v26 = vld [vmem:[%s13716_s17 + $0x1510] ss:$48 sps:$4 sm:$0xff]   ;;  %v12234_v44 = vld [vmem:[%s13716_s17 + $0x2b8] ss:$48 sps:$4 sm:$0xff]  }
 0x75a   : > { %9346 = vmatprep.subr.bf16.mxu1 %v12167_v28  ;;  %v12237_v50 = vld [vmem:[%s13716_s17 + $0x8b8] ss:$48 sps:$4 sm:$0xff]   ;;  %v12242_v28 = vld [vmem:[%s13716_s17 + $0x25c] ss:$48 sps:$4 sm:$0xff]  }
 0x75c   : > { %9306 = vmatpush1.bf16.msra.mxu0 %v12162_v60  ;;  %v12245_v60 = vld [vmem:[%s13716_s17 + $0x85c] ss:$48 sps:$4 sm:$0xff]  }
 0x75d   : > { %9347 = vmatpush1.bf16.msra.mxu1 %v12165_v6  ;;  %v12811_v14 = vpop.eup %12810  ;;  %9307 = vmatprep.subr.bf16.mxu0 %v12170_v19  ;;  %v12240_v6 = vld [vmem:[%s13716_s17 + $0x258] ss:$48 sps:$4 sm:$0xff]  }
 0x75e   : > { %9348 = vmatprep.subr.bf16.mxu1 %v12173_v30  ;;  %9883 = vst [vmem:[%s13726_s4] sm:$0xff] %v12811_v14  ;;  %v12243_v19 = vld [vmem:[%s13716_s17 + $0x858] ss:$48 sps:$4 sm:$0xff]  }
 0x75f   : > { %v12813_v59 = vpop.eup %12812 }
 0x760   : > { %9884 = vst [vmem:[%s13726_s4 + $0x8] sm:$0xff] %v12813_v59  ;;  %9308 = vmatpush1.bf16.msra.mxu0 %v12168_v27  ;;  %v12246_v59 = vld [vmem:[%s13716_s17 + $0x1f8] ss:$48 sps:$4 sm:$0xff]  }
 0x761   : > { %9349 = vmatpush1.bf16.msra.mxu1 %v12171_v20  ;;  %9309 = vmatprep.subr.bf16.mxu0 %v12176_v18  ;;  %v12248_v18 = vld [vmem:[%s13716_s17 + $0x1fc] ss:$48 sps:$4 sm:$0xff]  }
 0x762   : > { %9350 = vmatprep.subr.bf16.mxu1 %v12179_v21  ;;  %v12251_v21 = vld [vmem:[%s13716_s17 + $0x7fc] ss:$48 sps:$4 sm:$0xff]  }
 0x764   : > { %9310 = vmatpush1.bf16.msra.mxu0 %v12174_v49  ;;  %v12249_v49 = vld [vmem:[%s13716_s17 + $0x7f8] ss:$48 sps:$4 sm:$0xff]  }
 0x765   : > { %9351 = vmatpush1.bf16.msra.mxu1 %v12177_v53  ;;  %9311 = vmatprep.subr.bf16.mxu0 %v12182_v54 }
 0x766   : > { %9352 = vmatprep.subr.bf16.mxu1 %v12185_v55 }
 0x768   : > { %9312 = vmatpush1.bf16.msra.mxu0 %v12180_v61 }
 0x769   : > { %9353 = vmatpush1.bf16.msra.mxu1 %v12183_v1  ;;  %9313 = vmatprep.subr.bf16.mxu0 %v12188_v16  ;;  %v12254_v1 = vld [vmem:[%s13716_s17 + $0x19c] ss:$48 sps:$4 sm:$0xff]  }
 0x76a   : > { %9354 = vmatprep.subr.bf16.mxu1 %v12191_v17  ;;  %v12257_v16 = vld [vmem:[%s13716_s17 + $0x79c] ss:$48 sps:$4 sm:$0xff]   ;;  %v12252_v17 = vld [vmem:[%s13716_s17 + $0x198] ss:$48 sps:$4 sm:$0xff]  }
 0x76c   : > { %9314 = vmatpush2.bf16.msra.mxu0 %v12186_v22  ;;  %v12255_v22 = vld [vmem:[%s13716_s17 + $0x798] ss:$48 sps:$4 sm:$0xff]  }
 0x76d   : > { %9355 = vmatpush2.bf16.msra.mxu1 %v12189_v23  ;;  %9315 = vmatprep.subr.bf16.mxu0 %v12194_v25  ;;  %v12260_v23 = vld [vmem:[%s13716_s17 + $0x13c] ss:$48 sps:$4 sm:$0xff]  }
 0x76e   : > { %9356 = vmatprep.subr.bf16.mxu1 %v12197_v3  ;;  %v12263_v25 = vld [vmem:[%s13716_s17 + $0x73c] ss:$48 sps:$4 sm:$0xff]   ;;  %v12258_v3 = vld [vmem:[%s13716_s17 + $0x138] ss:$48 sps:$4 sm:$0xff]  }
 0x770   : > { %9316 = vmatpush2.bf16.msra.mxu0 %v12192_v4  ;;  %v12261_v4 = vld [vmem:[%s13716_s17 + $0x738] ss:$48 sps:$4 sm:$0xff]  }
 0x771   : > { %9357 = vmatpush2.bf16.msra.mxu1 %v12195_v5  ;;  %9317 = vmatprep.subr.bf16.mxu0 %v12200_v9  ;;  %v12266_v5 = vld [vmem:[%s13716_s17 + $0xdc] ss:$48 sps:$4 sm:$0xff]  }
 0x772   : > { %9358 = vmatprep.subr.bf16.mxu1 %v12203_v31  ;;  %v12269_v9 = vld [vmem:[%s13716_s17 + $0x6dc] ss:$48 sps:$4 sm:$0xff]   ;;  %v12264_v31 = vld [vmem:[%s13716_s17 + $0xd8] ss:$48 sps:$4 sm:$0xff]  }
 0x774   : > { %9318 = vmatpush2.bf16.msra.mxu0 %v12198_v33  ;;  %v12267_v33 = vld [vmem:[%s13716_s17 + $0x6d8] ss:$48 sps:$4 sm:$0xff]  }
 0x775   : > { %9359 = vmatpush2.bf16.msra.mxu1 %v12201_v35  ;;  %9319 = vmatprep.subr.bf16.mxu0 %v12206_v34  ;;  %v12272_v35 = vld [vmem:[%s13716_s17 + $0x7c] ss:$48 sps:$4 sm:$0xff]  }
 0x776   : > { %9360 = vmatprep.subr.bf16.mxu1 %v12209_v46  ;;  %v12275_v34 = vld [vmem:[%s13716_s17 + $0x67c] ss:$48 sps:$4 sm:$0xff]   ;;  %v12270_v46 = vld [vmem:[%s13716_s17 + $0x78] ss:$48 sps:$4 sm:$0xff]  }
 0x778   : > { %9320 = vmatpush2.bf16.msra.mxu0 %v12204_v43  ;;  %v12273_v43 = vld [vmem:[%s13716_s17 + $0x678] ss:$48 sps:$4 sm:$0xff]  }
 0x779   : > { %9361 = vmatpush2.bf16.msra.mxu1 %v12207_v32  ;;  %9321 = vmatprep.subr.bf16.mxu0 %v12212_v29  ;;  %v12278_v32 = vld [vmem:[%s13716_s17 + $0x1c] ss:$48 sps:$4 sm:$0xff]  }
 0x77a   : > { %9362 = vmatprep.subr.bf16.mxu1 %v12215_v11  ;;  %v12281_v29 = vld [vmem:[%s13716_s17 + $0x61c] ss:$48 sps:$4 sm:$0xff]   ;;  %v12276_v11 = vld [vmem:[%s13716_s17 + $0x18] ss:$48 sps:$4 sm:$0xff]  }
 0x77c   : > { %9322 = vmatpush2.bf16.msra.mxu0 %v12210_v63  ;;  %v12279_v63 = vld [vmem:[%s13716_s17 + $0x618] ss:$48 sps:$4 sm:$0xff]  }
 0x77d   : > { %9363 = vmatpush2.bf16.msra.mxu1 %v12213_v52  ;;  %9323 = vmatprep.subr.bf16.mxu0 %v12218_v39  ;;  %v12284_v52 = vld [vmem:[%s13716_s17 + $0x5bc] ss:$48 sps:$4 sm:$0xff]  }
 0x77e   : > { %9364 = vmatprep.subr.bf16.mxu1 %v12221_v38  ;;  %v12287_v39 = vld [vmem:[%s13716_s17 + $0xbbc] ss:$48 sps:$4 sm:$0xff]   ;;  %v12282_v38 = vld [vmem:[%s13716_s17 + $0x5b8] ss:$48 sps:$4 sm:$0xff]  }
 0x780   : > { %9324 = vmatpush2.bf16.msra.mxu0 %v12216_v45  ;;  %v12285_v45 = vld [vmem:[%s13716_s17 + $0xbb8] ss:$48 sps:$4 sm:$0xff]  }
 0x781   : > { %9365 = vmatpush2.bf16.msra.mxu1 %v12219_v12  ;;  %9325 = vmatprep.subr.bf16.mxu0 %v12224_v36  ;;  %v12290_v12 = vld [vmem:[%s13716_s17 + $0x55c] ss:$48 sps:$4 sm:$0xff]  }
 0x782   : > { %9366 = vmatprep.subr.bf16.mxu1 %v12227_v37  ;;  %v12293_v36 = vld [vmem:[%s13716_s17 + $0xb5c] ss:$48 sps:$4 sm:$0xff]   ;;  %v12288_v37 = vld [vmem:[%s13716_s17 + $0x558] ss:$48 sps:$4 sm:$0xff]  }
 0x784   : > { %9326 = vmatpush2.bf16.msra.mxu0 %v12222_v0  ;;  %v12291_v0 = vld [vmem:[%s13716_s17 + $0xb58] ss:$48 sps:$4 sm:$0xff]  }
 0x785   : > { %9367 = vmatpush2.bf16.msra.mxu1 %v12225_v40  ;;  %9327 = vmatprep.subr.bf16.mxu0 %v12230_v47  ;;  %v12296_v40 = vld [vmem:[%s13716_s17 + $0x4fc] ss:$48 sps:$4 sm:$0xff]  }
 0x786   : > { %9368 = vmatprep.subr.bf16.mxu1 %v12233_v48  ;;  %v12299_v47 = vld [vmem:[%s13716_s17 + $0xafc] ss:$48 sps:$4 sm:$0xff]   ;;  %v12294_v48 = vld [vmem:[%s13716_s17 + $0x4f8] ss:$48 sps:$4 sm:$0xff]  }
 0x788   : > { %9328 = vmatpush2.bf16.msra.mxu0 %v12228_v24  ;;  %v12297_v24 = vld [vmem:[%s13716_s17 + $0xaf8] ss:$48 sps:$4 sm:$0xff]  }
 0x789   : > { %9369 = vmatpush2.bf16.msra.mxu1 %v12231_v26  ;;  %9379 = vmatprep.subr.bf16.mxu0 %v12236_v42  ;;  %v12302_v26 = vld [vmem:[%s13716_s17 + $0x49c] ss:$48 sps:$4 sm:$0xff]  }
 0x78a   : > { %9420 = vmatprep.subr.bf16.mxu1 %v12239_v57  ;;  %v12305_v42 = vld [vmem:[%s13716_s17 + $0xa9c] ss:$48 sps:$4 sm:$0xff]   ;;  %v12300_v57 = vld [vmem:[%s13716_s17 + $0x498] ss:$48 sps:$4 sm:$0xff]  }
 0x78b   : > { %v14475_v30 = vpop.f32.mrf.mxu0  ;;  %9330 = vmatmul.mubr.bf16.vlgmr.msra.gmra.mxu0 %v14170_v58 }
 0x78c   : > { %v14477_v27 = vpop.f32.mrf.mxu1  ;;  %9371 = vmatmul.mubr.bf16.vlgmr.msra.gmra.mxu1 %v14172_v62  ;;  %9380 = vmatpush1.bf16.msra.mxu0 %v12234_v44  ;;  %v12303_v44 = vld [vmem:[%s13716_s17 + $0xa98] ss:$48 sps:$4 sm:$0xff]  }
 0x78d   : > { %9421 = vmatpush1.bf16.msra.mxu1 %v12237_v50  ;;  %v14481_v20 = vpop.f32.mrf.mxu0  ;;  %9381 = vmatprep.subr.bf16.mxu0 %v12242_v28  ;;  %v12308_v50 = vld [vmem:[%s13716_s17 + $0x43c] ss:$48 sps:$4 sm:$0xff]  }
 0x78e   : > { %v14483_v14 = vpop.f32.mrf.mxu1  ;;  %9422 = vmatprep.subr.bf16.mxu1 %v12245_v60  ;;  %9411 = vmatprep.mubr.bf16.mxu0 %v14070_v13  ;;  %v12311_v28 = vld [vmem:[%s13716_s17 + $0xa3c] ss:$48 sps:$4 sm:$0xff]   ;;  %v12306_v60 = vld [vmem:[%s13716_s17 + $0x438] ss:$48 sps:$4 sm:$0xff]  }
 0x78f   : > { %9452 = vmatprep.mubr.bf16.mxu1 %v14073_v15  ;;  %v9089_v53 = vpop.f32.mrf.mxu0 }
 0x790   : > { %v9130_v54 = vpop.f32.mrf.mxu1  ;;  %9382 = vmatpush1.bf16.msra.mxu0 %v12240_v6  ;;  %v12309_v6 = vld [vmem:[%s13716_s17 + $0xa38] ss:$48 sps:$4 sm:$0xff]   ;;  %v12323_v53 = vld [vmem:[%s13716_s17 + $0x97c] ss:$48 sps:$4 sm:$0xff]  }
 0x791   : > { %9423 = vmatpush1.bf16.msra.mxu1 %v12243_v19  ;;  %v9090_v55 = vpop.f32.mrf.mxu0  ;;  %9383 = vmatprep.subr.bf16.mxu0 %v12248_v18  ;;  %v12314_v19 = vld [vmem:[%s13716_s17 + $0x3dc] ss:$48 sps:$4 sm:$0xff]   ;;  %v4997_v54 = vsub.s32 2, %v14374_v41 }
 0x792   : > { %v9131_v61 = vpop.f32.mrf.mxu1  ;;  %9424 = vmatprep.subr.bf16.mxu1 %v12251_v21  ;;  %v12317_v18 = vld [vmem:[%s13716_s17 + $0x9dc] ss:$48 sps:$4 sm:$0xff]   ;;  %v12312_v21 = vld [vmem:[%s13716_s17 + $0x3d8] ss:$48 sps:$4 sm:$0xff]   ;;  %v5001_v55 = vsub.s32 3, %v14374_v41 }
 0x793   : > { %v12318_v61 = vld [vmem:[%s13716_s17 + $0x378] ss:$48 sps:$4 sm:$0xff]  }
 0x794   : > { %9384 = vmatpush1.bf16.msra.mxu0 %v12246_v59  ;;  %v12315_v59 = vld [vmem:[%s13716_s17 + $0x9d8] ss:$48 sps:$4 sm:$0xff]  }
 0x795   : > { %9425 = vmatpush1.bf16.msra.mxu1 %v12249_v49  ;;  %9385 = vmatprep.subr.bf16.mxu0 %v12254_v1  ;;  %v12320_v49 = vld [vmem:[%s13716_s17 + $0x37c] ss:$48 sps:$4 sm:$0xff]   ;;  %v12321_v1 = vld [vmem:[%s13716_s17 + $0x978] ss:$48 sps:$4 sm:$0xff]  }
 0x796   : > { %9426 = vmatprep.subr.bf16.mxu1 %v12257_v16  ;;  %v12326_v16 = vld [vmem:[%s13716_s17 + $0x31c] ss:$48 sps:$4 sm:$0xff]  }
 0x798   : > { %9386 = vmatpush1.bf16.msra.mxu0 %v12252_v17  ;;  %v12329_v17 = vld [vmem:[%s13716_s17 + $0x91c] ss:$48 sps:$4 sm:$0xff]  }
 0x799   : > { %9427 = vmatpush1.bf16.msra.mxu1 %v12255_v22  ;;  %9387 = vmatprep.subr.bf16.mxu0 %v12260_v23  ;;  %v14544_v22 = vld [vmem:[%s13728_s27] sm:$0xff] }
 0x79a   : > { %9428 = vmatprep.subr.bf16.mxu1 %v12263_v25  ;;  %v4998_v23 = vrot.slane %v14544_v22, %v4997_v54  ;;  %v5002_v25 = vrot.slane %v14544_v22, %v5001_v55 }
 0x79c   : > { %9388 = vmatpush1.bf16.msra.mxu0 %v12258_v3  ;;  %v12324_v3 = vld [vmem:[%s13716_s17 + $0x318] ss:$48 sps:$4 sm:$0xff]  }
 0x79d   : > { %9429 = vmatpush1.bf16.msra.mxu1 %v12261_v4  ;;  %9389 = vmatprep.subr.bf16.mxu0 %v12266_v5  ;;  %v12327_v4 = vld [vmem:[%s13716_s17 + $0x918] ss:$48 sps:$4 sm:$0xff]   ;;  %v12332_v5 = vld [vmem:[%s13716_s17 + $0xebc] ss:$48 sps:$4 sm:$0xff]  }
 0x79e   : > { %9430 = vmatprep.subr.bf16.mxu1 %v12269_v9  ;;  %v12335_v9 = vld [vmem:[%s13716_s17 + $0x14bc] ss:$48 sps:$4 sm:$0xff]  }
 0x7a0   : > { %9390 = vmatpush1.bf16.msra.mxu0 %v12264_v31  ;;  %v9086_v31 = vadd.f32 %v14475_v30, %v4998_v23  ;;  %v12374_v23 = vld [vmem:[%s13716_s17 + $0xc1c] ss:$48 sps:$4 sm:$0xff]  }
 0x7a1   : > { %9431 = vmatpush1.bf16.msra.mxu1 %v12267_v33  ;;  %9391 = vmatprep.subr.bf16.mxu0 %v12272_v35  ;;  %v12330_v33 = vld [vmem:[%s13716_s17 + $0xeb8] ss:$48 sps:$4 sm:$0xff]  }
 0x7a2   : > { %9432 = vmatprep.subr.bf16.mxu1 %v12275_v34  ;;  %v12333_v35 = vld [vmem:[%s13716_s17 + $0x14b8] ss:$48 sps:$4 sm:$0xff]   ;;  %v9088_v34 = vadd.f32 %v14481_v20, %v5002_v25  ;;  %v12377_v25 = vld [vmem:[%s13716_s17 + $0x121c] ss:$48 sps:$4 sm:$0xff]  }
 0x7a4   : > { %9392 = vmatpush1.bf16.msra.mxu0 %v12270_v46  ;;  %v12338_v46 = vld [vmem:[%s13716_s17 + $0xe5c] ss:$48 sps:$4 sm:$0xff]   ;;  %v9129_v30 = vadd.f32 %v14483_v14, %v9088_v34 }
 0x7a5   : > { %9433 = vmatpush1.bf16.msra.mxu1 %v12273_v43  ;;  %9393 = vmatprep.subr.bf16.mxu0 %v12278_v32  ;;  %v12341_v43 = vld [vmem:[%s13716_s17 + $0x145c] ss:$48 sps:$4 sm:$0xff]   ;;  %v9127_v32 = vadd.f32 %v14477_v27, %v9086_v31  ;;  %v12378_v31 = vld [vmem:[%s13716_s17 + $0x11b8] ss:$48 sps:$4 sm:$0xff]  }
 0x7a6   : > { %9434 = vmatprep.subr.bf16.mxu1 %v12281_v29  ;;  %v12344_v27 = vld [vmem:[%s13716_s17 + $0xdfc] ss:$48 sps:$4 sm:$0xff]  }
 0x7a7   : > { %v12389_v34 = vld [vmem:[%s13716_s17 + $0x175c] ss:$48 sps:$4 sm:$0xff]  }
 0x7a8   : > { %9394 = vmatpush1.bf16.msra.mxu0 %v12276_v11 }
 0x7a9   : > { %9435 = vmatpush1.bf16.msra.mxu1 %v12279_v63  ;;  %9395 = vmatprep.subr.bf16.mxu0 %v12284_v52  ;;  %v12336_v63 = vld [vmem:[%s13716_s17 + $0xe58] ss:$48 sps:$4 sm:$0xff]  }
 0x7aa   : > { %9436 = vmatprep.subr.bf16.mxu1 %v12287_v39  ;;  %v12339_v52 = vld [vmem:[%s13716_s17 + $0x1458] ss:$48 sps:$4 sm:$0xff]  }
 0x7ac   : > { %9396 = vmatpush2.bf16.msra.mxu0 %v12282_v38 }
 0x7ad   : > { %9437 = vmatpush2.bf16.msra.mxu1 %v12285_v45  ;;  %9397 = vmatprep.subr.bf16.mxu0 %v12290_v12  ;;  %v12347_v45 = vld [vmem:[%s13716_s17 + $0x13fc] ss:$48 sps:$4 sm:$0xff]  }
 0x7ae   : > { %9438 = vmatprep.subr.bf16.mxu1 %v12293_v36 }
 0x7b0   : > { %9398 = vmatpush2.bf16.msra.mxu0 %v12288_v37 }
 0x7b1   : > { %9439 = vmatpush2.bf16.msra.mxu1 %v12291_v0  ;;  %9399 = vmatprep.subr.bf16.mxu0 %v12296_v40  ;;  %v12342_v40 = vld [vmem:[%s13716_s17 + $0xdf8] ss:$48 sps:$4 sm:$0xff]  }
 0x7b2   : > { %9440 = vmatprep.subr.bf16.mxu1 %v12299_v47  ;;  %v12345_v47 = vld [vmem:[%s13716_s17 + $0x13f8] ss:$48 sps:$4 sm:$0xff]  }
 0x7b4   : > { %9400 = vmatpush2.bf16.msra.mxu0 %v12294_v48 }
 0x7b5   : > { %9441 = vmatpush2.bf16.msra.mxu1 %v12297_v24  ;;  %9401 = vmatprep.subr.bf16.mxu0 %v12302_v26  ;;  %v12350_v26 = vld [vmem:[%s13716_s17 + $0xd9c] ss:$48 sps:$4 sm:$0xff]  }
 0x7b6   : > { %9442 = vmatprep.subr.bf16.mxu1 %v12305_v42  ;;  %v12353_v42 = vld [vmem:[%s13716_s17 + $0x139c] ss:$48 sps:$4 sm:$0xff]  }
 0x7b8   : > { %9402 = vmatpush2.bf16.msra.mxu0 %v12300_v57  ;;  %v12348_v57 = vld [vmem:[%s13716_s17 + $0xd98] ss:$48 sps:$4 sm:$0xff]  }
 0x7b9   : > { %9443 = vmatpush2.bf16.msra.mxu1 %v12303_v44  ;;  %9403 = vmatprep.subr.bf16.mxu0 %v12308_v50  ;;  %v12351_v44 = vld [vmem:[%s13716_s17 + $0x1398] ss:$48 sps:$4 sm:$0xff]   ;;  %v12356_v50 = vld [vmem:[%s13716_s17 + $0xd3c] ss:$48 sps:$4 sm:$0xff]  }
 0x7ba   : > { %9444 = vmatprep.subr.bf16.mxu1 %v12311_v28  ;;  %v12359_v28 = vld [vmem:[%s13716_s17 + $0x133c] ss:$48 sps:$4 sm:$0xff]  }
 0x7bc   : > { %9404 = vmatpush2.bf16.msra.mxu0 %v12306_v60  ;;  %v12354_v60 = vld [vmem:[%s13716_s17 + $0xd38] ss:$48 sps:$4 sm:$0xff]  }
 0x7bd   : > { %9445 = vmatpush2.bf16.msra.mxu1 %v12309_v6  ;;  %9405 = vmatprep.subr.bf16.mxu0 %v12314_v19  ;;  %v12357_v6 = vld [vmem:[%s13716_s17 + $0x1338] ss:$48 sps:$4 sm:$0xff]   ;;  %v12362_v19 = vld [vmem:[%s13716_s17 + $0xcdc] ss:$48 sps:$4 sm:$0xff]  }
 0x7be   : > { %9446 = vmatprep.subr.bf16.mxu1 %v12317_v18  ;;  %v12365_v18 = vld [vmem:[%s13716_s17 + $0x12dc] ss:$48 sps:$4 sm:$0xff]  }
 0x7c0   : > { %9406 = vmatpush2.bf16.msra.mxu0 %v12312_v21  ;;  %v12360_v21 = vld [vmem:[%s13716_s17 + $0xcd8] ss:$48 sps:$4 sm:$0xff]  }
 0x7c1   : > { %9447 = vmatpush2.bf16.msra.mxu1 %v12315_v59  ;;  %9407 = vmatprep.subr.bf16.mxu0 %v12320_v49  ;;  %v12363_v59 = vld [vmem:[%s13716_s17 + $0x12d8] ss:$48 sps:$4 sm:$0xff]  }
 0x7c2   : > { %9448 = vmatprep.subr.bf16.mxu1 %v12323_v53  ;;  %v12368_v53 = vld [vmem:[%s13716_s17 + $0xc7c] ss:$48 sps:$4 sm:$0xff]  }
 0x7c4   : > { %9408 = vmatpush2.bf16.msra.mxu0 %v12318_v61  ;;  %v12371_v61 = vld [vmem:[%s13716_s17 + $0x127c] ss:$48 sps:$4 sm:$0xff]  }
 0x7c5   : > { %9449 = vmatpush2.bf16.msra.mxu1 %v12321_v1  ;;  %9409 = vmatprep.subr.bf16.mxu0 %v12326_v16  ;;  %v12366_v16 = vld [vmem:[%s13716_s17 + $0xc78] ss:$48 sps:$4 sm:$0xff]  }
 0x7c6   : > { %9450 = vmatprep.subr.bf16.mxu1 %v12329_v17  ;;  %v12369_v17 = vld [vmem:[%s13716_s17 + $0x1278] ss:$48 sps:$4 sm:$0xff]  }
 0x7c8   : > { %9410 = vmatpush2.bf16.msra.mxu0 %v12324_v3  ;;  %v12372_v3 = vld [vmem:[%s13716_s17 + $0xc18] ss:$48 sps:$4 sm:$0xff]  }
 0x7c9   : > { %9451 = vmatpush2.bf16.msra.mxu1 %v12327_v4  ;;  %9461 = vmatprep.subr.bf16.mxu0 %v12332_v5  ;;  %v12375_v4 = vld [vmem:[%s13716_s17 + $0x1218] ss:$48 sps:$4 sm:$0xff]   ;;  %v12380_v5 = vld [vmem:[%s13716_s17 + $0x11bc] ss:$48 sps:$4 sm:$0xff]  }
 0x7ca   : > { %9502 = vmatprep.subr.bf16.mxu1 %v12335_v9  ;;  %v12383_v9 = vld [vmem:[%s13716_s17 + $0x17bc] ss:$48 sps:$4 sm:$0xff]  }
 0x7cb   : > { %v9167_v29 = vpop.f32.mrf.mxu0  ;;  %9412 = vmatmul.mubr.bf16.vlgmr.msra.gmra.mxu0 %v14094_v7 }
 0x7cc   : > { %v9208_v11 = vpop.f32.mrf.mxu1  ;;  %9453 = vmatmul.mubr.bf16.vlgmr.msra.gmra.mxu1 %v14096_v8  ;;  %v9168_v20 = vadd.f32 %v9167_v29, %v9127_v32  ;;  %9462 = vmatpush1.bf16.msra.mxu0 %v12330_v33  ;;  %v12381_v33 = vld [vmem:[%s13716_s17 + $0x17b8] ss:$48 sps:$4 sm:$0xff]   ;;  %v12392_v32 = vld [vmem:[%s13716_s17 + $0x10fc] ss:$48 sps:$4 sm:$0xff]  }
 0x7cd   : > { %9503 = vmatpush1.bf16.msra.mxu1 %v12333_v35  ;;  %v9169_v39 = vpop.f32.mrf.mxu0  ;;  %9463 = vmatprep.subr.bf16.mxu0 %v12338_v46  ;;  %v12386_v35 = vld [vmem:[%s13716_s17 + $0x115c] ss:$48 sps:$4 sm:$0xff]   ;;  %v12384_v46 = vld [vmem:[%s13716_s17 + $0x1158] ss:$48 sps:$4 sm:$0xff]  }
 0x7ce   : > { %v9210_v38 = vpop.f32.mrf.mxu1  ;;  %9504 = vmatprep.subr.bf16.mxu1 %v12341_v43  ;;  %v9209_v12 = vadd.f32 %v9208_v11, %v9168_v20  ;;  %v9170_v36 = vadd.f32 %v9169_v39, %v9129_v30  ;;  %9493 = vmatprep.mubr.bf16.mxu0 %v14126_v51  ;;  %v12387_v43 = vld [vmem:[%s13716_s17 + $0x1758] ss:$48 sps:$4 sm:$0xff]   ;;  %v12395_v29 = vld [vmem:[%s13716_s17 + $0x16fc] ss:$48 sps:$4 sm:$0xff]  }
 0x7cf   : > { %9534 = vmatprep.mubr.bf16.mxu1 %v14129_v56  ;;  %v9171_v14 = vpop.f32.mrf.mxu0  ;;  %v12390_v11 = vld [vmem:[%s13716_s17 + $0x10f8] ss:$48 sps:$4 sm:$0xff]   ;;  %v12398_v20 = vld [vmem:[%s13716_s17 + $0x109c] ss:$48 sps:$4 sm:$0xff]  }
 0x7d0   : > { %v9212_v37 = vpop.f32.mrf.mxu1  ;;  %12814 = vtanh.f32 %v9209_v12  ;;  %v9211_v0 = vadd.f32 %v9210_v38, %v9170_v36  ;;  %9464 = vmatpush1.bf16.msra.mxu0 %v12336_v63  ;;  %v12393_v30 = vld [vmem:[%s13716_s17 + $0x16f8] ss:$48 sps:$4 sm:$0xff]   ;;  %v12401_v63 = vld [vmem:[%s13716_s17 + $0x169c] ss:$48 sps:$4 sm:$0xff]  }
 0x7d1   : > { %9505 = vmatpush1.bf16.msra.mxu1 %v12339_v52  ;;  %v9172_v48 = vpop.f32.mrf.mxu0  ;;  %9465 = vmatprep.subr.bf16.mxu0 %v12344_v27  ;;  %v12396_v52 = vld [vmem:[%s13716_s17 + $0x1098] ss:$48 sps:$4 sm:$0xff]   ;;  %v12404_v38 = vld [vmem:[%s13716_s17 + $0x103c] ss:$48 sps:$4 sm:$0xff]  }
 0x7d2   : > { %v9213_v24 = vpop.f32.mrf.mxu1  ;;  %9506 = vmatprep.subr.bf16.mxu1 %v12347_v45  ;;  %12816 = vtanh.f32 %v9211_v0  ;;  %v12399_v39 = vld [vmem:[%s13716_s17 + $0x1698] ss:$48 sps:$4 sm:$0xff]   ;;  %v12407_v27 = vld [vmem:[%s13716_s17 + $0x163c] ss:$48 sps:$4 sm:$0xff]  }
 0x7d3   : > { %v12402_v45 = vld [vmem:[%s13716_s17 + $0x1038] ss:$48 sps:$4 sm:$0xff]   ;;  %v12410_v36 = vld [vmem:[%s13716_s17 + $0xfdc] ss:$48 sps:$4 sm:$0xff]  }
 0x7d4   : > { %9466 = vmatpush1.bf16.msra.mxu0 %v12342_v40  ;;  %v12405_v12 = vld [vmem:[%s13716_s17 + $0x1638] ss:$48 sps:$4 sm:$0xff]   ;;  %v12413_v14 = vld [vmem:[%s13716_s17 + $0x15dc] ss:$48 sps:$4 sm:$0xff]  }
 0x7d5   : > { %9507 = vmatpush1.bf16.msra.mxu1 %v12345_v47  ;;  %9467 = vmatprep.subr.bf16.mxu0 %v12350_v26  ;;  %v12408_v37 = vld [vmem:[%s13716_s17 + $0xfd8] ss:$48 sps:$4 sm:$0xff]   ;;  %v12416_v40 = vld [vmem:[%s13716_s17 + $0xf7c] ss:$48 sps:$4 sm:$0xff]  }
 0x7d6   : > { %9508 = vmatprep.subr.bf16.mxu1 %v12353_v42  ;;  %v12411_v0 = vld [vmem:[%s13716_s17 + $0x15d8] ss:$48 sps:$4 sm:$0xff]   ;;  %v12419_v47 = vld [vmem:[%s13716_s17 + $0x157c] ss:$48 sps:$4 sm:$0xff]  }
 0x7d7   : > { %v12414_v48 = vld [vmem:[%s13716_s17 + $0xf78] ss:$48 sps:$4 sm:$0xff]   ;;  %v12422_v26 = vld [vmem:[%s13716_s17 + $0xf1c] ss:$48 sps:$4 sm:$0xff]  }
 0x7d8   : > { %9468 = vmatpush1.bf16.msra.mxu0 %v12348_v57  ;;  %v12417_v24 = vld [vmem:[%s13716_s17 + $0x1578] ss:$48 sps:$4 sm:$0xff]   ;;  %v12425_v42 = vld [vmem:[%s13716_s17 + $0x151c] ss:$48 sps:$4 sm:$0xff]  }
 0x7d9   : > { %9509 = vmatpush1.bf16.msra.mxu1 %v12351_v44  ;;  %9469 = vmatprep.subr.bf16.mxu0 %v12356_v50  ;;  %v12420_v57 = vld [vmem:[%s13716_s17 + $0xf18] ss:$48 sps:$4 sm:$0xff]   ;;  %v12428_v50 = vld [vmem:[%s13716_s17 + $0x2c4] ss:$48 sps:$4 sm:$0xff]  }
 0x7da   : > { %9510 = vmatprep.subr.bf16.mxu1 %v12359_v28  ;;  %v12423_v44 = vld [vmem:[%s13716_s17 + $0x1518] ss:$48 sps:$4 sm:$0xff]   ;;  %v12431_v28 = vld [vmem:[%s13716_s17 + $0x8c4] ss:$48 sps:$4 sm:$0xff]  }
 0x7dc   : > { %9470 = vmatpush1.bf16.msra.mxu0 %v12354_v60  ;;  %v12426_v60 = vld [vmem:[%s13716_s17 + $0x2c0] ss:$48 sps:$4 sm:$0xff]  }
 0x7dd   : > { %9511 = vmatpush1.bf16.msra.mxu1 %v12357_v6  ;;  %v12815_v49 = vpop.eup %12814  ;;  %9471 = vmatprep.subr.bf16.mxu0 %v12362_v19  ;;  %v12429_v6 = vld [vmem:[%s13716_s17 + $0x8c0] ss:$48 sps:$4 sm:$0xff]   ;;  %v12434_v19 = vld [vmem:[%s13716_s17 + $0x264] ss:$48 sps:$4 sm:$0xff]  }
 0x7de   : > { %9512 = vmatprep.subr.bf16.mxu1 %v12365_v18  ;;  %9885 = vst [vmem:[%s13726_s4 + $0x10] sm:$0xff] %v12815_v49  ;;  %v12437_v18 = vld [vmem:[%s13716_s17 + $0x864] ss:$48 sps:$4 sm:$0xff]   ;;  %v12432_v49 = vld [vmem:[%s13716_s17 + $0x260] ss:$48 sps:$4 sm:$0xff]  }
 0x7df   : > { %v12817_v1 = vpop.eup %12816 }
 0x7e0   : > { %9886 = vst [vmem:[%s13726_s4 + $0x18] sm:$0xff] %v12817_v1  ;;  %9472 = vmatpush1.bf16.msra.mxu0 %v12360_v21 }
 0x7e1   : > { %9513 = vmatpush1.bf16.msra.mxu1 %v12363_v59  ;;  %9473 = vmatprep.subr.bf16.mxu0 %v12368_v53  ;;  %v12435_v53 = vld [vmem:[%s13716_s17 + $0x860] ss:$48 sps:$4 sm:$0xff]  }
 0x7e2   : > { %9514 = vmatprep.subr.bf16.mxu1 %v12371_v61 }
 0x7e4   : > { %9474 = vmatpush1.bf16.msra.mxu0 %v12366_v16  ;;  %v12440_v16 = vld [vmem:[%s13716_s17 + $0x204] ss:$48 sps:$4 sm:$0xff]  }
 0x7e5   : > { %9515 = vmatpush1.bf16.msra.mxu1 %v12369_v17  ;;  %9475 = vmatprep.subr.bf16.mxu0 %v12374_v23  ;;  %v12443_v17 = vld [vmem:[%s13716_s17 + $0x804] ss:$48 sps:$4 sm:$0xff]  }
 0x7e6   : > { %9516 = vmatprep.subr.bf16.mxu1 %v12377_v25 }
 0x7e8   : > { %9476 = vmatpush1.bf16.msra.mxu0 %v12372_v3  ;;  %v12438_v3 = vld [vmem:[%s13716_s17 + $0x200] ss:$48 sps:$4 sm:$0xff]  }
 0x7e9   : > { %9517 = vmatpush1.bf16.msra.mxu1 %v12375_v4  ;;  %9477 = vmatprep.subr.bf16.mxu0 %v12380_v5  ;;  %v12441_v4 = vld [vmem:[%s13716_s17 + $0x800] ss:$48 sps:$4 sm:$0xff]  }
 0x7ea   : > { %9518 = vmatprep.subr.bf16.mxu1 %v12383_v9 }
 0x7ec   : > { %9478 = vmatpush2.bf16.msra.mxu0 %v12378_v31  ;;  %v12446_v31 = vld [vmem:[%s13716_s17 + $0x1a4] ss:$48 sps:$4 sm:$0xff]  }
 0x7ed   : > { %9519 = vmatpush2.bf16.msra.mxu1 %v12381_v33  ;;  %9479 = vmatprep.subr.bf16.mxu0 %v12386_v35  ;;  %v12449_v33 = vld [vmem:[%s13716_s17 + $0x7a4] ss:$48 sps:$4 sm:$0xff]   ;;  %v12444_v35 = vld [vmem:[%s13716_s17 + $0x1a0] ss:$48 sps:$4 sm:$0xff]  }
 0x7ee   : > { %9520 = vmatprep.subr.bf16.mxu1 %v12389_v34  ;;  %v12447_v34 = vld [vmem:[%s13716_s17 + $0x7a0] ss:$48 sps:$4 sm:$0xff]  }
 0x7f0   : > { %9480 = vmatpush2.bf16.msra.mxu0 %v12384_v46  ;;  %v12452_v46 = vld [vmem:[%s13716_s17 + $0x144] ss:$48 sps:$4 sm:$0xff]  }
 0x7f1   : > { %9521 = vmatpush2.bf16.msra.mxu1 %v12387_v43  ;;  %9481 = vmatprep.subr.bf16.mxu0 %v12392_v32  ;;  %v12455_v43 = vld [vmem:[%s13716_s17 + $0x744] ss:$48 sps:$4 sm:$0xff]   ;;  %v12450_v32 = vld [vmem:[%s13716_s17 + $0x140] ss:$48 sps:$4 sm:$0xff]  }
 0x7f2   : > { %9522 = vmatprep.subr.bf16.mxu1 %v12395_v29  ;;  %v12453_v29 = vld [vmem:[%s13716_s17 + $0x740] ss:$48 sps:$4 sm:$0xff]  }
 0x7f4   : > { %9482 = vmatpush2.bf16.msra.mxu0 %v12390_v11  ;;  %v12458_v11 = vld [vmem:[%s13716_s17 + $0xe4] ss:$48 sps:$4 sm:$0xff]  }
 0x7f5   : > { %9523 = vmatpush2.bf16.msra.mxu1 %v12393_v30  ;;  %9483 = vmatprep.subr.bf16.mxu0 %v12398_v20  ;;  %v12461_v30 = vld [vmem:[%s13716_s17 + $0x6e4] ss:$48 sps:$4 sm:$0xff]   ;;  %v12456_v20 = vld [vmem:[%s13716_s17 + $0xe0] ss:$48 sps:$4 sm:$0xff]  }
 0x7f6   : > { %9524 = vmatprep.subr.bf16.mxu1 %v12401_v63  ;;  %v12459_v63 = vld [vmem:[%s13716_s17 + $0x6e0] ss:$48 sps:$4 sm:$0xff]  }
 0x7f8   : > { %9484 = vmatpush2.bf16.msra.mxu0 %v12396_v52  ;;  %v12464_v52 = vld [vmem:[%s13716_s17 + $0x84] ss:$48 sps:$4 sm:$0xff]  }
 0x7f9   : > { %9525 = vmatpush2.bf16.msra.mxu1 %v12399_v39  ;;  %9485 = vmatprep.subr.bf16.mxu0 %v12404_v38  ;;  %v12467_v39 = vld [vmem:[%s13716_s17 + $0x684] ss:$48 sps:$4 sm:$0xff]   ;;  %v12462_v38 = vld [vmem:[%s13716_s17 + $0x80] ss:$48 sps:$4 sm:$0xff]  }
 0x7fa   : > { %9526 = vmatprep.subr.bf16.mxu1 %v12407_v27  ;;  %v12465_v27 = vld [vmem:[%s13716_s17 + $0x680] ss:$48 sps:$4 sm:$0xff]  }
 0x7fc   : > { %9486 = vmatpush2.bf16.msra.mxu0 %v12402_v45  ;;  %v12470_v45 = vld [vmem:[%s13716_s17 + $0x24] ss:$48 sps:$4 sm:$0xff]  }
 0x7fd   : > { %9527 = vmatpush2.bf16.msra.mxu1 %v12405_v12  ;;  %9487 = vmatprep.subr.bf16.mxu0 %v12410_v36  ;;  %v12473_v12 = vld [vmem:[%s13716_s17 + $0x624] ss:$48 sps:$4 sm:$0xff]   ;;  %v12468_v36 = vld [vmem:[%s13716_s17 + $0x20] ss:$48 sps:$4 sm:$0xff]  }
 0x7fe   : > { %9528 = vmatprep.subr.bf16.mxu1 %v12413_v14  ;;  %v12471_v14 = vld [vmem:[%s13716_s17 + $0x620] ss:$48 sps:$4 sm:$0xff]  }
 0x800   : > { %9488 = vmatpush2.bf16.msra.mxu0 %v12408_v37  ;;  %v12476_v37 = vld [vmem:[%s13716_s17 + $0x5c4] ss:$48 sps:$4 sm:$0xff]  }
 0x801   : > { %9529 = vmatpush2.bf16.msra.mxu1 %v12411_v0  ;;  %9489 = vmatprep.subr.bf16.mxu0 %v12416_v40  ;;  %v12479_v0 = vld [vmem:[%s13716_s17 + $0xbc4] ss:$48 sps:$4 sm:$0xff]   ;;  %v12474_v40 = vld [vmem:[%s13716_s17 + $0x5c0] ss:$48 sps:$4 sm:$0xff]  }
 0x802   : > { %9530 = vmatprep.subr.bf16.mxu1 %v12419_v47  ;;  %v12477_v47 = vld [vmem:[%s13716_s17 + $0xbc0] ss:$48 sps:$4 sm:$0xff]  }
 0x804   : > { %9490 = vmatpush2.bf16.msra.mxu0 %v12414_v48  ;;  %v12482_v48 = vld [vmem:[%s13716_s17 + $0x564] ss:$48 sps:$4 sm:$0xff]  }
 0x805   : > { %9531 = vmatpush2.bf16.msra.mxu1 %v12417_v24  ;;  %9491 = vmatprep.subr.bf16.mxu0 %v12422_v26  ;;  %v12485_v24 = vld [vmem:[%s13716_s17 + $0xb64] ss:$48 sps:$4 sm:$0xff]   ;;  %v12480_v26 = vld [vmem:[%s13716_s17 + $0x560] ss:$48 sps:$4 sm:$0xff]  }
 0x806   : > { %9532 = vmatprep.subr.bf16.mxu1 %v12425_v42  ;;  %v12483_v42 = vld [vmem:[%s13716_s17 + $0xb60] ss:$48 sps:$4 sm:$0xff]  }
 0x808   : > { %9492 = vmatpush2.bf16.msra.mxu0 %v12420_v57  ;;  %v12488_v57 = vld [vmem:[%s13716_s17 + $0x504] ss:$48 sps:$4 sm:$0xff]  }
 0x809   : > { %9533 = vmatpush2.bf16.msra.mxu1 %v12423_v44  ;;  %9543 = vmatprep.subr.bf16.mxu0 %v12428_v50  ;;  %v12491_v44 = vld [vmem:[%s13716_s17 + $0xb04] ss:$48 sps:$4 sm:$0xff]   ;;  %v12486_v50 = vld [vmem:[%s13716_s17 + $0x500] ss:$48 sps:$4 sm:$0xff]  }
 0x80a   : > { %9584 = vmatprep.subr.bf16.mxu1 %v12431_v28  ;;  %v12489_v28 = vld [vmem:[%s13716_s17 + $0xb00] ss:$48 sps:$4 sm:$0xff]  }
 0x80b   : > { %v14634_v21 = vpop.f32.mrf.mxu0  ;;  %9494 = vmatmul.mubr.bf16.vlgmr.msra.gmra.mxu0 %v14170_v58 }
 0x80c   : > { %v14636_v59 = vpop.f32.mrf.mxu1  ;;  %9535 = vmatmul.mubr.bf16.vlgmr.msra.gmra.mxu1 %v14172_v62  ;;  %9544 = vmatpush1.bf16.msra.mxu0 %v12426_v60  ;;  %v12494_v60 = vld [vmem:[%s13716_s17 + $0x4a4] ss:$48 sps:$4 sm:$0xff]  }
 0x80d   : > { %9585 = vmatpush1.bf16.msra.mxu1 %v12429_v6  ;;  %v14642_v61 = vpop.f32.mrf.mxu0  ;;  %9545 = vmatprep.subr.bf16.mxu0 %v12434_v19  ;;  %v12497_v6 = vld [vmem:[%s13716_s17 + $0xaa4] ss:$48 sps:$4 sm:$0xff]   ;;  %v12492_v19 = vld [vmem:[%s13716_s17 + $0x4a0] ss:$48 sps:$4 sm:$0xff]  }
 0x80e   : > { %v14644_v1 = vpop.f32.mrf.mxu1  ;;  %9586 = vmatprep.subr.bf16.mxu1 %v12437_v18  ;;  %9575 = vmatprep.mubr.bf16.mxu0 %v14070_v13  ;;  %v12495_v18 = vld [vmem:[%s13716_s17 + $0xaa0] ss:$48 sps:$4 sm:$0xff]  }
 0x80f   : > { %9616 = vmatprep.mubr.bf16.mxu1 %v14073_v15  ;;  %v9253_v23 = vpop.f32.mrf.mxu0 }
 0x810   : > { %v9294_v25 = vpop.f32.mrf.mxu1  ;;  %9546 = vmatpush1.bf16.msra.mxu0 %v12432_v49  ;;  %v12500_v49 = vld [vmem:[%s13716_s17 + $0x444] ss:$48 sps:$4 sm:$0xff]  }
 0x811   : > { %9587 = vmatpush1.bf16.msra.mxu1 %v12435_v53  ;;  %v9254_v5 = vpop.f32.mrf.mxu0  ;;  %9547 = vmatprep.subr.bf16.mxu0 %v12440_v16  ;;  %v12503_v53 = vld [vmem:[%s13716_s17 + $0xa44] ss:$48 sps:$4 sm:$0xff]   ;;  %v12498_v16 = vld [vmem:[%s13716_s17 + $0x440] ss:$48 sps:$4 sm:$0xff]  }
 0x812   : > { %v9295_v9 = vpop.f32.mrf.mxu1  ;;  %9588 = vmatprep.subr.bf16.mxu1 %v12443_v17  ;;  %v12501_v17 = vld [vmem:[%s13716_s17 + $0xa40] ss:$48 sps:$4 sm:$0xff]   ;;  %v12506_v23 = vld [vmem:[%s13716_s17 + $0x3e4] ss:$48 sps:$4 sm:$0xff]  }
 0x813   : > { %v12509_v25 = vld [vmem:[%s13716_s17 + $0x9e4] ss:$48 sps:$4 sm:$0xff]  }
 0x814   : > { %9548 = vmatpush1.bf16.msra.mxu0 %v12438_v3  ;;  %v12504_v3 = vld [vmem:[%s13716_s17 + $0x3e0] ss:$48 sps:$4 sm:$0xff]   ;;  %v12512_v5 = vld [vmem:[%s13716_s17 + $0x384] ss:$48 sps:$4 sm:$0xff]  }
 0x815   : > { %9589 = vmatpush1.bf16.msra.mxu1 %v12441_v4  ;;  %9549 = vmatprep.subr.bf16.mxu0 %v12446_v31  ;;  %v12507_v4 = vld [vmem:[%s13716_s17 + $0x9e0] ss:$48 sps:$4 sm:$0xff]   ;;  %v12515_v9 = vld [vmem:[%s13716_s17 + $0x984] ss:$48 sps:$4 sm:$0xff]   ;;  %v5005_v31 = vsub.s32 4, %v14374_v41 }
 0x816   : > { %9590 = vmatprep.subr.bf16.mxu1 %v12449_v33  ;;  %v5009_v33 = vsub.s32 5, %v14374_v41 }
 0x818   : > { %9550 = vmatpush1.bf16.msra.mxu0 %v12444_v35  ;;  %v12510_v35 = vld [vmem:[%s13716_s17 + $0x380] ss:$48 sps:$4 sm:$0xff]  }
 0x819   : > { %9591 = vmatpush1.bf16.msra.mxu1 %v12447_v34  ;;  %9551 = vmatprep.subr.bf16.mxu0 %v12452_v46  ;;  %v12513_v34 = vld [vmem:[%s13716_s17 + $0x980] ss:$48 sps:$4 sm:$0xff]   ;;  %v12518_v46 = vld [vmem:[%s13716_s17 + $0x324] ss:$48 sps:$4 sm:$0xff]  }
 0x81a   : > { %9592 = vmatprep.subr.bf16.mxu1 %v12455_v43  ;;  %v12521_v43 = vld [vmem:[%s13716_s17 + $0x924] ss:$48 sps:$4 sm:$0xff]  }
 0x81c   : > { %9552 = vmatpush1.bf16.msra.mxu0 %v12450_v32  ;;  %v5006_v32 = vrot.slane %v14544_v22, %v5005_v31  ;;  %v12560_v31 = vld [vmem:[%s13716_s17 + $0xc84] ss:$48 sps:$4 sm:$0xff]  }
 0x81d   : > { %9593 = vmatpush1.bf16.msra.mxu1 %v12453_v29  ;;  %9553 = vmatprep.subr.bf16.mxu0 %v12458_v11  ;;  %v5010_v29 = vrot.slane %v14544_v22, %v5009_v33  ;;  %v12516_v11 = vld [vmem:[%s13716_s17 + $0x320] ss:$48 sps:$4 sm:$0xff]   ;;  %v12563_v33 = vld [vmem:[%s13716_s17 + $0x1284] ss:$48 sps:$4 sm:$0xff]  }
 0x81e   : > { %9594 = vmatprep.subr.bf16.mxu1 %v12461_v30  ;;  %v12519_v30 = vld [vmem:[%s13716_s17 + $0x920] ss:$48 sps:$4 sm:$0xff]  }
 0x81f   : > { %v12525_v22 = vld [vmem:[%s13716_s17 + $0x14c0] ss:$48 sps:$4 sm:$0xff]  }
 0x820   : > { %9554 = vmatpush1.bf16.msra.mxu0 %v12456_v20  ;;  %v12524_v20 = vld [vmem:[%s13716_s17 + $0xec4] ss:$48 sps:$4 sm:$0xff]  }
 0x821   : > { %9595 = vmatpush1.bf16.msra.mxu1 %v12459_v63  ;;  %9555 = vmatprep.subr.bf16.mxu0 %v12464_v52  ;;  %v12527_v63 = vld [vmem:[%s13716_s17 + $0x14c4] ss:$48 sps:$4 sm:$0xff]   ;;  %v9250_v52 = vadd.f32 %v14634_v21, %v5006_v32 }
 0x822   : > { %9596 = vmatprep.subr.bf16.mxu1 %v12467_v39  ;;  %v9252_v39 = vadd.f32 %v14642_v61, %v5010_v29  ;;  %v12569_v32 = vld [vmem:[%s13716_s17 + $0x1224] ss:$48 sps:$4 sm:$0xff]   ;;  %v12564_v29 = vld [vmem:[%s13716_s17 + $0xc20] ss:$48 sps:$4 sm:$0xff]  }
 0x824   : > { %9556 = vmatpush1.bf16.msra.mxu0 %v12462_v38  ;;  %v12522_v38 = vld [vmem:[%s13716_s17 + $0xec0] ss:$48 sps:$4 sm:$0xff]   ;;  %v9293_v21 = vadd.f32 %v14644_v1, %v9252_v39  ;;  %v12578_v39 = vld [vmem:[%s13716_s17 + $0x1164] ss:$48 sps:$4 sm:$0xff]  }
 0x825   : > { %9597 = vmatpush1.bf16.msra.mxu1 %v12465_v27  ;;  %9557 = vmatprep.subr.bf16.mxu0 %v12470_v45  ;;  %v12530_v27 = vld [vmem:[%s13716_s17 + $0xe64] ss:$48 sps:$4 sm:$0xff]  }
 0x826   : > { %9598 = vmatprep.subr.bf16.mxu1 %v12473_v12  ;;  %v12533_v45 = vld [vmem:[%s13716_s17 + $0x1464] ss:$48 sps:$4 sm:$0xff]   ;;  %v9291_v12 = vadd.f32 %v14636_v59, %v9250_v52  ;;  %v12573_v52 = vld [vmem:[%s13716_s17 + $0x17c0] ss:$48 sps:$4 sm:$0xff]  }
 0x827   : > { %v12536_v59 = vld [vmem:[%s13716_s17 + $0xe04] ss:$48 sps:$4 sm:$0xff]  }
 0x828   : > { %9558 = vmatpush1.bf16.msra.mxu0 %v12468_v36 }
 0x829   : > { %9599 = vmatpush1.bf16.msra.mxu1 %v12471_v14  ;;  %9559 = vmatprep.subr.bf16.mxu0 %v12476_v37  ;;  %v12528_v37 = vld [vmem:[%s13716_s17 + $0xe60] ss:$48 sps:$4 sm:$0xff]  }
 0x82a   : > { %9600 = vmatprep.subr.bf16.mxu1 %v12479_v0  ;;  %v12531_v0 = vld [vmem:[%s13716_s17 + $0x1460] ss:$48 sps:$4 sm:$0xff]  }
 0x82c   : > { %9560 = vmatpush2.bf16.msra.mxu0 %v12474_v40 }
 0x82d   : > { %9601 = vmatpush2.bf16.msra.mxu1 %v12477_v47  ;;  %9561 = vmatprep.subr.bf16.mxu0 %v12482_v48  ;;  %v12539_v48 = vld [vmem:[%s13716_s17 + $0x1404] ss:$48 sps:$4 sm:$0xff]  }
 0x82e   : > { %9602 = vmatprep.subr.bf16.mxu1 %v12485_v24 }
 0x830   : > { %9562 = vmatpush2.bf16.msra.mxu0 %v12480_v26 }
 0x831   : > { %9603 = vmatpush2.bf16.msra.mxu1 %v12483_v42  ;;  %9563 = vmatprep.subr.bf16.mxu0 %v12488_v57 }
 0x832   : > { %9604 = vmatprep.subr.bf16.mxu1 %v12491_v44  ;;  %v12534_v44 = vld [vmem:[%s13716_s17 + $0xe00] ss:$48 sps:$4 sm:$0xff]  }
 0x834   : > { %9564 = vmatpush2.bf16.msra.mxu0 %v12486_v50  ;;  %v12537_v50 = vld [vmem:[%s13716_s17 + $0x1400] ss:$48 sps:$4 sm:$0xff]  }
 0x835   : > { %9605 = vmatpush2.bf16.msra.mxu1 %v12489_v28  ;;  %9565 = vmatprep.subr.bf16.mxu0 %v12494_v60 }
 0x836   : > { %9606 = vmatprep.subr.bf16.mxu1 %v12497_v6  ;;  %v12542_v6 = vld [vmem:[%s13716_s17 + $0xda4] ss:$48 sps:$4 sm:$0xff]  }
 0x838   : > { %9566 = vmatpush2.bf16.msra.mxu0 %v12492_v19  ;;  %v12545_v19 = vld [vmem:[%s13716_s17 + $0x13a4] ss:$48 sps:$4 sm:$0xff]  }
 0x839   : > { %9607 = vmatpush2.bf16.msra.mxu1 %v12495_v18  ;;  %9567 = vmatprep.subr.bf16.mxu0 %v12500_v49  ;;  %v12540_v18 = vld [vmem:[%s13716_s17 + $0xda0] ss:$48 sps:$4 sm:$0xff]  }
 0x83a   : > { %9608 = vmatprep.subr.bf16.mxu1 %v12503_v53  ;;  %v12543_v49 = vld [vmem:[%s13716_s17 + $0x13a0] ss:$48 sps:$4 sm:$0xff]   ;;  %v12548_v53 = vld [vmem:[%s13716_s17 + $0xd44] ss:$48 sps:$4 sm:$0xff]  }
 0x83c   : > { %9568 = vmatpush2.bf16.msra.mxu0 %v12498_v16  ;;  %v12551_v16 = vld [vmem:[%s13716_s17 + $0x1344] ss:$48 sps:$4 sm:$0xff]  }
 0x83d   : > { %9609 = vmatpush2.bf16.msra.mxu1 %v12501_v17  ;;  %9569 = vmatprep.subr.bf16.mxu0 %v12506_v23  ;;  %v12546_v17 = vld [vmem:[%s13716_s17 + $0xd40] ss:$48 sps:$4 sm:$0xff]  }
 0x83e   : > { %9610 = vmatprep.subr.bf16.mxu1 %v12509_v25  ;;  %v12549_v23 = vld [vmem:[%s13716_s17 + $0x1340] ss:$48 sps:$4 sm:$0xff]   ;;  %v12554_v25 = vld [vmem:[%s13716_s17 + $0xce4] ss:$48 sps:$4 sm:$0xff]  }
 0x840   : > { %9570 = vmatpush2.bf16.msra.mxu0 %v12504_v3  ;;  %v12557_v3 = vld [vmem:[%s13716_s17 + $0x12e4] ss:$48 sps:$4 sm:$0xff]  }
 0x841   : > { %9611 = vmatpush2.bf16.msra.mxu1 %v12507_v4  ;;  %9571 = vmatprep.subr.bf16.mxu0 %v12512_v5  ;;  %v12552_v4 = vld [vmem:[%s13716_s17 + $0xce0] ss:$48 sps:$4 sm:$0xff]  }
 0x842   : > { %9612 = vmatprep.subr.bf16.mxu1 %v12515_v9  ;;  %v12555_v5 = vld [vmem:[%s13716_s17 + $0x12e0] ss:$48 sps:$4 sm:$0xff]  }
 0x844   : > { %9572 = vmatpush2.bf16.msra.mxu0 %v12510_v35 }
 0x845   : > { %9613 = vmatpush2.bf16.msra.mxu1 %v12513_v34  ;;  %9573 = vmatprep.subr.bf16.mxu0 %v12518_v46  ;;  %v12558_v34 = vld [vmem:[%s13716_s17 + $0xc80] ss:$48 sps:$4 sm:$0xff]  }
 0x846   : > { %9614 = vmatprep.subr.bf16.mxu1 %v12521_v43  ;;  %v12561_v46 = vld [vmem:[%s13716_s17 + $0x1280] ss:$48 sps:$4 sm:$0xff]   ;;  %v12566_v43 = vld [vmem:[%s13716_s17 + $0xc24] ss:$48 sps:$4 sm:$0xff]  }
 0x848   : > { %9574 = vmatpush2.bf16.msra.mxu0 %v12516_v11  ;;  %v12567_v11 = vld [vmem:[%s13716_s17 + $0x1220] ss:$48 sps:$4 sm:$0xff]  }
 0x849   : > { %9615 = vmatpush2.bf16.msra.mxu1 %v12519_v30  ;;  %9625 = vmatprep.subr.bf16.mxu0 %v12524_v20  ;;  %v12572_v30 = vld [vmem:[%s13716_s17 + $0x11c4] ss:$48 sps:$4 sm:$0xff]  }
 0x84a   : > { %9666 = vmatprep.subr.bf16.mxu1 %v12527_v63  ;;  %v12575_v20 = vld [vmem:[%s13716_s17 + $0x17c4] ss:$48 sps:$4 sm:$0xff]   ;;  %v12570_v63 = vld [vmem:[%s13716_s17 + $0x11c0] ss:$48 sps:$4 sm:$0xff]  }
 0x84b   : > { %v9331_v36 = vpop.f32.mrf.mxu0  ;;  %9576 = vmatmul.mubr.bf16.vlgmr.msra.gmra.mxu0 %v14094_v7 }
 0x84c   : > { %v9372_v14 = vpop.f32.mrf.mxu1  ;;  %9617 = vmatmul.mubr.bf16.vlgmr.msra.gmra.mxu1 %v14096_v8  ;;  %v9332_v61 = vadd.f32 %v9331_v36, %v9291_v12  ;;  %9626 = vmatpush1.bf16.msra.mxu0 %v12522_v38  ;;  %v12581_v38 = vld [vmem:[%s13716_s17 + $0x1764] ss:$48 sps:$4 sm:$0xff]   ;;  %v12582_v36 = vld [vmem:[%s13716_s17 + $0x1100] ss:$48 sps:$4 sm:$0xff]  }
 0x84d   : > { %9667 = vmatpush1.bf16.msra.mxu1 %v12525_v22  ;;  %v9333_v40 = vpop.f32.mrf.mxu0  ;;  %9627 = vmatprep.subr.bf16.mxu0 %v12530_v27  ;;  %v12576_v22 = vld [vmem:[%s13716_s17 + $0x1160] ss:$48 sps:$4 sm:$0xff]   ;;  %v12587_v12 = vld [vmem:[%s13716_s17 + $0x1704] ss:$48 sps:$4 sm:$0xff]  }
 0x84e   : > { %v9374_v47 = vpop.f32.mrf.mxu1  ;;  %9668 = vmatprep.subr.bf16.mxu1 %v12533_v45  ;;  %v9373_v24 = vadd.f32 %v9372_v14, %v9332_v61  ;;  %v9334_v26 = vadd.f32 %v9333_v40, %v9293_v21  ;;  %9657 = vmatprep.mubr.bf16.mxu0 %v14126_v51  ;;  %v12579_v27 = vld [vmem:[%s13716_s17 + $0x1760] ss:$48 sps:$4 sm:$0xff]   ;;  %v12584_v45 = vld [vmem:[%s13716_s17 + $0x1104] ss:$48 sps:$4 sm:$0xff]  }
 0x84f   : > { %9698 = vmatprep.mubr.bf16.mxu1 %v14129_v56  ;;  %v9335_v1 = vpop.f32.mrf.mxu0  ;;  %v12585_v14 = vld [vmem:[%s13716_s17 + $0x1700] ss:$48 sps:$4 sm:$0xff]   ;;  %v12590_v21 = vld [vmem:[%s13716_s17 + $0x10a4] ss:$48 sps:$4 sm:$0xff]  }
 0x850   : > { %v9376_v42 = vpop.f32.mrf.mxu1  ;;  %12818 = vtanh.f32 %v9373_v24  ;;  %v9375_v57 = vadd.f32 %v9374_v47, %v9334_v26  ;;  %9628 = vmatpush1.bf16.msra.mxu0 %v12528_v37  ;;  %v12593_v61 = vld [vmem:[%s13716_s17 + $0x16a4] ss:$48 sps:$4 sm:$0xff]   ;;  %v12588_v37 = vld [vmem:[%s13716_s17 + $0x10a0] ss:$48 sps:$4 sm:$0xff]  }
 0x851   : > { %9669 = vmatpush1.bf16.msra.mxu1 %v12531_v0  ;;  %v9336_v28 = vpop.f32.mrf.mxu0  ;;  %9629 = vmatprep.subr.bf16.mxu0 %v12536_v59  ;;  %v12591_v0 = vld [vmem:[%s13716_s17 + $0x16a0] ss:$48 sps:$4 sm:$0xff]   ;;  %v12596_v40 = vld [vmem:[%s13716_s17 + $0x1044] ss:$48 sps:$4 sm:$0xff]  }
 0x852   : > { %v9377_v60 = vpop.f32.mrf.mxu1  ;;  %9670 = vmatprep.subr.bf16.mxu1 %v12539_v48  ;;  %12820 = vtanh.f32 %v9375_v57  ;;  %v12599_v47 = vld [vmem:[%s13716_s17 + $0x1644] ss:$48 sps:$4 sm:$0xff]   ;;  %v12594_v59 = vld [vmem:[%s13716_s17 + $0x1040] ss:$48 sps:$4 sm:$0xff]  }
 0x853   : > { %v12597_v48 = vld [vmem:[%s13716_s17 + $0x1640] ss:$48 sps:$4 sm:$0xff]   ;;  %v12602_v24 = vld [vmem:[%s13716_s17 + $0xfe4] ss:$48 sps:$4 sm:$0xff]  }
 0x854   : > { %9630 = vmatpush1.bf16.msra.mxu0 %v12534_v44  ;;  %v12605_v26 = vld [vmem:[%s13716_s17 + $0x15e4] ss:$48 sps:$4 sm:$0xff]   ;;  %v12600_v1 = vld [vmem:[%s13716_s17 + $0xfe0] ss:$48 sps:$4 sm:$0xff]  }
 0x855   : > { %9671 = vmatpush1.bf16.msra.mxu1 %v12537_v50  ;;  %9631 = vmatprep.subr.bf16.mxu0 %v12542_v6  ;;  %v12603_v42 = vld [vmem:[%s13716_s17 + $0x15e0] ss:$48 sps:$4 sm:$0xff]   ;;  %v12608_v57 = vld [vmem:[%s13716_s17 + $0xf84] ss:$48 sps:$4 sm:$0xff]  }
 0x856   : > { %9672 = vmatprep.subr.bf16.mxu1 %v12545_v19  ;;  %v12611_v44 = vld [vmem:[%s13716_s17 + $0x1584] ss:$48 sps:$4 sm:$0xff]   ;;  %v12606_v50 = vld [vmem:[%s13716_s17 + $0xf80] ss:$48 sps:$4 sm:$0xff]  }
 0x857   : > { %v12609_v28 = vld [vmem:[%s13716_s17 + $0x1580] ss:$48 sps:$4 sm:$0xff]   ;;  %v12614_v60 = vld [vmem:[%s13716_s17 + $0xf24] ss:$48 sps:$4 sm:$0xff]  }
 0x858   : > { %9632 = vmatpush1.bf16.msra.mxu0 %v12540_v18  ;;  %v12617_v6 = vld [vmem:[%s13716_s17 + $0x1524] ss:$48 sps:$4 sm:$0xff]   ;;  %v12612_v19 = vld [vmem:[%s13716_s17 + $0xf20] ss:$48 sps:$4 sm:$0xff]  }
 0x859   : > { %9673 = vmatpush1.bf16.msra.mxu1 %v12543_v49  ;;  %9633 = vmatprep.subr.bf16.mxu0 %v12548_v53  ;;  %v12615_v18 = vld [vmem:[%s13716_s17 + $0x1520] ss:$48 sps:$4 sm:$0xff]   ;;  %v12620_v49 = vld [vmem:[%s13716_s17 + $0x2cc] ss:$48 sps:$4 sm:$0xff]  }
 0x85a   : > { %9674 = vmatprep.subr.bf16.mxu1 %v12551_v16  ;;  %v12623_v53 = vld [vmem:[%s13716_s17 + $0x8cc] ss:$48 sps:$4 sm:$0xff]   ;;  %v12618_v16 = vld [vmem:[%s13716_s17 + $0x2c8] ss:$48 sps:$4 sm:$0xff]  }
 0x85c   : > { %9634 = vmatpush1.bf16.msra.mxu0 %v12546_v17  ;;  %v12621_v17 = vld [vmem:[%s13716_s17 + $0x8c8] ss:$48 sps:$4 sm:$0xff]  }
 0x85d   : > { %9675 = vmatpush1.bf16.msra.mxu1 %v12549_v23  ;;  %v12819_v9 = vpop.eup %12818  ;;  %9635 = vmatprep.subr.bf16.mxu0 %v12554_v25  ;;  %v12626_v23 = vld [vmem:[%s13716_s17 + $0x26c] ss:$48 sps:$4 sm:$0xff]  }
 0x85e   : > { %9676 = vmatprep.subr.bf16.mxu1 %v12557_v3  ;;  %9887 = vst [vmem:[%s13726_s4 + $0x20] sm:$0xff] %v12819_v9  ;;  %v12629_v25 = vld [vmem:[%s13716_s17 + $0x86c] ss:$48 sps:$4 sm:$0xff]   ;;  %v12627_v9 = vld [vmem:[%s13716_s17 + $0x868] ss:$48 sps:$4 sm:$0xff]  }
 0x85f   : > { %v12821_v35 = vpop.eup %12820 }
 0x860   : > { %9888 = vst [vmem:[%s13726_s4 + $0x28] sm:$0xff] %v12821_v35  ;;  %9636 = vmatpush1.bf16.msra.mxu0 %v12552_v4  ;;  %v12632_v35 = vld [vmem:[%s13716_s17 + $0x20c] ss:$48 sps:$4 sm:$0xff]  }
 0x861   : > { %9677 = vmatpush1.bf16.msra.mxu1 %v12555_v5  ;;  %9637 = vmatprep.subr.bf16.mxu0 %v12560_v31  ;;  %v12624_v5 = vld [vmem:[%s13716_s17 + $0x268] ss:$48 sps:$4 sm:$0xff]  }
 0x862   : > { %9678 = vmatprep.subr.bf16.mxu1 %v12563_v33 }
 0x864   : > { %9638 = vmatpush1.bf16.msra.mxu0 %v12558_v34  ;;  %v12635_v34 = vld [vmem:[%s13716_s17 + $0x80c] ss:$48 sps:$4 sm:$0xff]  }
 0x865   : > { %9679 = vmatpush1.bf16.msra.mxu1 %v12561_v46  ;;  %9639 = vmatprep.subr.bf16.mxu0 %v12566_v43 }
 0x866   : > { %9680 = vmatprep.subr.bf16.mxu1 %v12569_v32  ;;  %v12630_v32 = vld [vmem:[%s13716_s17 + $0x208] ss:$48 sps:$4 sm:$0xff]  }
 0x868   : > { %9640 = vmatpush1.bf16.msra.mxu0 %v12564_v29  ;;  %v12633_v29 = vld [vmem:[%s13716_s17 + $0x808] ss:$48 sps:$4 sm:$0xff]  }
 0x869   : > { %9681 = vmatpush1.bf16.msra.mxu1 %v12567_v11  ;;  %9641 = vmatprep.subr.bf16.mxu0 %v12572_v30 }
 0x86a   : > { %9682 = vmatprep.subr.bf16.mxu1 %v12575_v20  ;;  %v12638_v20 = vld [vmem:[%s13716_s17 + $0x1ac] ss:$48 sps:$4 sm:$0xff]  }
 0x86c   : > { %9642 = vmatpush2.bf16.msra.mxu0 %v12570_v63  ;;  %v12639_v63 = vld [vmem:[%s13716_s17 + $0x7a8] ss:$48 sps:$4 sm:$0xff]  }
 0x86d   : > { %9683 = vmatpush2.bf16.msra.mxu1 %v12573_v52  ;;  %9643 = vmatprep.subr.bf16.mxu0 %v12578_v39  ;;  %v12644_v52 = vld [vmem:[%s13716_s17 + $0x14c] ss:$48 sps:$4 sm:$0xff]  }
 0x86e   : > { %9684 = vmatprep.subr.bf16.mxu1 %v12581_v38  ;;  %v12647_v39 = vld [vmem:[%s13716_s17 + $0x74c] ss:$48 sps:$4 sm:$0xff]   ;;  %v12642_v38 = vld [vmem:[%s13716_s17 + $0x148] ss:$48 sps:$4 sm:$0xff]  }
 0x870   : > { %9644 = vmatpush2.bf16.msra.mxu0 %v12576_v22  ;;  %v12645_v22 = vld [vmem:[%s13716_s17 + $0x748] ss:$48 sps:$4 sm:$0xff]  }
 0x871   : > { %9685 = vmatpush2.bf16.msra.mxu1 %v12579_v27  ;;  %9645 = vmatprep.subr.bf16.mxu0 %v12584_v45  ;;  %v12650_v27 = vld [vmem:[%s13716_s17 + $0xec] ss:$48 sps:$4 sm:$0xff]  }
 0x872   : > { %9686 = vmatprep.subr.bf16.mxu1 %v12587_v12  ;;  %v12653_v45 = vld [vmem:[%s13716_s17 + $0x6ec] ss:$48 sps:$4 sm:$0xff]   ;;  %v12648_v12 = vld [vmem:[%s13716_s17 + $0xe8] ss:$48 sps:$4 sm:$0xff]  }
 0x874   : > { %9646 = vmatpush2.bf16.msra.mxu0 %v12582_v36  ;;  %v12651_v36 = vld [vmem:[%s13716_s17 + $0x6e8] ss:$48 sps:$4 sm:$0xff]  }
 0x875   : > { %9687 = vmatpush2.bf16.msra.mxu1 %v12585_v14  ;;  %9647 = vmatprep.subr.bf16.mxu0 %v12590_v21  ;;  %v12656_v14 = vld [vmem:[%s13716_s17 + $0x8c] ss:$48 sps:$4 sm:$0xff]  }
 0x876   : > { %9688 = vmatprep.subr.bf16.mxu1 %v12593_v61  ;;  %v12659_v21 = vld [vmem:[%s13716_s17 + $0x68c] ss:$48 sps:$4 sm:$0xff]   ;;  %v12654_v61 = vld [vmem:[%s13716_s17 + $0x88] ss:$48 sps:$4 sm:$0xff]  }
 0x878   : > { %9648 = vmatpush2.bf16.msra.mxu0 %v12588_v37  ;;  %v12657_v37 = vld [vmem:[%s13716_s17 + $0x688] ss:$48 sps:$4 sm:$0xff]  }
 0x879   : > { %9689 = vmatpush2.bf16.msra.mxu1 %v12591_v0  ;;  %9649 = vmatprep.subr.bf16.mxu0 %v12596_v40  ;;  %v12662_v0 = vld [vmem:[%s13716_s17 + $0x2c] ss:$48 sps:$4 sm:$0xff]  }
 0x87a   : > { %9690 = vmatprep.subr.bf16.mxu1 %v12599_v47  ;;  %v12665_v40 = vld [vmem:[%s13716_s17 + $0x62c] ss:$48 sps:$4 sm:$0xff]   ;;  %v12660_v47 = vld [vmem:[%s13716_s17 + $0x28] ss:$48 sps:$4 sm:$0xff]  }
 0x87c   : > { %9650 = vmatpush2.bf16.msra.mxu0 %v12594_v59  ;;  %v12663_v59 = vld [vmem:[%s13716_s17 + $0x628] ss:$48 sps:$4 sm:$0xff]  }
 0x87d   : > { %9691 = vmatpush2.bf16.msra.mxu1 %v12597_v48  ;;  %9651 = vmatprep.subr.bf16.mxu0 %v12602_v24  ;;  %v12668_v48 = vld [vmem:[%s13716_s17 + $0x5cc] ss:$48 sps:$4 sm:$0xff]  }
 0x87e   : > { %9692 = vmatprep.subr.bf16.mxu1 %v12605_v26  ;;  %v12671_v24 = vld [vmem:[%s13716_s17 + $0xbcc] ss:$48 sps:$4 sm:$0xff]   ;;  %v12666_v26 = vld [vmem:[%s13716_s17 + $0x5c8] ss:$48 sps:$4 sm:$0xff]  }
 0x880   : > { %9652 = vmatpush2.bf16.msra.mxu0 %v12600_v1  ;;  %v12669_v1 = vld [vmem:[%s13716_s17 + $0xbc8] ss:$48 sps:$4 sm:$0xff]  }
 0x881   : > { %9693 = vmatpush2.bf16.msra.mxu1 %v12603_v42  ;;  %9653 = vmatprep.subr.bf16.mxu0 %v12608_v57  ;;  %v12674_v42 = vld [vmem:[%s13716_s17 + $0x56c] ss:$48 sps:$4 sm:$0xff]  }
 0x882   : > { %9694 = vmatprep.subr.bf16.mxu1 %v12611_v44  ;;  %v12677_v57 = vld [vmem:[%s13716_s17 + $0xb6c] ss:$48 sps:$4 sm:$0xff]   ;;  %v12672_v44 = vld [vmem:[%s13716_s17 + $0x568] ss:$48 sps:$4 sm:$0xff]  }
 0x884   : > { %9654 = vmatpush2.bf16.msra.mxu0 %v12606_v50  ;;  %v12675_v50 = vld [vmem:[%s13716_s17 + $0xb68] ss:$48 sps:$4 sm:$0xff]  }
 0x885   : > { %9695 = vmatpush2.bf16.msra.mxu1 %v12609_v28  ;;  %9655 = vmatprep.subr.bf16.mxu0 %v12614_v60  ;;  %v12680_v28 = vld [vmem:[%s13716_s17 + $0x50c] ss:$48 sps:$4 sm:$0xff]  }
 0x886   : > { %9696 = vmatprep.subr.bf16.mxu1 %v12617_v6  ;;  %v12683_v60 = vld [vmem:[%s13716_s17 + $0xb0c] ss:$48 sps:$4 sm:$0xff]   ;;  %v12678_v6 = vld [vmem:[%s13716_s17 + $0x508] ss:$48 sps:$4 sm:$0xff]  }
 0x888   : > { %9656 = vmatpush2.bf16.msra.mxu0 %v12612_v19  ;;  %v12681_v19 = vld [vmem:[%s13716_s17 + $0xb08] ss:$48 sps:$4 sm:$0xff]  }
 0x889   : > { %9697 = vmatpush2.bf16.msra.mxu1 %v12615_v18  ;;  %9707 = vmatprep.subr.bf16.mxu0 %v12620_v49  ;;  %v12686_v18 = vld [vmem:[%s13716_s17 + $0x4ac] ss:$48 sps:$4 sm:$0xff]  }
 0x88a   : > { %9748 = vmatprep.subr.bf16.mxu1 %v12623_v53  ;;  %v12689_v49 = vld [vmem:[%s13716_s17 + $0xaac] ss:$48 sps:$4 sm:$0xff]   ;;  %v12684_v53 = vld [vmem:[%s13716_s17 + $0x4a8] ss:$48 sps:$4 sm:$0xff]  }
 0x88b   : > { %v14788_v3 = vpop.f32.mrf.mxu0  ;;  %9658 = vmatmul.mubr.bf16.vlgmr.msra.gmra.mxu0 %v14170_v58 }
 0x88c   : > { %v14790_v4 = vpop.f32.mrf.mxu1  ;;  %9699 = vmatmul.mubr.bf16.vlgmr.msra.gmra.mxu1 %v14172_v62  ;;  %9708 = vmatpush1.bf16.msra.mxu0 %v12618_v16  ;;  %v12687_v16 = vld [vmem:[%s13716_s17 + $0xaa8] ss:$48 sps:$4 sm:$0xff]  }
 0x88d   : > { %9749 = vmatpush1.bf16.msra.mxu1 %v12621_v17  ;;  %v14796_v31 = vpop.f32.mrf.mxu0  ;;  %9709 = vmatprep.subr.bf16.mxu0 %v12626_v23  ;;  %v12692_v17 = vld [vmem:[%s13716_s17 + $0x44c] ss:$48 sps:$4 sm:$0xff]  }
 0x88e   : > { %v14798_v33 = vpop.f32.mrf.mxu1  ;;  %9750 = vmatprep.subr.bf16.mxu1 %v12629_v25  ;;  %9739 = vmatprep.mubr.bf16.mxu0 %v14070_v13  ;;  %v12641_v13 = vld [vmem:[%s13716_s17 + $0x7ac] ss:$48 sps:$4 sm:$0xff]   ;;  %v12690_v25 = vld [vmem:[%s13716_s17 + $0x448] ss:$48 sps:$4 sm:$0xff]  }
 0x88f   : > { %9780 = vmatprep.mubr.bf16.mxu1 %v14073_v15  ;;  %v9417_v46 = vpop.f32.mrf.mxu0  ;;  %v12636_v15 = vld [vmem:[%s13716_s17 + $0x1a8] ss:$48 sps:$4 sm:$0xff]   ;;  %v12695_v23 = vld [vmem:[%s13716_s17 + $0xa4c] ss:$48 sps:$4 sm:$0xff]  }
 0x890   : > { %v9458_v43 = vpop.f32.mrf.mxu1  ;;  %9710 = vmatpush1.bf16.msra.mxu0 %v12624_v5  ;;  %v12693_v5 = vld [vmem:[%s13716_s17 + $0xa48] ss:$48 sps:$4 sm:$0xff]  }
 0x891   : > { %9751 = vmatpush1.bf16.msra.mxu1 %v12627_v9  ;;  %v9418_v11 = vpop.f32.mrf.mxu0  ;;  %9711 = vmatprep.subr.bf16.mxu0 %v12632_v35  ;;  %v12698_v9 = vld [vmem:[%s13716_s17 + $0x3ec] ss:$48 sps:$4 sm:$0xff]   ;;  %v12699_v46 = vld [vmem:[%s13716_s17 + $0x9e8] ss:$48 sps:$4 sm:$0xff]  }
 0x892   : > { %v9459_v30 = vpop.f32.mrf.mxu1  ;;  %9752 = vmatprep.subr.bf16.mxu1 %v12635_v34  ;;  %v12701_v35 = vld [vmem:[%s13716_s17 + $0x9ec] ss:$48 sps:$4 sm:$0xff]   ;;  %v12696_v34 = vld [vmem:[%s13716_s17 + $0x3e8] ss:$48 sps:$4 sm:$0xff]   ;;  %v5017_v11 = vsub.s32 7, %v14374_v41 }
 0x893   : > { %v12704_v43 = vld [vmem:[%s13716_s17 + $0x38c] ss:$48 sps:$4 sm:$0xff]   ;;  %v12702_v30 = vld [vmem:[%s13716_s17 + $0x388] ss:$48 sps:$4 sm:$0xff]  }
 0x894   : > { %9712 = vmatpush1.bf16.msra.mxu0 %v12630_v32  ;;  %v12707_v32 = vld [vmem:[%s13716_s17 + $0x98c] ss:$48 sps:$4 sm:$0xff]  }
 0x895   : > { %9753 = vmatpush1.bf16.msra.mxu1 %v12633_v29  ;;  %9713 = vmatprep.subr.bf16.mxu0 %v12638_v20  ;;  %v5013_v29 = vsub.s32 6, %v14374_v41  ;;  %v12705_v20 = vld [vmem:[%s13716_s17 + $0x988] ss:$48 sps:$4 sm:$0xff]  }
 0x896   : > { %9754 = vmatprep.subr.bf16.mxu1 %v12641_v13  ;;  %v12710_v13 = vld [vmem:[%s13716_s17 + $0x32c] ss:$48 sps:$4 sm:$0xff]  }
 0x898   : > { %9714 = vmatpush1.bf16.msra.mxu0 %v12636_v15  ;;  %v12713_v15 = vld [vmem:[%s13716_s17 + $0x92c] ss:$48 sps:$4 sm:$0xff]  }
 0x899   : > { %9755 = vmatpush1.bf16.msra.mxu1 %v12639_v63  ;;  %9715 = vmatprep.subr.bf16.mxu0 %v12644_v52  ;;  %v12835_v63 = vld [vmem:[%s13728_s27] sm:$0xff] }
 0x89a   : > { %9756 = vmatprep.subr.bf16.mxu1 %v12647_v39  ;;  %v5014_v52 = vrot.slane %v12835_v63, %v5013_v29  ;;  %v5018_v39 = vrot.slane %v12835_v63, %v5017_v11  ;;  %v12758_v29 = vld [vmem:[%s13716_s17 + $0xc2c] ss:$48 sps:$4 sm:$0xff]   ;;  %v12762_v63 = vld [vmem:[%s13716_s17 + $0x11c8] ss:$48 sps:$4 sm:$0xff]  }
 0x89b   : > { %v12761_v11 = vld [vmem:[%s13716_s17 + $0x122c] ss:$48 sps:$4 sm:$0xff]  }
 0x89c   : > { %9716 = vmatpush1.bf16.msra.mxu0 %v12642_v38  ;;  %v12708_v38 = vld [vmem:[%s13716_s17 + $0x328] ss:$48 sps:$4 sm:$0xff]  }
 0x89d   : > { %9757 = vmatpush1.bf16.msra.mxu1 %v12645_v22  ;;  %9717 = vmatprep.subr.bf16.mxu0 %v12650_v27  ;;  %v12711_v22 = vld [vmem:[%s13716_s17 + $0x928] ss:$48 sps:$4 sm:$0xff]   ;;  %v12716_v27 = vld [vmem:[%s13716_s17 + $0xecc] ss:$48 sps:$4 sm:$0xff]  }
 0x89e   : > { %9758 = vmatprep.subr.bf16.mxu1 %v12653_v45  ;;  %v12719_v45 = vld [vmem:[%s13716_s17 + $0x14cc] ss:$48 sps:$4 sm:$0xff]  }
 0x8a0   : > { %9718 = vmatpush1.bf16.msra.mxu0 %v12648_v12  ;;  %v9414_v12 = vadd.f32 %v14788_v3, %v5014_v52  ;;  %v12765_v52 = vld [vmem:[%s13716_s17 + $0x17c8] ss:$48 sps:$4 sm:$0xff]  }
 0x8a1   : > { %9759 = vmatpush1.bf16.msra.mxu1 %v12651_v36  ;;  %9719 = vmatprep.subr.bf16.mxu0 %v12656_v14  ;;  %v9416_v36 = vadd.f32 %v14796_v31, %v5018_v39  ;;  %v12714_v14 = vld [vmem:[%s13716_s17 + $0xec8] ss:$48 sps:$4 sm:$0xff]   ;;  %v12770_v39 = vld [vmem:[%s13716_s17 + $0x116c] ss:$48 sps:$4 sm:$0xff]  }
 0x8a2   : > { %9760 = vmatprep.subr.bf16.mxu1 %v12659_v21  ;;  %v12717_v21 = vld [vmem:[%s13716_s17 + $0x14c8] ss:$48 sps:$4 sm:$0xff]  }
 0x8a3   : > { %v9457_v3 = vadd.f32 %v14798_v33, %v9416_v36  ;;  %v12774_v36 = vld [vmem:[%s13716_s17 + $0x1108] ss:$48 sps:$4 sm:$0xff]  }
 0x8a4   : > { %9720 = vmatpush1.bf16.msra.mxu0 %v12654_v61  ;;  %v12722_v61 = vld [vmem:[%s13716_s17 + $0xe6c] ss:$48 sps:$4 sm:$0xff]  }
 0x8a5   : > { %9761 = vmatpush1.bf16.msra.mxu1 %v12657_v37  ;;  %9721 = vmatprep.subr.bf16.mxu0 %v12662_v0  ;;  %v12725_v37 = vld [vmem:[%s13716_s17 + $0x146c] ss:$48 sps:$4 sm:$0xff]   ;;  %v9455_v0 = vadd.f32 %v14790_v4, %v9414_v12 }
 0x8a6   : > { %9762 = vmatprep.subr.bf16.mxu1 %v12665_v40  ;;  %v12728_v4 = vld [vmem:[%s13716_s17 + $0xe0c] ss:$48 sps:$4 sm:$0xff]  }
 0x8a7   : > { %v12779_v12 = vld [vmem:[%s13716_s17 + $0x170c] ss:$48 sps:$4 sm:$0xff]  }
 0x8a8   : > { %9722 = vmatpush1.bf16.msra.mxu0 %v12660_v47 }
 0x8a9   : > { %9763 = vmatpush1.bf16.msra.mxu1 %v12663_v59  ;;  %9723 = vmatprep.subr.bf16.mxu0 %v12668_v48  ;;  %v12720_v59 = vld [vmem:[%s13716_s17 + $0xe68] ss:$48 sps:$4 sm:$0xff]  }
 0x8aa   : > { %9764 = vmatprep.subr.bf16.mxu1 %v12671_v24  ;;  %v12723_v48 = vld [vmem:[%s13716_s17 + $0x1468] ss:$48 sps:$4 sm:$0xff]  }
 0x8ac   : > { %9724 = vmatpush2.bf16.msra.mxu0 %v12666_v26 }
 0x8ad   : > { %9765 = vmatpush2.bf16.msra.mxu1 %v12669_v1  ;;  %9725 = vmatprep.subr.bf16.mxu0 %v12674_v42  ;;  %v12731_v1 = vld [vmem:[%s13716_s17 + $0x140c] ss:$48 sps:$4 sm:$0xff]  }
 0x8ae   : > { %9766 = vmatprep.subr.bf16.mxu1 %v12677_v57 }
 0x8b0   : > { %9726 = vmatpush2.bf16.msra.mxu0 %v12672_v44  ;;  %v12726_v44 = vld [vmem:[%s13716_s17 + $0xe08] ss:$48 sps:$4 sm:$0xff]  }
 0x8b1   : > { %9767 = vmatpush2.bf16.msra.mxu1 %v12675_v50  ;;  %9727 = vmatprep.subr.bf16.mxu0 %v12680_v28  ;;  %v12729_v50 = vld [vmem:[%s13716_s17 + $0x1408] ss:$48 sps:$4 sm:$0xff]  }
 0x8b2   : > { %9768 = vmatprep.subr.bf16.mxu1 %v12683_v60 }
 0x8b4   : > { %9728 = vmatpush2.bf16.msra.mxu0 %v12678_v6  ;;  %v12732_v6 = vld [vmem:[%s13716_s17 + $0xda8] ss:$48 sps:$4 sm:$0xff]  }
 0x8b5   : > { %9769 = vmatpush2.bf16.msra.mxu1 %v12681_v19  ;;  %9729 = vmatprep.subr.bf16.mxu0 %v12686_v18  ;;  %v12735_v19 = vld [vmem:[%s13716_s17 + $0x13a8] ss:$48 sps:$4 sm:$0xff]   ;;  %v12740_v18 = vld [vmem:[%s13716_s17 + $0xd4c] ss:$48 sps:$4 sm:$0xff]  }
 0x8b6   : > { %9770 = vmatprep.subr.bf16.mxu1 %v12689_v49  ;;  %v12743_v49 = vld [vmem:[%s13716_s17 + $0x134c] ss:$48 sps:$4 sm:$0xff]  }
 0x8b8   : > { %9730 = vmatpush2.bf16.msra.mxu0 %v12684_v53  ;;  %v12738_v53 = vld [vmem:[%s13716_s17 + $0xd48] ss:$48 sps:$4 sm:$0xff]  }
 0x8b9   : > { %9771 = vmatpush2.bf16.msra.mxu1 %v12687_v16  ;;  %9731 = vmatprep.subr.bf16.mxu0 %v12692_v17  ;;  %v12741_v16 = vld [vmem:[%s13716_s17 + $0x1348] ss:$48 sps:$4 sm:$0xff]   ;;  %v12746_v17 = vld [vmem:[%s13716_s17 + $0xcec] ss:$48 sps:$4 sm:$0xff]  }
 0x8ba   : > { %9772 = vmatprep.subr.bf16.mxu1 %v12695_v23  ;;  %v12749_v23 = vld [vmem:[%s13716_s17 + $0x12ec] ss:$48 sps:$4 sm:$0xff]  }
 0x8bc   : > { %9732 = vmatpush2.bf16.msra.mxu0 %v12690_v25  ;;  %v12744_v25 = vld [vmem:[%s13716_s17 + $0xce8] ss:$48 sps:$4 sm:$0xff]  }
 0x8bd   : > { %9773 = vmatpush2.bf16.msra.mxu1 %v12693_v5  ;;  %9733 = vmatprep.subr.bf16.mxu0 %v12698_v9  ;;  %v12747_v5 = vld [vmem:[%s13716_s17 + $0x12e8] ss:$48 sps:$4 sm:$0xff]  }
 0x8be   : > { %9774 = vmatprep.subr.bf16.mxu1 %v12701_v35  ;;  %v12752_v35 = vld [vmem:[%s13716_s17 + $0xc8c] ss:$48 sps:$4 sm:$0xff]  }
 0x8c0   : > { %9734 = vmatpush2.bf16.msra.mxu0 %v12696_v34  ;;  %v12755_v34 = vld [vmem:[%s13716_s17 + $0x128c] ss:$48 sps:$4 sm:$0xff]  }
 0x8c1   : > { %9775 = vmatpush2.bf16.msra.mxu1 %v12699_v46  ;;  %9735 = vmatprep.subr.bf16.mxu0 %v12704_v43  ;;  %v12750_v43 = vld [vmem:[%s13716_s17 + $0xc88] ss:$48 sps:$4 sm:$0xff]  }
 0x8c2   : > { %9776 = vmatprep.subr.bf16.mxu1 %v12707_v32  ;;  %v12753_v32 = vld [vmem:[%s13716_s17 + $0x1288] ss:$48 sps:$4 sm:$0xff]  }
 0x8c4   : > { %9736 = vmatpush2.bf16.msra.mxu0 %v12702_v30  ;;  %v12756_v30 = vld [vmem:[%s13716_s17 + $0xc28] ss:$48 sps:$4 sm:$0xff]  }
 0x8c5   : > { %9777 = vmatpush2.bf16.msra.mxu1 %v12705_v20  ;;  %9737 = vmatprep.subr.bf16.mxu0 %v12710_v13  ;;  %v12759_v20 = vld [vmem:[%s13716_s17 + $0x1228] ss:$48 sps:$4 sm:$0xff]   ;;  %v12764_v13 = vld [vmem:[%s13716_s17 + $0x11cc] ss:$48 sps:$4 sm:$0xff]  }
 0x8c6   : > { %9778 = vmatprep.subr.bf16.mxu1 %v12713_v15  ;;  %v12767_v15 = vld [vmem:[%s13716_s17 + $0x17cc] ss:$48 sps:$4 sm:$0xff]  }
 0x8c8   : > { %9738 = vmatpush2.bf16.msra.mxu0 %v12708_v38  ;;  %v12773_v38 = vld [vmem:[%s13716_s17 + $0x176c] ss:$48 sps:$4 sm:$0xff]  }
 0x8c9   : > { %9779 = vmatpush2.bf16.msra.mxu1 %v12711_v22  ;;  %9789 = vmatprep.subr.bf16.mxu0 %v12716_v27  ;;  %v12768_v22 = vld [vmem:[%s13716_s17 + $0x1168] ss:$48 sps:$4 sm:$0xff]  }
 0x8ca   : > { %9830 = vmatprep.subr.bf16.mxu1 %v12719_v45  ;;  %v12771_v27 = vld [vmem:[%s13716_s17 + $0x1768] ss:$48 sps:$4 sm:$0xff]   ;;  %v12776_v45 = vld [vmem:[%s13716_s17 + $0x110c] ss:$48 sps:$4 sm:$0xff]  }
 0x8cb   : > { %v9495_v40 = vpop.f32.mrf.mxu0  ;;  %9740 = vmatmul.mubr.bf16.vlgmr.msra.gmra.mxu0 %v14094_v7 }
 0x8cc   : > { %v9536_v47 = vpop.f32.mrf.mxu1  ;;  %9781 = vmatmul.mubr.bf16.vlgmr.msra.gmra.mxu1 %v14096_v8  ;;  %v9496_v31 = vadd.f32 %v9495_v40, %v9455_v0  ;;  %9790 = vmatpush1.bf16.msra.mxu0 %v12714_v14  ;;  %v12777_v14 = vld [vmem:[%s13716_s17 + $0x1708] ss:$48 sps:$4 sm:$0xff]   ;;  %v12788_v40 = vld [vmem:[%s13716_s17 + $0x104c] ss:$48 sps:$4 sm:$0xff]  }
 0x8cd   : > { %9831 = vmatpush1.bf16.msra.mxu1 %v12717_v21  ;;  %v9497_v24 = vpop.f32.mrf.mxu0  ;;  %9791 = vmatprep.subr.bf16.mxu0 %v12722_v61  ;;  %v12782_v21 = vld [vmem:[%s13716_s17 + $0x10ac] ss:$48 sps:$4 sm:$0xff]   ;;  %v12783_v0 = vld [vmem:[%s13716_s17 + $0x16a8] ss:$48 sps:$4 sm:$0xff]  }
 0x8ce   : > { %v9538_v26 = vpop.f32.mrf.mxu1  ;;  %9832 = vmatprep.subr.bf16.mxu1 %v12725_v37  ;;  %v9537_v42 = vadd.f32 %v9536_v47, %v9496_v31  ;;  %v9498_v7 = vadd.f32 %v9497_v24, %v9457_v3  ;;  %9821 = vmatprep.mubr.bf16.mxu0 %v14126_v51  ;;  %v12734_v51 = vld [vmem:[%s13716_s17 + $0xdac] ss:$48 sps:$4 sm:$0xff]   ;;  %v12780_v37 = vld [vmem:[%s13716_s17 + $0x10a8] ss:$48 sps:$4 sm:$0xff]  }
 0x8cf   : > { %9862 = vmatprep.mubr.bf16.mxu1 %v14129_v56  ;;  %v9499_v8 = vpop.f32.mrf.mxu0  ;;  %v12737_v56 = vld [vmem:[%s13716_s17 + $0x13ac] ss:$48 sps:$4 sm:$0xff]   ;;  %v12786_v3 = vld [vmem:[%s13716_s17 + $0x1048] ss:$48 sps:$4 sm:$0xff]  }
 0x8d0   : > { %v9540_v33 = vpop.f32.mrf.mxu1  ;;  %12822 = vtanh.f32 %v9537_v42  ;;  %v9539_v57 = vadd.f32 %v9538_v26, %v9498_v7  ;;  %9792 = vmatpush1.bf16.msra.mxu0 %v12720_v59  ;;  %v12785_v61 = vld [vmem:[%s13716_s17 + $0x16ac] ss:$48 sps:$4 sm:$0xff]   ;;  %v12789_v31 = vld [vmem:[%s13716_s17 + $0x1648] ss:$48 sps:$4 sm:$0xff]  }
 0x8d1   : > { %9833 = vmatpush1.bf16.msra.mxu1 %v12723_v48  ;;  %v9500_v28 = vpop.f32.mrf.mxu0  ;;  %9793 = vmatprep.subr.bf16.mxu0 %v12728_v4  ;;  %v12791_v47 = vld [vmem:[%s13716_s17 + $0x164c] ss:$48 sps:$4 sm:$0xff]   ;;  %v12792_v24 = vld [vmem:[%s13716_s17 + $0xfe8] ss:$48 sps:$4 sm:$0xff]  }
 0x8d2   : > { %v9541_v60 = vpop.f32.mrf.mxu1  ;;  %9834 = vmatprep.subr.bf16.mxu1 %v12731_v1  ;;  %12824 = vtanh.f32 %v9539_v57  ;;  %v12794_v59 = vld [vmem:[%s13716_s17 + $0xfec] ss:$48 sps:$4 sm:$0xff]   ;;  %v12795_v26 = vld [vmem:[%s13716_s17 + $0x15e8] ss:$48 sps:$4 sm:$0xff]  }
 0x8d3   : > { %v12797_v48 = vld [vmem:[%s13716_s17 + $0x15ec] ss:$48 sps:$4 sm:$0xff]   ;;  %v12798_v42 = vld [vmem:[%s13716_s17 + $0xf88] ss:$48 sps:$4 sm:$0xff]  }
 0x8d4   : > { %9794 = vmatpush1.bf16.msra.mxu0 %v12726_v44  ;;  %v12800_v4 = vld [vmem:[%s13716_s17 + $0xf8c] ss:$48 sps:$4 sm:$0xff]   ;;  %v12801_v7 = vld [vmem:[%s13716_s17 + $0x1588] ss:$48 sps:$4 sm:$0xff]  }
 0x8d5   : > { %9835 = vmatpush1.bf16.msra.mxu1 %v12729_v50  ;;  %9795 = vmatprep.subr.bf16.mxu0 %v12734_v51  ;;  %v12803_v1 = vld [vmem:[%s13716_s17 + $0x158c] ss:$48 sps:$4 sm:$0xff]   ;;  %v12804_v57 = vld [vmem:[%s13716_s17 + $0xf28] ss:$48 sps:$4 sm:$0xff]  }
 0x8d6   : > { %9836 = vmatprep.subr.bf16.mxu1 %v12737_v56  ;;  %v12806_v8 = vld [vmem:[%s13716_s17 + $0xf2c] ss:$48 sps:$4 sm:$0xff]   ;;  %v12807_v44 = vld [vmem:[%s13716_s17 + $0x1528] ss:$48 sps:$4 sm:$0xff]  }
 0x8d7   : > { %v12809_v33 = vld [vmem:[%s13716_s17 + $0x152c] ss:$48 sps:$4 sm:$0xff]  }
 0x8d8   : > { %9796 = vmatpush1.bf16.msra.mxu0 %v12732_v6 }
 0x8d9   : > { %9837 = vmatpush1.bf16.msra.mxu1 %v12735_v19  ;;  %9797 = vmatprep.subr.bf16.mxu0 %v12740_v18 }
 0x8da   : > { %9838 = vmatprep.subr.bf16.mxu1 %v12743_v49  ;;  %v4984_v49 = vld [vmem:[%s13728_s27 + $0x8] sm:$0xf] }
 0x8dc   : > { %9798 = vmatpush1.bf16.msra.mxu0 %v12738_v53  ;;  %v5022_v53 = vrot.slane %v4984_v49, %v4989_v2 }
 0x8dd   : > { %9839 = vmatpush1.bf16.msra.mxu1 %v12741_v16  ;;  %v12823_v9 = vpop.eup %12822  ;;  %9799 = vmatprep.subr.bf16.mxu0 %v12746_v17  ;;  %v5026_v16 = vrot.slane %v4984_v49, %v4993_v10 }
 0x8de   : > { %9840 = vmatprep.subr.bf16.mxu1 %v12749_v23  ;;  %9889 = vst [vmem:[%s13726_s4 + $0x30] sm:$0xff] %v12823_v9 }
 0x8df   : > { %v12825_v46 = vpop.eup %12824 }
 0x8e0   : > { %9890 = vst [vmem:[%s13726_s4 + $0x38] sm:$0xff] %v12825_v46  ;;  %9800 = vmatpush1.bf16.msra.mxu0 %v12744_v25 }
 0x8e1   : > { %9841 = vmatpush1.bf16.msra.mxu1 %v12747_v5  ;;  %9801 = vmatprep.subr.bf16.mxu0 %v12752_v35 }
 0x8e2   : > { %9842 = vmatprep.subr.bf16.mxu1 %v12755_v34 }
 0x8e4   : > { %9802 = vmatpush1.bf16.msra.mxu0 %v12750_v43 }
 0x8e5   : > { %9843 = vmatpush1.bf16.msra.mxu1 %v12753_v32  ;;  %9803 = vmatprep.subr.bf16.mxu0 %v12758_v29 }
 0x8e6   : > { %9844 = vmatprep.subr.bf16.mxu1 %v12761_v11 }
 0x8e8   : > { %9804 = vmatpush1.bf16.msra.mxu0 %v12756_v30 }
 0x8e9   : > { %9845 = vmatpush1.bf16.msra.mxu1 %v12759_v20  ;;  %9805 = vmatprep.subr.bf16.mxu0 %v12764_v13 }
 0x8ea   : > { %9846 = vmatprep.subr.bf16.mxu1 %v12767_v15 }
 0x8ec   : > { %9806 = vmatpush2.bf16.msra.mxu0 %v12762_v63 }
 0x8ed   : > { %9847 = vmatpush2.bf16.msra.mxu1 %v12765_v52  ;;  %9807 = vmatprep.subr.bf16.mxu0 %v12770_v39 }
 0x8ee   : > { %9848 = vmatprep.subr.bf16.mxu1 %v12773_v38 }
 0x8f0   : > { %9808 = vmatpush2.bf16.msra.mxu0 %v12768_v22 }
 0x8f1   : > { %9849 = vmatpush2.bf16.msra.mxu1 %v12771_v27  ;;  %9809 = vmatprep.subr.bf16.mxu0 %v12776_v45  ;;  %v5030_v45 = vrot.slane %v4984_v49, %v4997_v54 }
 0x8f2   : > { %9850 = vmatprep.subr.bf16.mxu1 %v12779_v12  ;;  %v5034_v12 = vrot.slane %v4984_v49, %v5001_v55 }
 0x8f4   : > { %9810 = vmatpush2.bf16.msra.mxu0 %v12774_v36 }
 0x8f5   : > { %9851 = vmatpush2.bf16.msra.mxu1 %v12777_v14  ;;  %9811 = vmatprep.subr.bf16.mxu0 %v12782_v21 }
 0x8f6   : > { %9852 = vmatprep.subr.bf16.mxu1 %v12785_v61 }
 0x8f8   : > { %9812 = vmatpush2.bf16.msra.mxu0 %v12780_v37 }
 0x8f9   : > { %9853 = vmatpush2.bf16.msra.mxu1 %v12783_v0  ;;  %9813 = vmatprep.subr.bf16.mxu0 %v12788_v40 }
 0x8fa   : > { %9854 = vmatprep.subr.bf16.mxu1 %v12791_v47 }
 0x8fc   : > { %9814 = vmatpush2.bf16.msra.mxu0 %v12786_v3 }
 0x8fd   : > { %9855 = vmatpush2.bf16.msra.mxu1 %v12789_v31  ;;  %9815 = vmatprep.subr.bf16.mxu0 %v12794_v59 }
 0x8fe   : > { %9856 = vmatprep.subr.bf16.mxu1 %v12797_v48 }
 0x900   : > { %9816 = vmatpush2.bf16.msra.mxu0 %v12792_v24 }
 0x901   : > { %9857 = vmatpush2.bf16.msra.mxu1 %v12795_v26  ;;  %9817 = vmatprep.subr.bf16.mxu0 %v12800_v4 }
 0x902   : > { %9858 = vmatprep.subr.bf16.mxu1 %v12803_v1 }
 0x904   : > { %9818 = vmatpush2.bf16.msra.mxu0 %v12798_v42 }
 0x905   : > { %9859 = vmatpush2.bf16.msra.mxu1 %v12801_v7  ;;  %9819 = vmatprep.subr.bf16.mxu0 %v12806_v8 }
 0x906   : > { %9860 = vmatprep.subr.bf16.mxu1 %v12809_v33 }
 0x908   : > { %9820 = vmatpush2.bf16.msra.mxu0 %v12804_v57 }
 0x909   : > { %9861 = vmatpush2.bf16.msra.mxu1 %v12807_v44 }
 0x90b   : > { %v9577_v50 = vpop.f32.mrf.mxu0  ;;  %9822 = vmatmul.mubr.bf16.vlgmr.msra.gmra.mxu0 %v14170_v58 }
 0x90c   : > { %v9618_v28 = vpop.f32.mrf.mxu1  ;;  %9863 = vmatmul.mubr.bf16.vlgmr.msra.gmra.mxu1 %v14172_v62  ;;  %v9578_v17 = vadd.f32 %v9577_v50, %v5022_v53 }
 0x90d   : > { %v9579_v60 = vpop.f32.mrf.mxu0 }
 0x90e   : > { %v9620_v51 = vpop.f32.mrf.mxu1  ;;  %v9580_v23 = vadd.f32 %v9579_v60, %v5026_v16  ;;  %v9619_v25 = vadd.f32 %v9618_v28, %v9578_v17 }
 0x90f   : > { %v9581_v56 = vpop.f32.mrf.mxu0 }
 0x910   : > { %v9622_v6 = vpop.f32.mrf.mxu1  ;;  %v9621_v62 = vadd.f32 %v9620_v51, %v9580_v23 }
 0x911   : > { %v9582_v19 = vpop.f32.mrf.mxu0 }
 0x912   : > { %v9623_v18 = vpop.f32.mrf.mxu1 }
 0x94b   : > { %v9659_v5 = vpop.f32.mrf.mxu0 }
 0x94c   : > { %v9700_v58 = vpop.f32.mrf.mxu1  ;;  %v9660_v9 = vadd.f32 %v9659_v5, %v9619_v25 }
 0x94d   : > { %v9661_v35 = vpop.f32.mrf.mxu0 }
 0x94e   : > { %v9702_v34 = vpop.f32.mrf.mxu1  ;;  %v9701_v46 = vadd.f32 %v9700_v58, %v9660_v9  ;;  %v9662_v43 = vadd.f32 %v9661_v35, %v9621_v62 }
 0x94f   : > { %v9663_v32 = vpop.f32.mrf.mxu0 }
 0x950   : > { %v9704_v29 = vpop.f32.mrf.mxu1  ;;  %12826 = vtanh.f32 %v9701_v46  ;;  %v9703_v2 = vadd.f32 %v9702_v34, %v9662_v43 }
 0x951   : > { %v9664_v11 = vpop.f32.mrf.mxu0 }
 0x952   : > { %v9705_v30 = vpop.f32.mrf.mxu1  ;;  %12828 = vtanh.f32 %v9703_v2 }
 0x95d   : > { %v12827_v10 = vpop.eup %12826 }
 0x95e   : > { %9891 = vst [vmem:[%s13726_s4 + $0x40] sm:$0xff] %v12827_v10 }
 0x95f   : > { %v12829_v20 = vpop.eup %12828 }
 0x960   : > { %9892 = vst [vmem:[%s13726_s4 + $0x48] sm:$0xff] %v12829_v20 }
 0x98b   : > { %v9741_v13 = vpop.f32.mrf.mxu0 }
 0x98c   : > { %v9782_v15 = vpop.f32.mrf.mxu1  ;;  %v9742_v36 = vadd.f32 %v9741_v13, %v5030_v45 }
 0x98d   : > { %v9743_v63 = vpop.f32.mrf.mxu0 }
 0x98e   : > { %v9784_v52 = vpop.f32.mrf.mxu1  ;;  %v9744_v14 = vadd.f32 %v9743_v63, %v5034_v12  ;;  %v9783_v21 = vadd.f32 %v9782_v15, %v9742_v36 }
 0x98f   : > { %v9745_v39 = vpop.f32.mrf.mxu0 }
 0x990   : > { %v9786_v38 = vpop.f32.mrf.mxu1  ;;  %v9785_v0 = vadd.f32 %v9784_v52, %v9744_v14 }
 0x991   : > { %v9746_v22 = vpop.f32.mrf.mxu0 }
 0x992   : > { %v9787_v27 = vpop.f32.mrf.mxu1 }
 0x9cb   : > { %v9823_v61 = vpop.f32.mrf.mxu0 }
 0x9cc   : > { %v9864_v37 = vpop.f32.mrf.mxu1  ;;  %v9824_v40 = vadd.f32 %v9823_v61, %v9783_v21 }
 0x9cd   : > { %v9825_v47 = vpop.f32.mrf.mxu0 }
 0x9ce   : > { %v9866_v3 = vpop.f32.mrf.mxu1  ;;  %v9865_v31 = vadd.f32 %v9864_v37, %v9824_v40  ;;  %v9826_v59 = vadd.f32 %v9825_v47, %v9785_v0 }
 0x9cf   : > { %v9827_v48 = vpop.f32.mrf.mxu0 }
 0x9d0   : > { %v9868_v24 = vpop.f32.mrf.mxu1  ;;  %12830 = vtanh.f32 %v9865_v31  ;;  %v9867_v54 = vadd.f32 %v9866_v3, %v9826_v59 }
 0x9d1   : > { %v9828_v26 = vpop.f32.mrf.mxu0 }
 0x9d2   : > { %v9869_v41 = vpop.f32.mrf.mxu1  ;;  %12832 = vtanh.f32 %v9867_v54 }
 0x9dd   : > { %v12831_v55 = vpop.eup %12830 }
 0x9de   : > { %9893 = vst [vmem:[%s13726_s4 + $0x50] sm:$0xff] %v12831_v55 }
 0x9df   : > { %v12833_v4 = vpop.eup %12832 }
 0x9e0   : > { %9894 = vst [vmem:[%s13726_s4 + $0x58] sm:$0xff] %v12833_v4 }
 0x9e1 PF: > { %p32_p1 = scmp.ge.s32.totalorder %s13547_s23, 4   ;;  %s15046_s24 = smov %s13314_s25 }
 0x9e2   : > { %s15047_s25 = smov %s13318_s26  ;;  %s15048_s26 = smov %s13558_s14 }
 0x9e3   : > { %s15049_s27 = smov %s13547_s23  ;;  %34 = sbr.rel (!%p32_p1) target bundleno = 21 (0x15), region = 198 }
 0x9e8   :  { %9917 = vsyncpa [#allocation4], 1 }
 0x9e9   :  { %9919 = vsyncpa [#allocation4 + $0x1], 1 }
 0x9ea   :  { %9920 = vsyncpa [#allocation6], 1 }
 0x9eb   :  { %9921 = vsyncpa [#allocation9], 1 }
 0x9ec   :  { %9922 = vsyncpa [#allocation12], 1 }
 0x9ed   :  { %9923 = vsyncpa [#allocation15], 1 }
 0x9ee   :  { %9924 = vsyncpa [#allocation18], 1 }
 0x9ef   :  { %9925 = vsyncpa [#allocation21], 1 }
 0x9f0   :  { %9926 = vsyncpa [#allocation24], 1 }

</bundles_post_ra>
